<compile_context>
chip_gen: v6e
topology: v6e:2x2x1
jax: 0.10.0
libtpu: 0.0.40
codegen_flags: <defaults>
</compile_context>

<pallas_src>
import functools

import jax
import jax.numpy as jnp
from jax.experimental import pallas as pl
from jax.experimental.pallas import tpu as pltpu


def _round_up(n, m):
    return ((n + m - 1) // m) * m


def _pick_row_tile(hout, max_rows=64):
    if hout <= max_rows:
        return hout
    for cand in (64, 32, 16, 8):
        if hout % cand == 0:
            return cand
    return hout


def _pick_k_tile(k, max_tk=2048):
    if k <= max_tk:
        return k
    for cand in (2048, 1024, 512, 256, 128):
        if k % cand == 0:
            return cand
    return k


# ----------------------------------------------------------------------------
# Fused 2x2/stride-2 max pool on an (H*W, C) f32 accumulator (rows in (h, w)
# row-major order).  Uses only leading-dim splits, sublane-dim slices and a
# sublane reduce -> all cheap/supported Mosaic ops.  Returns (H//2, W//2, C).
# ----------------------------------------------------------------------------
def _pool2x2(acc, H, W, C):
    Wh = W // 2
    h3 = acc.reshape(H * Wh, 2, C)            # pairs (w=2j, w=2j+1)
    hpool = jnp.max(h3, axis=1)               # horizontal pool -> (H*Wh, C)
    v3 = hpool.reshape(H // 2, 2 * Wh, C)     # rows h=2i then h=2i+1
    return jnp.maximum(v3[:, :Wh, :], v3[:, Wh:, :])


# ----------------------------------------------------------------------------
# conv1 (3 -> 64) as im2col matmul + fused bias/ReLU/maxpool, row-tiled.
# ----------------------------------------------------------------------------
def conv1_kernel(x_ref, w_ref, b_ref, o_ref, *, W):
    # x_ref: (1, Ht*W, 27) bf16 im2col rows for Ht input rows of one image
    # w_ref: (27, Cout) bf16 ; b_ref: (1, Cout) f32 ; o_ref: (1, Ht//2, W//2, Cout) bf16
    Cout = w_ref.shape[1]
    Ht = x_ref.shape[1] // W
    acc = jnp.dot(x_ref[0], w_ref[...], preferred_element_type=jnp.float32)
    acc = jnp.maximum(acc + b_ref[...], 0.0)
    o_ref[0] = _pool2x2(acc, Ht, W, Cout).astype(o_ref.dtype)


def conv1_relu_pool(x_nhwc, w, b):
    B, H, W, Cin = x_nhwc.shape                       # Cin == 3
    Cout = w.shape[-1]
    xp = jnp.pad(x_nhwc, ((0, 0), (1, 1), (1, 1), (0, 0)))
    # im2col (wrapper glue, tiny at Cin=3): 9 shifted views -> K = 27.
    cols = jnp.concatenate(
        [xp[:, ky:ky + H, kx:kx + W, :] for ky in range(3) for kx in range(3)],
        axis=-1).reshape(B, H * W, 9 * Cin)
    Hout, Wout = H // 2, W // 2
    th = _pick_row_tile(Hout)                         # output rows per grid step
    return pl.pallas_call(
        functools.partial(conv1_kernel, W=W),
        out_shape=jax.ShapeDtypeStruct((B, Hout, Wout, Cout), jnp.bfloat16),
        grid=(B, Hout // th),
        in_specs=[
            pl.BlockSpec((1, 2 * th * W, 9 * Cin), lambda bi, ti: (bi, ti, 0)),
            pl.BlockSpec((9 * Cin, Cout), lambda bi, ti: (0, 0)),
            pl.BlockSpec((1, Cout), lambda bi, ti: (0, 0)),
        ],
        out_specs=pl.BlockSpec((1, th, Wout, Cout), lambda bi, ti: (bi, ti, 0, 0)),
        compiler_params=pltpu.CompilerParams(
            dimension_semantics=("parallel", "parallel")),
    )(cols, w.reshape(9 * Cin, Cout), b)


# ----------------------------------------------------------------------------
# Conv2d(3x3, padding=1) + ReLU (+ optional fused 2x2 maxpool), one batch
# element per grid step.  9 (H*W, Cin) @ (Cin, Cout) MXU matmuls in bf16 with
# f32 accumulation; the kx sublane shift is hoisted so only 3 window copies
# are materialized per step.
# ----------------------------------------------------------------------------
def conv3x3_relu_kernel(xp_ref, w_ref, b_ref, o_ref, *, pool):
    # xp_ref: (1, H+2, W+2, Cin) bf16 ; w_ref: (9, Cin, Cout) bf16
    # b_ref : (1, Cout) f32 ; o_ref: (1, Hout, Wout, Cout) bf16
    Hp, Wp, Cin = xp_ref.shape[1], xp_ref.shape[2], xp_ref.shape[3]
    H, W = Hp - 2, Wp - 2
    Cout = w_ref.shape[2]
    xp = xp_ref[0]
    acc = jnp.zeros((H * W, Cout), jnp.float32)
    for kx in range(3):
        xs = xp[:, kx:kx + W, :]                          # one sublane shift per kx
        for ky in range(3):
            patch = xs[ky:ky + H].reshape(H * W, Cin)     # cheap leading-dim slice
            acc = acc + jnp.dot(patch, w_ref[ky * 3 + kx],
                                preferred_element_type=jnp.float32)
    acc = jnp.maximum(acc + b_ref[...], 0.0)
    if pool:
        o_ref[0] = _pool2x2(acc, H, W, Cout).astype(o_ref.dtype)
    else:
        o_ref[0] = acc.reshape(H, W, Cout).astype(o_ref.dtype)


def conv3x3_relu(x_nhwc, w, b, *, pool):
    B, H, W, Cin = x_nhwc.shape
    Cout = w.shape[-1]
    xp = jnp.pad(x_nhwc, ((0, 0), (1, 1), (1, 1), (0, 0)))   # zero halo (glue)
    Hout, Wout = (H // 2, W // 2) if pool else (H, W)
    return pl.pallas_call(
        functools.partial(conv3x3_relu_kernel, pool=pool),
        out_shape=jax.ShapeDtypeStruct((B, Hout, Wout, Cout), jnp.bfloat16),
        grid=(B,),
        in_specs=[
            pl.BlockSpec((1, H + 2, W + 2, Cin), lambda bi: (bi, 0, 0, 0)),
            pl.BlockSpec((9, Cin, Cout), lambda bi: (0, 0, 0)),
            pl.BlockSpec((1, Cout), lambda bi: (0, 0)),
        ],
        out_specs=pl.BlockSpec((1, Hout, Wout, Cout), lambda bi: (bi, 0, 0, 0)),
        compiler_params=pltpu.CompilerParams(dimension_semantics=("parallel",)),
    )(xp, w.reshape(9, Cin, Cout), b)


# ----------------------------------------------------------------------------
# Linear (+ optional ReLU / sigmoid): K-tiled grid, bf16 operands, f32 VMEM
# accumulator.  Weights/bias are stored pre-padded to N = multiple of 128 so
# every store is lane-dense.
# ----------------------------------------------------------------------------
def linear_kernel(x_ref, w_ref, b_ref, o_ref, acc_ref, *, activation):
    k = pl.program_id(0)

    @pl.when(k == 0)
    def _():
        acc_ref[...] = jnp.zeros_like(acc_ref)

    acc_ref[...] += jnp.dot(x_ref[...], w_ref[...],
                            preferred_element_type=jnp.float32)

    @pl.when(k == pl.num_programs(0) - 1)
    def _():
        y = acc_ref[...] + b_ref[...]
        if activation == "relu":
            y = jnp.maximum(y, 0.0)
        elif activation == "sigmoid":
            y = pl.reciprocal(1.0 + jnp.exp(-y))          # exact; exp+recip on EUP
        o_ref[...] = y.astype(o_ref.dtype)


def linear(x, w, b, *, activation=None, out_dtype=jnp.bfloat16):
    B, K = x.shape
    Kw, N = w.shape
    assert K == Kw, (K, Kw)
    tk = _pick_k_tile(K)
    return pl.pallas_call(
        functools.partial(linear_kernel, activation=activation),
        out_shape=jax.ShapeDtypeStruct((B, N), out_dtype),
        grid=(K // tk,),
        in_specs=[
            pl.BlockSpec((B, tk), lambda k: (0, k)),
            pl.BlockSpec((tk, N), lambda k: (k, 0)),
            pl.BlockSpec((1, N), lambda k: (0, 0)),
        ],
        out_specs=pl.BlockSpec((B, N), lambda k: (0, 0)),
        scratch_shapes=[pltpu.VMEM((B, N), jnp.float32)],
        compiler_params=pltpu.CompilerParams(dimension_semantics=("arbitrary",)),
    )(x.astype(jnp.bfloat16), w, b)


# ----------------------------------------------------------------------------
# Deterministic parameter init (shapes follow the PyTorch module __init__).
# Conv weights: (3, 3, Cin, Cout) bf16.  FC weights: (K, Npad) bf16 with N
# zero-padded to a multiple of 128; fc1's rows are permuted once here so the
# NHWC flatten in the forward pass matches torch's NCHW x.view(-1, C*H*W).
# ----------------------------------------------------------------------------
def _pack_fc(w, b, k_total=None):
    k, n = w.shape
    kp = k if k_total is None else k_total
    npad = _round_up(n, 128)
    wp = jnp.zeros((kp, npad), jnp.float32).at[:k, :n].set(w)
    bp = jnp.zeros((1, npad), jnp.float32).at[0, :n].set(b)
    return wp.astype(jnp.bfloat16), bp


def init_params(key, num_classes, input_size):
    conv_cfg = [(3, 64), (64, 128), (128, 256), (256, 256), (256, 64)]
    hf = wf = input_size // 8
    feat = 64 * hf * wf                      # nn_size = 1
    nh = num_classes * 16
    nh_pad = _round_up(nh, 128)
    keys = jax.random.split(key, len(conv_cfg) + 3)

    params = {"conv": [], "fc": []}
    for i, (cin, cout) in enumerate(conv_cfg):
        scale = (2.0 / (cin * 9)) ** 0.5
        w = scale * jax.random.normal(keys[i], (3, 3, cin, cout), jnp.float32)
        params["conv"].append((w.astype(jnp.bfloat16),
                               jnp.zeros((1, cout), jnp.float32)))

    # fc1: generated in torch's NCHW-flatten row order (c, h, w), then permuted
    # once to NHWC row order -> no per-forward transpose of the feature map.
    s1 = (2.0 / feat) ** 0.5
    w1_nchw = s1 * jax.random.normal(keys[5], (64, hf, wf, nh), jnp.float32)
    w1 = jnp.transpose(w1_nchw, (1, 2, 0, 3)).reshape(feat, nh)
    params["fc"].append(_pack_fc(w1, jnp.zeros((nh,), jnp.float32)))

    s2 = (2.0 / nh) ** 0.5
    w2 = s2 * jax.random.normal(keys[6], (nh, nh), jnp.float32)
    params["fc"].append(_pack_fc(w2, jnp.zeros((nh,), jnp.float32), k_total=nh_pad))

    w3 = s2 * jax.random.normal(keys[7], (nh, num_classes), jnp.float32)
    params["fc"].append(_pack_fc(w3, jnp.zeros((num_classes,), jnp.float32),
                                 k_total=nh_pad))
    return params


def multi_label_cnn_forward(params, x_nchw, *, num_classes):
    # x_nchw: (B, 3, H, W) PyTorch layout -> NHWC bf16 for the kernels.
    x = jnp.transpose(x_nchw, (0, 2, 3, 1)).astype(jnp.bfloat16)

    (w1, b1), (w2, b2), (w3, b3), (w4, b4), (w5, b5) = params["conv"]
    x = conv1_relu_pool(x, w1, b1)                 # (B, H/2, W/2, 64)
    x = conv3x3_relu(x, w2, b2, pool=True)         # (B, H/4, W/4, 128)
    x = conv3x3_relu(x, w3, b3, pool=False)        # (B, H/4, W/4, 256)
    x = conv3x3_relu(x, w4, b4, pool=False)        # (B, H/4, W/4, 256)
    x = conv3x3_relu(x, w5, b5, pool=True)         # (B, H/8, W/8, 64)

    # NHWC flatten feeds fc1 directly (its weight rows were permuted at init).
    x = x.reshape(x.shape[0], -1)

    (fw1, fb1), (fw2, fb2), (fw3, fb3) = params["fc"]
    x = linear(x, fw1, fb1, activation="relu")
    x = linear(x, fw2, fb2, activation="relu")
    x = linear(x, fw3, fb3, activation="sigmoid", out_dtype=jnp.float32)
    return x[:, :num_classes]                      # drop the N padding columns


if __name__ == "__main__":
    num_classes = 5
    input_size = 16     # small, divisible by 8 (module assumes input_size // 8)
    batch = 2

    key = jax.random.PRNGKey(0)
    pkey, xkey = jax.random.split(key)
    params = init_params(pkey, num_classes, input_size)
    x = jax.random.normal(xkey, (batch, 3, input_size, input_size), jnp.float32)

    fwd = jax.jit(functools.partial(multi_label_cnn_forward,
                                    num_classes=num_classes))
    out = jax.block_until_ready(fwd(params, x))

    assert out.shape == (batch, num_classes), out.shape
    assert bool(jnp.all((out >= 0.0) & (out <= 1.0)))
    print("KERNEL_OK")
</pallas_src>

<mosaic_0001>
module attributes {stable_mosaic.version = 11 : i64} {
  func.func @conv1_kernel(%arg0: i32, %arg1: i32, %arg2: memref<1x256x27xbf16, #tpu.memory_space<vmem>>, %arg3: memref<27x64xbf16, #tpu.memory_space<vmem>>, %arg4: memref<1x64xf32, #tpu.memory_space<vmem>>, %arg5: memref<1x8x8x64xbf16, #tpu.memory_space<vmem>>) attributes {dimension_semantics = [#tpu.dimension_semantics<parallel>, #tpu.dimension_semantics<parallel>], iteration_bounds = array<i64: 2, 1>, scalar_prefetch = 0 : i64, scratch_operands = 0 : i64, tpu.core_type = #tpu.core_type<tc>, window_params = [{transform_indices = @transform_0, window_bounds = array<i64: 1, 256, 27>}, {pipeline_mode = #tpu.pipeline_mode<synchronous>, transform_indices = @transform_1, window_bounds = array<i64: 27, 64>}, {pipeline_mode = #tpu.pipeline_mode<synchronous>, transform_indices = @transform_2, window_bounds = array<i64: 1, 64>}, {transform_indices = @transform_3, window_bounds = array<i64: 1, 8, 8, 64>}]} {
    %c0 = arith.constant 0 : index
    %c0_0 = arith.constant 0 : index
    %c0_1 = arith.constant 0 : index
    %0 = vector.load %arg2[%c0, %c0_0, %c0_1] : memref<1x256x27xbf16, #tpu.memory_space<vmem>>, vector<1x256x27xbf16>
    %1 = vector.shape_cast %0 : vector<1x256x27xbf16> to vector<256x27xbf16>
    %c0_2 = arith.constant 0 : index
    %c0_3 = arith.constant 0 : index
    %2 = vector.load %arg3[%c0_2, %c0_3] : memref<27x64xbf16, #tpu.memory_space<vmem>>, vector<27x64xbf16>
    %cst = arith.constant dense<0.000000e+00> : vector<256x64xf32>
    %3 = tpu.matmul %1, %2, %cst {dimension_numbers = #tpu.dot_dimension_numbers<[1], [0], [0], [1], [0, 0, 1, 1], [], []>} : vector<256x27xbf16>, vector<27x64xbf16>, vector<256x64xf32> -> vector<256x64xf32>
    %c0_4 = arith.constant 0 : index
    %c0_5 = arith.constant 0 : index
    %4 = vector.load %arg4[%c0_4, %c0_5] : memref<1x64xf32, #tpu.memory_space<vmem>>, vector<1x64xf32>
    %5 = vector.broadcast %4 : vector<1x64xf32> to vector<256x64xf32>
    %6 = arith.addf %3, %5 : vector<256x64xf32>
    %cst_6 = arith.constant 0.000000e+00 : f32
    %7 = vector.broadcast %cst_6 : f32 to vector<256x64xf32>
    %8 = arith.maximumf %6, %7 : vector<256x64xf32>
    %9 = vector.shape_cast %8 : vector<256x64xf32> to vector<128x2x64xf32>
    %cst_7 = arith.constant dense<0xFF800000> : vector<128x64xf32>
    %10 = vector.multi_reduction <maximumf>, %9, %cst_7 [1] : vector<128x2x64xf32> to vector<128x64xf32>
    %11 = vector.shape_cast %10 : vector<128x64xf32> to vector<8x16x64xf32>
    %12 = vector.extract_strided_slice %11 {offsets = [0, 0, 0], sizes = [8, 8, 64], strides = [1, 1, 1]} : vector<8x16x64xf32> to vector<8x8x64xf32>
    %13 = vector.extract_strided_slice %11 {offsets = [0, 8, 0], sizes = [8, 8, 64], strides = [1, 1, 1]} : vector<8x16x64xf32> to vector<8x8x64xf32>
    %14 = arith.maximumf %12, %13 : vector<8x8x64xf32>
    %15 = arith.truncf %14 : vector<8x8x64xf32> to vector<8x8x64xbf16>
    %c0_8 = arith.constant 0 : index
    %c0_9 = arith.constant 0 : index
    %c0_10 = arith.constant 0 : index
    %c0_11 = arith.constant 0 : index
    %16 = vector.load %arg5[%c0_8, %c0_9, %c0_10, %c0_11] : memref<1x8x8x64xbf16, #tpu.memory_space<vmem>>, vector<1x8x8x64xbf16>
    %17 = vector.shape_cast %16 : vector<1x8x8x64xbf16> to vector<8x8x64xbf16>
    %18 = vector.shape_cast %15 : vector<8x8x64xbf16> to vector<1x8x8x64xbf16>
    tpu.vector_store %arg5[%c0_8, %c0_9, %c0_10, %c0_11], %18 {strides = array<i32>} : memref<1x8x8x64xbf16, #tpu.memory_space<vmem>>, vector<1x8x8x64xbf16>,
    return
  }
  func.func @transform_0(%arg0: i32, %arg1: i32) -> (i32, i32, i32) {
    %c0_i32 = arith.constant 0 : i32
    %c0_i32_0 = arith.constant 0 : i32
    return %arg0, %arg1, %c0_i32 : i32, i32, i32
  }
  func.func @transform_1(%arg0: i32, %arg1: i32) -> (i32, i32) {
    %c0_i32 = arith.constant 0 : i32
    %c0_i32_0 = arith.constant 0 : i32
    %c0_i32_1 = arith.constant 0 : i32
    return %c0_i32, %c0_i32_0 : i32, i32
  }
  func.func @transform_2(%arg0: i32, %arg1: i32) -> (i32, i32) {
    %c0_i32 = arith.constant 0 : i32
    %c0_i32_0 = arith.constant 0 : i32
    %c0_i32_1 = arith.constant 0 : i32
    return %c0_i32, %c0_i32_0 : i32, i32
  }
  func.func @transform_3(%arg0: i32, %arg1: i32) -> (i32, i32, i32, i32) {
    %c0_i32 = arith.constant 0 : i32
    %c0_i32_0 = arith.constant 0 : i32
    %c0_i32_1 = arith.constant 0 : i32
    return %arg0, %arg1, %c0_i32, %c0_i32_0 : i32, i32, i32, i32
  }
}

module attributes {stable_mosaic.version = 11 : i64} {
  func.func @conv3x3_relu_kernel(%arg0: i32, %arg1: memref<1x10x10x64xbf16, #tpu.memory_space<vmem>>, %arg2: memref<9x64x128xbf16, #tpu.memory_space<vmem>>, %arg3: memref<1x128xf32, #tpu.memory_space<vmem>>, %arg4: memref<1x4x4x128xbf16, #tpu.memory_space<vmem>>) attributes {dimension_semantics = [#tpu.dimension_semantics<parallel>], iteration_bounds = array<i64: 2>, scalar_prefetch = 0 : i64, scratch_operands = 0 : i64, tpu.core_type = #tpu.core_type<tc>, window_params = [{transform_indices = @transform_0, window_bounds = array<i64: 1, 10, 10, 64>}, {pipeline_mode = #tpu.pipeline_mode<synchronous>, transform_indices = @transform_1, window_bounds = array<i64: 9, 64, 128>}, {pipeline_mode = #tpu.pipeline_mode<synchronous>, transform_indices = @transform_2, window_bounds = array<i64: 1, 128>}, {transform_indices = @transform_3, window_bounds = array<i64: 1, 4, 4, 128>}]} {
    %c0 = arith.constant 0 : index
    %c0_0 = arith.constant 0 : index
    %c0_1 = arith.constant 0 : index
    %c0_2 = arith.constant 0 : index
    %0 = vector.load %arg1[%c0, %c0_0, %c0_1, %c0_2] : memref<1x10x10x64xbf16, #tpu.memory_space<vmem>>, vector<1x10x10x64xbf16>
    %1 = vector.shape_cast %0 : vector<1x10x10x64xbf16> to vector<10x10x64xbf16>
    %cst = arith.constant 0.000000e+00 : f32
    %2 = vector.broadcast %cst : f32 to vector<64x128xf32>
    %3 = vector.extract_strided_slice %1 {offsets = [0, 0, 0], sizes = [10, 8, 64], strides = [1, 1, 1]} : vector<10x10x64xbf16> to vector<10x8x64xbf16>
    %4 = vector.extract_strided_slice %3 {offsets = [0, 0, 0], sizes = [8, 8, 64], strides = [1, 1, 1]} : vector<10x8x64xbf16> to vector<8x8x64xbf16>
    %5 = vector.shape_cast %4 : vector<8x8x64xbf16> to vector<64x64xbf16>
    %c0_3 = arith.constant 0 : index
    %c0_4 = arith.constant 0 : index
    %c0_5 = arith.constant 0 : index
    %6 = vector.load %arg2[%c0_3, %c0_4, %c0_5] : memref<9x64x128xbf16, #tpu.memory_space<vmem>>, vector<1x64x128xbf16>
    %7 = vector.shape_cast %6 : vector<1x64x128xbf16> to vector<64x128xbf16>
    %cst_6 = arith.constant dense<0.000000e+00> : vector<64x128xf32>
    %8 = tpu.matmul %5, %7, %cst_6 {dimension_numbers = #tpu.dot_dimension_numbers<[1], [0], [0], [1], [0, 0, 1, 1], [], []>} : vector<64x64xbf16>, vector<64x128xbf16>, vector<64x128xf32> -> vector<64x128xf32>
    %9 = arith.addf %2, %8 : vector<64x128xf32>
    %10 = vector.extract_strided_slice %3 {offsets = [1, 0, 0], sizes = [8, 8, 64], strides = [1, 1, 1]} : vector<10x8x64xbf16> to vector<8x8x64xbf16>
    %11 = vector.shape_cast %10 : vector<8x8x64xbf16> to vector<64x64xbf16>
    %c3 = arith.constant 3 : index
    %c0_7 = arith.constant 0 : index
    %c0_8 = arith.constant 0 : index
    %12 = vector.load %arg2[%c3, %c0_7, %c0_8] : memref<9x64x128xbf16, #tpu.memory_space<vmem>>, vector<1x64x128xbf16>
    %13 = vector.shape_cast %12 : vector<1x64x128xbf16> to vector<64x128xbf16>
    %cst_9 = arith.constant dense<0.000000e+00> : vector<64x128xf32>
    %14 = tpu.matmul %11, %13, %cst_9 {dimension_numbers = #tpu.dot_dimension_numbers<[1], [0], [0], [1], [0, 0, 1, 1], [], []>} : vector<64x64xbf16>, vector<64x128xbf16>, vector<64x128xf32> -> vector<64x128xf32>
    %15 = arith.addf %9, %14 : vector<64x128xf32>
    %16 = vector.extract_strided_slice %3 {offsets = [2, 0, 0], sizes = [8, 8, 64], strides = [1, 1, 1]} : vector<10x8x64xbf16> to vector<8x8x64xbf16>
    %17 = vector.shape_cast %16 : vector<8x8x64xbf16> to vector<64x64xbf16>
    %c6 = arith.constant 6 : index
    %c0_10 = arith.constant 0 : index
    %c0_11 = arith.constant 0 : index
    %18 = vector.load %arg2[%c6, %c0_10, %c0_11] : memref<9x64x128xbf16, #tpu.memory_space<vmem>>, vector<1x64x128xbf16>
    %19 = vector.shape_cast %18 : vector<1x64x128xbf16> to vector<64x128xbf16>
    %cst_12 = arith.constant dense<0.000000e+00> : vector<64x128xf32>
    %20 = tpu.matmul %17, %19, %cst_12 {dimension_numbers = #tpu.dot_dimension_numbers<[1], [0], [0], [1], [0, 0, 1, 1], [], []>} : vector<64x64xbf16>, vector<64x128xbf16>, vector<64x128xf32> -> vector<64x128xf32>
    %21 = arith.addf %15, %20 : vector<64x128xf32>
    %22 = vector.extract_strided_slice %1 {offsets = [0, 1, 0], sizes = [10, 8, 64], strides = [1, 1, 1]} : vector<10x10x64xbf16> to vector<10x8x64xbf16>
    %23 = vector.extract_strided_slice %22 {offsets = [0, 0, 0], sizes = [8, 8, 64], strides = [1, 1, 1]} : vector<10x8x64xbf16> to vector<8x8x64xbf16>
    %24 = vector.shape_cast %23 : vector<8x8x64xbf16> to vector<64x64xbf16>
    %c1 = arith.constant 1 : index
    %c0_13 = arith.constant 0 : index
    %c0_14 = arith.constant 0 : index
    %25 = vector.load %arg2[%c1, %c0_13, %c0_14] : memref<9x64x128xbf16, #tpu.memory_space<vmem>>, vector<1x64x128xbf16>
    %26 = vector.shape_cast %25 : vector<1x64x128xbf16> to vector<64x128xbf16>
    %cst_15 = arith.constant dense<0.000000e+00> : vector<64x128xf32>
    %27 = tpu.matmul %24, %26, %cst_15 {dimension_numbers = #tpu.dot_dimension_numbers<[1], [0], [0], [1], [0, 0, 1, 1], [], []>} : vector<64x64xbf16>, vector<64x128xbf16>, vector<64x128xf32> -> vector<64x128xf32>
    %28 = arith.addf %21, %27 : vector<64x128xf32>
    %29 = vector.extract_strided_slice %22 {offsets = [1, 0, 0], sizes = [8, 8, 64], strides = [1, 1, 1]} : vector<10x8x64xbf16> to vector<8x8x64xbf16>
    %30 = vector.shape_cast %29 : vector<8x8x64xbf16> to vector<64x64xbf16>
    %c4 = arith.constant 4 : index
    %c0_16 = arith.constant 0 : index
    %c0_17 = arith.constant 0 : index
    %31 = vector.load %arg2[%c4, %c0_16, %c0_17] : memref<9x64x128xbf16, #tpu.memory_space<vmem>>, vector<1x64x128xbf16>
    %32 = vector.shape_cast %31 : vector<1x64x128xbf16> to vector<64x128xbf16>
    %cst_18 = arith.constant dense<0.000000e+00> : vector<64x128xf32>
    %33 = tpu.matmul %30, %32, %cst_18 {dimension_numbers = #tpu.dot_dimension_numbers<[1], [0], [0], [1], [0, 0, 1, 1], [], []>} : vector<64x64xbf16>, vector<64x128xbf16>, vector<64x128xf32> -> vector<64x128xf32>
    %34 = arith.addf %28, %33 : vector<64x128xf32>
    %35 = vector.extract_strided_slice %22 {offsets = [2, 0, 0], sizes = [8, 8, 64], strides = [1, 1, 1]} : vector<10x8x64xbf16> to vector<8x8x64xbf16>
    %36 = vector.shape_cast %35 : vector<8x8x64xbf16> to vector<64x64xbf16>
    %c7 = arith.constant 7 : index
    %c0_19 = arith.constant 0 : index
    %c0_20 = arith.constant 0 : index
    %37 = vector.load %arg2[%c7, %c0_19, %c0_20] : memref<9x64x128xbf16, #tpu.memory_space<vmem>>, vector<1x64x128xbf16>
    %38 = vector.shape_cast %37 : vector<1x64x128xbf16> to vector<64x128xbf16>
    %cst_21 = arith.constant dense<0.000000e+00> : vector<64x128xf32>
    %39 = tpu.matmul %36, %38, %cst_21 {dimension_numbers = #tpu.dot_dimension_numbers<[1], [0], [0], [1], [0, 0, 1, 1], [], []>} : vector<64x64xbf16>, vector<64x128xbf16>, vector<64x128xf32> -> vector<64x128xf32>
    %40 = arith.addf %34, %39 : vector<64x128xf32>
    %41 = vector.extract_strided_slice %1 {offsets = [0, 2, 0], sizes = [10, 8, 64], strides = [1, 1, 1]} : vector<10x10x64xbf16> to vector<10x8x64xbf16>
    %42 = vector.extract_strided_slice %41 {offsets = [0, 0, 0], sizes = [8, 8, 64], strides = [1, 1, 1]} : vector<10x8x64xbf16> to vector<8x8x64xbf16>
    %43 = vector.shape_cast %42 : vector<8x8x64xbf16> to vector<64x64xbf16>
    %c2 = arith.constant 2 : index
    %c0_22 = arith.constant 0 : index
    %c0_23 = arith.constant 0 : index
    %44 = vector.load %arg2[%c2, %c0_22, %c0_23] : memref<9x64x128xbf16, #tpu.memory_space<vmem>>, vector<1x64x128xbf16>
    %45 = vector.shape_cast %44 : vector<1x64x128xbf16> to vector<64x128xbf16>
    %cst_24 = arith.constant dense<0.000000e+00> : vector<64x128xf32>
    %46 = tpu.matmul %43, %45, %cst_24 {dimension_numbers = #tpu.dot_dimension_numbers<[1], [0], [0], [1], [0, 0, 1, 1], [], []>} : vector<64x64xbf16>, vector<64x128xbf16>, vector<64x128xf32> -> vector<64x128xf32>
    %47 = arith.addf %40, %46 : vector<64x128xf32>
    %48 = vector.extract_strided_slice %41 {offsets = [1, 0, 0], sizes = [8, 8, 64], strides = [1, 1, 1]} : vector<10x8x64xbf16> to vector<8x8x64xbf16>
    %49 = vector.shape_cast %48 : vector<8x8x64xbf16> to vector<64x64xbf16>
    %c5 = arith.constant 5 : index
    %c0_25 = arith.constant 0 : index
    %c0_26 = arith.constant 0 : index
    %50 = vector.load %arg2[%c5, %c0_25, %c0_26] : memref<9x64x128xbf16, #tpu.memory_space<vmem>>, vector<1x64x128xbf16>
    %51 = vector.shape_cast %50 : vector<1x64x128xbf16> to vector<64x128xbf16>
    %cst_27 = arith.constant dense<0.000000e+00> : vector<64x128xf32>
    %52 = tpu.matmul %49, %51, %cst_27 {dimension_numbers = #tpu.dot_dimension_numbers<[1], [0], [0], [1], [0, 0, 1, 1], [], []>} : vector<64x64xbf16>, vector<64x128xbf16>, vector<64x128xf32> -> vector<64x128xf32>
    %53 = arith.addf %47, %52 : vector<64x128xf32>
    %54 = vector.extract_strided_slice %41 {offsets = [2, 0, 0], sizes = [8, 8, 64], strides = [1, 1, 1]} : vector<10x8x64xbf16> to vector<8x8x64xbf16>
    %55 = vector.shape_cast %54 : vector<8x8x64xbf16> to vector<64x64xbf16>
    %c8 = arith.constant 8 : index
    %c0_28 = arith.constant 0 : index
    %c0_29 = arith.constant 0 : index
    %56 = vector.load %arg2[%c8, %c0_28, %c0_29] : memref<9x64x128xbf16, #tpu.memory_space<vmem>>, vector<1x64x128xbf16>
    %57 = vector.shape_cast %56 : vector<1x64x128xbf16> to vector<64x128xbf16>
    %cst_30 = arith.constant dense<0.000000e+00> : vector<64x128xf32>
    %58 = tpu.matmul %55, %57, %cst_30 {dimension_numbers = #tpu.dot_dimension_numbers<[1], [0], [0], [1], [0, 0, 1, 1], [], []>} : vector<64x64xbf16>, vector<64x128xbf16>, vector<64x128xf32> -> vector<64x128xf32>
    %59 = arith.addf %53, %58 : vector<64x128xf32>
    %c0_31 = arith.constant 0 : index
    %c0_32 = arith.constant 0 : index
    %60 = vector.load %arg3[%c0_31, %c0_32] : memref<1x128xf32, #tpu.memory_space<vmem>>, vector<1x128xf32>
    %61 = vector.broadcast %60 : vector<1x128xf32> to vector<64x128xf32>
    %62 = arith.addf %59, %61 : vector<64x128xf32>
    %cst_33 = arith.constant 0.000000e+00 : f32
    %63 = vector.broadcast %cst_33 : f32 to vector<64x128xf32>
    %64 = arith.maximumf %62, %63 : vector<64x128xf32>
    %65 = vector.shape_cast %64 : vector<64x128xf32> to vector<32x2x128xf32>
    %cst_34 = arith.constant dense<0xFF800000> : vector<32x128xf32>
    %66 = vector.multi_reduction <maximumf>, %65, %cst_34 [1] : vector<32x2x128xf32> to vector<32x128xf32>
    %67 = vector.shape_cast %66 : vector<32x128xf32> to vector<4x8x128xf32>
    %68 = vector.extract_strided_slice %67 {offsets = [0, 0, 0], sizes = [4, 4, 128], strides = [1, 1, 1]} : vector<4x8x128xf32> to vector<4x4x128xf32>
    %69 = vector.extract_strided_slice %67 {offsets = [0, 4, 0], sizes = [4, 4, 128], strides = [1, 1, 1]} : vector<4x8x128xf32> to vector<4x4x128xf32>
    %70 = arith.maximumf %68, %69 : vector<4x4x128xf32>
    %71 = arith.truncf %70 : vector<4x4x128xf32> to vector<4x4x128xbf16>
    %c0_35 = arith.constant 0 : index
    %c0_36 = arith.constant 0 : index
    %c0_37 = arith.constant 0 : index
    %c0_38 = arith.constant 0 : index
    %72 = vector.load %arg4[%c0_35, %c0_36, %c0_37, %c0_38] : memref<1x4x4x128xbf16, #tpu.memory_space<vmem>>, vector<1x4x4x128xbf16>
    %73 = vector.shape_cast %72 : vector<1x4x4x128xbf16> to vector<4x4x128xbf16>
    %74 = vector.shape_cast %71 : vector<4x4x128xbf16> to vector<1x4x4x128xbf16>
    tpu.vector_store %arg4[%c0_35, %c0_36, %c0_37, %c0_38], %74 {strides = array<i32>} : memref<1x4x4x128xbf16, #tpu.memory_space<vmem>>, vector<1x4x4x128xbf16>,
    return
  }
  func.func @transform_0(%arg0: i32) -> (i32, i32, i32, i32) {
    %c0_i32 = arith.constant 0 : i32
    %c0_i32_0 = arith.constant 0 : i32
    %c0_i32_1 = arith.constant 0 : i32
    %c0_i32_2 = arith.constant 0 : i32
    return %arg0, %c0_i32, %c0_i32_0, %c0_i32_1 : i32, i32, i32, i32
  }
  func.func @transform_1(%arg0: i32) -> (i32, i32, i32) {
    %c0_i32 = arith.constant 0 : i32
    %c0_i32_0 = arith.constant 0 : i32
    %c0_i32_1 = arith.constant 0 : i32
    %c0_i32_2 = arith.constant 0 : i32
    return %c0_i32, %c0_i32_0, %c0_i32_1 : i32, i32, i32
  }
  func.func @transform_2(%arg0: i32) -> (i32, i32) {
    %c0_i32 = arith.constant 0 : i32
    %c0_i32_0 = arith.constant 0 : i32
    %c0_i32_1 = arith.constant 0 : i32
    return %c0_i32, %c0_i32_0 : i32, i32
  }
  func.func @transform_3(%arg0: i32) -> (i32, i32, i32, i32) {
    %c0_i32 = arith.constant 0 : i32
    %c0_i32_0 = arith.constant 0 : i32
    %c0_i32_1 = arith.constant 0 : i32
    %c0_i32_2 = arith.constant 0 : i32
    return %arg0, %c0_i32, %c0_i32_0, %c0_i32_1 : i32, i32, i32, i32
  }
}

module attributes {stable_mosaic.version = 11 : i64} {
  func.func @conv3x3_relu_kernel(%arg0: i32, %arg1: memref<1x6x6x128xbf16, #tpu.memory_space<vmem>>, %arg2: memref<9x128x256xbf16, #tpu.memory_space<vmem>>, %arg3: memref<1x256xf32, #tpu.memory_space<vmem>>, %arg4: memref<1x4x4x256xbf16, #tpu.memory_space<vmem>>) attributes {dimension_semantics = [#tpu.dimension_semantics<parallel>], iteration_bounds = array<i64: 2>, scalar_prefetch = 0 : i64, scratch_operands = 0 : i64, tpu.core_type = #tpu.core_type<tc>, window_params = [{transform_indices = @transform_0, window_bounds = array<i64: 1, 6, 6, 128>}, {pipeline_mode = #tpu.pipeline_mode<synchronous>, transform_indices = @transform_1, window_bounds = array<i64: 9, 128, 256>}, {pipeline_mode = #tpu.pipeline_mode<synchronous>, transform_indices = @transform_2, window_bounds = array<i64: 1, 256>}, {transform_indices = @transform_3, window_bounds = array<i64: 1, 4, 4, 256>}]} {
    %c0 = arith.constant 0 : index
    %c0_0 = arith.constant 0 : index
    %c0_1 = arith.constant 0 : index
    %c0_2 = arith.constant 0 : index
    %0 = vector.load %arg1[%c0, %c0_0, %c0_1, %c0_2] : memref<1x6x6x128xbf16, #tpu.memory_space<vmem>>, vector<1x6x6x128xbf16>
    %1 = vector.shape_cast %0 : vector<1x6x6x128xbf16> to vector<6x6x128xbf16>
    %cst = arith.constant 0.000000e+00 : f32
    %2 = vector.broadcast %cst : f32 to vector<16x256xf32>
    %3 = vector.extract_strided_slice %1 {offsets = [0, 0, 0], sizes = [6, 4, 128], strides = [1, 1, 1]} : vector<6x6x128xbf16> to vector<6x4x128xbf16>
    %4 = vector.extract_strided_slice %3 {offsets = [0, 0, 0], sizes = [4, 4, 128], strides = [1, 1, 1]} : vector<6x4x128xbf16> to vector<4x4x128xbf16>
    %5 = vector.shape_cast %4 : vector<4x4x128xbf16> to vector<16x128xbf16>
    %c0_3 = arith.constant 0 : index
    %c0_4 = arith.constant 0 : index
    %c0_5 = arith.constant 0 : index
    %6 = vector.load %arg2[%c0_3, %c0_4, %c0_5] : memref<9x128x256xbf16, #tpu.memory_space<vmem>>, vector<1x128x256xbf16>
    %7 = vector.shape_cast %6 : vector<1x128x256xbf16> to vector<128x256xbf16>
    %cst_6 = arith.constant dense<0.000000e+00> : vector<16x256xf32>
    %8 = tpu.matmul %5, %7, %cst_6 {dimension_numbers = #tpu.dot_dimension_numbers<[1], [0], [0], [1], [0, 0, 1, 1], [], []>} : vector<16x128xbf16>, vector<128x256xbf16>, vector<16x256xf32> -> vector<16x256xf32>
    %9 = arith.addf %2, %8 : vector<16x256xf32>
    %10 = vector.extract_strided_slice %3 {offsets = [1, 0, 0], sizes = [4, 4, 128], strides = [1, 1, 1]} : vector<6x4x128xbf16> to vector<4x4x128xbf16>
    %11 = vector.shape_cast %10 : vector<4x4x128xbf16> to vector<16x128xbf16>
    %c3 = arith.constant 3 : index
    %c0_7 = arith.constant 0 : index
    %c0_8 = arith.constant 0 : index
    %12 = vector.load %arg2[%c3, %c0_7, %c0_8] : memref<9x128x256xbf16, #tpu.memory_space<vmem>>, vector<1x128x256xbf16>
    %13 = vector.shape_cast %12 : vector<1x128x256xbf16> to vector<128x256xbf16>
    %cst_9 = arith.constant dense<0.000000e+00> : vector<16x256xf32>
    %14 = tpu.matmul %11, %13, %cst_9 {dimension_numbers = #tpu.dot_dimension_numbers<[1], [0], [0], [1], [0, 0, 1, 1], [], []>} : vector<16x128xbf16>, vector<128x256xbf16>, vector<16x256xf32> -> vector<16x256xf32>
    %15 = arith.addf %9, %14 : vector<16x256xf32>
    %16 = vector.extract_strided_slice %3 {offsets = [2, 0, 0], sizes = [4, 4, 128], strides = [1, 1, 1]} : vector<6x4x128xbf16> to vector<4x4x128xbf16>
    %17 = vector.shape_cast %16 : vector<4x4x128xbf16> to vector<16x128xbf16>
    %c6 = arith.constant 6 : index
    %c0_10 = arith.constant 0 : index
    %c0_11 = arith.constant 0 : index
    %18 = vector.load %arg2[%c6, %c0_10, %c0_11] : memref<9x128x256xbf16, #tpu.memory_space<vmem>>, vector<1x128x256xbf16>
    %19 = vector.shape_cast %18 : vector<1x128x256xbf16> to vector<128x256xbf16>
    %cst_12 = arith.constant dense<0.000000e+00> : vector<16x256xf32>
    %20 = tpu.matmul %17, %19, %cst_12 {dimension_numbers = #tpu.dot_dimension_numbers<[1], [0], [0], [1], [0, 0, 1, 1], [], []>} : vector<16x128xbf16>, vector<128x256xbf16>, vector<16x256xf32> -> vector<16x256xf32>
    %21 = arith.addf %15, %20 : vector<16x256xf32>
    %22 = vector.extract_strided_slice %1 {offsets = [0, 1, 0], sizes = [6, 4, 128], strides = [1, 1, 1]} : vector<6x6x128xbf16> to vector<6x4x128xbf16>
    %23 = vector.extract_strided_slice %22 {offsets = [0, 0, 0], sizes = [4, 4, 128], strides = [1, 1, 1]} : vector<6x4x128xbf16> to vector<4x4x128xbf16>
    %24 = vector.shape_cast %23 : vector<4x4x128xbf16> to vector<16x128xbf16>
    %c1 = arith.constant 1 : index
    %c0_13 = arith.constant 0 : index
    %c0_14 = arith.constant 0 : index
    %25 = vector.load %arg2[%c1, %c0_13, %c0_14] : memref<9x128x256xbf16, #tpu.memory_space<vmem>>, vector<1x128x256xbf16>
    %26 = vector.shape_cast %25 : vector<1x128x256xbf16> to vector<128x256xbf16>
    %cst_15 = arith.constant dense<0.000000e+00> : vector<16x256xf32>
    %27 = tpu.matmul %24, %26, %cst_15 {dimension_numbers = #tpu.dot_dimension_numbers<[1], [0], [0], [1], [0, 0, 1, 1], [], []>} : vector<16x128xbf16>, vector<128x256xbf16>, vector<16x256xf32> -> vector<16x256xf32>
    %28 = arith.addf %21, %27 : vector<16x256xf32>
    %29 = vector.extract_strided_slice %22 {offsets = [1, 0, 0], sizes = [4, 4, 128], strides = [1, 1, 1]} : vector<6x4x128xbf16> to vector<4x4x128xbf16>
    %30 = vector.shape_cast %29 : vector<4x4x128xbf16> to vector<16x128xbf16>
    %c4 = arith.constant 4 : index
    %c0_16 = arith.constant 0 : index
    %c0_17 = arith.constant 0 : index
    %31 = vector.load %arg2[%c4, %c0_16, %c0_17] : memref<9x128x256xbf16, #tpu.memory_space<vmem>>, vector<1x128x256xbf16>
    %32 = vector.shape_cast %31 : vector<1x128x256xbf16> to vector<128x256xbf16>
    %cst_18 = arith.constant dense<0.000000e+00> : vector<16x256xf32>
    %33 = tpu.matmul %30, %32, %cst_18 {dimension_numbers = #tpu.dot_dimension_numbers<[1], [0], [0], [1], [0, 0, 1, 1], [], []>} : vector<16x128xbf16>, vector<128x256xbf16>, vector<16x256xf32> -> vector<16x256xf32>
    %34 = arith.addf %28, %33 : vector<16x256xf32>
    %35 = vector.extract_strided_slice %22 {offsets = [2, 0, 0], sizes = [4, 4, 128], strides = [1, 1, 1]} : vector<6x4x128xbf16> to vector<4x4x128xbf16>
    %36 = vector.shape_cast %35 : vector<4x4x128xbf16> to vector<16x128xbf16>
    %c7 = arith.constant 7 : index
    %c0_19 = arith.constant 0 : index
    %c0_20 = arith.constant 0 : index
    %37 = vector.load %arg2[%c7, %c0_19, %c0_20] : memref<9x128x256xbf16, #tpu.memory_space<vmem>>, vector<1x128x256xbf16>
    %38 = vector.shape_cast %37 : vector<1x128x256xbf16> to vector<128x256xbf16>
    %cst_21 = arith.constant dense<0.000000e+00> : vector<16x256xf32>
    %39 = tpu.matmul %36, %38, %cst_21 {dimension_numbers = #tpu.dot_dimension_numbers<[1], [0], [0], [1], [0, 0, 1, 1], [], []>} : vector<16x128xbf16>, vector<128x256xbf16>, vector<16x256xf32> -> vector<16x256xf32>
    %40 = arith.addf %34, %39 : vector<16x256xf32>
    %41 = vector.extract_strided_slice %1 {offsets = [0, 2, 0], sizes = [6, 4, 128], strides = [1, 1, 1]} : vector<6x6x128xbf16> to vector<6x4x128xbf16>
    %42 = vector.extract_strided_slice %41 {offsets = [0, 0, 0], sizes = [4, 4, 128], strides = [1, 1, 1]} : vector<6x4x128xbf16> to vector<4x4x128xbf16>
    %43 = vector.shape_cast %42 : vector<4x4x128xbf16> to vector<16x128xbf16>
    %c2 = arith.constant 2 : index
    %c0_22 = arith.constant 0 : index
    %c0_23 = arith.constant 0 : index
    %44 = vector.load %arg2[%c2, %c0_22, %c0_23] : memref<9x128x256xbf16, #tpu.memory_space<vmem>>, vector<1x128x256xbf16>
    %45 = vector.shape_cast %44 : vector<1x128x256xbf16> to vector<128x256xbf16>
    %cst_24 = arith.constant dense<0.000000e+00> : vector<16x256xf32>
    %46 = tpu.matmul %43, %45, %cst_24 {dimension_numbers = #tpu.dot_dimension_numbers<[1], [0], [0], [1], [0, 0, 1, 1], [], []>} : vector<16x128xbf16>, vector<128x256xbf16>, vector<16x256xf32> -> vector<16x256xf32>
    %47 = arith.addf %40, %46 : vector<16x256xf32>
    %48 = vector.extract_strided_slice %41 {offsets = [1, 0, 0], sizes = [4, 4, 128], strides = [1, 1, 1]} : vector<6x4x128xbf16> to vector<4x4x128xbf16>
    %49 = vector.shape_cast %48 : vector<4x4x128xbf16> to vector<16x128xbf16>
    %c5 = arith.constant 5 : index
    %c0_25 = arith.constant 0 : index
    %c0_26 = arith.constant 0 : index
    %50 = vector.load %arg2[%c5, %c0_25, %c0_26] : memref<9x128x256xbf16, #tpu.memory_space<vmem>>, vector<1x128x256xbf16>
    %51 = vector.shape_cast %50 : vector<1x128x256xbf16> to vector<128x256xbf16>
    %cst_27 = arith.constant dense<0.000000e+00> : vector<16x256xf32>
    %52 = tpu.matmul %49, %51, %cst_27 {dimension_numbers = #tpu.dot_dimension_numbers<[1], [0], [0], [1], [0, 0, 1, 1], [], []>} : vector<16x128xbf16>, vector<128x256xbf16>, vector<16x256xf32> -> vector<16x256xf32>
    %53 = arith.addf %47, %52 : vector<16x256xf32>
    %54 = vector.extract_strided_slice %41 {offsets = [2, 0, 0], sizes = [4, 4, 128], strides = [1, 1, 1]} : vector<6x4x128xbf16> to vector<4x4x128xbf16>
    %55 = vector.shape_cast %54 : vector<4x4x128xbf16> to vector<16x128xbf16>
    %c8 = arith.constant 8 : index
    %c0_28 = arith.constant 0 : index
    %c0_29 = arith.constant 0 : index
    %56 = vector.load %arg2[%c8, %c0_28, %c0_29] : memref<9x128x256xbf16, #tpu.memory_space<vmem>>, vector<1x128x256xbf16>
    %57 = vector.shape_cast %56 : vector<1x128x256xbf16> to vector<128x256xbf16>
    %cst_30 = arith.constant dense<0.000000e+00> : vector<16x256xf32>
    %58 = tpu.matmul %55, %57, %cst_30 {dimension_numbers = #tpu.dot_dimension_numbers<[1], [0], [0], [1], [0, 0, 1, 1], [], []>} : vector<16x128xbf16>, vector<128x256xbf16>, vector<16x256xf32> -> vector<16x256xf32>
    %59 = arith.addf %53, %58 : vector<16x256xf32>
    %c0_31 = arith.constant 0 : index
    %c0_32 = arith.constant 0 : index
    %60 = vector.load %arg3[%c0_31, %c0_32] : memref<1x256xf32, #tpu.memory_space<vmem>>, vector<1x256xf32>
    %61 = vector.broadcast %60 : vector<1x256xf32> to vector<16x256xf32>
    %62 = arith.addf %59, %61 : vector<16x256xf32>
    %cst_33 = arith.constant 0.000000e+00 : f32
    %63 = vector.broadcast %cst_33 : f32 to vector<16x256xf32>
    %64 = arith.maximumf %62, %63 : vector<16x256xf32>
    %65 = vector.shape_cast %64 : vector<16x256xf32> to vector<4x4x256xf32>
    %66 = arith.truncf %65 : vector<4x4x256xf32> to vector<4x4x256xbf16>
    %c0_34 = arith.constant 0 : index
    %c0_35 = arith.constant 0 : index
    %c0_36 = arith.constant 0 : index
    %c0_37 = arith.constant 0 : index
    %67 = vector.load %arg4[%c0_34, %c0_35, %c0_36, %c0_37] : memref<1x4x4x256xbf16, #tpu.memory_space<vmem>>, vector<1x4x4x256xbf16>
    %68 = vector.shape_cast %67 : vector<1x4x4x256xbf16> to vector<4x4x256xbf16>
    %69 = vector.shape_cast %66 : vector<4x4x256xbf16> to vector<1x4x4x256xbf16>
    tpu.vector_store %arg4[%c0_34, %c0_35, %c0_36, %c0_37], %69 {strides = array<i32>} : memref<1x4x4x256xbf16, #tpu.memory_space<vmem>>, vector<1x4x4x256xbf16>,
    return
  }
  func.func @transform_0(%arg0: i32) -> (i32, i32, i32, i32) {
    %c0_i32 = arith.constant 0 : i32
    %c0_i32_0 = arith.constant 0 : i32
    %c0_i32_1 = arith.constant 0 : i32
    %c0_i32_2 = arith.constant 0 : i32
    return %arg0, %c0_i32, %c0_i32_0, %c0_i32_1 : i32, i32, i32, i32
  }
  func.func @transform_1(%arg0: i32) -> (i32, i32, i32) {
    %c0_i32 = arith.constant 0 : i32
    %c0_i32_0 = arith.constant 0 : i32
    %c0_i32_1 = arith.constant 0 : i32
    %c0_i32_2 = arith.constant 0 : i32
    return %c0_i32, %c0_i32_0, %c0_i32_1 : i32, i32, i32
  }
  func.func @transform_2(%arg0: i32) -> (i32, i32) {
    %c0_i32 = arith.constant 0 : i32
    %c0_i32_0 = arith.constant 0 : i32
    %c0_i32_1 = arith.constant 0 : i32
    return %c0_i32, %c0_i32_0 : i32, i32
  }
  func.func @transform_3(%arg0: i32) -> (i32, i32, i32, i32) {
    %c0_i32 = arith.constant 0 : i32
    %c0_i32_0 = arith.constant 0 : i32
    %c0_i32_1 = arith.constant 0 : i32
    %c0_i32_2 = arith.constant 0 : i32
    return %arg0, %c0_i32, %c0_i32_0, %c0_i32_1 : i32, i32, i32, i32
  }
}

module attributes {stable_mosaic.version = 11 : i64} {
  func.func @conv3x3_relu_kernel(%arg0: i32, %arg1: memref<1x6x6x256xbf16, #tpu.memory_space<vmem>>, %arg2: memref<9x256x256xbf16, #tpu.memory_space<vmem>>, %arg3: memref<1x256xf32, #tpu.memory_space<vmem>>, %arg4: memref<1x4x4x256xbf16, #tpu.memory_space<vmem>>) attributes {dimension_semantics = [#tpu.dimension_semantics<parallel>], iteration_bounds = array<i64: 2>, scalar_prefetch = 0 : i64, scratch_operands = 0 : i64, tpu.core_type = #tpu.core_type<tc>, window_params = [{transform_indices = @transform_0, window_bounds = array<i64: 1, 6, 6, 256>}, {pipeline_mode = #tpu.pipeline_mode<synchronous>, transform_indices = @transform_1, window_bounds = array<i64: 9, 256, 256>}, {pipeline_mode = #tpu.pipeline_mode<synchronous>, transform_indices = @transform_2, window_bounds = array<i64: 1, 256>}, {transform_indices = @transform_3, window_bounds = array<i64: 1, 4, 4, 256>}]} {
    %c0 = arith.constant 0 : index
    %c0_0 = arith.constant 0 : index
    %c0_1 = arith.constant 0 : index
    %c0_2 = arith.constant 0 : index
    %0 = vector.load %arg1[%c0, %c0_0, %c0_1, %c0_2] : memref<1x6x6x256xbf16, #tpu.memory_space<vmem>>, vector<1x6x6x256xbf16>
    %1 = vector.shape_cast %0 : vector<1x6x6x256xbf16> to vector<6x6x256xbf16>
    %cst = arith.constant 0.000000e+00 : f32
    %2 = vector.broadcast %cst : f32 to vector<16x256xf32>
    %3 = vector.extract_strided_slice %1 {offsets = [0, 0, 0], sizes = [6, 4, 256], strides = [1, 1, 1]} : vector<6x6x256xbf16> to vector<6x4x256xbf16>
    %4 = vector.extract_strided_slice %3 {offsets = [0, 0, 0], sizes = [4, 4, 256], strides = [1, 1, 1]} : vector<6x4x256xbf16> to vector<4x4x256xbf16>
    %5 = vector.shape_cast %4 : vector<4x4x256xbf16> to vector<16x256xbf16>
    %c0_3 = arith.constant 0 : index
    %c0_4 = arith.constant 0 : index
    %c0_5 = arith.constant 0 : index
    %6 = vector.load %arg2[%c0_3, %c0_4, %c0_5] : memref<9x256x256xbf16, #tpu.memory_space<vmem>>, vector<1x256x256xbf16>
    %7 = vector.shape_cast %6 : vector<1x256x256xbf16> to vector<256x256xbf16>
    %cst_6 = arith.constant dense<0.000000e+00> : vector<16x256xf32>
    %8 = tpu.matmul %5, %7, %cst_6 {dimension_numbers = #tpu.dot_dimension_numbers<[1], [0], [0], [1], [0, 0, 1, 1], [], []>} : vector<16x256xbf16>, vector<256x256xbf16>, vector<16x256xf32> -> vector<16x256xf32>
    %9 = arith.addf %2, %8 : vector<16x256xf32>
    %10 = vector.extract_strided_slice %3 {offsets = [1, 0, 0], sizes = [4, 4, 256], strides = [1, 1, 1]} : vector<6x4x256xbf16> to vector<4x4x256xbf16>
    %11 = vector.shape_cast %10 : vector<4x4x256xbf16> to vector<16x256xbf16>
    %c3 = arith.constant 3 : index
    %c0_7 = arith.constant 0 : index
    %c0_8 = arith.constant 0 : index
    %12 = vector.load %arg2[%c3, %c0_7, %c0_8] : memref<9x256x256xbf16, #tpu.memory_space<vmem>>, vector<1x256x256xbf16>
    %13 = vector.shape_cast %12 : vector<1x256x256xbf16> to vector<256x256xbf16>
    %cst_9 = arith.constant dense<0.000000e+00> : vector<16x256xf32>
    %14 = tpu.matmul %11, %13, %cst_9 {dimension_numbers = #tpu.dot_dimension_numbers<[1], [0], [0], [1], [0, 0, 1, 1], [], []>} : vector<16x256xbf16>, vector<256x256xbf16>, vector<16x256xf32> -> vector<16x256xf32>
    %15 = arith.addf %9, %14 : vector<16x256xf32>
    %16 = vector.extract_strided_slice %3 {offsets = [2, 0, 0], sizes = [4, 4, 256], strides = [1, 1, 1]} : vector<6x4x256xbf16> to vector<4x4x256xbf16>
    %17 = vector.shape_cast %16 : vector<4x4x256xbf16> to vector<16x256xbf16>
    %c6 = arith.constant 6 : index
    %c0_10 = arith.constant 0 : index
    %c0_11 = arith.constant 0 : index
    %18 = vector.load %arg2[%c6, %c0_10, %c0_11] : memref<9x256x256xbf16, #tpu.memory_space<vmem>>, vector<1x256x256xbf16>
    %19 = vector.shape_cast %18 : vector<1x256x256xbf16> to vector<256x256xbf16>
    %cst_12 = arith.constant dense<0.000000e+00> : vector<16x256xf32>
    %20 = tpu.matmul %17, %19, %cst_12 {dimension_numbers = #tpu.dot_dimension_numbers<[1], [0], [0], [1], [0, 0, 1, 1], [], []>} : vector<16x256xbf16>, vector<256x256xbf16>, vector<16x256xf32> -> vector<16x256xf32>
    %21 = arith.addf %15, %20 : vector<16x256xf32>
    %22 = vector.extract_strided_slice %1 {offsets = [0, 1, 0], sizes = [6, 4, 256], strides = [1, 1, 1]} : vector<6x6x256xbf16> to vector<6x4x256xbf16>
    %23 = vector.extract_strided_slice %22 {offsets = [0, 0, 0], sizes = [4, 4, 256], strides = [1, 1, 1]} : vector<6x4x256xbf16> to vector<4x4x256xbf16>
    %24 = vector.shape_cast %23 : vector<4x4x256xbf16> to vector<16x256xbf16>
    %c1 = arith.constant 1 : index
    %c0_13 = arith.constant 0 : index
    %c0_14 = arith.constant 0 : index
    %25 = vector.load %arg2[%c1, %c0_13, %c0_14] : memref<9x256x256xbf16, #tpu.memory_space<vmem>>, vector<1x256x256xbf16>
    %26 = vector.shape_cast %25 : vector<1x256x256xbf16> to vector<256x256xbf16>
    %cst_15 = arith.constant dense<0.000000e+00> : vector<16x256xf32>
    %27 = tpu.matmul %24, %26, %cst_15 {dimension_numbers = #tpu.dot_dimension_numbers<[1], [0], [0], [1], [0, 0, 1, 1], [], []>} : vector<16x256xbf16>, vector<256x256xbf16>, vector<16x256xf32> -> vector<16x256xf32>
    %28 = arith.addf %21, %27 : vector<16x256xf32>
    %29 = vector.extract_strided_slice %22 {offsets = [1, 0, 0], sizes = [4, 4, 256], strides = [1, 1, 1]} : vector<6x4x256xbf16> to vector<4x4x256xbf16>
    %30 = vector.shape_cast %29 : vector<4x4x256xbf16> to vector<16x256xbf16>
    %c4 = arith.constant 4 : index
    %c0_16 = arith.constant 0 : index
    %c0_17 = arith.constant 0 : index
    %31 = vector.load %arg2[%c4, %c0_16, %c0_17] : memref<9x256x256xbf16, #tpu.memory_space<vmem>>, vector<1x256x256xbf16>
    %32 = vector.shape_cast %31 : vector<1x256x256xbf16> to vector<256x256xbf16>
    %cst_18 = arith.constant dense<0.000000e+00> : vector<16x256xf32>
    %33 = tpu.matmul %30, %32, %cst_18 {dimension_numbers = #tpu.dot_dimension_numbers<[1], [0], [0], [1], [0, 0, 1, 1], [], []>} : vector<16x256xbf16>, vector<256x256xbf16>, vector<16x256xf32> -> vector<16x256xf32>
    %34 = arith.addf %28, %33 : vector<16x256xf32>
    %35 = vector.extract_strided_slice %22 {offsets = [2, 0, 0], sizes = [4, 4, 256], strides = [1, 1, 1]} : vector<6x4x256xbf16> to vector<4x4x256xbf16>
    %36 = vector.shape_cast %35 : vector<4x4x256xbf16> to vector<16x256xbf16>
    %c7 = arith.constant 7 : index
    %c0_19 = arith.constant 0 : index
    %c0_20 = arith.constant 0 : index
    %37 = vector.load %arg2[%c7, %c0_19, %c0_20] : memref<9x256x256xbf16, #tpu.memory_space<vmem>>, vector<1x256x256xbf16>
    %38 = vector.shape_cast %37 : vector<1x256x256xbf16> to vector<256x256xbf16>
    %cst_21 = arith.constant dense<0.000000e+00> : vector<16x256xf32>
    %39 = tpu.matmul %36, %38, %cst_21 {dimension_numbers = #tpu.dot_dimension_numbers<[1], [0], [0], [1], [0, 0, 1, 1], [], []>} : vector<16x256xbf16>, vector<256x256xbf16>, vector<16x256xf32> -> vector<16x256xf32>
    %40 = arith.addf %34, %39 : vector<16x256xf32>
    %41 = vector.extract_strided_slice %1 {offsets = [0, 2, 0], sizes = [6, 4, 256], strides = [1, 1, 1]} : vector<6x6x256xbf16> to vector<6x4x256xbf16>
    %42 = vector.extract_strided_slice %41 {offsets = [0, 0, 0], sizes = [4, 4, 256], strides = [1, 1, 1]} : vector<6x4x256xbf16> to vector<4x4x256xbf16>
    %43 = vector.shape_cast %42 : vector<4x4x256xbf16> to vector<16x256xbf16>
    %c2 = arith.constant 2 : index
    %c0_22 = arith.constant 0 : index
    %c0_23 = arith.constant 0 : index
    %44 = vector.load %arg2[%c2, %c0_22, %c0_23] : memref<9x256x256xbf16, #tpu.memory_space<vmem>>, vector<1x256x256xbf16>
    %45 = vector.shape_cast %44 : vector<1x256x256xbf16> to vector<256x256xbf16>
    %cst_24 = arith.constant dense<0.000000e+00> : vector<16x256xf32>
    %46 = tpu.matmul %43, %45, %cst_24 {dimension_numbers = #tpu.dot_dimension_numbers<[1], [0], [0], [1], [0, 0, 1, 1], [], []>} : vector<16x256xbf16>, vector<256x256xbf16>, vector<16x256xf32> -> vector<16x256xf32>
    %47 = arith.addf %40, %46 : vector<16x256xf32>
    %48 = vector.extract_strided_slice %41 {offsets = [1, 0, 0], sizes = [4, 4, 256], strides = [1, 1, 1]} : vector<6x4x256xbf16> to vector<4x4x256xbf16>
    %49 = vector.shape_cast %48 : vector<4x4x256xbf16> to vector<16x256xbf16>
    %c5 = arith.constant 5 : index
    %c0_25 = arith.constant 0 : index
    %c0_26 = arith.constant 0 : index
    %50 = vector.load %arg2[%c5, %c0_25, %c0_26] : memref<9x256x256xbf16, #tpu.memory_space<vmem>>, vector<1x256x256xbf16>
    %51 = vector.shape_cast %50 : vector<1x256x256xbf16> to vector<256x256xbf16>
    %cst_27 = arith.constant dense<0.000000e+00> : vector<16x256xf32>
    %52 = tpu.matmul %49, %51, %cst_27 {dimension_numbers = #tpu.dot_dimension_numbers<[1], [0], [0], [1], [0, 0, 1, 1], [], []>} : vector<16x256xbf16>, vector<256x256xbf16>, vector<16x256xf32> -> vector<16x256xf32>
    %53 = arith.addf %47, %52 : vector<16x256xf32>
    %54 = vector.extract_strided_slice %41 {offsets = [2, 0, 0], sizes = [4, 4, 256], strides = [1, 1, 1]} : vector<6x4x256xbf16> to vector<4x4x256xbf16>
    %55 = vector.shape_cast %54 : vector<4x4x256xbf16> to vector<16x256xbf16>
    %c8 = arith.constant 8 : index
    %c0_28 = arith.constant 0 : index
    %c0_29 = arith.constant 0 : index
    %56 = vector.load %arg2[%c8, %c0_28, %c0_29] : memref<9x256x256xbf16, #tpu.memory_space<vmem>>, vector<1x256x256xbf16>
    %57 = vector.shape_cast %56 : vector<1x256x256xbf16> to vector<256x256xbf16>
    %cst_30 = arith.constant dense<0.000000e+00> : vector<16x256xf32>
    %58 = tpu.matmul %55, %57, %cst_30 {dimension_numbers = #tpu.dot_dimension_numbers<[1], [0], [0], [1], [0, 0, 1, 1], [], []>} : vector<16x256xbf16>, vector<256x256xbf16>, vector<16x256xf32> -> vector<16x256xf32>
    %59 = arith.addf %53, %58 : vector<16x256xf32>
    %c0_31 = arith.constant 0 : index
    %c0_32 = arith.constant 0 : index
    %60 = vector.load %arg3[%c0_31, %c0_32] : memref<1x256xf32, #tpu.memory_space<vmem>>, vector<1x256xf32>
    %61 = vector.broadcast %60 : vector<1x256xf32> to vector<16x256xf32>
    %62 = arith.addf %59, %61 : vector<16x256xf32>
    %cst_33 = arith.constant 0.000000e+00 : f32
    %63 = vector.broadcast %cst_33 : f32 to vector<16x256xf32>
    %64 = arith.maximumf %62, %63 : vector<16x256xf32>
    %65 = vector.shape_cast %64 : vector<16x256xf32> to vector<4x4x256xf32>
    %66 = arith.truncf %65 : vector<4x4x256xf32> to vector<4x4x256xbf16>
    %c0_34 = arith.constant 0 : index
    %c0_35 = arith.constant 0 : index
    %c0_36 = arith.constant 0 : index
    %c0_37 = arith.constant 0 : index
    %67 = vector.load %arg4[%c0_34, %c0_35, %c0_36, %c0_37] : memref<1x4x4x256xbf16, #tpu.memory_space<vmem>>, vector<1x4x4x256xbf16>
    %68 = vector.shape_cast %67 : vector<1x4x4x256xbf16> to vector<4x4x256xbf16>
    %69 = vector.shape_cast %66 : vector<4x4x256xbf16> to vector<1x4x4x256xbf16>
    tpu.vector_store %arg4[%c0_34, %c0_35, %c0_36, %c0_37], %69 {strides = array<i32>} : memref<1x4x4x256xbf16, #tpu.memory_space<vmem>>, vector<1x4x4x256xbf16>,
    return
  }
  func.func @transform_0(%arg0: i32) -> (i32, i32, i32, i32) {
    %c0_i32 = arith.constant 0 : i32
    %c0_i32_0 = arith.constant 0 : i32
    %c0_i32_1 = arith.constant 0 : i32
    %c0_i32_2 = arith.constant 0 : i32
    return %arg0, %c0_i32, %c0_i32_0, %c0_i32_1 : i32, i32, i32, i32
  }
  func.func @transform_1(%arg0: i32) -> (i32, i32, i32) {
    %c0_i32 = arith.constant 0 : i32
    %c0_i32_0 = arith.constant 0 : i32
    %c0_i32_1 = arith.constant 0 : i32
    %c0_i32_2 = arith.constant 0 : i32
    return %c0_i32, %c0_i32_0, %c0_i32_1 : i32, i32, i32
  }
  func.func @transform_2(%arg0: i32) -> (i32, i32) {
    %c0_i32 = arith.constant 0 : i32
    %c0_i32_0 = arith.constant 0 : i32
    %c0_i32_1 = arith.constant 0 : i32
    return %c0_i32, %c0_i32_0 : i32, i32
  }
  func.func @transform_3(%arg0: i32) -> (i32, i32, i32, i32) {
    %c0_i32 = arith.constant 0 : i32
    %c0_i32_0 = arith.constant 0 : i32
    %c0_i32_1 = arith.constant 0 : i32
    %c0_i32_2 = arith.constant 0 : i32
    return %arg0, %c0_i32, %c0_i32_0, %c0_i32_1 : i32, i32, i32, i32
  }
}

module attributes {stable_mosaic.version = 11 : i64} {
  func.func @linear_kernel(%arg0: i32, %arg1: memref<2x256xbf16, #tpu.memory_space<vmem>>, %arg2: memref<256x128xbf16, #tpu.memory_space<vmem>>, %arg3: memref<1x128xf32, #tpu.memory_space<vmem>>, %arg4: memref<2x128xbf16, #tpu.memory_space<vmem>>, %arg5: memref<2x128xf32, #tpu.memory_space<vmem>>) attributes {dimension_semantics = [#tpu.dimension_semantics<arbitrary>], iteration_bounds = array<i64: 1>, scalar_prefetch = 0 : i64, scratch_operands = 1 : i64, tpu.core_type = #tpu.core_type<tc>, window_params = [{transform_indices = @transform_0, window_bounds = array<i64: 2, 256>}, {transform_indices = @transform_1, window_bounds = array<i64: 256, 128>}, {pipeline_mode = #tpu.pipeline_mode<synchronous>, transform_indices = @transform_2, window_bounds = array<i64: 1, 128>}, {pipeline_mode = #tpu.pipeline_mode<synchronous>, transform_indices = @transform_3, window_bounds = array<i64: 2, 128>}]} {
    %c0_i32 = arith.constant 0 : i32
    %0 = arith.cmpi eq, %arg0, %c0_i32 : i32
    %1 = arith.extui %0 : i1 to i32
    %c0_i32_0 = arith.constant 0 : i32
    %2 = arith.cmpi ne, %1, %c0_i32_0 : i32
    scf.if %2 {
      %cst_10 = arith.constant 0.000000e+00 : f32
      %12 = vector.broadcast %cst_10 : f32 to vector<2x128xf32>
      %c0_11 = arith.constant 0 : index
      %c0_12 = arith.constant 0 : index
      %13 = vector.load %arg5[%c0_11, %c0_12] : memref<2x128xf32, #tpu.memory_space<vmem>>, vector<2x128xf32>
      tpu.vector_store %arg5[%c0_11, %c0_12], %12 {strides = array<i32>} : memref<2x128xf32, #tpu.memory_space<vmem>>, vector<2x128xf32>,
    } else {
    }
    %c0 = arith.constant 0 : index
    %c0_1 = arith.constant 0 : index
    %3 = vector.load %arg5[%c0, %c0_1] : memref<2x128xf32, #tpu.memory_space<vmem>>, vector<2x128xf32>
    %c0_2 = arith.constant 0 : index
    %c0_3 = arith.constant 0 : index
    %4 = vector.load %arg1[%c0_2, %c0_3] : memref<2x256xbf16, #tpu.memory_space<vmem>>, vector<2x256xbf16>
    %c0_4 = arith.constant 0 : index
    %c0_5 = arith.constant 0 : index
    %5 = vector.load %arg2[%c0_4, %c0_5] : memref<256x128xbf16, #tpu.memory_space<vmem>>, vector<256x128xbf16>
    %cst = arith.constant dense<0.000000e+00> : vector<2x128xf32>
    %6 = tpu.matmul %4, %5, %cst {dimension_numbers = #tpu.dot_dimension_numbers<[1], [0], [0], [1], [0, 0, 1, 1], [], []>} : vector<2x256xbf16>, vector<256x128xbf16>, vector<2x128xf32> -> vector<2x128xf32>
    %7 = arith.addf %3, %6 : vector<2x128xf32>
    %c0_6 = arith.constant 0 : index
    %c0_7 = arith.constant 0 : index
    %8 = vector.load %arg5[%c0_6, %c0_7] : memref<2x128xf32, #tpu.memory_space<vmem>>, vector<2x128xf32>
    tpu.vector_store %arg5[%c0_6, %c0_7], %7 {strides = array<i32>} : memref<2x128xf32, #tpu.memory_space<vmem>>, vector<2x128xf32>,
    %c0_i32_8 = arith.constant 0 : i32
    %9 = arith.cmpi eq, %arg0, %c0_i32_8 : i32
    %10 = arith.extui %9 : i1 to i32
    %c0_i32_9 = arith.constant 0 : i32
    %11 = arith.cmpi ne, %10, %c0_i32_9 : i32
    scf.if %11 {
      %c0_10 = arith.constant 0 : index
      %c0_11 = arith.constant 0 : index
      %12 = vector.load %arg5[%c0_10, %c0_11] : memref<2x128xf32, #tpu.memory_space<vmem>>, vector<2x128xf32>
      %c0_12 = arith.constant 0 : index
      %c0_13 = arith.constant 0 : index
      %13 = vector.load %arg3[%c0_12, %c0_13] : memref<1x128xf32, #tpu.memory_space<vmem>>, vector<1x128xf32>
      %14 = vector.broadcast %13 : vector<1x128xf32> to vector<2x128xf32>
      %15 = arith.addf %12, %14 : vector<2x128xf32>
      %cst_14 = arith.constant 0.000000e+00 : f32
      %16 = vector.broadcast %cst_14 : f32 to vector<2x128xf32>
      %17 = arith.maximumf %15, %16 : vector<2x128xf32>
      %18 = arith.truncf %17 : vector<2x128xf32> to vector<2x128xbf16>
      %c0_15 = arith.constant 0 : index
      %c0_16 = arith.constant 0 : index
      %19 = vector.load %arg4[%c0_15, %c0_16] : memref<2x128xbf16, #tpu.memory_space<vmem>>, vector<2x128xbf16>
      tpu.vector_store %arg4[%c0_15, %c0_16], %18 {strides = array<i32>} : memref<2x128xbf16, #tpu.memory_space<vmem>>, vector<2x128xbf16>,
    } else {
    }
    return
  }
  func.func @transform_0(%arg0: i32) -> (i32, i32) {
    %c0_i32 = arith.constant 0 : i32
    %c0_i32_0 = arith.constant 0 : i32
    return %c0_i32, %arg0 : i32, i32
  }
  func.func @transform_1(%arg0: i32) -> (i32, i32) {
    %c0_i32 = arith.constant 0 : i32
    %c0_i32_0 = arith.constant 0 : i32
    return %arg0, %c0_i32 : i32, i32
  }
  func.func @transform_2(%arg0: i32) -> (i32, i32) {
    %c0_i32 = arith.constant 0 : i32
    %c0_i32_0 = arith.constant 0 : i32
    %c0_i32_1 = arith.constant 0 : i32
    return %c0_i32, %c0_i32_0 : i32, i32
  }
  func.func @transform_3(%arg0: i32) -> (i32, i32) {
    %c0_i32 = arith.constant 0 : i32
    %c0_i32_0 = arith.constant 0 : i32
    %c0_i32_1 = arith.constant 0 : i32
    return %c0_i32, %c0_i32_0 : i32, i32
  }
}

module attributes {stable_mosaic.version = 11 : i64} {
  func.func @conv3x3_relu_kernel(%arg0: i32, %arg1: memref<1x6x6x256xbf16, #tpu.memory_space<vmem>>, %arg2: memref<9x256x64xbf16, #tpu.memory_space<vmem>>, %arg3: memref<1x64xf32, #tpu.memory_space<vmem>>, %arg4: memref<1x2x2x64xbf16, #tpu.memory_space<vmem>>) attributes {dimension_semantics = [#tpu.dimension_semantics<parallel>], iteration_bounds = array<i64: 2>, scalar_prefetch = 0 : i64, scratch_operands = 0 : i64, tpu.core_type = #tpu.core_type<tc>, window_params = [{transform_indices = @transform_0, window_bounds = array<i64: 1, 6, 6, 256>}, {pipeline_mode = #tpu.pipeline_mode<synchronous>, transform_indices = @transform_1, window_bounds = array<i64: 9, 256, 64>}, {pipeline_mode = #tpu.pipeline_mode<synchronous>, transform_indices = @transform_2, window_bounds = array<i64: 1, 64>}, {transform_indices = @transform_3, window_bounds = array<i64: 1, 2, 2, 64>}]} {
    %c0 = arith.constant 0 : index
    %c0_0 = arith.constant 0 : index
    %c0_1 = arith.constant 0 : index
    %c0_2 = arith.constant 0 : index
    %0 = vector.load %arg1[%c0, %c0_0, %c0_1, %c0_2] : memref<1x6x6x256xbf16, #tpu.memory_space<vmem>>, vector<1x6x6x256xbf16>
    %1 = vector.shape_cast %0 : vector<1x6x6x256xbf16> to vector<6x6x256xbf16>
    %cst = arith.constant 0.000000e+00 : f32
    %2 = vector.broadcast %cst : f32 to vector<16x64xf32>
    %3 = vector.extract_strided_slice %1 {offsets = [0, 0, 0], sizes = [6, 4, 256], strides = [1, 1, 1]} : vector<6x6x256xbf16> to vector<6x4x256xbf16>
    %4 = vector.extract_strided_slice %3 {offsets = [0, 0, 0], sizes = [4, 4, 256], strides = [1, 1, 1]} : vector<6x4x256xbf16> to vector<4x4x256xbf16>
    %5 = vector.shape_cast %4 : vector<4x4x256xbf16> to vector<16x256xbf16>
    %c0_3 = arith.constant 0 : index
    %c0_4 = arith.constant 0 : index
    %c0_5 = arith.constant 0 : index
    %6 = vector.load %arg2[%c0_3, %c0_4, %c0_5] : memref<9x256x64xbf16, #tpu.memory_space<vmem>>, vector<1x256x64xbf16>
    %7 = vector.shape_cast %6 : vector<1x256x64xbf16> to vector<256x64xbf16>
    %cst_6 = arith.constant dense<0.000000e+00> : vector<16x64xf32>
    %8 = tpu.matmul %5, %7, %cst_6 {dimension_numbers = #tpu.dot_dimension_numbers<[1], [0], [0], [1], [0, 0, 1, 1], [], []>} : vector<16x256xbf16>, vector<256x64xbf16>, vector<16x64xf32> -> vector<16x64xf32>
    %9 = arith.addf %2, %8 : vector<16x64xf32>
    %10 = vector.extract_strided_slice %3 {offsets = [1, 0, 0], sizes = [4, 4, 256], strides = [1, 1, 1]} : vector<6x4x256xbf16> to vector<4x4x256xbf16>
    %11 = vector.shape_cast %10 : vector<4x4x256xbf16> to vector<16x256xbf16>
    %c3 = arith.constant 3 : index
    %c0_7 = arith.constant 0 : index
    %c0_8 = arith.constant 0 : index
    %12 = vector.load %arg2[%c3, %c0_7, %c0_8] : memref<9x256x64xbf16, #tpu.memory_space<vmem>>, vector<1x256x64xbf16>
    %13 = vector.shape_cast %12 : vector<1x256x64xbf16> to vector<256x64xbf16>
    %cst_9 = arith.constant dense<0.000000e+00> : vector<16x64xf32>
    %14 = tpu.matmul %11, %13, %cst_9 {dimension_numbers = #tpu.dot_dimension_numbers<[1], [0], [0], [1], [0, 0, 1, 1], [], []>} : vector<16x256xbf16>, vector<256x64xbf16>, vector<16x64xf32> -> vector<16x64xf32>
    %15 = arith.addf %9, %14 : vector<16x64xf32>
    %16 = vector.extract_strided_slice %3 {offsets = [2, 0, 0], sizes = [4, 4, 256], strides = [1, 1, 1]} : vector<6x4x256xbf16> to vector<4x4x256xbf16>
    %17 = vector.shape_cast %16 : vector<4x4x256xbf16> to vector<16x256xbf16>
    %c6 = arith.constant 6 : index
    %c0_10 = arith.constant 0 : index
    %c0_11 = arith.constant 0 : index
    %18 = vector.load %arg2[%c6, %c0_10, %c0_11] : memref<9x256x64xbf16, #tpu.memory_space<vmem>>, vector<1x256x64xbf16>
    %19 = vector.shape_cast %18 : vector<1x256x64xbf16> to vector<256x64xbf16>
    %cst_12 = arith.constant dense<0.000000e+00> : vector<16x64xf32>
    %20 = tpu.matmul %17, %19, %cst_12 {dimension_numbers = #tpu.dot_dimension_numbers<[1], [0], [0], [1], [0, 0, 1, 1], [], []>} : vector<16x256xbf16>, vector<256x64xbf16>, vector<16x64xf32> -> vector<16x64xf32>
    %21 = arith.addf %15, %20 : vector<16x64xf32>
    %22 = vector.extract_strided_slice %1 {offsets = [0, 1, 0], sizes = [6, 4, 256], strides = [1, 1, 1]} : vector<6x6x256xbf16> to vector<6x4x256xbf16>
    %23 = vector.extract_strided_slice %22 {offsets = [0, 0, 0], sizes = [4, 4, 256], strides = [1, 1, 1]} : vector<6x4x256xbf16> to vector<4x4x256xbf16>
    %24 = vector.shape_cast %23 : vector<4x4x256xbf16> to vector<16x256xbf16>
    %c1 = arith.constant 1 : index
    %c0_13 = arith.constant 0 : index
    %c0_14 = arith.constant 0 : index
    %25 = vector.load %arg2[%c1, %c0_13, %c0_14] : memref<9x256x64xbf16, #tpu.memory_space<vmem>>, vector<1x256x64xbf16>
    %26 = vector.shape_cast %25 : vector<1x256x64xbf16> to vector<256x64xbf16>
    %cst_15 = arith.constant dense<0.000000e+00> : vector<16x64xf32>
    %27 = tpu.matmul %24, %26, %cst_15 {dimension_numbers = #tpu.dot_dimension_numbers<[1], [0], [0], [1], [0, 0, 1, 1], [], []>} : vector<16x256xbf16>, vector<256x64xbf16>, vector<16x64xf32> -> vector<16x64xf32>
    %28 = arith.addf %21, %27 : vector<16x64xf32>
    %29 = vector.extract_strided_slice %22 {offsets = [1, 0, 0], sizes = [4, 4, 256], strides = [1, 1, 1]} : vector<6x4x256xbf16> to vector<4x4x256xbf16>
    %30 = vector.shape_cast %29 : vector<4x4x256xbf16> to vector<16x256xbf16>
    %c4 = arith.constant 4 : index
    %c0_16 = arith.constant 0 : index
    %c0_17 = arith.constant 0 : index
    %31 = vector.load %arg2[%c4, %c0_16, %c0_17] : memref<9x256x64xbf16, #tpu.memory_space<vmem>>, vector<1x256x64xbf16>
    %32 = vector.shape_cast %31 : vector<1x256x64xbf16> to vector<256x64xbf16>
    %cst_18 = arith.constant dense<0.000000e+00> : vector<16x64xf32>
    %33 = tpu.matmul %30, %32, %cst_18 {dimension_numbers = #tpu.dot_dimension_numbers<[1], [0], [0], [1], [0, 0, 1, 1], [], []>} : vector<16x256xbf16>, vector<256x64xbf16>, vector<16x64xf32> -> vector<16x64xf32>
    %34 = arith.addf %28, %33 : vector<16x64xf32>
    %35 = vector.extract_strided_slice %22 {offsets = [2, 0, 0], sizes = [4, 4, 256], strides = [1, 1, 1]} : vector<6x4x256xbf16> to vector<4x4x256xbf16>
    %36 = vector.shape_cast %35 : vector<4x4x256xbf16> to vector<16x256xbf16>
    %c7 = arith.constant 7 : index
    %c0_19 = arith.constant 0 : index
    %c0_20 = arith.constant 0 : index
    %37 = vector.load %arg2[%c7, %c0_19, %c0_20] : memref<9x256x64xbf16, #tpu.memory_space<vmem>>, vector<1x256x64xbf16>
    %38 = vector.shape_cast %37 : vector<1x256x64xbf16> to vector<256x64xbf16>
    %cst_21 = arith.constant dense<0.000000e+00> : vector<16x64xf32>
    %39 = tpu.matmul %36, %38, %cst_21 {dimension_numbers = #tpu.dot_dimension_numbers<[1], [0], [0], [1], [0, 0, 1, 1], [], []>} : vector<16x256xbf16>, vector<256x64xbf16>, vector<16x64xf32> -> vector<16x64xf32>
    %40 = arith.addf %34, %39 : vector<16x64xf32>
    %41 = vector.extract_strided_slice %1 {offsets = [0, 2, 0], sizes = [6, 4, 256], strides = [1, 1, 1]} : vector<6x6x256xbf16> to vector<6x4x256xbf16>
    %42 = vector.extract_strided_slice %41 {offsets = [0, 0, 0], sizes = [4, 4, 256], strides = [1, 1, 1]} : vector<6x4x256xbf16> to vector<4x4x256xbf16>
    %43 = vector.shape_cast %42 : vector<4x4x256xbf16> to vector<16x256xbf16>
    %c2 = arith.constant 2 : index
    %c0_22 = arith.constant 0 : index
    %c0_23 = arith.constant 0 : index
    %44 = vector.load %arg2[%c2, %c0_22, %c0_23] : memref<9x256x64xbf16, #tpu.memory_space<vmem>>, vector<1x256x64xbf16>
    %45 = vector.shape_cast %44 : vector<1x256x64xbf16> to vector<256x64xbf16>
    %cst_24 = arith.constant dense<0.000000e+00> : vector<16x64xf32>
    %46 = tpu.matmul %43, %45, %cst_24 {dimension_numbers = #tpu.dot_dimension_numbers<[1], [0], [0], [1], [0, 0, 1, 1], [], []>} : vector<16x256xbf16>, vector<256x64xbf16>, vector<16x64xf32> -> vector<16x64xf32>
    %47 = arith.addf %40, %46 : vector<16x64xf32>
    %48 = vector.extract_strided_slice %41 {offsets = [1, 0, 0], sizes = [4, 4, 256], strides = [1, 1, 1]} : vector<6x4x256xbf16> to vector<4x4x256xbf16>
    %49 = vector.shape_cast %48 : vector<4x4x256xbf16> to vector<16x256xbf16>
    %c5 = arith.constant 5 : index
    %c0_25 = arith.constant 0 : index
    %c0_26 = arith.constant 0 : index
    %50 = vector.load %arg2[%c5, %c0_25, %c0_26] : memref<9x256x64xbf16, #tpu.memory_space<vmem>>, vector<1x256x64xbf16>
    %51 = vector.shape_cast %50 : vector<1x256x64xbf16> to vector<256x64xbf16>
    %cst_27 = arith.constant dense<0.000000e+00> : vector<16x64xf32>
    %52 = tpu.matmul %49, %51, %cst_27 {dimension_numbers = #tpu.dot_dimension_numbers<[1], [0], [0], [1], [0, 0, 1, 1], [], []>} : vector<16x256xbf16>, vector<256x64xbf16>, vector<16x64xf32> -> vector<16x64xf32>
    %53 = arith.addf %47, %52 : vector<16x64xf32>
    %54 = vector.extract_strided_slice %41 {offsets = [2, 0, 0], sizes = [4, 4, 256], strides = [1, 1, 1]} : vector<6x4x256xbf16> to vector<4x4x256xbf16>
    %55 = vector.shape_cast %54 : vector<4x4x256xbf16> to vector<16x256xbf16>
    %c8 = arith.constant 8 : index
    %c0_28 = arith.constant 0 : index
    %c0_29 = arith.constant 0 : index
    %56 = vector.load %arg2[%c8, %c0_28, %c0_29] : memref<9x256x64xbf16, #tpu.memory_space<vmem>>, vector<1x256x64xbf16>
    %57 = vector.shape_cast %56 : vector<1x256x64xbf16> to vector<256x64xbf16>
    %cst_30 = arith.constant dense<0.000000e+00> : vector<16x64xf32>
    %58 = tpu.matmul %55, %57, %cst_30 {dimension_numbers = #tpu.dot_dimension_numbers<[1], [0], [0], [1], [0, 0, 1, 1], [], []>} : vector<16x256xbf16>, vector<256x64xbf16>, vector<16x64xf32> -> vector<16x64xf32>
    %59 = arith.addf %53, %58 : vector<16x64xf32>
    %c0_31 = arith.constant 0 : index
    %c0_32 = arith.constant 0 : index
    %60 = vector.load %arg3[%c0_31, %c0_32] : memref<1x64xf32, #tpu.memory_space<vmem>>, vector<1x64xf32>
    %61 = vector.broadcast %60 : vector<1x64xf32> to vector<16x64xf32>
    %62 = arith.addf %59, %61 : vector<16x64xf32>
    %cst_33 = arith.constant 0.000000e+00 : f32
    %63 = vector.broadcast %cst_33 : f32 to vector<16x64xf32>
    %64 = arith.maximumf %62, %63 : vector<16x64xf32>
    %65 = vector.shape_cast %64 : vector<16x64xf32> to vector<8x2x64xf32>
    %cst_34 = arith.constant dense<0xFF800000> : vector<8x64xf32>
    %66 = vector.multi_reduction <maximumf>, %65, %cst_34 [1] : vector<8x2x64xf32> to vector<8x64xf32>
    %67 = vector.shape_cast %66 : vector<8x64xf32> to vector<2x4x64xf32>
    %68 = vector.extract_strided_slice %67 {offsets = [0, 0, 0], sizes = [2, 2, 64], strides = [1, 1, 1]} : vector<2x4x64xf32> to vector<2x2x64xf32>
    %69 = vector.extract_strided_slice %67 {offsets = [0, 2, 0], sizes = [2, 2, 64], strides = [1, 1, 1]} : vector<2x4x64xf32> to vector<2x2x64xf32>
    %70 = arith.maximumf %68, %69 : vector<2x2x64xf32>
    %71 = arith.truncf %70 : vector<2x2x64xf32> to vector<2x2x64xbf16>
    %c0_35 = arith.constant 0 : index
    %c0_36 = arith.constant 0 : index
    %c0_37 = arith.constant 0 : index
    %c0_38 = arith.constant 0 : index
    %72 = vector.load %arg4[%c0_35, %c0_36, %c0_37, %c0_38] : memref<1x2x2x64xbf16, #tpu.memory_space<vmem>>, vector<1x2x2x64xbf16>
    %73 = vector.shape_cast %72 : vector<1x2x2x64xbf16> to vector<2x2x64xbf16>
    %74 = vector.shape_cast %71 : vector<2x2x64xbf16> to vector<1x2x2x64xbf16>
    tpu.vector_store %arg4[%c0_35, %c0_36, %c0_37, %c0_38], %74 {strides = array<i32>} : memref<1x2x2x64xbf16, #tpu.memory_space<vmem>>, vector<1x2x2x64xbf16>,
    return
  }
  func.func @transform_0(%arg0: i32) -> (i32, i32, i32, i32) {
    %c0_i32 = arith.constant 0 : i32
    %c0_i32_0 = arith.constant 0 : i32
    %c0_i32_1 = arith.constant 0 : i32
    %c0_i32_2 = arith.constant 0 : i32
    return %arg0, %c0_i32, %c0_i32_0, %c0_i32_1 : i32, i32, i32, i32
  }
  func.func @transform_1(%arg0: i32) -> (i32, i32, i32) {
    %c0_i32 = arith.constant 0 : i32
    %c0_i32_0 = arith.constant 0 : i32
    %c0_i32_1 = arith.constant 0 : i32
    %c0_i32_2 = arith.constant 0 : i32
    return %c0_i32, %c0_i32_0, %c0_i32_1 : i32, i32, i32
  }
  func.func @transform_2(%arg0: i32) -> (i32, i32) {
    %c0_i32 = arith.constant 0 : i32
    %c0_i32_0 = arith.constant 0 : i32
    %c0_i32_1 = arith.constant 0 : i32
    return %c0_i32, %c0_i32_0 : i32, i32
  }
  func.func @transform_3(%arg0: i32) -> (i32, i32, i32, i32) {
    %c0_i32 = arith.constant 0 : i32
    %c0_i32_0 = arith.constant 0 : i32
    %c0_i32_1 = arith.constant 0 : i32
    %c0_i32_2 = arith.constant 0 : i32
    return %arg0, %c0_i32, %c0_i32_0, %c0_i32_1 : i32, i32, i32, i32
  }
}

module attributes {stable_mosaic.version = 11 : i64} {
  func.func @linear_kernel(%arg0: i32, %arg1: memref<2x128xbf16, #tpu.memory_space<vmem>>, %arg2: memref<128x128xbf16, #tpu.memory_space<vmem>>, %arg3: memref<1x128xf32, #tpu.memory_space<vmem>>, %arg4: memref<2x128xbf16, #tpu.memory_space<vmem>>, %arg5: memref<2x128xf32, #tpu.memory_space<vmem>>) attributes {dimension_semantics = [#tpu.dimension_semantics<arbitrary>], iteration_bounds = array<i64: 1>, scalar_prefetch = 0 : i64, scratch_operands = 1 : i64, tpu.core_type = #tpu.core_type<tc>, window_params = [{transform_indices = @transform_0, window_bounds = array<i64: 2, 128>}, {transform_indices = @transform_1, window_bounds = array<i64: 128, 128>}, {pipeline_mode = #tpu.pipeline_mode<synchronous>, transform_indices = @transform_2, window_bounds = array<i64: 1, 128>}, {pipeline_mode = #tpu.pipeline_mode<synchronous>, transform_indices = @transform_3, window_bounds = array<i64: 2, 128>}]} {
    %c0_i32 = arith.constant 0 : i32
    %0 = arith.cmpi eq, %arg0, %c0_i32 : i32
    %1 = arith.extui %0 : i1 to i32
    %c0_i32_0 = arith.constant 0 : i32
    %2 = arith.cmpi ne, %1, %c0_i32_0 : i32
    scf.if %2 {
      %cst_10 = arith.constant 0.000000e+00 : f32
      %12 = vector.broadcast %cst_10 : f32 to vector<2x128xf32>
      %c0_11 = arith.constant 0 : index
      %c0_12 = arith.constant 0 : index
      %13 = vector.load %arg5[%c0_11, %c0_12] : memref<2x128xf32, #tpu.memory_space<vmem>>, vector<2x128xf32>
      tpu.vector_store %arg5[%c0_11, %c0_12], %12 {strides = array<i32>} : memref<2x128xf32, #tpu.memory_space<vmem>>, vector<2x128xf32>,
    } else {
    }
    %c0 = arith.constant 0 : index
    %c0_1 = arith.constant 0 : index
    %3 = vector.load %arg5[%c0, %c0_1] : memref<2x128xf32, #tpu.memory_space<vmem>>, vector<2x128xf32>
    %c0_2 = arith.constant 0 : index
    %c0_3 = arith.constant 0 : index
    %4 = vector.load %arg1[%c0_2, %c0_3] : memref<2x128xbf16, #tpu.memory_space<vmem>>, vector<2x128xbf16>
    %c0_4 = arith.constant 0 : index
    %c0_5 = arith.constant 0 : index
    %5 = vector.load %arg2[%c0_4, %c0_5] : memref<128x128xbf16, #tpu.memory_space<vmem>>, vector<128x128xbf16>
    %cst = arith.constant dense<0.000000e+00> : vector<2x128xf32>
    %6 = tpu.matmul %4, %5, %cst {dimension_numbers = #tpu.dot_dimension_numbers<[1], [0], [0], [1], [0, 0, 1, 1], [], []>} : vector<2x128xbf16>, vector<128x128xbf16>, vector<2x128xf32> -> vector<2x128xf32>
    %7 = arith.addf %3, %6 : vector<2x128xf32>
    %c0_6 = arith.constant 0 : index
    %c0_7 = arith.constant 0 : index
    %8 = vector.load %arg5[%c0_6, %c0_7] : memref<2x128xf32, #tpu.memory_space<vmem>>, vector<2x128xf32>
    tpu.vector_store %arg5[%c0_6, %c0_7], %7 {strides = array<i32>} : memref<2x128xf32, #tpu.memory_space<vmem>>, vector<2x128xf32>,
    %c0_i32_8 = arith.constant 0 : i32
    %9 = arith.cmpi eq, %arg0, %c0_i32_8 : i32
    %10 = arith.extui %9 : i1 to i32
    %c0_i32_9 = arith.constant 0 : i32
    %11 = arith.cmpi ne, %10, %c0_i32_9 : i32
    scf.if %11 {
      %c0_10 = arith.constant 0 : index
      %c0_11 = arith.constant 0 : index
      %12 = vector.load %arg5[%c0_10, %c0_11] : memref<2x128xf32, #tpu.memory_space<vmem>>, vector<2x128xf32>
      %c0_12 = arith.constant 0 : index
      %c0_13 = arith.constant 0 : index
      %13 = vector.load %arg3[%c0_12, %c0_13] : memref<1x128xf32, #tpu.memory_space<vmem>>, vector<1x128xf32>
      %14 = vector.broadcast %13 : vector<1x128xf32> to vector<2x128xf32>
      %15 = arith.addf %12, %14 : vector<2x128xf32>
      %cst_14 = arith.constant 0.000000e+00 : f32
      %16 = vector.broadcast %cst_14 : f32 to vector<2x128xf32>
      %17 = arith.maximumf %15, %16 : vector<2x128xf32>
      %18 = arith.truncf %17 : vector<2x128xf32> to vector<2x128xbf16>
      %c0_15 = arith.constant 0 : index
      %c0_16 = arith.constant 0 : index
      %19 = vector.load %arg4[%c0_15, %c0_16] : memref<2x128xbf16, #tpu.memory_space<vmem>>, vector<2x128xbf16>
      tpu.vector_store %arg4[%c0_15, %c0_16], %18 {strides = array<i32>} : memref<2x128xbf16, #tpu.memory_space<vmem>>, vector<2x128xbf16>,
    } else {
    }
    return
  }
  func.func @transform_0(%arg0: i32) -> (i32, i32) {
    %c0_i32 = arith.constant 0 : i32
    %c0_i32_0 = arith.constant 0 : i32
    return %c0_i32, %arg0 : i32, i32
  }
  func.func @transform_1(%arg0: i32) -> (i32, i32) {
    %c0_i32 = arith.constant 0 : i32
    %c0_i32_0 = arith.constant 0 : i32
    return %arg0, %c0_i32 : i32, i32
  }
  func.func @transform_2(%arg0: i32) -> (i32, i32) {
    %c0_i32 = arith.constant 0 : i32
    %c0_i32_0 = arith.constant 0 : i32
    %c0_i32_1 = arith.constant 0 : i32
    return %c0_i32, %c0_i32_0 : i32, i32
  }
  func.func @transform_3(%arg0: i32) -> (i32, i32) {
    %c0_i32 = arith.constant 0 : i32
    %c0_i32_0 = arith.constant 0 : i32
    %c0_i32_1 = arith.constant 0 : i32
    return %c0_i32, %c0_i32_0 : i32, i32
  }
}

module attributes {stable_mosaic.version = 11 : i64} {
  func.func @linear_kernel(%arg0: i32, %arg1: memref<2x128xbf16, #tpu.memory_space<vmem>>, %arg2: memref<128x128xbf16, #tpu.memory_space<vmem>>, %arg3: memref<1x128xf32, #tpu.memory_space<vmem>>, %arg4: memref<2x128xf32, #tpu.memory_space<vmem>>, %arg5: memref<2x128xf32, #tpu.memory_space<vmem>>) attributes {dimension_semantics = [#tpu.dimension_semantics<arbitrary>], iteration_bounds = array<i64: 1>, scalar_prefetch = 0 : i64, scratch_operands = 1 : i64, tpu.core_type = #tpu.core_type<tc>, window_params = [{transform_indices = @transform_0, window_bounds = array<i64: 2, 128>}, {transform_indices = @transform_1, window_bounds = array<i64: 128, 128>}, {pipeline_mode = #tpu.pipeline_mode<synchronous>, transform_indices = @transform_2, window_bounds = array<i64: 1, 128>}, {pipeline_mode = #tpu.pipeline_mode<synchronous>, transform_indices = @transform_3, window_bounds = array<i64: 2, 128>}]} {
    %c0_i32 = arith.constant 0 : i32
    %0 = arith.cmpi eq, %arg0, %c0_i32 : i32
    %1 = arith.extui %0 : i1 to i32
    %c0_i32_0 = arith.constant 0 : i32
    %2 = arith.cmpi ne, %1, %c0_i32_0 : i32
    scf.if %2 {
      %cst_10 = arith.constant 0.000000e+00 : f32
      %12 = vector.broadcast %cst_10 : f32 to vector<2x128xf32>
      %c0_11 = arith.constant 0 : index
      %c0_12 = arith.constant 0 : index
      %13 = vector.load %arg5[%c0_11, %c0_12] : memref<2x128xf32, #tpu.memory_space<vmem>>, vector<2x128xf32>
      tpu.vector_store %arg5[%c0_11, %c0_12], %12 {strides = array<i32>} : memref<2x128xf32, #tpu.memory_space<vmem>>, vector<2x128xf32>,
    } else {
    }
    %c0 = arith.constant 0 : index
    %c0_1 = arith.constant 0 : index
    %3 = vector.load %arg5[%c0, %c0_1] : memref<2x128xf32, #tpu.memory_space<vmem>>, vector<2x128xf32>
    %c0_2 = arith.constant 0 : index
    %c0_3 = arith.constant 0 : index
    %4 = vector.load %arg1[%c0_2, %c0_3] : memref<2x128xbf16, #tpu.memory_space<vmem>>, vector<2x128xbf16>
    %c0_4 = arith.constant 0 : index
    %c0_5 = arith.constant 0 : index
    %5 = vector.load %arg2[%c0_4, %c0_5] : memref<128x128xbf16, #tpu.memory_space<vmem>>, vector<128x128xbf16>
    %cst = arith.constant dense<0.000000e+00> : vector<2x128xf32>
    %6 = tpu.matmul %4, %5, %cst {dimension_numbers = #tpu.dot_dimension_numbers<[1], [0], [0], [1], [0, 0, 1, 1], [], []>} : vector<2x128xbf16>, vector<128x128xbf16>, vector<2x128xf32> -> vector<2x128xf32>
    %7 = arith.addf %3, %6 : vector<2x128xf32>
    %c0_6 = arith.constant 0 : index
    %c0_7 = arith.constant 0 : index
    %8 = vector.load %arg5[%c0_6, %c0_7] : memref<2x128xf32, #tpu.memory_space<vmem>>, vector<2x128xf32>
    tpu.vector_store %arg5[%c0_6, %c0_7], %7 {strides = array<i32>} : memref<2x128xf32, #tpu.memory_space<vmem>>, vector<2x128xf32>,
    %c0_i32_8 = arith.constant 0 : i32
    %9 = arith.cmpi eq, %arg0, %c0_i32_8 : i32
    %10 = arith.extui %9 : i1 to i32
    %c0_i32_9 = arith.constant 0 : i32
    %11 = arith.cmpi ne, %10, %c0_i32_9 : i32
    scf.if %11 {
      %c0_10 = arith.constant 0 : index
      %c0_11 = arith.constant 0 : index
      %12 = vector.load %arg5[%c0_10, %c0_11] : memref<2x128xf32, #tpu.memory_space<vmem>>, vector<2x128xf32>
      %c0_12 = arith.constant 0 : index
      %c0_13 = arith.constant 0 : index
      %13 = vector.load %arg3[%c0_12, %c0_13] : memref<1x128xf32, #tpu.memory_space<vmem>>, vector<1x128xf32>
      %14 = vector.broadcast %13 : vector<1x128xf32> to vector<2x128xf32>
      %15 = arith.addf %12, %14 : vector<2x128xf32>
      %cst_14 = arith.constant 0.000000e+00 : f32
      %16 = vector.broadcast %cst_14 : f32 to vector<2x128xf32>
      %17 = arith.subf %16, %15 : vector<2x128xf32>
      %18 = math.exp %17 : vector<2x128xf32>
      %cst_15 = arith.constant 1.000000e+00 : f32
      %19 = vector.broadcast %cst_15 : f32 to vector<2x128xf32>
      %20 = arith.addf %19, %18 : vector<2x128xf32>
      %21 = tpu.reciprocal %20 : vector<2x128xf32> -> vector<2x128xf32>
      %c0_16 = arith.constant 0 : index
      %c0_17 = arith.constant 0 : index
      %22 = vector.load %arg4[%c0_16, %c0_17] : memref<2x128xf32, #tpu.memory_space<vmem>>, vector<2x128xf32>
      tpu.vector_store %arg4[%c0_16, %c0_17], %21 {strides = array<i32>} : memref<2x128xf32, #tpu.memory_space<vmem>>, vector<2x128xf32>,
    } else {
    }
    return
  }
  func.func @transform_0(%arg0: i32) -> (i32, i32) {
    %c0_i32 = arith.constant 0 : i32
    %c0_i32_0 = arith.constant 0 : i32
    return %c0_i32, %arg0 : i32, i32
  }
  func.func @transform_1(%arg0: i32) -> (i32, i32) {
    %c0_i32 = arith.constant 0 : i32
    %c0_i32_0 = arith.constant 0 : i32
    return %arg0, %c0_i32 : i32, i32
  }
  func.func @transform_2(%arg0: i32) -> (i32, i32) {
    %c0_i32 = arith.constant 0 : i32
    %c0_i32_0 = arith.constant 0 : i32
    %c0_i32_1 = arith.constant 0 : i32
    return %c0_i32, %c0_i32_0 : i32, i32
  }
  func.func @transform_3(%arg0: i32) -> (i32, i32) {
    %c0_i32 = arith.constant 0 : i32
    %c0_i32_0 = arith.constant 0 : i32
    %c0_i32_1 = arith.constant 0 : i32
    return %c0_i32, %c0_i32_0 : i32, i32
  }
}

</mosaic_0001>

<bundles_post_ra>
// kernel: multi_label_cnn_forward.8
= control target key start
LH: loop header
LB: loop body
LE: loop exit
PB: predicated region body
PF: predicated region fallthrough
CT: control target
= control target key end

     0   :  { %8 = vsyncpa [#allocation3], 0  ;;  %s3149_s12 = smov 0   ;;  %s3151_s13 = smov 0   ;;  %s3843_s0 = inlined_call_operand.vmem [shape: bf16[2,256,27], index: 0, kind: input, shape index: {}]   ;;  %s3844_s1 = inlined_call_operand.vmem [shape: bf16[27,64], index: 1, kind: input, shape index: {}]   ;;  %s3845_s2 = inlined_call_operand.hbm [shape: f32[1,64], index: 2, kind: input, shape index: {}]   ;;  %s3846_s3 = inlined_call_operand.vmem [shape: bf16[2,8,8,64], index: 3, kind: output, shape index: {}]  }
   0x1   :  { %s3153_s14 = smov 0  }
   0x2 LB: > { %s2779_s15 = sadd.s32 4294967295, %s3124_s14   ;;  %s26_s16 = sadd.s32 1, %s3120_s13  ;;  %s3124_s14 = sphi %s3153_s14, %s14_s14   ;;  %s3120_s13 = sphi %s3151_s13, %s3850_s13   ;;  %s3116_s12 = sphi %s3149_s12, %s3849_s12  }
   0x3   : > { %p28_p0 = scmp.ge.s32.totalorder %s26_s16, 2  ;;  %p2781_p1 = scmp.ge.s32.totalorder %s3124_s14, 1 }
   0x4   : > { %p129_p2 = scmp.lt.s32.totalorder %s3124_s14, 3  ;;  %p3174_p4 = scmp.eq.s32.totalorder %s2779_s15, 0 }
   0x5   : > { %s3852_s16 = smov (%p28_p0, %s26_s16), 0  ;;  %s3126_s19 = smov [#allocation2]  }
   0x6   : > { %p3170_p3 = pnand %p2781_p1, %p129_p2  ;;  %s145_s20 = sshll.u32 %s3126_s19, 4  ;;  %s146_s20 = int_to_ptr.vmem [resolvable:$true] %s145_s20 }
   0x7   : > { %s3083_s21 = scalar_lea.vmem %s146_s20, 16  ;;  %s3090_s22 = scalar_lea.vmem %s146_s20, 32 }
   0x8   : > { %p3019_p5 = pneg %p3170_p3  ;;  %p3084_p8 = scmp.ne.s32.totalorder %s146_s20, %s3083_s21 }
   0x9   : > { %p3091_p11 = scmp.lt.s32.totalorder %s146_s20, %s146_s20  ;;  %p3092_p12 = scmp.lt.s32.totalorder %s3090_s22, %s3083_s21 }
   0xa   : > { %p3020_p6 = pnand %p3174_p4, %p3019_p5 }
   0xb   : > { %p3093_p13 = por %p3092_p12, %p3091_p11 }
   0xc   : > { %p3074_p7 = pneg %p3020_p6 }
   0xe   : > { %p3086_p9 = pnand %p3084_p8, %p3074_p7 }
  0x10   : > { %p3087_p10 = pneg %p3086_p9 }
  0x12   : > { %p3094_p0 = pnand %p3093_p13, %p3087_p10 }
  0x14   : > { %3097 = shalt.err (!%p3094_p0)
}
  0x15   : > { %3022 = dma.hbm_to_vmem [thread:$0]  (!%p3020_p6), %s3845_s2, 16, %s146_s20, [#allocation3]  }
  0x16   : > { %171 = sbr.rel (%p3170_p3) target bundleno = 589 (0x24d), region = 32 }
  0x1b   : > { %3111 = dma.done.wait (%p3174_p4), [#allocation3], 16  }
  0x1c   : > { %3113 = vsyncadd (%p3174_p4), [#allocation3], 4294967280  ;;  %vm407_vm0 = vcmask 1044480   ;;  %p204_p1 = scmp.lt.s32.totalorder %s3116_s12, 1  ;;  %vm408_vm1 = vcmask 1045504   ;;  %v3127_v0 = vmov 65535   ;;  %v643_v24 = vlaneseq }
  0x1d   : > { %v409_v1 = vsel %vm407_vm0, 4294967295, %v3127_v0  ;;  %v3052_v3 = vld [vmem:[%s3844_s1 + $0x8] sm:$0x3f]   ;;  %v3053_v4 = vld [vmem:[%s3844_s1] sm:$0xff]   ;;  %vm358_vm2 = vcmask 220160   ;;  %vm1311_vm3 = vcmask 517120  }
  0x1e   : > { %s3854_s12 = smov (!%p204_p1, %s3116_s12), 1  ;;  %v410_v2 = vsel %vm408_vm1, %v409_v1, 0  ;;  %v3128_v22 = vmov 1983009808   ;;  %v644_v26 = vshrl.u32 %v643_v24, 7  ;;  %vm2592_vm4 = vcmask 1041409  }
  0x1f   : > { %s2891_s25 = sshll.u32 %s3854_s12, 7  ;;  %v412_v5 = vand.u32 %v3052_v3, %v410_v2  ;;  %v641_v23 = vunpack.c.l.s4 %v3128_v22  ;;  %v3239_v27 = vld [vmem:[#allocation2] ss:$0 sm:$0xff]  ;;  %vm2594_vm5 = vcmask 1042434   ;;  %vm2596_vm6 = vcmask 1043459   ;;  %s2892_s6 = sshll.u32 %s3854_s12, 5 }
  0x20   : > { %s3199_s28 = scalar_lea.vmem %s3843_s0, %s2891_s25  ;;  %vm2598_vm7 = vcmask 1044484   ;;  %vm2600_vm8 = vcmask 1045509   ;;  %vm2602_vm9 = vcmask 1046534   ;;  %vm2604_vm10 = vcmask 1047559   ;;  %s3401_s9 = scalar_lea.vmem %s3846_s3, %s2892_s6 }
  0x21   : > { %v3054_v6 = vld [vmem:[%s3199_s28] sm:$0xff]   ;;  %2975 = vmatprep.subr.bf16.mxu0 %v412_v5  ;;  %3011 = vmatprep.subr.bf16.mxu1 %v412_v5  ;;  %v3056_v8 = vld [vmem:[%s3199_s28 + $0x8] sm:$0xff]   ;;  %v3058_v10 = vld [vmem:[%s3199_s28 + $0x10] sm:$0xff]   ;;  %v642_v25 = vunpack.c.0.s8 %v641_v23  ;;  %vm2671_vm11 = vcmask 519168  }
  0x22   : > { %v3055_v7 = vld [vmem:[%s3199_s28 + $0x40] sm:$0xff]   ;;  %2976 = vmatpush3.bf16.msra.mxu0 %v412_v5  ;;  %3013 = vmatpush3.bf16.msra.mxu1 %v412_v5  ;;  %v3057_v9 = vld [vmem:[%s3199_s28 + $0x48] sm:$0xff]   ;;  %v3059_v11 = vld [vmem:[%s3199_s28 + $0x50] sm:$0xff]  }
  0x23   : > { %2977 = vmatprep.subr.bf16.mxu0 %v3053_v4  ;;  %3012 = vmatprep.subr.bf16.mxu1 %v3053_v4  ;;  %v3060_v12 = vld [vmem:[%s3199_s28 + $0x18] sm:$0xff]   ;;  %v3062_v14 = vld [vmem:[%s3199_s28 + $0x20] sm:$0xff]   ;;  %v3064_v16 = vld [vmem:[%s3199_s28 + $0x28] sm:$0xff]   ;;  %v3242_v31 = vsub.s32 %v642_v25, %v644_v26 }
  0x24   : > { %2979 = vmatprep.mubr.msk.bf16.mxu0 %vm358_vm2, %v3054_v6  ;;  %2995 = vmatprep.mubr.msk.bf16.mxu1 %vm358_vm2, %v3055_v7  ;;  %v3061_v13 = vld [vmem:[%s3199_s28 + $0x58] sm:$0xff]   ;;  %v3063_v15 = vld [vmem:[%s3199_s28 + $0x60] sm:$0xff]   ;;  %v3065_v17 = vld [vmem:[%s3199_s28 + $0x68] sm:$0xff]  }
  0x25   : > { %v3066_v18 = vld [vmem:[%s3199_s28 + $0x30] sm:$0xff]   ;;  %v3068_v20 = vld [vmem:[%s3199_s28 + $0x38] sm:$0xff]  }
  0x26   : > { %2978 = vmatpush3.bf16.msra.mxu0 %v3053_v4  ;;  %3014 = vmatpush3.bf16.msra.mxu1 %v3053_v4  ;;  %v3067_v19 = vld [vmem:[%s3199_s28 + $0x70] sm:$0xff]   ;;  %v3069_v21 = vld [vmem:[%s3199_s28 + $0x78] sm:$0xff]  }
  0x29   : > { %2980 = vmatmul.mubr.msk.bf16.vlgmr.msra.gmra.mxu0 %vm358_vm2, %v3056_v8  ;;  %2996 = vmatmul.mubr.msk.bf16.vlgmr.msra.gmra.mxu1 %vm358_vm2, %v3057_v9 }
  0x2a   : > { %2983 = vmatprep.mubr.msk.bf16.mxu0 %vm358_vm2, %v3058_v10  ;;  %2999 = vmatprep.mubr.msk.bf16.mxu1 %vm358_vm2, %v3059_v11 }
  0x31   : > { %2984 = vmatmul.mubr.msk.bf16.gmra.mxu0 %vm358_vm2, %v3060_v12  ;;  %3000 = vmatmul.mubr.msk.bf16.gmra.mxu1 %vm358_vm2, %v3061_v13 }
  0x32   : > { %2987 = vmatprep.mubr.msk.bf16.mxu0 %vm358_vm2, %v3062_v14  ;;  %3003 = vmatprep.mubr.msk.bf16.mxu1 %vm358_vm2, %v3063_v15 }
  0x39   : > { %2988 = vmatmul.mubr.msk.bf16.gmra.mxu0 %vm358_vm2, %v3064_v16  ;;  %3004 = vmatmul.mubr.msk.bf16.gmra.mxu1 %vm358_vm2, %v3065_v17 }
  0x3a   : > { %2991 = vmatprep.mubr.msk.bf16.mxu0 %vm358_vm2, %v3066_v18  ;;  %3007 = vmatprep.mubr.msk.bf16.mxu1 %vm358_vm2, %v3067_v19 }
  0x41   : > { %2992 = vmatmul.mubr.msk.bf16.gmra.mxu0 %vm358_vm2, %v3068_v20  ;;  %3008 = vmatmul.mubr.msk.bf16.gmra.mxu1 %vm358_vm2, %v3069_v21 }
  0xe9   : > { %v2981_v28 = vpop.f32.mrf.mxu0  ;;  %v2997_v29 = vpop.f32.mrf.mxu1 }
  0xea   : > { %v457_v30 = vadd.f32 %v2981_v28, %v3239_v27  ;;  %v521_v32 = vadd.f32 %v2997_v29, %v3239_v27 }
  0xeb   : > { %v448_v33 = vpop.f32.mrf.mxu0  ;;  %v512_v34 = vpop.f32.mrf.mxu1 }
  0xec   : > { %v577_v35 = vmax.f32 %v457_v30, 0.0  ;;  %v593_v36 = vmax.f32 %v521_v32, 0.0  ;;  %v449_v37 = vadd.f32 %v3239_v27, %v448_v33  ;;  %v513_v38 = vadd.f32 %v3239_v27, %v512_v34 }
  0xed   : > { %v2982_v39 = vpop.f32.mrf.mxu0  ;;  %v2998_v40 = vpop.f32.mrf.mxu1 }
  0xee   : > { %v673_v41 = vcombine.high %v577_v35, %v577_v35  ;;  %v680_v42 = vrot.slane %v577_v35, %v3242_v31  ;;  %v945_v43 = vcombine.high %v593_v36, %v593_v36  ;;  %v952_v44 = vrot.slane %v593_v36, %v3242_v31 }
  0xef   : > { %v3249_v45 = vmax.f32 %v449_v37, 0.0  ;;  %v3251_v46 = vmax.f32 %v513_v38, 0.0  ;;  %v3254_v47 = vadd.f32 %v2982_v39, %v3239_v27  ;;  %v3257_v48 = vadd.f32 %v2998_v40, %v3239_v27 }
  0xf0   : > { %v687_v49 = vrot.slane %v673_v41, %v3242_v31  ;;  %v688_v50 = vcombine.high %v680_v42, %v680_v42  ;;  %v1368_v51 = vsel %vm1311_vm3, %v680_v42, -inf  ;;  %v959_v52 = vrot.slane %v945_v43, %v3242_v31 }
  0xf1   : > { %v1369_v53 = vrot.slane %v1368_v51, 4  ;;  %v960_v54 = vcombine.high %v952_v44, %v952_v44  ;;  %v1816_v55 = vsel %vm1311_vm3, %v952_v44, -inf  ;;  %v639_v56 = vcombine.high %v3249_v45, %v3249_v45 }
  0xf2   : > { %v689_v57 = vcombine.high %v687_v49, %v687_v49  ;;  %v1375_v58 = vsel %vm1311_vm3, %v688_v50, -inf  ;;  %v1382_v59 = vsel %vm1311_vm3, %v687_v49, -inf  ;;  %v961_v60 = vcombine.high %v959_v52, %v959_v52 }
  0xf3   : > { %v1370_v61 = vmax.f32 %v1368_v51, %v1369_v53  ;;  %v1376_v62 = vrot.slane %v1375_v58, 4  ;;  %v1383_v63 = vrot.slane %v1382_v59, 4  ;;  %v1817_v0 = vrot.slane %v1816_v55, 4 }
  0xf4   : > { %v1389_v1 = vsel %vm1311_vm3, %v689_v57, -inf  ;;  %v1823_v2 = vsel %vm1311_vm3, %v960_v54, -inf  ;;  %v1830_v3 = vsel %vm1311_vm3, %v959_v52, -inf  ;;  %v1837_v4 = vsel %vm1311_vm3, %v961_v60, -inf }
  0xf5   : > { %v1371_v5 = vrot.slane %v1370_v61, 2  ;;  %v1377_v6 = vmax.f32 %v1375_v58, %v1376_v62  ;;  %v1384_v7 = vmax.f32 %v1382_v59, %v1383_v63  ;;  %v1390_v8 = vrot.slane %v1389_v1, 4 }
  0xf6   : > { %v1818_v9 = vmax.f32 %v1816_v55, %v1817_v0  ;;  %v1824_v10 = vrot.slane %v1823_v2, 4  ;;  %v1831_v11 = vrot.slane %v1830_v3, 4  ;;  %v1838_v12 = vrot.slane %v1837_v4, 4 }
  0xf7   : > { %v1372_v13 = vmax.f32 %v1370_v61, %v1371_v5  ;;  %v1378_v14 = vrot.slane %v1377_v6, 2  ;;  %v1385_v15 = vrot.slane %v1384_v7, 2  ;;  %v1391_v16 = vmax.f32 %v1389_v1, %v1390_v8 }
  0xf8   : > { %v1819_v17 = vrot.slane %v1818_v9, 2  ;;  %v1825_v18 = vmax.f32 %v1823_v2, %v1824_v10  ;;  %v1832_v19 = vmax.f32 %v1830_v3, %v1831_v11  ;;  %v1839_v20 = vmax.f32 %v1837_v4, %v1838_v12 }
  0xf9   : > { %v1373_v21 = vrot.slane %v1372_v13, 1  ;;  %v1379_v22 = vmax.f32 %v1377_v6, %v1378_v14  ;;  %v1386_v23 = vmax.f32 %v1384_v7, %v1385_v15  ;;  %v1392_v24 = vrot.slane %v1391_v16, 2 }
  0xfa   : > { %v1820_v25 = vmax.f32 %v1818_v9, %v1819_v17  ;;  %v1826_v26 = vrot.slane %v1825_v18, 2  ;;  %v1833_v28 = vrot.slane %v1832_v19, 2  ;;  %v1840_v29 = vrot.slane %v1839_v20, 2 }
  0xfb   : > { %v3271_v30 = vmax.f32 %v1372_v13, %v1373_v21  ;;  %v1380_v32 = vrot.slane %v1379_v22, 1  ;;  %v1387_v33 = vrot.slane %v1386_v23, 1  ;;  %v1393_v34 = vmax.f32 %v1391_v16, %v1392_v24 }
  0xfc   : > { %v1821_v35 = vrot.slane %v1820_v25, 1  ;;  %v1827_v36 = vmax.f32 %v1825_v18, %v1826_v26  ;;  %v1834_v37 = vmax.f32 %v1832_v19, %v1833_v28  ;;  %v1841_v38 = vmax.f32 %v1839_v20, %v1840_v29 }
  0xfd   : > { %v3273_v39 = vmax.f32 %v1379_v22, %v1380_v32  ;;  %v3275_v40 = vmax.f32 %v1386_v23, %v1387_v33  ;;  %v1394_v41 = vrot.slane %v1393_v34, 1  ;;  %v646_v42 = vrot.slane %v3249_v45, %v3242_v31 }
  0xfe   : > { %v3279_v43 = vmax.f32 %v1820_v25, %v1821_v35  ;;  %v1828_v44 = vrot.slane %v1827_v36, 1  ;;  %v1835_v49 = vrot.slane %v1834_v37, 1  ;;  %v1842_v50 = vrot.slane %v1841_v38, 1 }
  0xff   : > { %v3281_v51 = vmax.f32 %v1393_v34, %v1394_v41  ;;  %v653_v52 = vrot.slane %v639_v56, %v3242_v31  ;;  %v654_v53 = vcombine.high %v646_v42, %v646_v42  ;;  %v1312_v54 = vsel %vm1311_vm3, %v646_v42, -inf }
 0x100   : > { %v3285_v55 = vmax.f32 %v1827_v36, %v1828_v44  ;;  %v3287_v57 = vmax.f32 %v1834_v37, %v1835_v49  ;;  %v3289_v58 = vmax.f32 %v1841_v38, %v1842_v50  ;;  %v1313_v59 = vrot.slane %v1312_v54, 4 }
 0x101   : > { %v655_v45 = vcombine.high %v653_v52, %v653_v52  ;;  %v1319_v60 = vsel %vm1311_vm3, %v654_v53, -inf  ;;  %v1326_v61 = vsel %vm1311_vm3, %v653_v52, -inf  ;;  %v911_v62 = vcombine.high %v3251_v46, %v3251_v46 }
 0x102   : > { %v1314_v63 = vmax.f32 %v1312_v54, %v1313_v59  ;;  %v1320_v56 = vrot.slane %v1319_v60, 4  ;;  %v1327_v0 = vrot.slane %v1326_v61, 4  ;;  %v918_v1 = vrot.slane %v3251_v46, %v3242_v31 }
 0x103   : > { %v1333_v2 = vsel %vm1311_vm3, %v655_v45, -inf  ;;  %v925_v3 = vrot.slane %v911_v62, %v3242_v31  ;;  %v3300_v4 = vmax.f32 %v3254_v47, 0.0  ;;  %v3303_v5 = vmax.f32 %v3257_v48, 0.0 }
 0x104   : > { %v1315_v6 = vrot.slane %v1314_v63, 2  ;;  %v1321_v7 = vmax.f32 %v1319_v60, %v1320_v56  ;;  %v1328_v8 = vmax.f32 %v1326_v61, %v1327_v0  ;;  %v1334_v9 = vrot.slane %v1333_v2, 4 }
 0x105   : > { %v926_v10 = vcombine.high %v918_v1, %v918_v1  ;;  %v927_v11 = vcombine.high %v925_v3, %v925_v3  ;;  %v1760_v12 = vsel %vm1311_vm3, %v918_v1, -inf  ;;  %v1774_v46 = vsel %vm1311_vm3, %v925_v3, -inf }
 0x106   : > { %v1316_v13 = vmax.f32 %v1314_v63, %v1315_v6  ;;  %v1322_v14 = vrot.slane %v1321_v7, 2  ;;  %v1329_v15 = vrot.slane %v1328_v8, 2  ;;  %v1335_v16 = vmax.f32 %v1333_v2, %v1334_v9 }
 0x107   : > { %v1761_v17 = vrot.slane %v1760_v12, 4  ;;  %v1767_v47 = vsel %vm1311_vm3, %v926_v10, -inf  ;;  %v1775_v18 = vrot.slane %v1774_v46, 4  ;;  %v1781_v48 = vsel %vm1311_vm3, %v927_v11, -inf }
 0x108   : > { %v1317_v19 = vrot.slane %v1316_v13, 1  ;;  %v1323_v20 = vmax.f32 %v1321_v7, %v1322_v14  ;;  %v1330_v21 = vmax.f32 %v1328_v8, %v1329_v15  ;;  %v1336_v22 = vrot.slane %v1335_v16, 2 }
 0x109   : > { %v1762_v23 = vmax.f32 %v1760_v12, %v1761_v17  ;;  %v1768_v24 = vrot.slane %v1767_v47, 4  ;;  %v1776_v25 = vmax.f32 %v1774_v46, %v1775_v18  ;;  %v1782_v26 = vrot.slane %v1781_v48, 4 }
 0x10a   : > { %v1318_v28 = vmax.f32 %v1316_v13, %v1317_v19  ;;  %v1324_v29 = vrot.slane %v1323_v20, 1  ;;  %v1331_v32 = vrot.slane %v1330_v21, 1  ;;  %v1337_v33 = vmax.f32 %v1335_v16, %v1336_v22 }
 0x10b   : > { %v1763_v34 = vrot.slane %v1762_v23, 2  ;;  %v1769_v35 = vmax.f32 %v1767_v47, %v1768_v24  ;;  %v1777_v36 = vrot.slane %v1776_v25, 2  ;;  %v1783_v37 = vmax.f32 %v1781_v48, %v1782_v26 }
 0x10c   : > { %v1325_v38 = vmax.f32 %v1323_v20, %v1324_v29  ;;  %v1332_v41 = vmax.f32 %v1330_v21, %v1331_v32  ;;  %v1338_v42 = vrot.slane %v1337_v33, 1  ;;  %v2208_v44 = vmax.f32 %v1318_v28, %v3271_v30 }
 0x10d   : > { %v1764_v49 = vmax.f32 %v1762_v23, %v1763_v34  ;;  %v1770_v50 = vrot.slane %v1769_v35, 2  ;;  %v1778_v52 = vmax.f32 %v1776_v25, %v1777_v36  ;;  %v1784_v53 = vrot.slane %v1783_v37, 2 }
 0x10e   : > { %v1339_v54 = vmax.f32 %v1337_v33, %v1338_v42  ;;  %v2209_v59 = vmax.f32 %v1325_v38, %v3273_v39  ;;  %v2210_v45 = vmax.f32 %v1332_v41, %v3275_v40  ;;  %v2893_v60 = vpack.c.bf16 %v2208_v44, %v2208_v44 }
 0x10f   : > { %v1765_v61 = vrot.slane %v1764_v49, 1  ;;  %v1771_v62 = vmax.f32 %v1769_v35, %v1770_v50  ;;  %v1779_v63 = vrot.slane %v1778_v52, 1  ;;  %v1785_v56 = vmax.f32 %v1783_v37, %v1784_v53 }
 0x110   : > { %v2211_v0 = vmax.f32 %v1339_v54, %v3281_v51  ;;  %v2894_v1 = vpack.c.bf16 %v2209_v59, %v2209_v59  ;;  %v2895_v2 = vpack.c.bf16 %v2210_v45, %v2210_v45  ;;  %v2528_v3 = vunpack.c.l.b16 %v2893_v60 }
 0x111   : > { %v1766_v30 = vmax.f32 %v1764_v49, %v1765_v61  ;;  %v1772_v6 = vrot.slane %v1771_v62, 1  ;;  %v1780_v7 = vmax.f32 %v1778_v52, %v1779_v63  ;;  %v1786_v8 = vrot.slane %v1785_v56, 1 }
 0x112   : > { %v2896_v9 = vpack.c.bf16 %v2211_v0, %v2211_v0  ;;  %v2529_v10 = vunpack.c.l.b16 %v2894_v1  ;;  %v2530_v11 = vunpack.c.l.b16 %v2895_v2  ;;  %v690_v39 = vcombine.high %v3300_v4, %v3300_v4 }
 0x113   : > { %v1773_v40 = vmax.f32 %v1771_v62, %v1772_v6  ;;  %v1787_v12 = vmax.f32 %v1785_v56, %v1786_v8  ;;  %v2240_v46 = vmax.f32 %v1766_v30, %v3279_v43  ;;  %v2242_v13 = vmax.f32 %v1780_v7, %v3287_v57 }
 0x114   : > { %v3317_v51 = vunpack.c.l.b16 %v2896_v9  ;;  %v2593_v14 = vsel %vm2592_vm4, %v2529_v10, %v2528_v3  ;;  %v697_v15 = vrot.slane %v3300_v4, %v3242_v31  ;;  %v704_v16 = vrot.slane %v690_v39, %v3242_v31 }
 0x115   : > { %v3324_v17 = vsel %vm2594_vm5, %v2530_v11, %v2593_v14  ;;  %v2241_v47 = vmax.f32 %v1773_v40, %v3285_v55  ;;  %v2243_v18 = vmax.f32 %v1787_v12, %v3289_v58  ;;  %v2925_v48 = vpack.c.bf16 %v2240_v46, %v2240_v46  ;;  %v451_v55 = vpop.f32.mrf.mxu0 }
 0x116   : > { %v2927_v43 = vpack.c.bf16 %v2242_v13, %v2242_v13  ;;  %v705_v19 = vcombine.high %v697_v15, %v697_v15  ;;  %v706_v57 = vcombine.high %v704_v16, %v704_v16  ;;  %v1396_v20 = vsel %vm1311_vm3, %v697_v15, -inf }
 0x117   : > { %v2926_v21 = vpack.c.bf16 %v2241_v47, %v2241_v47  ;;  %v2928_v22 = vpack.c.bf16 %v2243_v18, %v2243_v18  ;;  %v2560_v23 = vunpack.c.l.b16 %v2925_v48  ;;  %v1397_v24 = vrot.slane %v1396_v20, 4  ;;  %v515_v47 = vpop.f32.mrf.mxu1 }
 0x118   : > { %v2562_v4 = vunpack.c.l.b16 %v2927_v43  ;;  %v1403_v25 = vsel %vm1311_vm3, %v705_v19, -inf  ;;  %v1410_v26 = vsel %vm1311_vm3, %v704_v16, -inf  ;;  %v1417_v28 = vsel %vm1311_vm3, %v706_v57, -inf }
 0x119   : > { %v2561_v29 = vunpack.c.l.b16 %v2926_v21  ;;  %v3332_v58 = vunpack.c.l.b16 %v2928_v22  ;;  %v1398_v32 = vmax.f32 %v1396_v20, %v1397_v24  ;;  %v1404_v33 = vrot.slane %v1403_v25, 4 }
 0x11a   : > { %v1411_v34 = vrot.slane %v1410_v26, 4  ;;  %v1418_v35 = vrot.slane %v1417_v28, 4  ;;  %v962_v36 = vcombine.high %v3303_v5, %v3303_v5  ;;  %v969_v37 = vrot.slane %v3303_v5, %v3242_v31 }
 0x11b   : > { %v2627_v38 = vsel %vm2592_vm4, %v2561_v29, %v2560_v23  ;;  %v1399_v41 = vrot.slane %v1398_v32, 2  ;;  %v1405_v42 = vmax.f32 %v1403_v25, %v1404_v33  ;;  %v452_v44 = vadd.f32 %v3239_v27, %v451_v55 }
 0x11c   : > { %v3341_v49 = vsel %vm2594_vm5, %v2562_v4, %v2627_v38  ;;  %v1412_v50 = vmax.f32 %v1410_v26, %v1411_v34  ;;  %v1419_v52 = vmax.f32 %v1417_v28, %v1418_v35  ;;  %v976_v53 = vrot.slane %v962_v36, %v3242_v31 }
 0x11d   : > { %v1400_v54 = vmax.f32 %v1398_v32, %v1399_v41  ;;  %v1406_v59 = vrot.slane %v1405_v42, 2  ;;  %v977_v45 = vcombine.high %v969_v37, %v969_v37  ;;  %v1844_v60 = vsel %vm1311_vm3, %v969_v37, -inf }
 0x11e   : > { %v1413_v5 = vrot.slane %v1412_v50, 2  ;;  %v1420_v61 = vrot.slane %v1419_v52, 2  ;;  %v978_v62 = vcombine.high %v976_v53, %v976_v53  ;;  %v1845_v63 = vrot.slane %v1844_v60, 4 }
 0x11f   : > { %v1401_v56 = vrot.slane %v1400_v54, 1  ;;  %v1407_v0 = vmax.f32 %v1405_v42, %v1406_v59  ;;  %v1851_v1 = vsel %vm1311_vm3, %v977_v45, -inf  ;;  %v1858_v2 = vsel %vm1311_vm3, %v976_v53, -inf }
 0x120   : > { %v1414_v3 = vmax.f32 %v1412_v50, %v1413_v5  ;;  %v1421_v30 = vmax.f32 %v1419_v52, %v1420_v61  ;;  %v1846_v6 = vmax.f32 %v1844_v60, %v1845_v63  ;;  %v1852_v7 = vrot.slane %v1851_v1, 4 }
 0x121   : > { %v3347_v8 = vmax.f32 %v1400_v54, %v1401_v56  ;;  %v1408_v9 = vrot.slane %v1407_v0, 1  ;;  %v1859_v10 = vrot.slane %v1858_v2, 4  ;;  %v1865_v11 = vsel %vm1311_vm3, %v978_v62, -inf }
 0x122   : > { %v1415_v39 = vrot.slane %v1414_v3, 1  ;;  %v1422_v40 = vrot.slane %v1421_v30, 1  ;;  %v1847_v12 = vrot.slane %v1846_v6, 2  ;;  %v1853_v46 = vmax.f32 %v1851_v1, %v1852_v7 }
 0x123   : > { %v3350_v13 = vmax.f32 %v1407_v0, %v1408_v9  ;;  %v1860_v14 = vmax.f32 %v1858_v2, %v1859_v10  ;;  %v1866_v15 = vrot.slane %v1865_v11, 4  ;;  %v576_v16 = vmax.f32 %v452_v44, 0.0 }
 0x124   : > { %v3352_v18 = vmax.f32 %v1414_v3, %v1415_v39  ;;  %v3354_v48 = vmax.f32 %v1421_v30, %v1422_v40  ;;  %v1848_v43 = vmax.f32 %v1846_v6, %v1847_v12  ;;  %v1854_v19 = vrot.slane %v1853_v46, 2 }
 0x125   : > { %v1861_v57 = vrot.slane %v1860_v14, 2  ;;  %v1867_v20 = vmax.f32 %v1865_v11, %v1866_v15  ;;  %v656_v21 = vcombine.high %v576_v16, %v576_v16  ;;  %v663_v22 = vrot.slane %v576_v16, %v3242_v31 }
 0x126   : > { %v1849_v23 = vrot.slane %v1848_v43, 1  ;;  %v1855_v24 = vmax.f32 %v1853_v46, %v1854_v19  ;;  %v3360_v4 = vsel %vm2596_vm6, %v3317_v51, %v3324_v17  ;;  %v516_v25 = vadd.f32 %v3239_v27, %v515_v47 }
 0x127   : > { %v1862_v26 = vmax.f32 %v1860_v14, %v1861_v57  ;;  %v1868_v28 = vrot.slane %v1867_v20, 2  ;;  %v670_v55 = vrot.slane %v656_v21, %v3242_v31  ;;  %v671_v29 = vcombine.high %v663_v22, %v663_v22 }
 0x128   : > { %v3364_v32 = vmax.f32 %v1848_v43, %v1849_v23  ;;  %v1856_v33 = vrot.slane %v1855_v24, 1  ;;  %v1340_v34 = vsel %vm1311_vm3, %v663_v22, -inf  ;;  %v592_v35 = vmax.f32 %v516_v25, 0.0 }
 0x129   : > { %v1863_v36 = vrot.slane %v1862_v26, 1  ;;  %v1869_v37 = vmax.f32 %v1867_v20, %v1868_v28  ;;  %v672_v38 = vcombine.high %v670_v55, %v670_v55  ;;  %v1341_v41 = vrot.slane %v1340_v34, 4 }
 0x12a   : > { %v3367_v42 = vmax.f32 %v1855_v24, %v1856_v33  ;;  %v1347_v51 = vsel %vm1311_vm3, %v671_v29, -inf  ;;  %v1354_v17 = vsel %vm1311_vm3, %v670_v55, -inf  ;;  %v928_v44 = vcombine.high %v592_v35, %v592_v35 }
 0x12b   : > { %v3371_v50 = vmax.f32 %v1862_v26, %v1863_v36  ;;  %v1870_v52 = vrot.slane %v1869_v37, 1  ;;  %v1342_v53 = vmax.f32 %v1340_v34, %v1341_v41  ;;  %v1348_v54 = vrot.slane %v1347_v51, 4 }
 0x12c   : > { %v1355_v59 = vrot.slane %v1354_v17, 4  ;;  %v1361_v45 = vsel %vm1311_vm3, %v672_v38, -inf  ;;  %v935_v60 = vrot.slane %v592_v35, %v3242_v31  ;;  %v942_v5 = vrot.slane %v928_v44, %v3242_v31 }
 0x12d   : > { %v3376_v61 = vmax.f32 %v1869_v37, %v1870_v52  ;;  %v1343_v62 = vrot.slane %v1342_v53, 2  ;;  %v1349_v63 = vmax.f32 %v1347_v51, %v1348_v54  ;;  %v1362_v56 = vrot.slane %v1361_v45, 4 }
 0x12e   : > { %v1356_v0 = vmax.f32 %v1354_v17, %v1355_v59  ;;  %v943_v1 = vcombine.high %v935_v60, %v935_v60  ;;  %v944_v2 = vcombine.high %v942_v5, %v942_v5  ;;  %v1788_v3 = vsel %vm1311_vm3, %v935_v60, -inf }
 0x12f   : > { %v1344_v30 = vmax.f32 %v1342_v53, %v1343_v62  ;;  %v1350_v6 = vrot.slane %v1349_v63, 2  ;;  %v1363_v7 = vmax.f32 %v1361_v45, %v1362_v56  ;;  %v1789_v9 = vrot.slane %v1788_v3, 4 }
 0x130   : > { %v1357_v10 = vrot.slane %v1356_v0, 2  ;;  %v1795_v11 = vsel %vm1311_vm3, %v943_v1, -inf  ;;  %v1802_v39 = vsel %vm1311_vm3, %v942_v5, -inf  ;;  %v1809_v40 = vsel %vm1311_vm3, %v944_v2, -inf  ;;  %v2985_v5 = vpop.f32.mrf.mxu0 }
 0x131   : > { %v1345_v12 = vrot.slane %v1344_v30, 1  ;;  %v1351_v46 = vmax.f32 %v1349_v63, %v1350_v6  ;;  %v1364_v14 = vrot.slane %v1363_v7, 2  ;;  %v1790_v15 = vmax.f32 %v1788_v3, %v1789_v9  ;;  %v3001_v3 = vpop.f32.mrf.mxu1 }
 0x132   : > { %v1358_v16 = vmax.f32 %v1356_v0, %v1357_v10  ;;  %v1796_v47 = vrot.slane %v1795_v11, 4  ;;  %v1803_v43 = vrot.slane %v1802_v39, 4  ;;  %v1810_v19 = vrot.slane %v1809_v40, 4 }
 0x133   : > { %v1346_v57 = vmax.f32 %v1344_v30, %v1345_v12  ;;  %v1352_v20 = vrot.slane %v1351_v46, 1  ;;  %v1365_v21 = vmax.f32 %v1363_v7, %v1364_v14  ;;  %v1791_v22 = vrot.slane %v1790_v15, 2 }
 0x134   : > { %v1359_v23 = vrot.slane %v1358_v16, 1  ;;  %v1797_v24 = vmax.f32 %v1795_v11, %v1796_v47  ;;  %v1804_v25 = vmax.f32 %v1802_v39, %v1803_v43  ;;  %v1811_v26 = vmax.f32 %v1809_v40, %v1810_v19  ;;  %v464_v40 = vpop.f32.mrf.mxu0 }
 0x135   : > { %v1353_v28 = vmax.f32 %v1351_v46, %v1352_v20  ;;  %v1366_v55 = vrot.slane %v1365_v21, 1  ;;  %v2212_v29 = vmax.f32 %v1346_v57, %v3347_v8  ;;  %v1792_v33 = vmax.f32 %v1790_v15, %v1791_v22 }
 0x136   : > { %v1360_v34 = vmax.f32 %v1358_v16, %v1359_v23  ;;  %v1798_v35 = vrot.slane %v1797_v24, 2  ;;  %v1805_v36 = vrot.slane %v1804_v25, 2  ;;  %v1812_v37 = vrot.slane %v1811_v26, 2  ;;  %v528_v16 = vpop.f32.mrf.mxu1 }
 0x137   : > { %v1367_v38 = vmax.f32 %v1365_v21, %v1366_v55  ;;  %v2213_v41 = vmax.f32 %v1353_v28, %v3350_v13  ;;  %v2897_v51 = vpack.c.bf16 %v2212_v29, %v2212_v29  ;;  %v1793_v17 = vrot.slane %v1792_v33, 1  ;;  %v2986_v21 = vpop.f32.mrf.mxu0 }
 0x138   : > { %v2214_v44 = vmax.f32 %v1360_v34, %v3352_v18  ;;  %v1799_v52 = vmax.f32 %v1797_v24, %v1798_v35  ;;  %v1806_v53 = vmax.f32 %v1804_v25, %v1805_v36  ;;  %v1813_v54 = vmax.f32 %v1811_v26, %v1812_v37 }
 0x139   : > { %v2215_v59 = vmax.f32 %v1367_v38, %v3354_v48  ;;  %v2898_v8 = vpack.c.bf16 %v2213_v41, %v2213_v41  ;;  %v2532_v45 = vunpack.c.l.b16 %v2897_v51  ;;  %v1794_v60 = vmax.f32 %v1792_v33, %v1793_v17 }
 0x13a   : > { %v2899_v62 = vpack.c.bf16 %v2214_v44, %v2214_v44  ;;  %v1800_v63 = vrot.slane %v1799_v52, 1  ;;  %v1807_v56 = vrot.slane %v1806_v53, 1  ;;  %v1814_v0 = vrot.slane %v1813_v54, 1 }
 0x13b   : > { %v2900_v13 = vpack.c.bf16 %v2215_v59, %v2215_v59  ;;  %v2533_v1 = vunpack.c.l.b16 %v2898_v8  ;;  %v2599_v2 = vsel %vm2598_vm7, %v2532_v45, %v3360_v4  ;;  %v2244_v18 = vmax.f32 %v1794_v60, %v3364_v32 }
 0x13c   : > { %v2534_v30 = vunpack.c.l.b16 %v2899_v62  ;;  %v1801_v6 = vmax.f32 %v1799_v52, %v1800_v63  ;;  %v1808_v48 = vmax.f32 %v1806_v53, %v1807_v56  ;;  %v1815_v7 = vmax.f32 %v1813_v54, %v1814_v0 }
 0x13d   : > { %v2535_v9 = vunpack.c.l.b16 %v2900_v13  ;;  %v2601_v10 = vsel %vm2600_vm8, %v2533_v1, %v2599_v2  ;;  %v2929_v11 = vpack.c.bf16 %v2244_v18, %v2244_v18  ;;  %v2629_v39 = vsel %vm2596_vm6, %v3332_v58, %v3341_v49 }
 0x13e   : > { %v2603_v12 = vsel %vm2602_vm9, %v2534_v30, %v2601_v10  ;;  %v2245_v4 = vmax.f32 %v1801_v6, %v3367_v42  ;;  %v2246_v32 = vmax.f32 %v1808_v48, %v3371_v50  ;;  %v2247_v46 = vmax.f32 %v1815_v7, %v3376_v61 }
 0x13f   : > { %v2605_v14 = vsel %vm2604_vm10, %v2535_v9, %v2603_v12  ;;  %v2564_v15 = vunpack.c.l.b16 %v2929_v11  ;;  %v473_v58 = vadd.f32 %v2985_v5, %v3239_v27  ;;  %v537_v49 = vadd.f32 %v3001_v3, %v3239_v27 }
 0x140   : > { %v2655_v47 = vpack.c.b16 %v2605_v14, %v2605_v14  ;;  %v2930_v42 = vpack.c.bf16 %v2245_v4, %v2245_v4  ;;  %v2931_v43 = vpack.c.bf16 %v2246_v32, %v2246_v32  ;;  %v2932_v50 = vpack.c.bf16 %v2247_v46, %v2247_v46 }
 0x141   : > { %v2630_v61 = vsel %vm2598_vm7, %v2564_v15, %v2629_v39  ;;  %v581_v19 = vmax.f32 %v473_v58, 0.0  ;;  %v597_v57 = vmax.f32 %v537_v49, 0.0  ;;  %v465_v20 = vadd.f32 %v3239_v27, %v464_v40 }
 0x142   : > { %2672 = vst.msk [vmem:[%s3401_s9] sm:$0xf] %vm2671_vm11, %v2655_v47  ;;  %v2565_v22 = vunpack.c.l.b16 %v2930_v42  ;;  %v2566_v23 = vunpack.c.l.b16 %v2931_v43  ;;  %v2567_v24 = vunpack.c.l.b16 %v2932_v50  ;;  %v529_v25 = vadd.f32 %v3239_v27, %v528_v16 }
 0x143   : > { %v741_v26 = vcombine.high %v581_v19, %v581_v19  ;;  %v748_v28 = vrot.slane %v581_v19, %v3242_v31  ;;  %v1013_v55 = vcombine.high %v597_v57, %v597_v57  ;;  %v1020_v29 = vrot.slane %v597_v57, %v3242_v31 }
 0x144   : > { %v2631_v33 = vsel %vm2600_vm8, %v2565_v22, %v2630_v61  ;;  %v3414_v34 = vmax.f32 %v465_v20, 0.0  ;;  %v3416_v35 = vmax.f32 %v529_v25, 0.0  ;;  %v3419_v36 = vadd.f32 %v2986_v21, %v3239_v27 }
 0x145   : > { %v2632_v37 = vsel %vm2602_vm9, %v2566_v23, %v2631_v33  ;;  %v755_v38 = vrot.slane %v741_v26, %v3242_v31  ;;  %v756_v41 = vcombine.high %v748_v28, %v748_v28  ;;  %v1480_v51 = vsel %vm1311_vm3, %v748_v28, -inf }
 0x146   : > { %v2633_v17 = vsel %vm2604_vm10, %v2567_v24, %v2632_v37  ;;  %v1481_v44 = vrot.slane %v1480_v51, 4  ;;  %v1027_v52 = vrot.slane %v1013_v55, %v3242_v31  ;;  %v1028_v53 = vcombine.high %v1020_v29, %v1020_v29 }
 0x147   : > { %v2659_v54 = vpack.c.b16 %v2633_v17, %v2633_v17  ;;  %v757_v59 = vcombine.high %v755_v38, %v755_v38  ;;  %v1487_v8 = vsel %vm1311_vm3, %v756_v41, -inf  ;;  %v1494_v27 = vsel %vm1311_vm3, %v755_v38, -inf }
 0x148   : > { %v1482_v45 = vmax.f32 %v1480_v51, %v1481_v44  ;;  %v1488_v60 = vrot.slane %v1487_v8, 4  ;;  %v1495_v5 = vrot.slane %v1494_v27, 4  ;;  %v1029_v62 = vcombine.high %v1027_v52, %v1027_v52 }
 0x149   : > { %2676 = vst.msk [vmem:[%s3401_s9 + $0x10] sm:$0xf] %vm2671_vm11, %v2659_v54  ;;  %v1501_v63 = vsel %vm1311_vm3, %v757_v59, -inf  ;;  %v1928_v56 = vsel %vm1311_vm3, %v1020_v29, -inf  ;;  %v1935_v0 = vsel %vm1311_vm3, %v1028_v53, -inf  ;;  %v1942_v13 = vsel %vm1311_vm3, %v1027_v52, -inf }
 0x14a   : > { %v1483_v1 = vrot.slane %v1482_v45, 2  ;;  %v1489_v2 = vmax.f32 %v1487_v8, %v1488_v60  ;;  %v1496_v18 = vmax.f32 %v1494_v27, %v1495_v5  ;;  %v1502_v3 = vrot.slane %v1501_v63, 4 }
 0x14b   : > { %v1929_v30 = vrot.slane %v1928_v56, 4  ;;  %v1936_v6 = vrot.slane %v1935_v0, 4  ;;  %v1943_v48 = vrot.slane %v1942_v13, 4  ;;  %v1949_v7 = vsel %vm1311_vm3, %v1029_v62, -inf }
 0x14c   : > { %v1484_v9 = vmax.f32 %v1482_v45, %v1483_v1  ;;  %v1490_v10 = vrot.slane %v1489_v2, 2  ;;  %v1497_v11 = vrot.slane %v1496_v18, 2  ;;  %v1503_v39 = vmax.f32 %v1501_v63, %v1502_v3 }
 0x14d   : > { %v1930_v40 = vmax.f32 %v1928_v56, %v1929_v30  ;;  %v1937_v12 = vmax.f32 %v1935_v0, %v1936_v6  ;;  %v1944_v4 = vmax.f32 %v1942_v13, %v1943_v48  ;;  %v1950_v32 = vrot.slane %v1949_v7, 4 }
 0x14e   : > { %v1485_v46 = vrot.slane %v1484_v9, 1  ;;  %v1491_v14 = vmax.f32 %v1489_v2, %v1490_v10  ;;  %v1498_v15 = vmax.f32 %v1496_v18, %v1497_v11  ;;  %v1504_v58 = vrot.slane %v1503_v39, 2 }
 0x14f   : > { %v1931_v49 = vrot.slane %v1930_v40, 2  ;;  %v1938_v16 = vrot.slane %v1937_v12, 2  ;;  %v1945_v47 = vrot.slane %v1944_v4, 2  ;;  %v1951_v42 = vmax.f32 %v1949_v7, %v1950_v32 }
 0x150   : > { %v3435_v43 = vmax.f32 %v1484_v9, %v1485_v46  ;;  %v1492_v50 = vrot.slane %v1491_v14, 1  ;;  %v1499_v61 = vrot.slane %v1498_v15, 1  ;;  %v1505_v19 = vmax.f32 %v1503_v39, %v1504_v58 }
 0x151   : > { %v1932_v57 = vmax.f32 %v1930_v40, %v1931_v49  ;;  %v1939_v20 = vmax.f32 %v1937_v12, %v1938_v16  ;;  %v1946_v21 = vmax.f32 %v1944_v4, %v1945_v47  ;;  %v1952_v22 = vrot.slane %v1951_v42, 2 }
 0x152   : > { %v3437_v23 = vmax.f32 %v1491_v14, %v1492_v50  ;;  %v3439_v24 = vmax.f32 %v1498_v15, %v1499_v61  ;;  %v1506_v25 = vrot.slane %v1505_v19, 1  ;;  %v707_v26 = vcombine.high %v3414_v34, %v3414_v34 }
 0x153   : > { %v1933_v28 = vrot.slane %v1932_v57, 1  ;;  %v1940_v55 = vrot.slane %v1939_v20, 1  ;;  %v1947_v29 = vrot.slane %v1946_v21, 1  ;;  %v1953_v33 = vmax.f32 %v1951_v42, %v1952_v22 }
 0x154   : > { %v3443_v37 = vmax.f32 %v1505_v19, %v1506_v25  ;;  %v714_v38 = vrot.slane %v3414_v34, %v3242_v31  ;;  %v721_v41 = vrot.slane %v707_v26, %v3242_v31  ;;  %v979_v51 = vcombine.high %v3416_v35, %v3416_v35 }
 0x155   : > { %v3450_v17 = vmax.f32 %v1932_v57, %v1933_v28  ;;  %v3452_v44 = vmax.f32 %v1939_v20, %v1940_v55  ;;  %v3454_v52 = vmax.f32 %v1946_v21, %v1947_v29  ;;  %v1954_v53 = vrot.slane %v1953_v33, 1 }
 0x156   : > { %v722_v54 = vcombine.high %v714_v38, %v714_v38  ;;  %v723_v59 = vcombine.high %v721_v41, %v721_v41  ;;  %v1424_v8 = vsel %vm1311_vm3, %v714_v38, -inf  ;;  %v1438_v27 = vsel %vm1311_vm3, %v721_v41, -inf }
 0x157   : > { %v3458_v45 = vmax.f32 %v1953_v33, %v1954_v53  ;;  %v1425_v34 = vrot.slane %v1424_v8, 4  ;;  %v1439_v60 = vrot.slane %v1438_v27, 4  ;;  %v986_v5 = vrot.slane %v3416_v35, %v3242_v31 }
 0x158   : > { %v1431_v62 = vsel %vm1311_vm3, %v722_v54, -inf  ;;  %v1445_v63 = vsel %vm1311_vm3, %v723_v59, -inf  ;;  %v993_v56 = vrot.slane %v979_v51, %v3242_v31  ;;  %v3466_v0 = vmax.f32 %v3419_v36, 0.0 }
 0x159   : > { %v1426_v13 = vmax.f32 %v1424_v8, %v1425_v34  ;;  %v1432_v1 = vrot.slane %v1431_v62, 4  ;;  %v1440_v2 = vmax.f32 %v1438_v27, %v1439_v60  ;;  %v1446_v18 = vrot.slane %v1445_v63, 4 }
 0x15a   : > { %v994_v3 = vcombine.high %v986_v5, %v986_v5  ;;  %v995_v30 = vcombine.high %v993_v56, %v993_v56  ;;  %v1872_v6 = vsel %vm1311_vm3, %v986_v5, -inf  ;;  %v1886_v48 = vsel %vm1311_vm3, %v993_v56, -inf }
 0x15b   : > { %v1427_v35 = vrot.slane %v1426_v13, 2  ;;  %v1433_v7 = vmax.f32 %v1431_v62, %v1432_v1  ;;  %v1441_v9 = vrot.slane %v1440_v2, 2  ;;  %v1447_v10 = vmax.f32 %v1445_v63, %v1446_v18 }
 0x15c   : > { %v1873_v11 = vrot.slane %v1872_v6, 4  ;;  %v1879_v39 = vsel %vm1311_vm3, %v994_v3, -inf  ;;  %v1887_v40 = vrot.slane %v1886_v48, 4  ;;  %v1893_v36 = vsel %vm1311_vm3, %v995_v30, -inf }
 0x15d   : > { %v1428_v12 = vmax.f32 %v1426_v13, %v1427_v35  ;;  %v1434_v4 = vrot.slane %v1433_v7, 2  ;;  %v1442_v32 = vmax.f32 %v1440_v2, %v1441_v9  ;;  %v1448_v46 = vrot.slane %v1447_v10, 2 }
 0x15e   : > { %v1874_v14 = vmax.f32 %v1872_v6, %v1873_v11  ;;  %v1880_v15 = vrot.slane %v1879_v39, 4  ;;  %v1888_v58 = vmax.f32 %v1886_v48, %v1887_v40  ;;  %v1894_v49 = vrot.slane %v1893_v36, 4 }
 0x15f   : > { %v1429_v16 = vrot.slane %v1428_v12, 1  ;;  %v1435_v47 = vmax.f32 %v1433_v7, %v1434_v4  ;;  %v1443_v42 = vrot.slane %v1442_v32, 1  ;;  %v1449_v50 = vmax.f32 %v1447_v10, %v1448_v46 }
 0x160   : > { %v1875_v61 = vrot.slane %v1874_v14, 2  ;;  %v1881_v19 = vmax.f32 %v1879_v39, %v1880_v15  ;;  %v1889_v57 = vrot.slane %v1888_v58, 2  ;;  %v1895_v20 = vmax.f32 %v1893_v36, %v1894_v49 }
 0x161   : > { %v1430_v21 = vmax.f32 %v1428_v12, %v1429_v16  ;;  %v1436_v22 = vrot.slane %v1435_v47, 1  ;;  %v1444_v25 = vmax.f32 %v1442_v32, %v1443_v42  ;;  %v1450_v26 = vrot.slane %v1449_v50, 1 }
 0x162   : > { %v1876_v28 = vmax.f32 %v1874_v14, %v1875_v61  ;;  %v1882_v55 = vrot.slane %v1881_v19, 2  ;;  %v1890_v29 = vmax.f32 %v1888_v58, %v1889_v57  ;;  %v1896_v33 = vrot.slane %v1895_v20, 2  ;;  %v3002_v14 = vpop.f32.mrf.mxu1  ;;  %v467_v58 = vpop.f32.mrf.mxu0  ;;  %v3493_v57 = vld [vmem:[#allocation2] ss:$0 sm:$0xff] }
 0x163   : > { %v1437_v38 = vmax.f32 %v1435_v47, %v1436_v22  ;;  %v1451_v41 = vmax.f32 %v1449_v50, %v1450_v26  ;;  %v2216_v51 = vmax.f32 %v1430_v21, %v3435_v43  ;;  %v2218_v53 = vmax.f32 %v1444_v25, %v3439_v24 }
 0x164   : > { %v1877_v54 = vrot.slane %v1876_v28, 1  ;;  %v1883_v59 = vmax.f32 %v1881_v19, %v1882_v55  ;;  %v1891_v8 = vrot.slane %v1890_v29, 1  ;;  %v1897_v27 = vmax.f32 %v1895_v20, %v1896_v33 }
 0x165   : > { %v2217_v34 = vmax.f32 %v1437_v38, %v3437_v23  ;;  %v2219_v60 = vmax.f32 %v1451_v41, %v3443_v37  ;;  %v2901_v5 = vpack.c.bf16 %v2216_v51, %v2216_v51  ;;  %v2903_v62 = vpack.c.bf16 %v2218_v53, %v2218_v53 }
 0x166   : > { %v1878_v63 = vmax.f32 %v1876_v28, %v1877_v54  ;;  %v1884_v56 = vrot.slane %v1883_v59, 1  ;;  %v1892_v13 = vmax.f32 %v1890_v29, %v1891_v8  ;;  %v1898_v1 = vrot.slane %v1897_v27, 1 }
 0x167   : > { %v2902_v2 = vpack.c.bf16 %v2217_v34, %v2217_v34  ;;  %v2904_v18 = vpack.c.bf16 %v2219_v60, %v2219_v60  ;;  %v2536_v3 = vunpack.c.l.b16 %v2901_v5  ;;  %v2538_v43 = vunpack.c.l.b16 %v2903_v62 }
 0x168   : > { %v1885_v30 = vmax.f32 %v1883_v59, %v1884_v56  ;;  %v1899_v24 = vmax.f32 %v1897_v27, %v1898_v1  ;;  %v2248_v6 = vmax.f32 %v1878_v63, %v3450_v17  ;;  %v2250_v48 = vmax.f32 %v1892_v13, %v3454_v52 }
 0x169   : > { %v2537_v35 = vunpack.c.l.b16 %v2902_v2  ;;  %v2539_v23 = vunpack.c.l.b16 %v2904_v18  ;;  %v758_v37 = vcombine.high %v3466_v0, %v3466_v0  ;;  %v765_v7 = vrot.slane %v3466_v0, %v3242_v31 }
 0x16a   : > { %v2249_v9 = vmax.f32 %v1885_v30, %v3452_v44  ;;  %v2251_v10 = vmax.f32 %v1899_v24, %v3458_v45  ;;  %v2933_v11 = vpack.c.bf16 %v2248_v6, %v2248_v6  ;;  %v2935_v39 = vpack.c.bf16 %v2250_v48, %v2250_v48 }
 0x16b   : > { %v2606_v40 = vsel %vm2592_vm4, %v2537_v35, %v2536_v3  ;;  %v772_v17 = vrot.slane %v758_v37, %v3242_v31  ;;  %v773_v36 = vcombine.high %v765_v7, %v765_v7  ;;  %v1508_v52 = vsel %vm1311_vm3, %v765_v7, -inf }
 0x16c   : > { %v2607_v12 = vsel %vm2594_vm5, %v2538_v43, %v2606_v40  ;;  %v2934_v4 = vpack.c.bf16 %v2249_v9, %v2249_v9  ;;  %v2936_v32 = vpack.c.bf16 %v2251_v10, %v2251_v10  ;;  %v2568_v46 = vunpack.c.l.b16 %v2933_v11 }
 0x16d   : > { %v2570_v0 = vunpack.c.l.b16 %v2935_v39  ;;  %v774_v15 = vcombine.high %v772_v17, %v772_v17  ;;  %v1509_v44 = vrot.slane %v1508_v52, 4  ;;  %v1515_v45 = vsel %vm1311_vm3, %v773_v36, -inf }
 0x16e   : > { %v2569_v49 = vunpack.c.l.b16 %v2934_v4  ;;  %v3489_v16 = vunpack.c.l.b16 %v2936_v32  ;;  %v1516_v47 = vrot.slane %v1515_v45, 4  ;;  %v1522_v42 = vsel %vm1311_vm3, %v772_v17, -inf }
 0x16f   : > { %v1510_v50 = vmax.f32 %v1508_v52, %v1509_v44  ;;  %v1523_v61 = vrot.slane %v1522_v42, 4  ;;  %v1529_v19 = vsel %vm1311_vm3, %v774_v15, -inf  ;;  %v540_v20 = vadd.f32 %v3493_v57, %v3002_v14 }
 0x170   : > { %v2634_v21 = vsel %vm2592_vm4, %v2569_v49, %v2568_v46  ;;  %v1517_v22 = vmax.f32 %v1515_v45, %v1516_v47  ;;  %v1530_v25 = vrot.slane %v1529_v19, 4  ;;  %v468_v26 = vadd.f32 %v3493_v57, %v467_v58 }
 0x171   : > { %v3499_v28 = vsel %vm2594_vm5, %v2570_v0, %v2634_v21  ;;  %v1511_v55 = vrot.slane %v1510_v50, 2  ;;  %v1524_v29 = vmax.f32 %v1522_v42, %v1523_v61  ;;  %v598_v33 = vmax.f32 %v540_v20, 0.0 }
 0x172   : > { %v1518_v38 = vrot.slane %v1517_v22, 2  ;;  %v1531_v41 = vmax.f32 %v1529_v19, %v1530_v25  ;;  %v580_v51 = vmax.f32 %v468_v26, 0.0  ;;  %v3502_v53 = vsel %vm2596_vm6, %v2539_v23, %v2607_v12 }
 0x173   : > { %v1512_v54 = vmax.f32 %v1510_v50, %v1511_v55  ;;  %v1525_v59 = vrot.slane %v1524_v29, 2  ;;  %v1030_v8 = vcombine.high %v598_v33, %v598_v33  ;;  %v1037_v27 = vrot.slane %v598_v33, %v3242_v31 }
 0x174   : > { %v1519_v34 = vmax.f32 %v1517_v22, %v1518_v38  ;;  %v1532_v60 = vrot.slane %v1531_v41, 2  ;;  %v724_v5 = vcombine.high %v580_v51, %v580_v51  ;;  %v731_v62 = vrot.slane %v580_v51, %v3242_v31  ;;  %v531_v38 = vpop.f32.mrf.mxu1 }
 0x175   : > { %v1513_v63 = vrot.slane %v1512_v54, 1  ;;  %v1526_v56 = vmax.f32 %v1524_v29, %v1525_v59  ;;  %v1044_v13 = vrot.slane %v1030_v8, %v3242_v31  ;;  %v1045_v1 = vcombine.high %v1037_v27, %v1037_v27 }
 0x176   : > { %v1520_v2 = vrot.slane %v1519_v34, 1  ;;  %v1533_v18 = vmax.f32 %v1531_v41, %v1532_v60  ;;  %v1956_v3 = vsel %vm1311_vm3, %v1037_v27, -inf  ;;  %v738_v43 = vrot.slane %v724_v5, %v3242_v31  ;;  %v2989_v5 = vpop.f32.mrf.mxu0 }
 0x177   : > { %v3509_v30 = vmax.f32 %v1512_v54, %v1513_v63  ;;  %v1527_v24 = vrot.slane %v1526_v56, 1  ;;  %v1046_v6 = vcombine.high %v1044_v13, %v1044_v13  ;;  %v1957_v48 = vrot.slane %v1956_v3, 4 }
 0x178   : > { %v3511_v35 = vmax.f32 %v1519_v34, %v1520_v2  ;;  %v1534_v23 = vrot.slane %v1533_v18, 1  ;;  %v1963_v37 = vsel %vm1311_vm3, %v1045_v1, -inf  ;;  %v1970_v7 = vsel %vm1311_vm3, %v1044_v13, -inf }
 0x179   : > { %v3515_v9 = vmax.f32 %v1526_v56, %v1527_v24  ;;  %v1958_v10 = vmax.f32 %v1956_v3, %v1957_v48  ;;  %v1964_v11 = vrot.slane %v1963_v37, 4  ;;  %v1971_v39 = vrot.slane %v1970_v7, 4 }
 0x17a   : > { %v3517_v40 = vmax.f32 %v1533_v18, %v1534_v23  ;;  %v1977_v17 = vsel %vm1311_vm3, %v1046_v6, -inf  ;;  %v739_v36 = vcombine.high %v731_v62, %v731_v62  ;;  %v740_v52 = vcombine.high %v738_v43, %v738_v43 }
 0x17b   : > { %v1959_v12 = vrot.slane %v1958_v10, 2  ;;  %v1965_v4 = vmax.f32 %v1963_v37, %v1964_v11  ;;  %v1972_v32 = vmax.f32 %v1970_v7, %v1971_v39  ;;  %v1978_v46 = vrot.slane %v1977_v17, 4 }
 0x17c   : > { %v1452_v14 = vsel %vm1311_vm3, %v731_v62, -inf  ;;  %v1459_v0 = vsel %vm1311_vm3, %v739_v36, -inf  ;;  %v1466_v15 = vsel %vm1311_vm3, %v738_v43, -inf  ;;  %v1473_v44 = vsel %vm1311_vm3, %v740_v52, -inf  ;;  %v3005_v43 = vpop.f32.mrf.mxu1 }
 0x17d   : > { %v1960_v45 = vmax.f32 %v1958_v10, %v1959_v12  ;;  %v1966_v58 = vrot.slane %v1965_v4, 2  ;;  %v1973_v49 = vrot.slane %v1972_v32, 2  ;;  %v1979_v47 = vmax.f32 %v1977_v17, %v1978_v46 }
 0x17e   : > { %v1453_v42 = vrot.slane %v1452_v14, 4  ;;  %v1460_v50 = vrot.slane %v1459_v0, 4  ;;  %v1467_v61 = vrot.slane %v1466_v15, 4  ;;  %v1474_v19 = vrot.slane %v1473_v44, 4 }
 0x17f   : > { %v1961_v20 = vrot.slane %v1960_v45, 1  ;;  %v1967_v21 = vmax.f32 %v1965_v4, %v1966_v58  ;;  %v1974_v22 = vmax.f32 %v1972_v32, %v1973_v49  ;;  %v1980_v25 = vrot.slane %v1979_v47, 2 }
 0x180   : > { %v1454_v26 = vmax.f32 %v1452_v14, %v1453_v42  ;;  %v1461_v55 = vmax.f32 %v1459_v0, %v1460_v50  ;;  %v1468_v29 = vmax.f32 %v1466_v15, %v1467_v61  ;;  %v1475_v33 = vmax.f32 %v1473_v44, %v1474_v19 }
 0x181   : > { %v3524_v41 = vmax.f32 %v1960_v45, %v1961_v20  ;;  %v1968_v51 = vrot.slane %v1967_v21, 1  ;;  %v1975_v54 = vrot.slane %v1974_v22, 1  ;;  %v1981_v59 = vmax.f32 %v1979_v47, %v1980_v25 }
 0x182   : > { %v1455_v8 = vrot.slane %v1454_v26, 2  ;;  %v1462_v27 = vrot.slane %v1461_v55, 2  ;;  %v1469_v34 = vrot.slane %v1468_v29, 2  ;;  %v1476_v60 = vrot.slane %v1475_v33, 2 }
 0x183   : > { %v3526_v62 = vmax.f32 %v1967_v21, %v1968_v51  ;;  %v3528_v63 = vmax.f32 %v1974_v22, %v1975_v54  ;;  %v1982_v56 = vrot.slane %v1981_v59, 1  ;;  %v532_v13 = vadd.f32 %v3493_v57, %v531_v38 }
 0x184   : > { %v1456_v1 = vmax.f32 %v1454_v26, %v1455_v8  ;;  %v1463_v2 = vmax.f32 %v1461_v55, %v1462_v27  ;;  %v1470_v18 = vmax.f32 %v1468_v29, %v1469_v34  ;;  %v1477_v3 = vmax.f32 %v1475_v33, %v1476_v60 }
 0x185   : > { %v3531_v24 = vmax.f32 %v1981_v59, %v1982_v56  ;;  %v596_v6 = vmax.f32 %v532_v13, 0.0  ;;  %v3536_v48 = vsel %vm2596_vm6, %v3489_v16, %v3499_v28  ;;  %v489_v23 = vadd.f32 %v3493_v57, %v2989_v5 }
 0x186   : > { %v1457_v37 = vrot.slane %v1456_v1, 1  ;;  %v1464_v7 = vrot.slane %v1463_v2, 1  ;;  %v1471_v10 = vrot.slane %v1470_v18, 1  ;;  %v1478_v11 = vrot.slane %v1477_v3, 1 }
 0x187   : > { %v996_v39 = vcombine.high %v596_v6, %v596_v6  ;;  %v1003_v17 = vrot.slane %v596_v6, %v3242_v31  ;;  %v585_v36 = vmax.f32 %v489_v23, 0.0  ;;  %v553_v52 = vadd.f32 %v3493_v57, %v3005_v43 }
 0x188   : > { %v1458_v12 = vmax.f32 %v1456_v1, %v1457_v37  ;;  %v1465_v4 = vmax.f32 %v1463_v2, %v1464_v7  ;;  %v1472_v32 = vmax.f32 %v1470_v18, %v1471_v10  ;;  %v1479_v46 = vmax.f32 %v1477_v3, %v1478_v11 }
 0x189   : > { %v1010_v14 = vrot.slane %v996_v39, %v3242_v31  ;;  %v1011_v16 = vcombine.high %v1003_v17, %v1003_v17  ;;  %v1900_v28 = vsel %vm1311_vm3, %v1003_v17, -inf  ;;  %v809_v0 = vcombine.high %v585_v36, %v585_v36 }
 0x18a   : > { %v2220_v15 = vmax.f32 %v1458_v12, %v3509_v30  ;;  %v2221_v44 = vmax.f32 %v1465_v4, %v3511_v35  ;;  %v2222_v45 = vmax.f32 %v1472_v32, %v3515_v9  ;;  %v2223_v58 = vmax.f32 %v1479_v46, %v3517_v40 }
 0x18b   : > { %v1012_v49 = vcombine.high %v1010_v14, %v1010_v14  ;;  %v1901_v47 = vrot.slane %v1900_v28, 4  ;;  %v1907_v42 = vsel %vm1311_vm3, %v1011_v16, -inf  ;;  %v1914_v50 = vsel %vm1311_vm3, %v1010_v14, -inf }
 0x18c   : > { %v2905_v61 = vpack.c.bf16 %v2220_v15, %v2220_v15  ;;  %v2906_v19 = vpack.c.bf16 %v2221_v44, %v2221_v44  ;;  %v2907_v20 = vpack.c.bf16 %v2222_v45, %v2222_v45  ;;  %v2908_v21 = vpack.c.bf16 %v2223_v58, %v2223_v58 }
 0x18d   : > { %v1902_v22 = vmax.f32 %v1900_v28, %v1901_v47  ;;  %v1908_v25 = vrot.slane %v1907_v42, 4  ;;  %v1915_v26 = vrot.slane %v1914_v50, 4  ;;  %v1921_v30 = vsel %vm1311_vm3, %v1012_v49, -inf }
 0x18e   : > { %v2540_v35 = vunpack.c.l.b16 %v2905_v61  ;;  %v2541_v55 = vunpack.c.l.b16 %v2906_v19  ;;  %v2542_v9 = vunpack.c.l.b16 %v2907_v20  ;;  %v2543_v29 = vunpack.c.l.b16 %v2908_v21 }
 0x18f   : > { %v1903_v40 = vrot.slane %v1902_v22, 2  ;;  %v1909_v33 = vmax.f32 %v1907_v42, %v1908_v25  ;;  %v1916_v38 = vmax.f32 %v1914_v50, %v1915_v26  ;;  %v1922_v51 = vrot.slane %v1921_v30, 4 }
 0x190   : > { %v2609_v54 = vsel %vm2598_vm7, %v2540_v35, %v3502_v53  ;;  %v816_v59 = vrot.slane %v585_v36, %v3242_v31  ;;  %v823_v8 = vrot.slane %v809_v0, %v3242_v31  ;;  %v3554_v27 = vmax.f32 %v553_v52, 0.0 }
 0x191   : > { %v2610_v34 = vsel %vm2600_vm8, %v2541_v55, %v2609_v54  ;;  %v1904_v60 = vmax.f32 %v1902_v22, %v1903_v40  ;;  %v1910_v5 = vrot.slane %v1909_v33, 2  ;;  %v1917_v56 = vrot.slane %v1916_v38, 2  ;;  %v480_v54 = vpop.f32.mrf.mxu0 }
 0x192   : > { %v2611_v13 = vsel %vm2602_vm9, %v2542_v9, %v2610_v34  ;;  %v1923_v1 = vmax.f32 %v1921_v30, %v1922_v51  ;;  %v824_v2 = vcombine.high %v816_v59, %v816_v59  ;;  %v825_v18 = vcombine.high %v823_v8, %v823_v8 }
 0x193   : > { %v2612_v3 = vsel %vm2604_vm10, %v2543_v29, %v2611_v13  ;;  %v1905_v53 = vrot.slane %v1904_v60, 1  ;;  %v1911_v43 = vmax.f32 %v1909_v33, %v1910_v5  ;;  %v1918_v6 = vmax.f32 %v1916_v38, %v1917_v56 }
 0x194   : > { %v2656_v23 = vpack.c.b16 %v2612_v3, %v2612_v3  ;;  %v1924_v37 = vrot.slane %v1923_v1, 2  ;;  %v1592_v7 = vsel %vm1311_vm3, %v816_v59, -inf  ;;  %v1599_v10 = vsel %vm1311_vm3, %v824_v2, -inf }
 0x195   : > { %v1906_v11 = vmax.f32 %v1904_v60, %v1905_v53  ;;  %v1912_v39 = vrot.slane %v1911_v43, 1  ;;  %v1919_v17 = vrot.slane %v1918_v6, 1  ;;  %v1593_v36 = vrot.slane %v1592_v7, 4 }
 0x196   : > { %2673 = vst.msk [vmem:[%s3401_s9 + $0x4] sm:$0xf] %vm2671_vm11, %v2656_v23  ;;  %v1925_v52 = vmax.f32 %v1923_v1, %v1924_v37  ;;  %v1600_v12 = vrot.slane %v1599_v10, 4  ;;  %v1606_v4 = vsel %vm1311_vm3, %v823_v8, -inf  ;;  %v1613_v32 = vsel %vm1311_vm3, %v825_v18, -inf  ;;  %v2990_v23 = vpop.f32.mrf.mxu0 }
 0x197   : > { %v1913_v46 = vmax.f32 %v1911_v43, %v1912_v39  ;;  %v1920_v14 = vmax.f32 %v1918_v6, %v1919_v17  ;;  %v2252_v16 = vmax.f32 %v1906_v11, %v3524_v41  ;;  %v1594_v28 = vmax.f32 %v1592_v7, %v1593_v36  ;;  %v544_v6 = vpop.f32.mrf.mxu1 }
 0x198   : > { %v1926_v0 = vrot.slane %v1925_v52, 1  ;;  %v1601_v15 = vmax.f32 %v1599_v10, %v1600_v12  ;;  %v1607_v44 = vrot.slane %v1606_v4, 4  ;;  %v1614_v45 = vrot.slane %v1613_v32, 4 }
 0x199   : > { %v2253_v58 = vmax.f32 %v1913_v46, %v3526_v62  ;;  %v2254_v49 = vmax.f32 %v1920_v14, %v3528_v63  ;;  %v2937_v47 = vpack.c.bf16 %v2252_v16, %v2252_v16  ;;  %v1595_v42 = vrot.slane %v1594_v28, 2 }
 0x19a   : > { %v1927_v50 = vmax.f32 %v1925_v52, %v1926_v0  ;;  %v1602_v61 = vrot.slane %v1601_v15, 2  ;;  %v1608_v19 = vmax.f32 %v1606_v4, %v1607_v44  ;;  %v1615_v20 = vmax.f32 %v1613_v32, %v1614_v45 }
 0x19b   : > { %v2938_v21 = vpack.c.bf16 %v2253_v58, %v2253_v58  ;;  %v2939_v22 = vpack.c.bf16 %v2254_v49, %v2254_v49  ;;  %v2572_v25 = vunpack.c.l.b16 %v2937_v47  ;;  %v1596_v26 = vmax.f32 %v1594_v28, %v1595_v42 }
 0x19c   : > { %v2255_v41 = vmax.f32 %v1927_v50, %v3531_v24  ;;  %v1603_v30 = vmax.f32 %v1601_v15, %v1602_v61  ;;  %v1609_v35 = vrot.slane %v1608_v19, 2  ;;  %v1616_v55 = vrot.slane %v1615_v20, 2 }
 0x19d   : > { %v2573_v9 = vunpack.c.l.b16 %v2938_v21  ;;  %v2574_v29 = vunpack.c.l.b16 %v2939_v22  ;;  %v2637_v62 = vsel %vm2598_vm7, %v2572_v25, %v3536_v48  ;;  %v1597_v63 = vrot.slane %v1596_v26, 1 }
 0x19e   : > { %v2940_v40 = vpack.c.bf16 %v2255_v41, %v2255_v41  ;;  %v1604_v33 = vrot.slane %v1603_v30, 1  ;;  %v1610_v38 = vmax.f32 %v1608_v19, %v1609_v35  ;;  %v1617_v51 = vmax.f32 %v1615_v20, %v1616_v55 }
 0x19f   : > { %v2638_v59 = vsel %vm2600_vm8, %v2573_v9, %v2637_v62  ;;  %v3572_v8 = vmax.f32 %v1596_v26, %v1597_v63  ;;  %v1081_v24 = vcombine.high %v3554_v27, %v3554_v27  ;;  %v1088_v34 = vrot.slane %v3554_v27, %v3242_v31 }
 0x1a0   : > { %v2575_v60 = vunpack.c.l.b16 %v2940_v40  ;;  %v2639_v5 = vsel %vm2602_vm9, %v2574_v29, %v2638_v59  ;;  %v3579_v48 = vmax.f32 %v1603_v30, %v1604_v33  ;;  %v1611_v56 = vrot.slane %v1610_v38, 1 }
 0x1a1   : > { %v1618_v13 = vrot.slane %v1617_v51, 1  ;;  %v1095_v1 = vrot.slane %v1081_v24, %v3242_v31  ;;  %v1096_v2 = vcombine.high %v1088_v34, %v1088_v34  ;;  %v2040_v18 = vsel %vm1311_vm3, %v1088_v34, -inf }
 0x1a2   : > { %v2640_v3 = vsel %vm2604_vm10, %v2575_v60, %v2639_v5  ;;  %v3584_v53 = vmax.f32 %v1610_v38, %v1611_v56  ;;  %v2041_v43 = vrot.slane %v2040_v18, 4  ;;  %v481_v27 = vadd.f32 %v3493_v57, %v480_v54 }
 0x1a3   : > { %v2660_v37 = vpack.c.b16 %v2640_v3, %v2640_v3  ;;  %v3587_v7 = vmax.f32 %v1617_v51, %v1618_v13  ;;  %v1097_v10 = vcombine.high %v1095_v1, %v1095_v1  ;;  %v2047_v11 = vsel %vm1311_vm3, %v1096_v2, -inf }
 0x1a4   : > { %v2042_v39 = vmax.f32 %v2040_v18, %v2041_v43  ;;  %v2048_v17 = vrot.slane %v2047_v11, 4  ;;  %v2054_v36 = vsel %vm1311_vm3, %v1095_v1, -inf  ;;  %v583_v52 = vmax.f32 %v481_v27, 0.0 }
 0x1a5   : > { %2677 = vst.msk [vmem:[%s3401_s9 + $0x14] sm:$0xf] %vm2671_vm11, %v2660_v37  ;;  %v2055_v12 = vrot.slane %v2054_v36, 4  ;;  %v2061_v4 = vsel %vm1311_vm3, %v1097_v10, -inf  ;;  %v545_v32 = vadd.f32 %v3493_v57, %v544_v6  ;;  %v492_v46 = vadd.f32 %v3493_v57, %v2990_v23 }
 0x1a6   : > { %v2043_v14 = vrot.slane %v2042_v39, 2  ;;  %v2049_v16 = vmax.f32 %v2047_v11, %v2048_v17  ;;  %v2062_v28 = vrot.slane %v2061_v4, 4  ;;  %v775_v0 = vcombine.high %v583_v52, %v583_v52 }
 0x1a7   : > { %v2056_v15 = vmax.f32 %v2054_v36, %v2055_v12  ;;  %v782_v44 = vrot.slane %v583_v52, %v3242_v31  ;;  %v599_v45 = vmax.f32 %v545_v32, 0.0  ;;  %v3597_v58 = vmax.f32 %v492_v46, 0.0 }
 0x1a8   : > { %v2044_v49 = vmax.f32 %v2042_v39, %v2043_v14  ;;  %v2050_v47 = vrot.slane %v2049_v16, 2  ;;  %v2063_v42 = vmax.f32 %v2061_v4, %v2062_v28  ;;  %v789_v50 = vrot.slane %v775_v0, %v3242_v31 }
 0x1a9   : > { %v2057_v61 = vrot.slane %v2056_v15, 2  ;;  %v790_v19 = vcombine.high %v782_v44, %v782_v44  ;;  %v1536_v20 = vsel %vm1311_vm3, %v782_v44, -inf  ;;  %v1047_v21 = vcombine.high %v599_v45, %v599_v45 }
 0x1aa   : > { %v2045_v22 = vrot.slane %v2044_v49, 1  ;;  %v2051_v25 = vmax.f32 %v2049_v16, %v2050_v47  ;;  %v2064_v26 = vrot.slane %v2063_v42, 2  ;;  %v791_v41 = vcombine.high %v789_v50, %v789_v50 }
 0x1ab   : > { %v2058_v30 = vmax.f32 %v2056_v15, %v2057_v61  ;;  %v1537_v35 = vrot.slane %v1536_v20, 4  ;;  %v1543_v55 = vsel %vm1311_vm3, %v790_v19, -inf  ;;  %v1550_v9 = vsel %vm1311_vm3, %v789_v50, -inf }
 0x1ac   : > { %v3603_v29 = vmax.f32 %v2044_v49, %v2045_v22  ;;  %v2052_v62 = vrot.slane %v2051_v25, 1  ;;  %v2065_v63 = vmax.f32 %v2063_v42, %v2064_v26  ;;  %v1544_v40 = vrot.slane %v1543_v55, 4 }
 0x1ad   : > { %v2059_v33 = vrot.slane %v2058_v30, 1  ;;  %v1538_v38 = vmax.f32 %v1536_v20, %v1537_v35  ;;  %v1551_v51 = vrot.slane %v1550_v9, 4  ;;  %v1557_v54 = vsel %vm1311_vm3, %v791_v41, -inf }
 0x1ae   : > { %v3606_v59 = vmax.f32 %v2051_v25, %v2052_v62  ;;  %v2066_v24 = vrot.slane %v2065_v63, 1  ;;  %v1545_v34 = vmax.f32 %v1543_v55, %v1544_v40  ;;  %v1558_v60 = vrot.slane %v1557_v54, 4 }
 0x1af   : > { %v3608_v5 = vmax.f32 %v2058_v30, %v2059_v33  ;;  %v1539_v56 = vrot.slane %v1538_v38, 2  ;;  %v1552_v13 = vmax.f32 %v1550_v9, %v1551_v51  ;;  %v1054_v1 = vrot.slane %v599_v45, %v3242_v31 }
 0x1b0   : > { %v3611_v2 = vmax.f32 %v2065_v63, %v2066_v24  ;;  %v1546_v18 = vrot.slane %v1545_v34, 2  ;;  %v1559_v3 = vmax.f32 %v1557_v54, %v1558_v60  ;;  %v1061_v43 = vrot.slane %v1047_v21, %v3242_v31 }
 0x1b1   : > { %v1540_v27 = vmax.f32 %v1538_v38, %v1539_v56  ;;  %v1553_v6 = vrot.slane %v1552_v13, 2  ;;  %v1062_v23 = vcombine.high %v1054_v1, %v1054_v1  ;;  %v1984_v37 = vsel %vm1311_vm3, %v1054_v1, -inf  ;;  %v3006_v1 = vpop.f32.mrf.mxu1 }
 0x1b2   : > { %v1547_v10 = vmax.f32 %v1545_v34, %v1546_v18  ;;  %v1560_v11 = vrot.slane %v1559_v3, 2  ;;  %v1063_v39 = vcombine.high %v1061_v43, %v1061_v43  ;;  %v1985_v17 = vrot.slane %v1984_v37, 4 }
 0x1b3   : > { %v1541_v36 = vrot.slane %v1540_v27, 1  ;;  %v1554_v52 = vmax.f32 %v1552_v13, %v1553_v6  ;;  %v1991_v12 = vsel %vm1311_vm3, %v1062_v23, -inf  ;;  %v1998_v4 = vsel %vm1311_vm3, %v1061_v43, -inf }
 0x1b4   : > { %v1548_v32 = vrot.slane %v1547_v10, 1  ;;  %v1561_v46 = vmax.f32 %v1559_v3, %v1560_v11  ;;  %v1986_v14 = vmax.f32 %v1984_v37, %v1985_v17  ;;  %v1992_v16 = vrot.slane %v1991_v12, 4 }
 0x1b5   : > { %v1542_v28 = vmax.f32 %v1540_v27, %v1541_v36  ;;  %v1555_v0 = vrot.slane %v1554_v52, 1  ;;  %v1999_v15 = vrot.slane %v1998_v4, 4  ;;  %v2005_v44 = vsel %vm1311_vm3, %v1063_v39, -inf }
 0x1b6   : > { %v1549_v45 = vmax.f32 %v1547_v10, %v1548_v32  ;;  %v1562_v49 = vrot.slane %v1561_v46, 1  ;;  %v1987_v47 = vrot.slane %v1986_v14, 2  ;;  %v1993_v42 = vmax.f32 %v1991_v12, %v1992_v16 }
 0x1b7   : > { %v1556_v50 = vmax.f32 %v1554_v52, %v1555_v0  ;;  %v2224_v61 = vmax.f32 %v1542_v28, %v3572_v8  ;;  %v2000_v19 = vmax.f32 %v1998_v4, %v1999_v15  ;;  %v2006_v20 = vrot.slane %v2005_v44, 4 }
 0x1b8   : > { %v1563_v21 = vmax.f32 %v1561_v46, %v1562_v49  ;;  %v2225_v22 = vmax.f32 %v1549_v45, %v3579_v48  ;;  %v1988_v25 = vmax.f32 %v1986_v14, %v1987_v47  ;;  %v1994_v26 = vrot.slane %v1993_v42, 2 }
 0x1b9   : > { %v2226_v41 = vmax.f32 %v1556_v50, %v3584_v53  ;;  %v2909_v30 = vpack.c.bf16 %v2224_v61, %v2224_v61  ;;  %v2001_v35 = vrot.slane %v2000_v19, 2  ;;  %v2007_v55 = vmax.f32 %v2005_v44, %v2006_v20 }
 0x1ba   : > { %v2227_v9 = vmax.f32 %v1563_v21, %v3587_v7  ;;  %v2910_v62 = vpack.c.bf16 %v2225_v22, %v2225_v22  ;;  %v1989_v63 = vrot.slane %v1988_v25, 1  ;;  %v1995_v40 = vmax.f32 %v1993_v42, %v1994_v26 }
 0x1bb   : > { %v2911_v33 = vpack.c.bf16 %v2226_v41, %v2226_v41  ;;  %v2544_v38 = vunpack.c.l.b16 %v2909_v30  ;;  %v2002_v8 = vmax.f32 %v2000_v19, %v2001_v35  ;;  %v2008_v51 = vrot.slane %v2007_v55, 2 }
 0x1bc   : > { %v2912_v54 = vpack.c.bf16 %v2227_v9, %v2227_v9  ;;  %v2545_v24 = vunpack.c.l.b16 %v2910_v62  ;;  %v1990_v34 = vmax.f32 %v1988_v25, %v1989_v63  ;;  %v1996_v48 = vrot.slane %v1995_v40, 1 }
 0x1bd   : > { %v2546_v60 = vunpack.c.l.b16 %v2911_v33  ;;  %v2003_v56 = vrot.slane %v2002_v8, 1  ;;  %v2009_v13 = vmax.f32 %v2007_v55, %v2008_v51  ;;  %v826_v53 = vcombine.high %v3597_v58, %v3597_v58 }
 0x1be   : > { %v2547_v18 = vunpack.c.l.b16 %v2912_v54  ;;  %v2613_v7 = vsel %vm2592_vm4, %v2545_v24, %v2544_v38  ;;  %v1997_v3 = vmax.f32 %v1995_v40, %v1996_v48  ;;  %v2256_v43 = vmax.f32 %v1990_v34, %v3603_v29 }
 0x1bf   : > { %v2614_v27 = vsel %vm2594_vm5, %v2546_v60, %v2613_v7  ;;  %v2004_v6 = vmax.f32 %v2002_v8, %v2003_v56  ;;  %v2010_v23 = vrot.slane %v2009_v13, 1  ;;  %v833_v37 = vrot.slane %v3597_v58, %v3242_v31 }
 0x1c0   : > { %v2257_v10 = vmax.f32 %v1997_v3, %v3606_v59  ;;  %v2941_v11 = vpack.c.bf16 %v2256_v43, %v2256_v43  ;;  %v840_v39 = vrot.slane %v826_v53, %v3242_v31  ;;  %v556_v17 = vadd.f32 %v3493_v57, %v3006_v1  ;;  %v547_v43 = vpop.f32.mrf.mxu1 }
 0x1c1   : > { %v2011_v36 = vmax.f32 %v2009_v13, %v2010_v23  ;;  %v2258_v52 = vmax.f32 %v2004_v6, %v3608_v5  ;;  %v841_v12 = vcombine.high %v833_v37, %v833_v37  ;;  %v1620_v29 = vsel %vm1311_vm3, %v833_v37, -inf }
 0x1c2   : > { %v2942_v4 = vpack.c.bf16 %v2257_v10, %v2257_v10  ;;  %v2576_v32 = vunpack.c.l.b16 %v2941_v11  ;;  %v842_v46 = vcombine.high %v840_v39, %v840_v39  ;;  %v1621_v14 = vrot.slane %v1620_v29, 4 }
 0x1c3   : > { %v2259_v16 = vmax.f32 %v2011_v36, %v3611_v2  ;;  %v2943_v58 = vpack.c.bf16 %v2258_v52, %v2258_v52  ;;  %v1627_v59 = vsel %vm1311_vm3, %v841_v12, -inf  ;;  %v1634_v28 = vsel %vm1311_vm3, %v840_v39, -inf  ;;  %v483_v2 = vpop.f32.mrf.mxu0 }
 0x1c4   : > { %v2577_v0 = vunpack.c.l.b16 %v2942_v4  ;;  %v1622_v15 = vmax.f32 %v1620_v29, %v1621_v14  ;;  %v1628_v44 = vrot.slane %v1627_v59, 4  ;;  %v1635_v45 = vrot.slane %v1634_v28, 4 }
 0x1c5   : > { %v2944_v49 = vpack.c.bf16 %v2259_v16, %v2259_v16  ;;  %v2578_v5 = vunpack.c.l.b16 %v2943_v58  ;;  %v1641_v47 = vsel %vm1311_vm3, %v842_v46, -inf  ;;  %v602_v42 = vmax.f32 %v556_v17, 0.0  ;;  %v2993_v4 = vpop.f32.mrf.mxu0 }
 0x1c6   : > { %v2641_v50 = vsel %vm2592_vm4, %v2577_v0, %v2576_v32  ;;  %v1623_v61 = vrot.slane %v1622_v15, 2  ;;  %v1629_v19 = vmax.f32 %v1627_v59, %v1628_v44  ;;  %v1636_v20 = vmax.f32 %v1634_v28, %v1635_v45 }
 0x1c7   : > { %v2579_v21 = vunpack.c.l.b16 %v2944_v49  ;;  %v2642_v22 = vsel %vm2594_vm5, %v2578_v5, %v2641_v50  ;;  %v1642_v25 = vrot.slane %v1641_v47, 4  ;;  %v1098_v26 = vcombine.high %v602_v42, %v602_v42 }
 0x1c8   : > { %v1624_v41 = vmax.f32 %v1622_v15, %v1623_v61  ;;  %v1630_v30 = vrot.slane %v1629_v19, 2  ;;  %v1637_v35 = vrot.slane %v1636_v20, 2  ;;  %v1105_v55 = vrot.slane %v602_v42, %v3242_v31 }
 0x1c9   : > { %v1643_v9 = vmax.f32 %v1641_v47, %v1642_v25  ;;  %v1112_v62 = vrot.slane %v1098_v26, %v3242_v31  ;;  %v484_v63 = vadd.f32 %v3493_v57, %v483_v2  ;;  %v3644_v40 = vsel %vm2596_vm6, %v2547_v18, %v2614_v27 }
 0x1ca   : > { %v1625_v33 = vrot.slane %v1624_v41, 1  ;;  %v1631_v38 = vmax.f32 %v1629_v19, %v1630_v30  ;;  %v1638_v8 = vmax.f32 %v1636_v20, %v1637_v35  ;;  %v1113_v51 = vcombine.high %v1105_v55, %v1105_v55 }
 0x1cb   : > { %v1644_v54 = vrot.slane %v1643_v9, 2  ;;  %v1114_v24 = vcombine.high %v1112_v62, %v1112_v62  ;;  %v2068_v34 = vsel %vm1311_vm3, %v1105_v55, -inf  ;;  %v2082_v48 = vsel %vm1311_vm3, %v1112_v62, -inf }
 0x1cc   : > { %v3648_v60 = vmax.f32 %v1624_v41, %v1625_v33  ;;  %v1632_v56 = vrot.slane %v1631_v38, 1  ;;  %v1639_v13 = vrot.slane %v1638_v8, 1  ;;  %v2069_v53 = vrot.slane %v2068_v34, 4 }
 0x1cd   : > { %v1645_v1 = vmax.f32 %v1643_v9, %v1644_v54  ;;  %v2075_v7 = vsel %vm1311_vm3, %v1113_v51, -inf  ;;  %v2083_v18 = vrot.slane %v2082_v48, 4  ;;  %v2089_v3 = vsel %vm1311_vm3, %v1114_v24, -inf }
 0x1ce   : > { %v3652_v27 = vmax.f32 %v1631_v38, %v1632_v56  ;;  %v3654_v6 = vmax.f32 %v1638_v8, %v1639_v13  ;;  %v2070_v23 = vmax.f32 %v2068_v34, %v2069_v53  ;;  %v2076_v37 = vrot.slane %v2075_v7, 4  ;;  %v3009_v38 = vpop.f32.mrf.mxu1 }
 0x1cf   : > { %v1646_v10 = vrot.slane %v1645_v1, 1  ;;  %v2084_v11 = vmax.f32 %v2082_v48, %v2083_v18  ;;  %v2090_v39 = vrot.slane %v2089_v3, 4  ;;  %v584_v17 = vmax.f32 %v484_v63, 0.0 }
 0x1d0   : > { %v2071_v36 = vrot.slane %v2070_v23, 2  ;;  %v2077_v52 = vmax.f32 %v2075_v7, %v2076_v37  ;;  %v548_v12 = vadd.f32 %v3493_v57, %v547_v43  ;;  %v3658_v29 = vsel %vm2596_vm6, %v2579_v21, %v2642_v22 }
 0x1d1   : > { %v3660_v32 = vmax.f32 %v1645_v1, %v1646_v10  ;;  %v2085_v46 = vrot.slane %v2084_v11, 2  ;;  %v2091_v14 = vmax.f32 %v2089_v3, %v2090_v39  ;;  %v792_v16 = vcombine.high %v584_v17, %v584_v17 }
 0x1d2   : > { %v2072_v58 = vmax.f32 %v2070_v23, %v2071_v36  ;;  %v2078_v59 = vrot.slane %v2077_v52, 2  ;;  %v799_v28 = vrot.slane %v584_v17, %v3242_v31  ;;  %v600_v0 = vmax.f32 %v548_v12, 0.0 }
 0x1d3   : > { %v2086_v15 = vmax.f32 %v2084_v11, %v2085_v46  ;;  %v2092_v44 = vrot.slane %v2091_v14, 2  ;;  %v806_v45 = vrot.slane %v792_v16, %v3242_v31  ;;  %v505_v49 = vadd.f32 %v3493_v57, %v2993_v4 }
 0x1d4   : > { %v2073_v5 = vrot.slane %v2072_v58, 1  ;;  %v2079_v47 = vmax.f32 %v2077_v52, %v2078_v59  ;;  %v807_v42 = vcombine.high %v799_v28, %v799_v28  ;;  %v1564_v50 = vsel %vm1311_vm3, %v799_v28, -inf }
 0x1d5   : > { %v2087_v61 = vrot.slane %v2086_v15, 1  ;;  %v2093_v19 = vmax.f32 %v2091_v14, %v2092_v44  ;;  %v808_v20 = vcombine.high %v806_v45, %v806_v45  ;;  %v1565_v2 = vrot.slane %v1564_v50, 4 }
 0x1d6   : > { %v3666_v21 = vmax.f32 %v2072_v58, %v2073_v5  ;;  %v2080_v22 = vrot.slane %v2079_v47, 1  ;;  %v1571_v25 = vsel %vm1311_vm3, %v807_v42, -inf  ;;  %v1578_v26 = vsel %vm1311_vm3, %v806_v45, -inf }
 0x1d7   : > { %v3670_v41 = vmax.f32 %v2086_v15, %v2087_v61  ;;  %v2094_v30 = vrot.slane %v2093_v19, 1  ;;  %v1566_v35 = vmax.f32 %v1564_v50, %v1565_v2  ;;  %v1572_v55 = vrot.slane %v1571_v25, 4 }
 0x1d8   : > { %v3672_v9 = vmax.f32 %v2079_v47, %v2080_v22  ;;  %v1579_v62 = vrot.slane %v1578_v26, 4  ;;  %v1585_v63 = vsel %vm1311_vm3, %v808_v20, -inf  ;;  %v1064_v33 = vcombine.high %v600_v0, %v600_v0 }
 0x1d9   : > { %v3675_v8 = vmax.f32 %v2093_v19, %v2094_v30  ;;  %v1567_v51 = vrot.slane %v1566_v35, 2  ;;  %v1573_v54 = vmax.f32 %v1571_v25, %v1572_v55  ;;  %v1586_v24 = vrot.slane %v1585_v63, 4 }
 0x1da   : > { %v1580_v34 = vmax.f32 %v1578_v26, %v1579_v62  ;;  %v1071_v48 = vrot.slane %v600_v0, %v3242_v31  ;;  %v1078_v56 = vrot.slane %v1064_v33, %v3242_v31  ;;  %v3679_v13 = vmax.f32 %v505_v49, 0.0 }
 0x1db   : > { %v1568_v53 = vmax.f32 %v1566_v35, %v1567_v51  ;;  %v1574_v1 = vrot.slane %v1573_v54, 2  ;;  %v1587_v7 = vmax.f32 %v1585_v63, %v1586_v24  ;;  %v3682_v18 = vadd.f32 %v3493_v57, %v3009_v38 }
 0x1dc   : > { %v1581_v3 = vrot.slane %v1580_v34, 2  ;;  %v1079_v43 = vcombine.high %v1071_v48, %v1071_v48  ;;  %v1080_v23 = vcombine.high %v1078_v56, %v1078_v56  ;;  %v2012_v37 = vsel %vm1311_vm3, %v1071_v48, -inf }
 0x1dd   : > { %v1569_v10 = vrot.slane %v1568_v53, 1  ;;  %v1575_v11 = vmax.f32 %v1573_v54, %v1574_v1  ;;  %v1588_v39 = vrot.slane %v1587_v7, 2  ;;  %v2013_v17 = vrot.slane %v2012_v37, 4 }
 0x1de   : > { %v1582_v36 = vmax.f32 %v1580_v34, %v1581_v3  ;;  %v2019_v52 = vsel %vm1311_vm3, %v1079_v43, -inf  ;;  %v2026_v12 = vsel %vm1311_vm3, %v1078_v56, -inf  ;;  %v2033_v4 = vsel %vm1311_vm3, %v1080_v23, -inf }
 0x1df   : > { %v1570_v46 = vmax.f32 %v1568_v53, %v1569_v10  ;;  %v1576_v14 = vrot.slane %v1575_v11, 1  ;;  %v1589_v57 = vmax.f32 %v1587_v7, %v1588_v39  ;;  %v2014_v16 = vmax.f32 %v2012_v37, %v2013_v17 }
 0x1e0   : > { %v1583_v58 = vrot.slane %v1582_v36, 1  ;;  %v2020_v59 = vrot.slane %v2019_v52, 4  ;;  %v2027_v28 = vrot.slane %v2026_v12, 4  ;;  %v2034_v0 = vrot.slane %v2033_v4, 4 }
 0x1e1   : > { %v1577_v15 = vmax.f32 %v1575_v11, %v1576_v14  ;;  %v1590_v44 = vrot.slane %v1589_v57, 1  ;;  %v2228_v45 = vmax.f32 %v1570_v46, %v3648_v60  ;;  %v2015_v49 = vrot.slane %v2014_v16, 2 }
 0x1e2   : > { %v1584_v5 = vmax.f32 %v1582_v36, %v1583_v58  ;;  %v2021_v47 = vmax.f32 %v2019_v52, %v2020_v59  ;;  %v2028_v42 = vmax.f32 %v2026_v12, %v2027_v28  ;;  %v2035_v50 = vmax.f32 %v2033_v4, %v2034_v0 }
 0x1e3   : > { %v1591_v61 = vmax.f32 %v1589_v57, %v1590_v44  ;;  %v2229_v19 = vmax.f32 %v1577_v15, %v3652_v27  ;;  %v2913_v20 = vpack.c.bf16 %v2228_v45, %v2228_v45  ;;  %v2016_v2 = vmax.f32 %v2014_v16, %v2015_v49 }
 0x1e4   : > { %v2230_v22 = vmax.f32 %v1584_v5, %v3654_v6  ;;  %v2022_v25 = vrot.slane %v2021_v47, 2  ;;  %v2029_v26 = vrot.slane %v2028_v42, 2  ;;  %v2036_v30 = vrot.slane %v2035_v50, 2 }
 0x1e5   : > { %v2231_v35 = vmax.f32 %v1591_v61, %v3660_v32  ;;  %v2914_v55 = vpack.c.bf16 %v2229_v19, %v2229_v19  ;;  %v2548_v62 = vunpack.c.l.b16 %v2913_v20  ;;  %v2017_v60 = vrot.slane %v2016_v2, 1 }
 0x1e6   : > { %v2915_v63 = vpack.c.bf16 %v2230_v22, %v2230_v22  ;;  %v2023_v33 = vmax.f32 %v2021_v47, %v2022_v25  ;;  %v2030_v38 = vmax.f32 %v2028_v42, %v2029_v26  ;;  %v2037_v51 = vmax.f32 %v2035_v50, %v2036_v30  ;;  %v496_v22 = vpop.f32.mrf.mxu0 }
 0x1e7   : > { %v2916_v54 = vpack.c.bf16 %v2231_v35, %v2231_v35  ;;  %v2549_v24 = vunpack.c.l.b16 %v2914_v55  ;;  %v2616_v27 = vsel %vm2598_vm7, %v2548_v62, %v3644_v40  ;;  %v2018_v34 = vmax.f32 %v2016_v2, %v2017_v60 }
 0x1e8   : > { %v2550_v48 = vunpack.c.l.b16 %v2915_v63  ;;  %v2024_v6 = vrot.slane %v2023_v33, 1  ;;  %v2031_v56 = vrot.slane %v2030_v38, 1  ;;  %v2038_v53 = vrot.slane %v2037_v51, 1 }
 0x1e9   : > { %v2551_v1 = vunpack.c.l.b16 %v2916_v54  ;;  %v2617_v32 = vsel %vm2600_vm8, %v2549_v24, %v2616_v27  ;;  %v2260_v7 = vmax.f32 %v2018_v34, %v3666_v21  ;;  %v877_v3 = vcombine.high %v3679_v13, %v3679_v13  ;;  %v560_v54 = vpop.f32.mrf.mxu1 }
 0x1ea   : > { %v2618_v43 = vsel %vm2602_vm9, %v2550_v48, %v2617_v32  ;;  %v2025_v23 = vmax.f32 %v2023_v33, %v2024_v6  ;;  %v2032_v37 = vmax.f32 %v2030_v38, %v2031_v56  ;;  %v2039_v10 = vmax.f32 %v2037_v51, %v2038_v53  ;;  %v3721_v38 = vld [vmem:[#allocation2] ss:$0 sm:$0xff] }
 0x1eb   : > { %v2619_v40 = vsel %vm2604_vm10, %v2551_v1, %v2618_v43  ;;  %v2945_v11 = vpack.c.bf16 %v2260_v7, %v2260_v7  ;;  %v884_v39 = vrot.slane %v3679_v13, %v3242_v31  ;;  %v891_v17 = vrot.slane %v877_v3, %v3242_v31 }
 0x1ec   : > { %v2657_v36 = vpack.c.b16 %v2619_v40, %v2619_v40  ;;  %v2261_v21 = vmax.f32 %v2025_v23, %v3672_v9  ;;  %v2262_v52 = vmax.f32 %v2032_v37, %v3670_v41  ;;  %v2263_v12 = vmax.f32 %v2039_v10, %v3675_v8 }
 0x1ed   : > { %v2580_v4 = vunpack.c.l.b16 %v2945_v11  ;;  %v892_v46 = vcombine.high %v884_v39, %v884_v39  ;;  %v893_v14 = vcombine.high %v891_v17, %v891_v17  ;;  %v1704_v57 = vsel %vm1311_vm3, %v884_v39, -inf }
 0x1ee   : > { %2674 = vst.msk [vmem:[%s3401_s9 + $0x8] sm:$0xf] %vm2671_vm11, %v2657_v36  ;;  %v2946_v16 = vpack.c.bf16 %v2261_v21, %v2261_v21  ;;  %v2947_v58 = vpack.c.bf16 %v2262_v52, %v2262_v52  ;;  %v2948_v59 = vpack.c.bf16 %v2263_v12, %v2263_v12  ;;  %v1705_v13 = vrot.slane %v1704_v57, 4 }
 0x1ef   : > { %v2644_v28 = vsel %vm2598_vm7, %v2580_v4, %v3658_v29  ;;  %v1711_v9 = vsel %vm1311_vm3, %v892_v46, -inf  ;;  %v1718_v41 = vsel %vm1311_vm3, %v891_v17, -inf  ;;  %v1725_v8 = vsel %vm1311_vm3, %v893_v14, -inf }
 0x1f0   : > { %v2581_v0 = vunpack.c.l.b16 %v2946_v16  ;;  %v2582_v15 = vunpack.c.l.b16 %v2947_v58  ;;  %v2583_v44 = vunpack.c.l.b16 %v2948_v59  ;;  %v1706_v45 = vmax.f32 %v1704_v57, %v1705_v13 }
 0x1f1   : > { %v1712_v49 = vrot.slane %v1711_v9, 4  ;;  %v1719_v5 = vrot.slane %v1718_v41, 4  ;;  %v1726_v47 = vrot.slane %v1725_v8, 4  ;;  %v605_v42 = vmax.f32 %v3682_v18, 0.0 }
 0x1f2   : > { %v2645_v50 = vsel %vm2600_vm8, %v2581_v0, %v2644_v28  ;;  %v1707_v61 = vrot.slane %v1706_v45, 2  ;;  %v497_v51 = vadd.f32 %v3721_v38, %v496_v22  ;;  %v561_v7 = vadd.f32 %v3721_v38, %v560_v54 }
 0x1f3   : > { %v2646_v29 = vsel %vm2602_vm9, %v2582_v15, %v2645_v50  ;;  %v1713_v19 = vmax.f32 %v1711_v9, %v1712_v49  ;;  %v1720_v20 = vmax.f32 %v1718_v41, %v1719_v5  ;;  %v1727_v2 = vmax.f32 %v1725_v8, %v1726_v47  ;;  %v2994_v5 = vpop.f32.mrf.mxu0 }
 0x1f4   : > { %v2647_v25 = vsel %vm2604_vm10, %v2583_v44, %v2646_v29  ;;  %v1149_v26 = vcombine.high %v605_v42, %v605_v42  ;;  %v1156_v30 = vrot.slane %v605_v42, %v3242_v31  ;;  %v1708_v24 = vmax.f32 %v1706_v45, %v1707_v61 }
 0x1f5   : > { %v2661_v35 = vpack.c.b16 %v2647_v25, %v2647_v25  ;;  %v1714_v55 = vrot.slane %v1713_v19, 2  ;;  %v1721_v62 = vrot.slane %v1720_v20, 2  ;;  %v1728_v60 = vrot.slane %v1727_v2, 2 }
 0x1f6   : > { %v1163_v18 = vrot.slane %v1149_v26, %v3242_v31  ;;  %v1164_v63 = vcombine.high %v1156_v30, %v1156_v30  ;;  %v2152_v33 = vsel %vm1311_vm3, %v1156_v30, -inf  ;;  %v587_v37 = vmax.f32 %v497_v51, 0.0 }
 0x1f7   : > { %2678 = vst.msk [vmem:[%s3401_s9 + $0x18] sm:$0xf] %vm2671_vm11, %v2661_v35  ;;  %v1715_v27 = vmax.f32 %v1713_v19, %v1714_v55  ;;  %v1722_v34 = vmax.f32 %v1720_v20, %v1721_v62  ;;  %v2153_v48 = vrot.slane %v2152_v33, 4  ;;  %v1729_v1 = vmax.f32 %v1727_v2, %v1728_v60 }
 0x1f8   : > { %v1165_v6 = vcombine.high %v1163_v18, %v1163_v18  ;;  %v2159_v56 = vsel %vm1311_vm3, %v1164_v63, -inf  ;;  %v2166_v53 = vsel %vm1311_vm3, %v1163_v18, -inf  ;;  %v1709_v10 = vrot.slane %v1708_v24, 1 }
 0x1f9   : > { %v2154_v32 = vmax.f32 %v2152_v33, %v2153_v48  ;;  %v2160_v3 = vrot.slane %v2159_v56, 4  ;;  %v2167_v43 = vrot.slane %v2166_v53, 4  ;;  %v1716_v40 = vrot.slane %v1715_v27, 1 }
 0x1fa   : > { %v2173_v23 = vsel %vm1311_vm3, %v1165_v6, -inf  ;;  %v1723_v11 = vrot.slane %v1722_v34, 1  ;;  %v843_v21 = vcombine.high %v587_v37, %v587_v37  ;;  %v1730_v52 = vrot.slane %v1729_v1, 1 }
 0x1fb   : > { %v2161_v39 = vmax.f32 %v2159_v56, %v2160_v3  ;;  %v2168_v17 = vmax.f32 %v2166_v53, %v2167_v43  ;;  %v2174_v36 = vrot.slane %v2173_v23, 4  ;;  %v850_v12 = vrot.slane %v587_v37, %v3242_v31 }
 0x1fc   : > { %v603_v4 = vmax.f32 %v561_v7, 0.0  ;;  %v2155_v46 = vrot.slane %v2154_v32, 2  ;;  %v857_v16 = vrot.slane %v843_v21, %v3242_v31  ;;  %v1710_v58 = vmax.f32 %v1708_v24, %v1709_v10 }
 0x1fd   : > { %v2162_v14 = vrot.slane %v2161_v39, 2  ;;  %v2175_v57 = vmax.f32 %v2173_v23, %v2174_v36  ;;  %v1717_v59 = vmax.f32 %v1715_v27, %v1716_v40  ;;  %v858_v13 = vcombine.high %v850_v12, %v850_v12 }
 0x1fe   : > { %v1648_v28 = vsel %vm1311_vm3, %v850_v12, -inf  ;;  %v3733_v9 = vmax.f32 %v1722_v34, %v1723_v11  ;;  %v2169_v8 = vrot.slane %v2168_v17, 2  ;;  %v859_v0 = vcombine.high %v857_v16, %v857_v16 }
 0x1ff   : > { %v3735_v41 = vmax.f32 %v2161_v39, %v2162_v14  ;;  %v1649_v15 = vrot.slane %v1648_v28, 4  ;;  %v1655_v44 = vsel %vm1311_vm3, %v858_v13, -inf  ;;  %v1662_v45 = vsel %vm1311_vm3, %v857_v16, -inf }
 0x200   : > { %v1115_v49 = vcombine.high %v603_v4, %v603_v4  ;;  %v3739_v47 = vmax.f32 %v1729_v1, %v1730_v52  ;;  %v3741_v42 = vmax.f32 %v2154_v32, %v2155_v46  ;;  %v2176_v50 = vrot.slane %v2175_v57, 2 }
 0x201   : > { %v1656_v61 = vrot.slane %v1655_v44, 4  ;;  %v1650_v29 = vmax.f32 %v1648_v28, %v1649_v15  ;;  %v1663_v19 = vrot.slane %v1662_v45, 4  ;;  %v1669_v20 = vsel %vm1311_vm3, %v859_v0, -inf }
 0x202   : > { %v1122_v2 = vrot.slane %v603_v4, %v3242_v31  ;;  %v2164_v22 = vrot.slane %v3735_v41, 1  ;;  %v3746_v25 = vmax.f32 %v2168_v17, %v2169_v8  ;;  %v508_v30 = vadd.f32 %v3721_v38, %v2994_v5 }
 0x203   : > { %v1657_v26 = vmax.f32 %v1655_v44, %v1656_v61  ;;  %v1651_v35 = vrot.slane %v1650_v29, 2  ;;  %v1664_v55 = vmax.f32 %v1662_v45, %v1663_v19  ;;  %v1670_v62 = vrot.slane %v1669_v20, 4 }
 0x204   : > { %v1129_v60 = vrot.slane %v1115_v49, %v3242_v31  ;;  %v2177_v18 = vmax.f32 %v2175_v57, %v2176_v50  ;;  %v1130_v33 = vcombine.high %v1122_v2, %v1122_v2  ;;  %v2096_v51 = vsel %vm1311_vm3, %v1122_v2, -inf }
 0x205   : > { %v1658_v63 = vrot.slane %v1657_v26, 2  ;;  %v1652_v54 = vmax.f32 %v1650_v29, %v1651_v35  ;;  %v1665_v24 = vrot.slane %v1664_v55, 2  ;;  %v1671_v27 = vmax.f32 %v1669_v20, %v1670_v62 }
 0x206   : > { %v1131_v34 = vcombine.high %v1129_v60, %v1129_v60  ;;  %v2097_v6 = vrot.slane %v2096_v51, 4  ;;  %v2103_v56 = vsel %vm1311_vm3, %v1130_v33, -inf  ;;  %v2110_v53 = vsel %vm1311_vm3, %v1129_v60, -inf }
 0x207   : > { %v1659_v48 = vmax.f32 %v1657_v26, %v1658_v63  ;;  %v1653_v1 = vrot.slane %v1652_v54, 1  ;;  %v1666_v32 = vmax.f32 %v1664_v55, %v1665_v24  ;;  %v1672_v7 = vrot.slane %v1671_v27, 2 }
 0x208   : > { %v2104_v3 = vrot.slane %v2103_v56, 4  ;;  %v2098_v23 = vmax.f32 %v2096_v51, %v2097_v6  ;;  %v2111_v37 = vrot.slane %v2110_v53, 4  ;;  %v2117_v10 = vsel %vm1311_vm3, %v1131_v34, -inf }
 0x209   : > { %v1660_v43 = vrot.slane %v1659_v48, 1  ;;  %v1654_v40 = vmax.f32 %v1652_v54, %v1653_v1  ;;  %v1667_v11 = vrot.slane %v1666_v32, 1  ;;  %v1673_v39 = vmax.f32 %v1671_v27, %v1672_v7  ;;  %v3010_v27 = vpop.f32.mrf.mxu1 }
 0x20a   : > { %v2105_v17 = vmax.f32 %v2103_v56, %v2104_v3  ;;  %v2099_v21 = vrot.slane %v2098_v23, 2  ;;  %v2112_v52 = vmax.f32 %v2110_v53, %v2111_v37  ;;  %v2118_v12 = vrot.slane %v2117_v10, 4  ;;  %v499_v53 = vpop.f32.mrf.mxu0 }
 0x20b   : > { %v1661_v36 = vmax.f32 %v1659_v48, %v1660_v43  ;;  %v1668_v4 = vmax.f32 %v1666_v32, %v1667_v11  ;;  %v1674_v46 = vrot.slane %v1673_v39, 1  ;;  %v2232_v14 = vmax.f32 %v1654_v40, %v1710_v58 }
 0x20c   : > { %v2106_v57 = vrot.slane %v2105_v17, 2  ;;  %v2100_v13 = vmax.f32 %v2098_v23, %v2099_v21  ;;  %v2113_v28 = vrot.slane %v2112_v52, 2  ;;  %v2119_v8 = vmax.f32 %v2117_v10, %v2118_v12 }
 0x20d   : > { %v2233_v16 = vmax.f32 %v1661_v36, %v1717_v59  ;;  %v2157_v0 = vrot.slane %v3741_v42, 1  ;;  %v1675_v15 = vmax.f32 %v1673_v39, %v1674_v46  ;;  %v2234_v44 = vmax.f32 %v1668_v4, %v3733_v9 }
 0x20e   : > { %v2107_v45 = vmax.f32 %v2105_v17, %v2106_v57  ;;  %v2171_v49 = vrot.slane %v3746_v25, 1  ;;  %v2101_v5 = vrot.slane %v2100_v13, 1  ;;  %v2114_v50 = vmax.f32 %v2112_v52, %v2113_v28 }
 0x20f   : > { %v2120_v61 = vrot.slane %v2119_v8, 2  ;;  %v2165_v29 = vmax.f32 %v3735_v41, %v2164_v22  ;;  %v2178_v19 = vrot.slane %v2177_v18, 1  ;;  %v2917_v58 = vpack.c.bf16 %v2232_v14, %v2232_v14 }
 0x210   : > { %v2108_v20 = vrot.slane %v2107_v45, 1  ;;  %v2918_v59 = vpack.c.bf16 %v2233_v16, %v2233_v16  ;;  %v2102_v2 = vmax.f32 %v2100_v13, %v2101_v5  ;;  %v2115_v26 = vrot.slane %v2114_v50, 1 }
 0x211   : > { %v2121_v35 = vmax.f32 %v2119_v8, %v2120_v61  ;;  %v2235_v55 = vmax.f32 %v1675_v15, %v3739_v47  ;;  %v2919_v62 = vpack.c.bf16 %v2234_v44, %v2234_v44  ;;  %v590_v9 = vmax.f32 %v508_v30, 0.0 }
 0x212   : > { %v2109_v60 = vmax.f32 %v2107_v45, %v2108_v20  ;;  %v2158_v63 = vmax.f32 %v3741_v42, %v2157_v0  ;;  %v2116_v33 = vmax.f32 %v2114_v50, %v2115_v26  ;;  %v2172_v54 = vmax.f32 %v3746_v25, %v2171_v49 }
 0x213   : > { %v2122_v51 = vrot.slane %v2121_v35, 1  ;;  %v2179_v24 = vmax.f32 %v2177_v18, %v2178_v19  ;;  %v894_v22 = vcombine.high %v590_v9, %v590_v9  ;;  %v2552_v34 = vunpack.c.l.b16 %v2917_v58 }
 0x214   : > { %v2265_v41 = vmax.f32 %v2109_v60, %v2165_v29  ;;  %v2264_v6 = vmax.f32 %v2102_v2, %v2158_v63  ;;  %v901_v56 = vrot.slane %v590_v9, %v3242_v31  ;;  %v2920_v47 = vpack.c.bf16 %v2235_v55, %v2235_v55 }
 0x215   : > { %v2123_v48 = vmax.f32 %v2121_v35, %v2122_v51  ;;  %v2553_v1 = vunpack.c.l.b16 %v2918_v59  ;;  %v2554_v32 = vunpack.c.l.b16 %v2919_v62  ;;  %v908_v30 = vrot.slane %v894_v22, %v3242_v31  ;;  %v563_v35 = vpop.f32.mrf.mxu1 }
 0x216   : > { %v2266_v42 = vmax.f32 %v2116_v33, %v2172_v54  ;;  %v2950_v7 = vpack.c.bf16 %v2265_v41, %v2265_v41  ;;  %v909_v3 = vcombine.high %v901_v56, %v901_v56  ;;  %v572_v25 = vadd.f32 %v3721_v38, %v3010_v27 }
 0x217   : > { %v910_v18 = vcombine.high %v908_v30, %v908_v30  ;;  %v1732_v43 = vsel %vm1311_vm3, %v901_v56, -inf  ;;  %v1746_v23 = vsel %vm1311_vm3, %v908_v30, -inf  ;;  %v500_v37 = vadd.f32 %v3721_v38, %v499_v53 }
 0x218   : > { %v2267_v10 = vmax.f32 %v2123_v48, %v2179_v24  ;;  %v2949_v40 = vpack.c.bf16 %v2264_v6, %v2264_v6  ;;  %v1733_v11 = vrot.slane %v1732_v43, 4  ;;  %v1739_v39 = vsel %vm1311_vm3, %v909_v3, -inf }
 0x219   : > { %v2620_v17 = vsel %vm2592_vm4, %v2553_v1, %v2552_v34  ;;  %v1740_v36 = vrot.slane %v1739_v39, 4  ;;  %v1747_v21 = vrot.slane %v1746_v23, 4  ;;  %v1753_v52 = vsel %vm1311_vm3, %v910_v18, -inf }
 0x21a   : > { %v2951_v12 = vpack.c.bf16 %v2266_v42, %v2266_v42  ;;  %v2585_v4 = vunpack.c.l.b16 %v2950_v7  ;;  %v1734_v46 = vmax.f32 %v1732_v43, %v1733_v11  ;;  %v1754_v14 = vrot.slane %v1753_v52, 4 }
 0x21b   : > { %v1741_v57 = vmax.f32 %v1739_v39, %v1740_v36  ;;  %v1748_v16 = vmax.f32 %v1746_v23, %v1747_v21  ;;  %v606_v13 = vmax.f32 %v572_v25, 0.0  ;;  %v588_v28 = vmax.f32 %v500_v37, 0.0 }
 0x21c   : > { %v2952_v8 = vpack.c.bf16 %v2267_v10, %v2267_v10  ;;  %v2584_v0 = vunpack.c.l.b16 %v2949_v40  ;;  %v1735_v15 = vrot.slane %v1734_v46, 2  ;;  %v1755_v44 = vmax.f32 %v1753_v52, %v1754_v14 }
 0x21d   : > { %v2555_v45 = vunpack.c.l.b16 %v2920_v47  ;;  %v2621_v49 = vsel %vm2594_vm5, %v2554_v32, %v2620_v17  ;;  %v1166_v5 = vcombine.high %v606_v13, %v606_v13  ;;  %v1173_v50 = vrot.slane %v606_v13, %v3242_v31 }
 0x21e   : > { %v3772_v61 = vunpack.c.l.b16 %v2951_v12  ;;  %v3775_v29 = vsel %vm2592_vm4, %v2585_v4, %v2584_v0  ;;  %v1742_v19 = vrot.slane %v1741_v57, 2  ;;  %v860_v58 = vcombine.high %v588_v28, %v588_v28 }
 0x21f   : > { %v1736_v20 = vmax.f32 %v1734_v46, %v1735_v15  ;;  %v1749_v59 = vrot.slane %v1748_v16, 2  ;;  %v1180_v2 = vrot.slane %v1166_v5, %v3242_v31  ;;  %v1181_v26 = vcombine.high %v1173_v50, %v1173_v50 }
 0x220   : > { %v3778_v55 = vunpack.c.l.b16 %v2952_v8  ;;  %v1756_v62 = vrot.slane %v1755_v44, 2  ;;  %v2180_v60 = vsel %vm1311_vm3, %v1173_v50, -inf  ;;  %v867_v9 = vrot.slane %v588_v28, %v3242_v31 }
 0x221   : > { %v1182_v63 = vcombine.high %v1180_v2, %v1180_v2  ;;  %v2181_v33 = vrot.slane %v2180_v60, 4  ;;  %v874_v51 = vrot.slane %v860_v58, %v3242_v31  ;;  %v3784_v54 = vsel %vm2596_vm6, %v2555_v45, %v2621_v49 }
 0x222   : > { %v1743_v24 = vmax.f32 %v1741_v57, %v1742_v19  ;;  %v2187_v41 = vsel %vm1311_vm3, %v1181_v26, -inf  ;;  %v2194_v22 = vsel %vm1311_vm3, %v1180_v2, -inf  ;;  %v564_v27 = vadd.f32 %v3721_v38, %v563_v35 }
 0x223   : > { %v1737_v34 = vrot.slane %v1736_v20, 1  ;;  %v1750_v48 = vmax.f32 %v1748_v16, %v1749_v59  ;;  %v2182_v6 = vmax.f32 %v2180_v60, %v2181_v33  ;;  %v2188_v56 = vrot.slane %v2187_v41, 4 }
 0x224   : > { %v1757_v53 = vmax.f32 %v1755_v44, %v1756_v62  ;;  %v2195_v47 = vrot.slane %v2194_v22, 4  ;;  %v2201_v1 = vsel %vm1311_vm3, %v1182_v63, -inf  ;;  %v875_v32 = vcombine.high %v867_v9, %v867_v9 }
 0x225   : > { %v2183_v30 = vrot.slane %v2182_v6, 2  ;;  %v2189_v42 = vmax.f32 %v2187_v41, %v2188_v56  ;;  %v2202_v7 = vrot.slane %v2201_v1, 4  ;;  %v876_v3 = vcombine.high %v874_v51, %v874_v51 }
 0x226   : > { %v2196_v25 = vmax.f32 %v2194_v22, %v2195_v47  ;;  %v1676_v18 = vsel %vm1311_vm3, %v867_v9, -inf  ;;  %v1683_v43 = vsel %vm1311_vm3, %v875_v32, -inf  ;;  %v1690_v38 = vsel %vm1311_vm3, %v874_v51, -inf }
 0x227   : > { %v1744_v23 = vrot.slane %v1743_v24, 1  ;;  %v1751_v37 = vrot.slane %v1750_v48, 1  ;;  %v2190_v10 = vrot.slane %v2189_v42, 2  ;;  %v1677_v40 = vrot.slane %v1676_v18, 4 }
 0x228   : > { %v2203_v11 = vmax.f32 %v2201_v1, %v2202_v7  ;;  %v1684_v39 = vrot.slane %v1683_v43, 4  ;;  %v1691_v17 = vrot.slane %v1690_v38, 4  ;;  %v1697_v36 = vsel %vm1311_vm3, %v876_v3, -inf }
 0x229   : > { %v1738_v21 = vmax.f32 %v1736_v20, %v1737_v34  ;;  %v1758_v52 = vrot.slane %v1757_v53, 1  ;;  %v3794_v12 = vmax.f32 %v2182_v6, %v2183_v30  ;;  %v1678_v4 = vmax.f32 %v1676_v18, %v1677_v40 }
 0x22a   : > { %v2197_v46 = vrot.slane %v2196_v25, 2  ;;  %v1685_v14 = vmax.f32 %v1683_v43, %v1684_v39  ;;  %v1692_v57 = vmax.f32 %v1690_v38, %v1691_v17  ;;  %v1698_v16 = vrot.slane %v1697_v36, 4 }
 0x22b   : > { %v1745_v13 = vmax.f32 %v1743_v24, %v1744_v23  ;;  %v1752_v28 = vmax.f32 %v1750_v48, %v1751_v37  ;;  %v3796_v8 = vmax.f32 %v2189_v42, %v2190_v10  ;;  %v1679_v0 = vrot.slane %v1678_v4, 2 }
 0x22c   : > { %v2204_v15 = vrot.slane %v2203_v11, 2  ;;  %v1686_v44 = vrot.slane %v1685_v14, 2  ;;  %v1693_v45 = vrot.slane %v1692_v57, 2  ;;  %v1699_v49 = vmax.f32 %v1697_v36, %v1698_v16 }
 0x22d   : > { %v1759_v5 = vmax.f32 %v1757_v53, %v1758_v52  ;;  %v2185_v50 = vrot.slane %v3794_v12, 1  ;;  %v1680_v19 = vmax.f32 %v1678_v4, %v1679_v0  ;;  %v604_v58 = vmax.f32 %v564_v27, 0.0 }
 0x22e   : > { %v3799_v20 = vmax.f32 %v2196_v25, %v2197_v46  ;;  %v1687_v59 = vmax.f32 %v1685_v14, %v1686_v44  ;;  %v1694_v2 = vmax.f32 %v1692_v57, %v1693_v45  ;;  %v1700_v26 = vrot.slane %v1699_v49, 2 }
 0x22f   : > { %v2192_v35 = vrot.slane %v3796_v8, 1  ;;  %v1681_v62 = vrot.slane %v1680_v19, 1  ;;  %v1132_v60 = vcombine.high %v604_v58, %v604_v58  ;;  %v1139_v9 = vrot.slane %v604_v58, %v3242_v31 }
 0x230   : > { %v3803_v63 = vmax.f32 %v2203_v11, %v2204_v15  ;;  %v1688_v33 = vrot.slane %v1687_v59, 1  ;;  %v1695_v51 = vrot.slane %v1694_v2, 1  ;;  %v1701_v24 = vmax.f32 %v1699_v49, %v1700_v26 }
 0x231   : > { %v1682_v41 = vmax.f32 %v1680_v19, %v1681_v62  ;;  %v1146_v22 = vrot.slane %v1132_v60, %v3242_v31  ;;  %v1147_v27 = vcombine.high %v1139_v9, %v1139_v9  ;;  %v2124_v34 = vsel %vm1311_vm3, %v1139_v9, -inf }
 0x232   : > { %v1689_v48 = vmax.f32 %v1687_v59, %v1688_v33  ;;  %v1696_v6 = vmax.f32 %v1694_v2, %v1695_v51  ;;  %v1702_v56 = vrot.slane %v1701_v24, 1  ;;  %v2125_v53 = vrot.slane %v2124_v34, 4 }
 0x233   : > { %v2236_v47 = vmax.f32 %v1682_v41, %v1738_v21  ;;  %v1148_v1 = vcombine.high %v1146_v22, %v1146_v22  ;;  %v2131_v32 = vsel %vm1311_vm3, %v1147_v27, -inf  ;;  %v2138_v30 = vsel %vm1311_vm3, %v1146_v22, -inf }
 0x234   : > { %v1703_v42 = vmax.f32 %v1701_v24, %v1702_v56  ;;  %v2237_v7 = vmax.f32 %v1689_v48, %v1745_v13  ;;  %v2238_v3 = vmax.f32 %v1696_v6, %v1752_v28  ;;  %v2126_v25 = vmax.f32 %v2124_v34, %v2125_v53 }
 0x235   : > { %v2921_v18 = vpack.c.bf16 %v2236_v47, %v2236_v47  ;;  %v2132_v43 = vrot.slane %v2131_v32, 4  ;;  %v2139_v31 = vrot.slane %v2138_v30, 4  ;;  %v2145_v38 = vsel %vm1311_vm3, %v1148_v1, -inf }
 0x236   : > { %v2239_v23 = vmax.f32 %v1703_v42, %v1759_v5  ;;  %v2922_v37 = vpack.c.bf16 %v2237_v7, %v2237_v7  ;;  %v2923_v10 = vpack.c.bf16 %v2238_v3, %v2238_v3  ;;  %v2127_v40 = vrot.slane %v2126_v25, 2 }
 0x237   : > { %v2556_v11 = vunpack.c.l.b16 %v2921_v18  ;;  %v2133_v39 = vmax.f32 %v2131_v32, %v2132_v43  ;;  %v2140_v17 = vmax.f32 %v2138_v30, %v2139_v31  ;;  %v2146_v36 = vrot.slane %v2145_v38, 4 }
 0x238   : > { %v2924_v21 = vpack.c.bf16 %v2239_v23, %v2239_v23  ;;  %v2557_v52 = vunpack.c.l.b16 %v2922_v37  ;;  %v2558_v4 = vunpack.c.l.b16 %v2923_v10  ;;  %v2128_v46 = vmax.f32 %v2126_v25, %v2127_v40 }
 0x239   : > { %v2623_v14 = vsel %vm2598_vm7, %v2556_v11, %v3784_v54  ;;  %v2134_v57 = vrot.slane %v2133_v39, 2  ;;  %v2141_v16 = vrot.slane %v2140_v17, 2  ;;  %v2147_v13 = vmax.f32 %v2145_v38, %v2146_v36 }
 0x23a   : > { %v2199_v28 = vrot.slane %v3799_v20, 1  ;;  %v2559_v0 = vunpack.c.l.b16 %v2924_v21  ;;  %v2624_v15 = vsel %vm2600_vm8, %v2557_v52, %v2623_v14  ;;  %v2129_v44 = vrot.slane %v2128_v46, 1 }
 0x23b   : > { %v2625_v45 = vsel %vm2602_vm9, %v2558_v4, %v2624_v15  ;;  %v2135_v49 = vmax.f32 %v2133_v39, %v2134_v57  ;;  %v2142_v5 = vmax.f32 %v2140_v17, %v2141_v16  ;;  %v2148_v19 = vrot.slane %v2147_v13, 2 }
 0x23c   : > { %v2186_v58 = vmax.f32 %v3794_v12, %v2185_v50  ;;  %v2206_v59 = vrot.slane %v3803_v63, 1  ;;  %v2626_v54 = vsel %vm2604_vm10, %v2559_v0, %v2625_v45  ;;  %v2130_v2 = vmax.f32 %v2128_v46, %v2129_v44 }
 0x23d   : > { %v2658_v26 = vpack.c.b16 %v2626_v54, %v2626_v54  ;;  %v2136_v62 = vrot.slane %v2135_v49, 1  ;;  %v2143_v60 = vrot.slane %v2142_v5, 1  ;;  %v2149_v9 = vmax.f32 %v2147_v13, %v2148_v19 }
 0x23e   : > { %v2649_v33 = vsel %vm2594_vm5, %v3772_v61, %v3775_v29  ;;  %v2193_v51 = vmax.f32 %v3796_v8, %v2192_v35  ;;  %v2268_v24 = vmax.f32 %v2130_v2, %v2186_v58  ;;  %v2200_v41 = vmax.f32 %v3799_v20, %v2199_v28 }
 0x23f   : > { %2675 = vst.msk [vmem:[%s3401_s9 + $0xc] sm:$0xf] %vm2671_vm11, %v2658_v26  ;;  %v2137_v12 = vmax.f32 %v2135_v49, %v2136_v62  ;;  %v2144_v50 = vmax.f32 %v2142_v5, %v2143_v60  ;;  %v2150_v22 = vrot.slane %v2149_v9, 1  ;;  %v2207_v27 = vmax.f32 %v3803_v63, %v2206_v59 }
 0x240   : > { %v2953_v34 = vpack.c.bf16 %v2268_v24, %v2268_v24  ;;  %v2650_v61 = vsel %vm2596_vm6, %v3778_v55, %v2649_v33 }
 0x241   : > { %v2151_v48 = vmax.f32 %v2149_v9, %v2150_v22  ;;  %v2269_v6 = vmax.f32 %v2137_v12, %v2193_v51  ;;  %v2270_v56 = vmax.f32 %v2144_v50, %v2200_v41 }
 0x242   : > { %v2588_v29 = vunpack.c.l.b16 %v2953_v34 }
 0x243   : > { %v2271_v8 = vmax.f32 %v2151_v48, %v2207_v27  ;;  %v2954_v35 = vpack.c.bf16 %v2269_v6, %v2269_v6  ;;  %v2955_v53 = vpack.c.bf16 %v2270_v56, %v2270_v56 }
 0x244   : > { %v2651_v20 = vsel %vm2598_vm7, %v2588_v29, %v2650_v61 }
 0x245   : > { %v2956_v47 = vpack.c.bf16 %v2271_v8, %v2271_v8  ;;  %v2589_v1 = vunpack.c.l.b16 %v2954_v35  ;;  %v2590_v32 = vunpack.c.l.b16 %v2955_v53 }
 0x247   : > { %v2591_v30 = vunpack.c.l.b16 %v2956_v47  ;;  %v2652_v63 = vsel %vm2600_vm8, %v2589_v1, %v2651_v20 }
 0x248   : > { %v2653_v42 = vsel %vm2602_vm9, %v2590_v32, %v2652_v63 }
 0x249   : > { %v2654_v7 = vsel %vm2604_vm10, %v2591_v30, %v2653_v42 }
 0x24a   : > { %v2662_v3 = vpack.c.b16 %v2654_v7, %v2654_v7 }
 0x24c   : > { %2679 = vst.msk [vmem:[%s3401_s9 + $0x1c] sm:$0xf] %vm2671_vm11, %v2662_v3 }
 0x24d PF: > { %s14_s14 = sadd.s32 1, %s3124_s14   ;;  %s3849_s12 = smov %s3120_s13 }
 0x24e   : > { %p11_p2 = scmp.ge.s32.totalorder %s14_s14, 4   ;;  %s3850_s13 = smov %s3852_s16 }
 0x250   :  { %13 = sbr.rel (!%p11_p2) target bundleno = 2 (0x2), region = 67 }
 0x255   :  { %2710 = vsyncpa [#allocation3], 1 }
 0x256   :  { %2712 = vsyncpa [#allocation3 + $0x1], 1 }

// kernel: multi_label_cnn_forward.9
= control target key start
LH: loop header
LB: loop body
LE: loop exit
PB: predicated region body
PF: predicated region fallthrough
CT: control target
= control target key end

     0   :  { %8 = vsyncpa [#allocation3], 0  ;;  %s2816_s12 = smov 0   ;;  %s3297_s0 = inlined_call_operand.vmem [shape: bf16[2,10,10,64], index: 0, kind: input, shape index: {}]   ;;  %s3298_s1 = inlined_call_operand.hbm [shape: bf16[9,64,128], index: 1, kind: input, shape index: {}]   ;;  %s3299_s2 = inlined_call_operand.vmem [shape: f32[1,128], index: 2, kind: input, shape index: {}]   ;;  %s3300_s3 = inlined_call_operand.vmem [shape: bf16[2,4,4,128], index: 3, kind: output, shape index: {}]  }
   0x1 LB: > { %s2335_s13 = sadd.s32 4294967295, %s2790_s12   ;;  %p2337_p0 = scmp.ge.s32.totalorder %s2790_s12, 1  ;;  %s2790_s12 = sphi %s2816_s12, %s14_s12  }
   0x2   : > { %p113_p1 = scmp.lt.s32.totalorder %s2790_s12, 3  ;;  %s2792_s14 = smov [#allocation2]  }
   0x3   : > { %s125_s15 = sshll.u32 %s2792_s14, 4  ;;  %p2695_p3 = scmp.eq.s32.totalorder %s2335_s13, 0  ;;  %s126_s15 = int_to_ptr.vmem [resolvable:$true] %s125_s15 }
   0x4   : > { %p2824_p2 = pnand %p2337_p0, %p113_p1  ;;  %s2765_s17 = scalar_lea.vmem %s126_s15, 4608 }
   0x5   : > { %p2766_p7 = scmp.ne.s32.totalorder %s126_s15, %s2765_s17  ;;  %p2773_p10 = scmp.lt.s32.totalorder %s126_s15, %s126_s15 }
   0x6   : > { %p2691_p4 = pneg %p2824_p2  ;;  %p2774_p11 = scmp.lt.s32.totalorder %s2765_s17, %s2765_s17 }
   0x8   : > { %p2692_p5 = pnand %p2695_p3, %p2691_p4  ;;  %p2775_p12 = por %p2774_p11, %p2773_p10 }
   0xa   : > { %p2756_p6 = pneg %p2692_p5 }
   0xc   : > { %p2768_p8 = pnand %p2766_p7, %p2756_p6 }
   0xe   : > { %p2769_p9 = pneg %p2768_p8 }
  0x10   : > { %p2776_p13 = pnand %p2775_p12, %p2769_p9 }
  0x12   : > { %2779 = shalt.err (!%p2776_p13)
}
  0x13   : > { %s2793_s18 = smov 64   ;;  %s2794_s19 = smov 4  }
  0x14   : > { %2694 = dma.hbm_to_vmem [thread:$0]  (!%p2692_p5), %s3298_s1, 4608, %s126_s15, [#allocation3], %s2793_s18, %s2793_s18, %s2794_s19  }
  0x15   : > { %152 = sbr.rel (%p2824_p2) target bundleno = 416 (0x1a0), region = 32 }
  0x1a   : > { %2785 = dma.done.wait (%p2695_p3), [#allocation3], 4608  }
  0x1b   : > { %2787 = vsyncadd (%p2695_p3), [#allocation3], 4294962688  ;;  %p176_p0 = scmp.lt.s32.totalorder %s2335_s13, 1  ;;  %v2709_v0 = vld [vmem:[#allocation2 + $0x78] sm:$0xff]   ;;  %v2711_v2 = vld [vmem:[#allocation2 + $0x70] sm:$0xff]   ;;  %vm268_vm0 = vcmask 523264  }
  0x1c   : > { %v2710_v1 = vld [vmem:[#allocation2 + $0x18] sm:$0xff]   ;;  %2534 = vmatprep.subr.bf16.mxu0 %v2709_v0  ;;  %v2712_v3 = vld [vmem:[#allocation2 + $0x10] sm:$0xff]   ;;  %v2713_v4 = vld [vmem:[#allocation2 + $0x68] sm:$0xff]   ;;  %vm565_vm1 = vsmask.f32 3328  ;;  %vm1080_vm4 = vcmask 1042432  }
  0x1d   : > { %s3307_s13 = smov (!%p176_p0, %s2335_s13), 1  ;;  %2550 = vmatprep.subr.bf16.mxu1 %v2710_v1  ;;  %2535 = vmatpush3.bf16.msra.mxu0 %v2709_v0  ;;  %v2714_v5 = vld [vmem:[#allocation2 + $0x8] sm:$0xff]   ;;  %v2715_v6 = vld [vmem:[#allocation2 + $0x60] sm:$0xff]   ;;  %v2721_v23 = vld [vmem:[#allocation2 + $0xd8] sm:$0xff]   ;;  %vm566_vm2 = vsmask.f32 7440 }
  0x1e   : > { %s2686_s22 = smul.u32 80, %s3307_s13  ;;  %2551 = vmatpush3.bf16.msra.mxu1 %v2710_v1  ;;  %2536 = vmatprep.subr.bf16.mxu0 %v2711_v2  ;;  %v2716_v10 = vld [vmem:[#allocation2] sm:$0xff]   ;;  %v2722_v24 = vld [vmem:[#allocation2 + $0x38] sm:$0xff]   ;;  %v2723_v34 = vld [vmem:[#allocation2 + $0xd0] sm:$0xff]   ;;  %vm1081_vm5 = vcmask 1046532   ;;  %vm1688_vm7 = vcmask 1041408  }
  0x1f   : > { %2552 = vmatprep.subr.bf16.mxu1 %v2712_v3  ;;  %v2724_v41 = vld [vmem:[#allocation2 + $0x30] sm:$0xff]   ;;  %v2729_v46 = vld [vmem:[#allocation2 + $0xc8] sm:$0xff]   ;;  %v2731_v56 = vld [vmem:[#allocation2 + $0xc0] sm:$0xff]   ;;  %vm2202_vm8 = vcmask 1041409   ;;  %vm2205_vm9 = vcmask 1042434   ;;  %vm2208_vm10 = vcmask 1043459  }
  0x20   : > { %s2844_s25 = scalar_lea.vmem %s3297_s0, %s2686_s22  ;;  %v2730_v50 = vld [vmem:[#allocation2 + $0x28] sm:$0xff]   ;;  %vm2928_vm3 = vmor %vm565_vm1, %vm566_vm2  ;;  %v2732_v1 = vld [vmem:[#allocation2 + $0x20] sm:$0xff]   ;;  %s2461_s28 = sshll.u32 %s3307_s13, 3 }
  0x21   : > { %2537 = vmatpush3.bf16.msra.mxu0 %v2711_v2  ;;  %v2847_v7 = vld [vmem:[%s2844_s25 + $0x8] sm:$0xf]  ;;  %v2850_v8 = vld [vmem:[%s2844_s25 + $0x10] sm:$0xf]  ;;  %v2853_v9 = vld [vmem:[%s2844_s25] sm:$0xf]  ;;  %s3230_s4 = scalar_lea.vmem %s3300_s3, %s2461_s28 }
  0x22   : > { %2553 = vmatpush3.bf16.msra.mxu1 %v2712_v3  ;;  %2538 = vmatprep.subr.bf16.mxu0 %v2713_v4  ;;  %v2345_v11 = vcombine.low %v2847_v7, %v2850_v8  ;;  %v583_v12 = vshrl.u32 %v2847_v7, 16  ;;  %v586_v13 = vshll.u32 %v2847_v7, 16  ;;  %v597_v14 = vshrl.u32 %v2850_v8, 16  ;;  %v2861_v15 = vld [vmem:[%s2844_s25 + $0x18] sm:$0xf]  ;;  %vm3041_vm6 = vmor %vm1080_vm4, %vm1081_vm5 }
  0x23   : > { %2554 = vmatprep.subr.bf16.mxu1 %v2714_v5  ;;  %v600_v16 = vshll.u32 %v2850_v8, 16  ;;  %v2357_v17 = vcombine.low %v2853_v9, %v2847_v7  ;;  %v569_v18 = vshrl.u32 %v2853_v9, 16  ;;  %v572_v19 = vshll.u32 %v2853_v9, 16  ;;  %v2869_v20 = vld [vmem:[%s2844_s25 + $0x20] sm:$0xf] }
  0x24   : > { %2542 = vmatprep.mubr.msk.bf16.mxu0 %vm268_vm0, %v2345_v11  ;;  %v585_v21 = vrot.slane %v583_v12, 4  ;;  %v599_v22 = vrot.slane %v597_v14, 4  ;;  %v588_v25 = vrot.slane %v586_v13, 5  ;;  %v611_v29 = vshrl.u32 %v2861_v15, 16  ;;  %v2882_v38 = vld [vmem:[%s2844_s25 + $0x28] sm:$0xf] }
  0x25   : > { %2539 = vmatpush3.bf16.msra.mxu0 %v2713_v4  ;;  %v602_v26 = vrot.slane %v600_v16, 5  ;;  %v571_v27 = vrot.slane %v569_v18, 4  ;;  %v574_v28 = vrot.slane %v572_v19, 5  ;;  %2558 = vmatprep.mubr.msk.bf16.mxu1 %vm268_vm0, %v2357_v17  ;;  %v614_v30 = vshll.u32 %v2861_v15, 16  ;;  %v2885_v39 = vld [vmem:[%s2844_s25 + $0x30] sm:$0xf] }
  0x26   : > { %2555 = vmatpush3.bf16.msra.mxu1 %v2714_v5  ;;  %2540 = vmatprep.subr.bf16.mxu0 %v2715_v6  ;;  %v2346_v32 = vcombine.low %v2861_v15, %v2869_v20  ;;  %v2879_v33 = vcombine.low %v2850_v8, %v2861_v15  ;;  %v613_v36 = vrot.slane %v611_v29, 4  ;;  %v2347_v42 = vcombine.low %v2882_v38, %v2885_v39  ;;  %v2890_v43 = vld [vmem:[%s2844_s25 + $0x38] sm:$0xf]  ;;  %v2900_v47 = vld [vmem:[%s2844_s25 + $0x40] sm:$0xf]  ;;  %v2735_v29 = vld [vmem:[#allocation2 + $0x90] sm:$0xff]  }
  0x27   : > { %2556 = vmatprep.subr.bf16.mxu1 %v2716_v10  ;;  %v603_v31 = vor.u32 %v602_v26, %v599_v22  ;;  %v575_v35 = vor.u32 %v574_v28, %v571_v27  ;;  %v616_v37 = vrot.slane %v614_v30, 5  ;;  %v589_v44 = vor.u32 %v588_v25, %v585_v21  ;;  %v2904_v51 = vld [vmem:[%s2844_s25 + $0x4] sm:$0x1]  ;;  %v2907_v52 = vld [vmem:[%s2844_s25 + $0xc] sm:$0x1]  ;;  %v2733_v19 = vld [vmem:[#allocation2 + $0x98] sm:$0xff]  }
  0x28   : > { %v2895_v45 = vcombine.low %v2869_v20, %v2882_v38  ;;  %v625_v54 = vshrl.u32 %v2869_v20, 16  ;;  %v2348_v55 = vcombine.low %v2890_v43, %v2900_v47  ;;  %v578_v57 = vshll.u32 %v2904_v51, 16  ;;  %v2917_v59 = vld [vmem:[%s2844_s25 + $0x14] sm:$0x1]  ;;  %v2920_v60 = vld [vmem:[%s2844_s25 + $0x1c] sm:$0x1] }
  0x29   : > { %2541 = vmatpush3.bf16.msra.mxu0 %v2715_v6  ;;  %v604_v40 = vrot.slane %v603_v31, 4  ;;  %v576_v48 = vrot.slane %v575_v35, 4  ;;  %v617_v49 = vor.u32 %v616_v37, %v613_v36  ;;  %v590_v53 = vrot.slane %v589_v44, 4  ;;  %v2949_v14 = vld [vmem:[%s2844_s25 + $0x24] sm:$0x1]  ;;  %v2734_v25 = vld [vmem:[#allocation2 + $0xf8] sm:$0xff]  }
  0x2a   : > { %2557 = vmatpush3.bf16.msra.mxu1 %v2716_v10  ;;  %2566 = vmatprep.subr.bf16.mxu0 %v2721_v23  ;;  %v592_v58 = vshll.u32 %v2907_v52, 16  ;;  %v2924_v61 = vcombine.low %v2885_v39, %v2890_v43  ;;  %v606_v63 = vshll.u32 %v2917_v59, 16  ;;  %v620_v0 = vshll.u32 %v2920_v60, 16  ;;  %v2957_v21 = vld [vmem:[%s2844_s25 + $0x2c] sm:$0x1] }
  0x2b   : > { %2582 = vmatprep.subr.bf16.mxu1 %v2722_v24  ;;  %v580_v2 = vrot.slane %v578_v57, 5  ;;  %v618_v4 = vrot.slane %v617_v49, 4  ;;  %v627_v16 = vrot.slane %v625_v54, 4  ;;  %v628_v17 = vshll.u32 %v2869_v20, 16  ;;  %v2975_v37 = vld [vmem:[%s2844_s25 + $0x48] sm:$0xf] }
  0x2c   : > { %2543 = vmatmul.mubr.msk.bf16.vlgmr.msra.gmra.mxu0 %vm268_vm0, %v2346_v32  ;;  %v594_v3 = vrot.slane %v592_v58, 5  ;;  %v608_v5 = vrot.slane %v606_v63, 5  ;;  %v622_v6 = vrot.slane %v620_v0, 5  ;;  %v634_v22 = vshll.u32 %v2949_v14, 16  ;;  %v2968_v32 = vld [vmem:[%s2844_s25 + $0x34] sm:$0x1] }
  0x2d   : > { %2559 = vmatmul.mubr.msk.bf16.vlgmr.msra.gmra.mxu1 %vm268_vm0, %v2879_v33  ;;  %2567 = vmatpush3.bf16.msra.mxu0 %v2721_v23  ;;  %v581_v10 = vsel %vm2928_vm3, %v576_v48, %v580_v2  ;;  %v639_v23 = vshrl.u32 %v2882_v38, 16  ;;  %v630_v26 = vrot.slane %v628_v17, 5  ;;  %v648_v27 = vshll.u32 %v2957_v21, 16  ;;  %v2738_v63 = vld [vmem:[#allocation2 + $0x88] sm:$0xff]  }
  0x2e   : > { %2583 = vmatpush3.bf16.msra.mxu1 %v2722_v24  ;;  %2568 = vmatprep.subr.bf16.mxu0 %v2723_v34  ;;  %v2939_v11 = vsel %vm2928_vm3, %v590_v53, %v594_v3  ;;  %v2946_v13 = vsel %vm2928_vm3, %v604_v40, %v608_v5  ;;  %v2954_v18 = vsel %vm2928_vm3, %v618_v4, %v622_v6  ;;  %v642_v24 = vshll.u32 %v2882_v38, 16  ;;  %v2978_v40 = vld [vmem:[%s2844_s25 + $0x3c] sm:$0x1]  ;;  %v2739_v4 = vld [vmem:[#allocation2 + $0xe8] sm:$0xff]  }
  0x2f   : > { %2584 = vmatprep.subr.bf16.mxu1 %v2724_v41  ;;  %2546 = vmatprep.mubr.msk.bf16.mxu0 %vm268_vm0, %v2347_v42  ;;  %v2378_v12 = vcombine.low %v581_v10, %v2939_v11  ;;  %v653_v28 = vshrl.u32 %v2885_v39, 16  ;;  %v641_v30 = vrot.slane %v639_v23, 4  ;;  %v636_v35 = vrot.slane %v634_v22, 5  ;;  %v2740_v22 = vld [vmem:[#allocation2 + $0x80] sm:$0xff]  }
  0x30   : > { %2562 = vmatprep.mubr.msk.bf16.mxu1 %vm268_vm0, %v2895_v45  ;;  %v644_v31 = vrot.slane %v642_v24, 5  ;;  %v650_v36 = vrot.slane %v648_v27, 5  ;;  %v662_v48 = vshll.u32 %v2968_v32, 16  ;;  %v670_v53 = vshll.u32 %v2890_v43, 16  ;;  %v3014_v24 = vld [vmem:[%s2844_s25 + $0x44] sm:$0x1] }
  0x31   : > { %2569 = vmatpush3.bf16.msra.mxu0 %v2723_v34  ;;  %v2972_v34 = vcombine.low %v2946_v13, %v2954_v18  ;;  %v655_v44 = vrot.slane %v653_v28, 4  ;;  %v676_v54 = vshll.u32 %v2978_v40, 16  ;;  %v811_v27 = vshrl.u32 %v2900_v47, 16 }
  0x32   : > { %2585 = vmatpush3.bf16.msra.mxu1 %v2724_v41  ;;  %2570 = vmatprep.subr.bf16.mxu0 %v2729_v46  ;;  %v2736_v41 = vld [vmem:[#allocation2 + $0xf0] sm:$0xff]   ;;  %v645_v42 = vor.u32 %v644_v31, %v641_v30  ;;  %v664_v58 = vrot.slane %v662_v48, 5  ;;  %v672_v2 = vrot.slane %v670_v53, 5  ;;  %v814_v28 = vshll.u32 %v2900_v47, 16 }
  0x33   : > { %2586 = vmatprep.subr.bf16.mxu1 %v2730_v50  ;;  %v678_v3 = vrot.slane %v676_v54, 5  ;;  %v813_v31 = vrot.slane %v811_v27, 4  ;;  %v1105_v62 = vrot.slane %v2957_v21, 5 }
  0x34   : > { %2547 = vmatmul.mubr.msk.bf16.gmra.mxu0 %vm268_vm0, %v2348_v55  ;;  %v646_v55 = vrot.slane %v645_v42, 4 }
  0x35   : > { %2563 = vmatmul.mubr.msk.bf16.gmra.mxu1 %vm268_vm0, %v2924_v61  ;;  %2571 = vmatpush3.bf16.msra.mxu0 %v2729_v46  ;;  %v656_v46 = vshll.u32 %v2885_v39, 16 }
  0x36   : > { %2587 = vmatpush3.bf16.msra.mxu1 %v2730_v50  ;;  %2572 = vmatprep.subr.bf16.mxu0 %v2731_v56  ;;  %v667_v50 = vshrl.u32 %v2890_v43, 16 }
  0x37   : > { %2588 = vmatprep.subr.bf16.mxu1 %v2732_v1  ;;  %2574 = vmatprep.mubr.msk.bf16.mxu0 %vm268_vm0, %v2879_v33  ;;  %v631_v33 = vor.u32 %v630_v26, %v627_v16  ;;  %v658_v57 = vrot.slane %v656_v46, 5  ;;  %v951_v16 = vshll.u32 %v2975_v37, 16  ;;  %v2741_v26 = vld [vmem:[#allocation2 + $0xe0] sm:$0xff]   ;;  %v2411_v46 = vrot.slane %v2853_v9, 9 }
  0x38   : > { %2590 = vmatprep.mubr.msk.bf16.mxu1 %vm268_vm0, %v2378_v12  ;;  %v2369_v12 = vcombine.low %v2900_v47, %v2975_v37  ;;  %v1089_v9 = vrot.slane %v2907_v52, 5  ;;  %v2746_v52 = vld [vmem:[#allocation2 + $0x48] sm:$0xff]  }
  0x39   : > { %2573 = vmatpush3.bf16.msra.mxu0 %v2731_v56  ;;  %v632_v49 = vrot.slane %v631_v33, 4  ;;  %v948_v56 = vshrl.u32 %v2975_v37, 16  ;;  %v659_v5 = vor.u32 %v658_v57, %v655_v44  ;;  %v953_v30 = vrot.slane %v951_v16, 5 }
  0x3a   : > { %2589 = vmatpush3.bf16.msra.mxu1 %v2732_v1  ;;  %2598 = vmatprep.subr.bf16.mxu0 %v2733_v19  ;;  %v669_v1 = vrot.slane %v667_v50, 4  ;;  %v816_v33 = vrot.slane %v814_v28, 5  ;;  %v2744_v50 = vld [vmem:[#allocation2 + $0x50] sm:$0xff]   ;;  %v2412_v57 = vrot.slane %v2847_v7, 9  ;;  %v2416_v16 = vrot.slane %v2882_v38, 9 }
  0x3b   : > { %2614 = vmatprep.subr.bf16.mxu1 %v2734_v25  ;;  %v2992_v0 = vsel %vm2928_vm3, %v632_v49, %v636_v35  ;;  %v660_v17 = vrot.slane %v659_v5, 4  ;;  %v820_v35 = vshll.u32 %v3014_v24, 16  ;;  %v2743_v49 = vld [vmem:[#allocation2 + $0xb8] sm:$0xff]   ;;  %v2414_v5 = vrot.slane %v2861_v15, 9  ;;  %v2751_v28 = vld [vmem:[#allocation2 + $0x110] sm:$0xff]  }
  0x3c   : > { %2575 = vmatmul.mubr.msk.bf16.vlgmr.msra.gmra.mxu0 %vm268_vm0, %v2895_v45  ;;  %v2996_v45 = vsel %vm2928_vm3, %v646_v55, %v650_v36  ;;  %v673_v10 = vor.u32 %v672_v2, %v669_v1  ;;  %v2742_v36 = vld [vmem:[#allocation2 + $0x58] sm:$0xff]   ;;  %v2391_v48 = vcombine.low %v2954_v18, %v2992_v0  ;;  %v1090_v2 = vsel %vm3041_vm6, %v2412_v57, %v1089_v9 }
  0x3d   : > { %2591 = vmatmul.mubr.msk.bf16.vlgmr.msra.gmra.mxu1 %vm268_vm0, %v2972_v34  ;;  %2599 = vmatpush3.bf16.msra.mxu0 %v2733_v19  ;;  %v3002_v6 = vcombine.low %v2992_v0, %v2996_v45  ;;  %v665_v23 = vsel %vm2928_vm3, %v660_v17, %v664_v58  ;;  %v822_v55 = vrot.slane %v820_v35, 5  ;;  %v2413_v0 = vrot.slane %v2850_v8, 9 }
  0x3e   : > { %2615 = vmatpush3.bf16.msra.mxu1 %v2734_v25  ;;  %2600 = vmatprep.subr.bf16.mxu0 %v2735_v29  ;;  %v674_v19 = vrot.slane %v673_v10, 4  ;;  %v2392_v53 = vcombine.low %v2996_v45, %v665_v23  ;;  %v1101_v17 = vrot.slane %v2949_v14, 5  ;;  %v2417_v15 = vrot.slane %v2885_v39, 9  ;;  %v2750_v14 = vld [vmem:[#allocation2 + $0x118] sm:$0xff]  }
  0x3f   : > { %2616 = vmatprep.subr.bf16.mxu1 %v2736_v41  ;;  %2578 = vmatprep.mubr.msk.bf16.mxu0 %vm268_vm0, %v2924_v61  ;;  %v2390_v61 = vcombine.low %v2939_v11, %v2946_v13  ;;  %v3025_v13 = vld [vmem:[%s2844_s25 + $0x4c] sm:$0x1]  ;;  %v2444_v35 = vrot.slane %v2975_v37, 9 }
  0x40   : > { %2594 = vmatprep.mubr.msk.bf16.mxu1 %vm268_vm0, %v3002_v6  ;;  %v3018_v25 = vsel %vm2928_vm3, %v674_v19, %v678_v3  ;;  %v957_v44 = vshll.u32 %v3025_v13, 16  ;;  %v2747_v3 = vld [vmem:[#allocation2 + $0xa8] sm:$0xff]   ;;  %v2415_v19 = vrot.slane %v2869_v20, 9  ;;  %v1106_v20 = vsel %vm3041_vm6, %v2416_v16, %v1105_v62 }
  0x41   : > { %2601 = vmatpush3.bf16.msra.mxu0 %v2735_v29  ;;  %v2381_v11 = vcombine.low %v665_v23, %v3018_v25  ;;  %v950_v29 = vrot.slane %v948_v56, 4  ;;  %v2745_v56 = vld [vmem:[#allocation2 + $0xb0] sm:$0xff]  }
  0x42   : > { %2617 = vmatpush3.bf16.msra.mxu1 %v2736_v41  ;;  %2602 = vmatprep.subr.bf16.mxu0 %v2738_v63  ;;  %v817_v41 = vor.u32 %v816_v33, %v813_v31  ;;  %v959_v58 = vrot.slane %v957_v44, 5  ;;  %v1102_v21 = vsel %vm3041_vm6, %v2415_v19, %v1101_v17  ;;  %v2753_v33 = vld [vmem:[#allocation2 + $0x100] sm:$0xff]  }
  0x43   : > { %2618 = vmatprep.subr.bf16.mxu1 %v2739_v4  ;;  %v954_v42 = vor.u32 %v953_v30, %v950_v29  ;;  %v2421_v23 = vcombine.low %v1102_v21, %v1106_v20  ;;  %v2431_v29 = vrot.slane %v2900_v47, 9  ;;  %v1248_v30 = vrot.slane %v3014_v24, 5 }
  0x44   : > { %2579 = vmatmul.mubr.msk.bf16.gmra.mxu0 %vm268_vm0, %v2369_v12  ;;  %v818_v54 = vrot.slane %v817_v41, 4  ;;  %v2748_v12 = vld [vmem:[#allocation2 + $0x40] sm:$0xff]  }
  0x45   : > { %2603 = vmatpush3.bf16.msra.mxu0 %v2738_v63  ;;  %2606 = vmatprep.mubr.msk.bf16.mxu0 %vm268_vm0, %v2390_v61  ;;  %v955_v18 = vrot.slane %v954_v42, 4  ;;  %v2749_v61 = vld [vmem:[#allocation2 + $0xa0] sm:$0xff]   ;;  %v1249_v47 = vsel %vm3041_vm6, %v2431_v29, %v1248_v30 }
  0x46   : > { %2595 = vmatmul.mubr.msk.bf16.gmra.mxu1 %vm268_vm0, %v2381_v11  ;;  %2604 = vmatprep.subr.bf16.mxu0 %v2740_v22  ;;  %v823_v7 = vsel %vm2928_vm3, %v818_v54, %v822_v55 }
  0x47   : > { %2619 = vmatpush3.bf16.msra.mxu1 %v2739_v4  ;;  %2622 = vmatprep.mubr.msk.bf16.mxu1 %vm268_vm0, %v2972_v34  ;;  %v1085_v34 = vrot.slane %v2904_v51, 5  ;;  %v1093_v51 = vrot.slane %v2917_v59, 5  ;;  %v960_v8 = vsel %vm2928_vm3, %v955_v18, %v959_v58  ;;  %v2393_v59 = vcombine.low %v3018_v25, %v823_v7 }
  0x48   : > { %2620 = vmatprep.subr.bf16.mxu1 %v2741_v26  ;;  %v2402_v10 = vcombine.low %v823_v7, %v960_v8  ;;  %v2418_v25 = vrot.slane %v2890_v43, 9 }
  0x49   : > { %2605 = vmatpush3.bf16.msra.mxu0 %v2740_v22  ;;  %v1086_v1 = vsel %vm3041_vm6, %v2411_v46, %v1085_v34  ;;  %v1094_v4 = vsel %vm3041_vm6, %v2413_v0, %v1093_v51 }
  0x4a   : > { %2630 = vmatprep.subr.bf16.mxu0 %v2742_v36  ;;  %v2419_v45 = vcombine.low %v1086_v1, %v1090_v2  ;;  %v2432_v22 = vcombine.low %v1090_v2, %v1094_v4 }
  0x4b   : > { %2621 = vmatpush3.bf16.msra.mxu1 %v2741_v26  ;;  %v1113_v26 = vrot.slane %v2978_v40, 5  ;;  %v2752_v40 = vld [vmem:[#allocation2 + $0x108] sm:$0xff]  }
  0x4c   : > { %2607 = vmatmul.mubr.msk.bf16.vlgmr.msra.gmra.mxu0 %vm268_vm0, %v2391_v48  ;;  %2646 = vmatprep.subr.bf16.mxu1 %v2743_v49 }
  0x4d   : > { %2631 = vmatpush3.bf16.msra.mxu0 %v2742_v36  ;;  %2610 = vmatprep.mubr.msk.bf16.mxu0 %vm268_vm0, %v2392_v53  ;;  %v1114_v43 = vsel %vm3041_vm6, %v2418_v25, %v1113_v26  ;;  %v1376_v36 = vrot.slane %v3025_v13, 5 }
  0x4e   : > { %2623 = vmatmul.mubr.msk.bf16.vlgmr.msra.gmra.mxu1 %vm268_vm0, %v3002_v6  ;;  %2632 = vmatprep.subr.bf16.mxu0 %v2744_v50  ;;  %v1097_v6 = vrot.slane %v2920_v60, 5  ;;  %v1109_v60 = vrot.slane %v2968_v32, 5  ;;  %v2435_v31 = vcombine.low %v1114_v43, %v1249_v47 }
  0x4f   : > { %2647 = vmatpush3.bf16.msra.mxu1 %v2743_v49  ;;  %2626 = vmatprep.mubr.msk.bf16.mxu1 %vm268_vm0, %v2381_v11  ;;  %v1377_v41 = vsel %vm3041_vm6, %v2444_v35, %v1376_v36 }
  0x50   : > { %2648 = vmatprep.subr.bf16.mxu1 %v2745_v56  ;;  %v1098_v38 = vsel %vm3041_vm6, %v2414_v5, %v1097_v6  ;;  %v1110_v32 = vsel %vm3041_vm6, %v2417_v15, %v1109_v60  ;;  %v2445_v37 = vcombine.low %v1249_v47, %v1377_v41 }
  0x51   : > { %2633 = vmatpush3.bf16.msra.mxu0 %v2744_v50  ;;  %v2420_v39 = vcombine.low %v1094_v4, %v1098_v38  ;;  %v2433_v27 = vcombine.low %v1098_v38, %v1102_v21  ;;  %v2434_v11 = vcombine.low %v1106_v20, %v1110_v32  ;;  %v2422_v24 = vcombine.low %v1110_v32, %v1114_v43 }
  0x52   : > { %2634 = vmatprep.subr.bf16.mxu0 %v2746_v52 }
  0x53   : > { %2649 = vmatpush3.bf16.msra.mxu1 %v2745_v56 }
  0x54   : > { %2611 = vmatmul.mubr.msk.bf16.gmra.mxu0 %vm268_vm0, %v2393_v59  ;;  %2650 = vmatprep.subr.bf16.mxu1 %v2747_v3 }
  0x55   : > { %2635 = vmatpush3.bf16.msra.mxu0 %v2746_v52  ;;  %2638 = vmatprep.mubr.msk.bf16.mxu0 %vm268_vm0, %v2419_v45 }
  0x56   : > { %2627 = vmatmul.mubr.msk.bf16.gmra.mxu1 %vm268_vm0, %v2402_v10  ;;  %2636 = vmatprep.subr.bf16.mxu0 %v2748_v12 }
  0x57   : > { %2651 = vmatpush3.bf16.msra.mxu1 %v2747_v3  ;;  %2654 = vmatprep.mubr.msk.bf16.mxu1 %vm268_vm0, %v2432_v22 }
  0x58   : > { %2652 = vmatprep.subr.bf16.mxu1 %v2749_v61 }
  0x59   : > { %2637 = vmatpush3.bf16.msra.mxu0 %v2748_v12 }
  0x5a   : > { %2662 = vmatprep.subr.bf16.mxu0 %v2750_v14 }
  0x5b   : > { %2653 = vmatpush3.bf16.msra.mxu1 %v2749_v61 }
  0x5c   : > { %2639 = vmatmul.mubr.msk.bf16.vlgmr.msra.gmra.mxu0 %vm268_vm0, %v2420_v39  ;;  %2678 = vmatprep.subr.bf16.mxu1 %v2750_v14 }
  0x5d   : > { %2663 = vmatpush3.bf16.msra.mxu0 %v2750_v14  ;;  %2642 = vmatprep.mubr.msk.bf16.mxu0 %vm268_vm0, %v2421_v23 }
  0x5e   : > { %2655 = vmatmul.mubr.msk.bf16.vlgmr.msra.gmra.mxu1 %vm268_vm0, %v2433_v27  ;;  %2664 = vmatprep.subr.bf16.mxu0 %v2751_v28 }
  0x5f   : > { %2682 = vmatpush3.bf16.msra.mxu1 %v2750_v14  ;;  %2658 = vmatprep.mubr.msk.bf16.mxu1 %vm268_vm0, %v2434_v11 }
  0x60   : > { %2679 = vmatprep.subr.bf16.mxu1 %v2751_v28 }
  0x61   : > { %2665 = vmatpush3.bf16.msra.mxu0 %v2751_v28 }
  0x62   : > { %2666 = vmatprep.subr.bf16.mxu0 %v2752_v40 }
  0x63   : > { %2683 = vmatpush3.bf16.msra.mxu1 %v2751_v28 }
  0x64   : > { %2643 = vmatmul.mubr.msk.bf16.gmra.mxu0 %vm268_vm0, %v2422_v24  ;;  %2680 = vmatprep.subr.bf16.mxu1 %v2752_v40 }
  0x65   : > { %2667 = vmatpush3.bf16.msra.mxu0 %v2752_v40  ;;  %2670 = vmatprep.mubr.msk.bf16.mxu0 %vm268_vm0, %v2420_v39 }
  0x66   : > { %2659 = vmatmul.mubr.msk.bf16.gmra.mxu1 %vm268_vm0, %v2435_v31  ;;  %2668 = vmatprep.subr.bf16.mxu0 %v2753_v33 }
  0x67   : > { %2684 = vmatpush3.bf16.msra.mxu1 %v2752_v40  ;;  %2674 = vmatprep.mubr.msk.bf16.mxu1 %vm268_vm0, %v2422_v24 }
  0x68   : > { %2681 = vmatprep.subr.bf16.mxu1 %v2753_v33 }
  0x69   : > { %2669 = vmatpush3.bf16.msra.mxu0 %v2753_v33 }
  0x6b   : > { %2685 = vmatpush3.bf16.msra.mxu1 %v2753_v33 }
  0x6c   : > { %2671 = vmatmul.mubr.msk.bf16.vlgmr.msra.gmra.mxu0 %vm268_vm0, %v2421_v23 }
  0x6e   : > { %2675 = vmatmul.mubr.msk.bf16.vlgmr.msra.gmra.mxu1 %vm268_vm0, %v2445_v37 }
  0xec   : > { %v2544_v13 = vpop.f32.mrf.mxu0 }
  0xed   : > { %v2560_v42 = vpop.f32.mrf.mxu1 }
  0xee   : > { %v315_v44 = vpop.f32.mrf.mxu0  ;;  %v431_v43 = vadd.f32 %v2560_v42, %v2544_v13 }
  0xef   : > { %v422_v46 = vpop.f32.mrf.mxu1 }
  0xf0   : > { %v423_v48 = vadd.f32 %v422_v46, %v315_v44  ;;  %v2545_v49 = vpop.f32.mrf.mxu0 }
  0xf1   : > { %v2561_v50 = vpop.f32.mrf.mxu1 }
  0xf2   : > { %v318_v53 = vpop.f32.mrf.mxu0  ;;  %v434_v46 = vadd.f32 %v2561_v50, %v2545_v49  ;;  %v2795_v49 = vmov 1983009808  }
  0xf3   : > { %v425_v54 = vpop.f32.mrf.mxu1  ;;  %v1522_v50 = vunpack.c.l.s4 %v2795_v49 }
  0xf4   : > { %v426_v55 = vadd.f32 %v425_v54, %v318_v53  ;;  %v2548_v34 = vpop.f32.mrf.mxu0 }
  0xf5   : > { %v2564_v56 = vpop.f32.mrf.mxu1 }
  0xf6   : > { %v331_v57 = vpop.f32.mrf.mxu0  ;;  %v447_v24 = vadd.f32 %v2564_v56, %v2548_v34 }
  0xf7   : > { %v438_v9 = vpop.f32.mrf.mxu1 }
  0xf8   : > { %v439_v18 = vadd.f32 %v438_v9, %v331_v57  ;;  %v2549_v58 = vpop.f32.mrf.mxu0 }
  0xf9   : > { %v2565_v63 = vpop.f32.mrf.mxu1 }
  0xfa   : > { %v334_v0 = vpop.f32.mrf.mxu0  ;;  %v450_v9 = vadd.f32 %v2565_v63, %v2549_v58 }
  0xfb   : > { %v441_v51 = vpop.f32.mrf.mxu1 }
  0xfc   : > { %v442_v7 = vadd.f32 %v441_v51, %v334_v0  ;;  %v2576_v52 = vpop.f32.mrf.mxu0 }
  0xfd   : > { %v2592_v1 = vpop.f32.mrf.mxu1  ;;  %v559_v31 = vadd.f32 %v2576_v52, %v431_v43 }
  0xfe   : > { %v526_v2 = vpop.f32.mrf.mxu0 }
  0xff   : > { %v557_v8 = vadd.f32 %v526_v2, %v423_v48  ;;  %v771_v59 = vpop.f32.mrf.mxu1  ;;  %v804_v44 = vadd.f32 %v2592_v1, %v559_v31  ;;  %v1523_v31 = vunpack.c.0.s8 %v1522_v50 }
 0x100   : > { %v2577_v3 = vpop.f32.mrf.mxu0 }
 0x101   : > { %v2593_v4 = vpop.f32.mrf.mxu1  ;;  %v802_v54 = vadd.f32 %v771_v59, %v557_v8 }
 0x102   : > { %v529_v45 = vpop.f32.mrf.mxu0 }
 0x103   : > { %v558_v5 = vadd.f32 %v529_v45, %v426_v55  ;;  %v774_v6 = vpop.f32.mrf.mxu1 }
 0x104   : > { %v2580_v10 = vpop.f32.mrf.mxu0 }
 0x105   : > { %v563_v36 = vadd.f32 %v2580_v10, %v447_v24  ;;  %v1524_v10 = vlaneseq  ;;  %v803_v8 = vadd.f32 %v774_v6, %v558_v5 }
 0x106   : > { %v2596_v12 = vpop.f32.mrf.mxu1  ;;  %v542_v16 = vpop.f32.mrf.mxu0 }
 0x107   : > { %v561_v62 = vadd.f32 %v542_v16, %v439_v18  ;;  %v808_v55 = vadd.f32 %v2596_v12, %v563_v36  ;;  %v560_v18 = vadd.f32 %v2577_v3, %v434_v46  ;;  %v1525_v36 = vshrl.u32 %v1524_v10, 7 }
 0x108   : > { %v787_v17 = vpop.f32.mrf.mxu1  ;;  %v2581_v19 = vpop.f32.mrf.mxu0 }
 0x109   : > { %v806_v22 = vadd.f32 %v787_v17, %v561_v62  ;;  %v564_v34 = vadd.f32 %v2581_v19, %v450_v9  ;;  %v805_v2 = vadd.f32 %v2593_v4, %v560_v18 }
 0x10a   : > { %v2597_v61 = vpop.f32.mrf.mxu1  ;;  %v545_v15 = vpop.f32.mrf.mxu0 }
 0x10b   : > { %v562_v60 = vadd.f32 %v545_v15, %v442_v7  ;;  %v809_v63 = vadd.f32 %v2597_v61, %v564_v34 }
 0x10c   : > { %v790_v38 = vpop.f32.mrf.mxu1  ;;  %v2608_v14 = vpop.f32.mrf.mxu0 }
 0x10d   : > { %v941_v57 = vadd.f32 %v2608_v14, %v804_v44  ;;  %v807_v3 = vadd.f32 %v790_v38, %v562_v60 }
 0x10e   : > { %v2624_v20 = vpop.f32.mrf.mxu1  ;;  %v908_v21 = vpop.f32.mrf.mxu0 }
 0x10f   : > { %v939_v42 = vadd.f32 %v908_v21, %v802_v54  ;;  %v1066_v52 = vadd.f32 %v2624_v20, %v941_v57 }
 0x110   : > { %v1033_v39 = vpop.f32.mrf.mxu1  ;;  %v2609_v32 = vpop.f32.mrf.mxu0 }
 0x111   : > { %v1064_v59 = vadd.f32 %v1033_v39, %v939_v42  ;;  %v942_v16 = vadd.f32 %v2609_v32, %v805_v2 }
 0x112   : > { %v2625_v23 = vpop.f32.mrf.mxu1  ;;  %v911_v25 = vpop.f32.mrf.mxu0 }
 0x113   : > { %v940_v15 = vadd.f32 %v911_v25, %v803_v8  ;;  %v1067_v5 = vadd.f32 %v2625_v23, %v942_v16 }
 0x114   : > { %v3105_v26 = vpop.f32.mrf.mxu1  ;;  %v2612_v27 = vpop.f32.mrf.mxu0 }
 0x115   : > { %v945_v51 = vadd.f32 %v2612_v27, %v808_v55  ;;  %v1065_v61 = vadd.f32 %v3105_v26, %v940_v15 }
 0x116   : > { %v2628_v28 = vpop.f32.mrf.mxu1  ;;  %v924_v11 = vpop.f32.mrf.mxu0 }
 0x117   : > { %v1070_v12 = vadd.f32 %v2628_v28, %v945_v51  ;;  %v943_v62 = vadd.f32 %v924_v11, %v806_v22  ;;  %v3112_v22 = vld [vmem:[%s3299_s2] ss:$0 sm:$0xff] }
 0x118   : > { %v1049_v29 = vpop.f32.mrf.mxu1  ;;  %v2613_v30 = vpop.f32.mrf.mxu0 }
 0x119   : > { %v946_v20 = vadd.f32 %v2613_v30, %v809_v63  ;;  %v1068_v6 = vadd.f32 %v1049_v29, %v943_v62  ;;  %v3116_v29 = vsub.s32 %v1523_v31, %v1525_v36 }
 0x11a   : > { %v2629_v40 = vpop.f32.mrf.mxu1  ;;  %v927_v47 = vpop.f32.mrf.mxu0 }
 0x11b   : > { %v944_v4 = vadd.f32 %v927_v47, %v807_v3  ;;  %v1071_v25 = vadd.f32 %v2629_v40, %v946_v20 }
 0x11c   : > { %v1052_v33 = vpop.f32.mrf.mxu1  ;;  %v2640_v35 = vpop.f32.mrf.mxu0 }
 0x11d   : > { %v1239_v58 = vadd.f32 %v2640_v35, %v1066_v52  ;;  %v1069_v11 = vadd.f32 %v1052_v33, %v944_v4 }
 0x11e   : > { %v2656_v41 = vpop.f32.mrf.mxu1  ;;  %v1206_v37 = vpop.f32.mrf.mxu0 }
 0x11f   : > { %v1237_v14 = vadd.f32 %v1206_v37, %v1064_v59  ;;  %v1367_v24 = vadd.f32 %v2656_v41, %v1239_v58 }
 0x120   : > { %v1334_v48 = vpop.f32.mrf.mxu1  ;;  %v2641_v53 = vpop.f32.mrf.mxu0 }
 0x121   : > { %v1365_v60 = vadd.f32 %v1334_v48, %v1237_v14  ;;  %v1240_v30 = vadd.f32 %v2641_v53, %v1067_v5 }
 0x122   : > { %v2657_v0 = vpop.f32.mrf.mxu1  ;;  %v1209_v13 = vpop.f32.mrf.mxu0 }
 0x123   : > { %v1238_v46 = vadd.f32 %v1209_v13, %v1065_v61  ;;  %v1368_v33 = vadd.f32 %v2657_v0, %v1240_v30 }
 0x124   : > { %v3107_v56 = vpop.f32.mrf.mxu1  ;;  %v2644_v7 = vpop.f32.mrf.mxu0 }
 0x125   : > { %v1243_v21 = vadd.f32 %v2644_v7, %v1070_v12  ;;  %v3122_v7 = vadd.f32 %v3107_v56, %v1238_v46 }
 0x126   : > { %v2660_v45 = vpop.f32.mrf.mxu1  ;;  %v1222_v1 = vpop.f32.mrf.mxu0 }
 0x127   : > { %v1371_v38 = vadd.f32 %v2660_v45, %v1243_v21  ;;  %v1241_v47 = vadd.f32 %v1222_v1, %v1068_v6 }
 0x128   : > { %v1350_v17 = vpop.f32.mrf.mxu1  ;;  %v2645_v19 = vpop.f32.mrf.mxu0 }
 0x129   : > { %v1244_v54 = vadd.f32 %v2645_v19, %v1071_v25  ;;  %v1369_v53 = vadd.f32 %v1350_v17, %v1241_v47 }
 0x12a   : > { %v2661_v27 = vpop.f32.mrf.mxu1  ;;  %v1225_v43 = vpop.f32.mrf.mxu0 }
 0x12b   : > { %v1242_v55 = vadd.f32 %v1225_v43, %v1069_v11  ;;  %v1372_v13 = vadd.f32 %v2661_v27, %v1244_v54 }
 0x12c   : > { %v1353_v39 = vpop.f32.mrf.mxu1  ;;  %v2672_v28 = vpop.f32.mrf.mxu0 }
 0x12d   : > { %v1483_v32 = vadd.f32 %v2672_v28, %v1367_v24  ;;  %v3124_v52 = vadd.f32 %v1353_v39, %v1242_v55 }
 0x12e   : > { %v2676_v35 = vpop.f32.mrf.mxu1  ;;  %v1450_v41 = vpop.f32.mrf.mxu0 }
 0x12f   : > { %v1498_v23 = vadd.f32 %v3112_v22, %v1483_v32  ;;  %v1487_v37 = vadd.f32 %v2676_v35, %v1371_v38  ;;  %v1481_v44 = vadd.f32 %v1450_v41, %v1365_v60 }
 0x130   : > { %v1466_v40 = vpop.f32.mrf.mxu1  ;;  %v2673_v34 = vpop.f32.mrf.mxu0 }
 0x131   : > { %v1506_v57 = vmax.f32 %v1498_v23, 0.0  ;;  %v1502_v26 = vadd.f32 %v3112_v22, %v1487_v37  ;;  %v1496_v48 = vadd.f32 %v3112_v22, %v1481_v44  ;;  %v1485_v2 = vadd.f32 %v1466_v40, %v1369_v53 }
 0x132   : > { %v1484_v59 = vadd.f32 %v2673_v34, %v1368_v33  ;;  %v2677_v46 = vpop.f32.mrf.mxu1 }
 0x133   : > { %v1554_v9 = vcombine.high %v1506_v57, %v1506_v57  ;;  %v1561_v18 = vrot.slane %v1506_v57, %v3116_v29  ;;  %v1510_v42 = vmax.f32 %v1502_v26, 0.0  ;;  %v1504_v51 = vmax.f32 %v1496_v48, 0.0  ;;  %v1453_v48 = vpop.f32.mrf.mxu0 }
 0x134   : > { %v1499_v34 = vadd.f32 %v3112_v22, %v1484_v59 }
 0x135   : > { %v1568_v45 = vrot.slane %v1554_v9, %v3116_v29  ;;  %v1569_v1 = vcombine.high %v1561_v18, %v1561_v18  ;;  %v1745_v0 = vsel %vm1688_vm7, %v1561_v18, -inf  ;;  %v1622_v49 = vcombine.high %v1510_v42, %v1510_v42 }
 0x136   : > { %v1746_v50 = vrot.slane %v1745_v0, 4  ;;  %v1629_v10 = vrot.slane %v1510_v42, %v3116_v29  ;;  %v1520_v8 = vcombine.high %v1504_v51, %v1504_v51  ;;  %v1527_v26 = vrot.slane %v1504_v51, %v3116_v29 }
 0x137   : > { %v1570_v12 = vcombine.high %v1568_v45, %v1568_v45  ;;  %v1752_v58 = vsel %vm1688_vm7, %v1569_v1, -inf  ;;  %v1759_v56 = vsel %vm1688_vm7, %v1568_v45, -inf  ;;  %v1636_v63 = vrot.slane %v1622_v49, %v3116_v29 }
 0x138   : > { %v1747_v3 = vmax.f32 %v1745_v0, %v1746_v50  ;;  %v1753_v16 = vrot.slane %v1752_v58, 4  ;;  %v1760_v62 = vrot.slane %v1759_v56, 4  ;;  %v1637_v17 = vcombine.high %v1629_v10, %v1629_v10 }
 0x139   : > { %v1766_v19 = vsel %vm1688_vm7, %v1570_v12, -inf  ;;  %v1638_v15 = vcombine.high %v1636_v63, %v1636_v63  ;;  %v1857_v14 = vsel %vm1688_vm7, %v1629_v10, -inf  ;;  %v1871_v21 = vsel %vm1688_vm7, %v1636_v63, -inf }
 0x13a   : > { %v1748_v20 = vrot.slane %v1747_v3, 2  ;;  %v1754_v4 = vmax.f32 %v1752_v58, %v1753_v16  ;;  %v1761_v27 = vmax.f32 %v1759_v56, %v1760_v62  ;;  %v1767_v43 = vrot.slane %v1766_v19, 4 }
 0x13b   : > { %v1858_v24 = vrot.slane %v1857_v14, 4  ;;  %v1864_v31 = vsel %vm1688_vm7, %v1637_v17, -inf  ;;  %v1872_v36 = vrot.slane %v1871_v21, 4  ;;  %v1878_v5 = vsel %vm1688_vm7, %v1638_v15, -inf }
 0x13c   : > { %v1749_v6 = vmax.f32 %v1747_v3, %v1748_v20  ;;  %v1755_v39 = vrot.slane %v1754_v4, 2  ;;  %v1762_v28 = vrot.slane %v1761_v27, 2  ;;  %v1768_v61 = vmax.f32 %v1766_v19, %v1767_v43 }
 0x13d   : > { %v1859_v60 = vmax.f32 %v1857_v14, %v1858_v24  ;;  %v1865_v38 = vrot.slane %v1864_v31, 4  ;;  %v1873_v32 = vmax.f32 %v1871_v21, %v1872_v36  ;;  %v1879_v25 = vrot.slane %v1878_v5, 4 }
 0x13e   : > { %v1750_v11 = vrot.slane %v1749_v6, 1  ;;  %v1756_v30 = vmax.f32 %v1754_v4, %v1755_v39  ;;  %v1763_v47 = vmax.f32 %v1761_v27, %v1762_v28  ;;  %v1769_v35 = vrot.slane %v1768_v61, 2 }
 0x13f   : > { %v1860_v41 = vrot.slane %v1859_v60, 2  ;;  %v1866_v23 = vmax.f32 %v1864_v31, %v1865_v38  ;;  %v1874_v37 = vrot.slane %v1873_v32, 2  ;;  %v1880_v44 = vmax.f32 %v1878_v5, %v1879_v25 }
 0x140   : > { %v1757_v54 = vrot.slane %v1756_v30, 1  ;;  %v1764_v55 = vrot.slane %v1763_v47, 1  ;;  %v1770_v57 = vmax.f32 %v1768_v61, %v1769_v35  ;;  %v1534_v18 = vrot.slane %v1520_v8, %v3116_v29 }
 0x141   : > { %v1861_v40 = vmax.f32 %v1859_v60, %v1860_v41  ;;  %v1867_v33 = vrot.slane %v1866_v23, 2  ;;  %v1875_v53 = vmax.f32 %v1873_v32, %v1874_v37  ;;  %v1881_v9 = vrot.slane %v1880_v44, 2 }
 0x142   : > { %v1500_v42 = vadd.f32 %v3112_v22, %v1485_v2  ;;  %v1488_v45 = vadd.f32 %v2677_v46, %v1372_v13  ;;  %v3141_v1 = vmax.f32 %v1749_v6, %v1750_v11  ;;  %v1771_v0 = vrot.slane %v1770_v57, 1 }
 0x143   : > { %v1868_v49 = vmax.f32 %v1866_v23, %v1867_v33  ;;  %v1482_v50 = vadd.f32 %v1453_v48, %v3122_v7  ;;  %v3144_v10 = vmax.f32 %v1756_v30, %v1757_v54  ;;  %v1535_v51 = vcombine.high %v1527_v26, %v1527_v26 }
 0x144   : > { %v1536_v12 = vcombine.high %v1534_v18, %v1534_v18  ;;  %v1689_v58 = vsel %vm1688_vm7, %v1527_v26, -inf  ;;  %v3147_v56 = vmax.f32 %v1763_v47, %v1764_v55  ;;  %v1862_v8 = vrot.slane %v1861_v40, 1 }
 0x145   : > { %v1876_v63 = vrot.slane %v1875_v53, 1  ;;  %v1882_v2 = vmax.f32 %v1880_v44, %v1881_v9  ;;  %v1690_v3 = vrot.slane %v1689_v58, 4  ;;  %v1696_v13 = vsel %vm1688_vm7, %v1535_v51, -inf }
 0x146   : > { %v1703_v59 = vsel %vm1688_vm7, %v1534_v18, -inf  ;;  %v1710_v16 = vsel %vm1688_vm7, %v1536_v12, -inf  ;;  %v3152_v62 = vmax.f32 %v1770_v57, %v1771_v0  ;;  %v1869_v7 = vrot.slane %v1868_v49, 1 }
 0x147   : > { %v1697_v17 = vrot.slane %v1696_v13, 4  ;;  %v1704_v19 = vrot.slane %v1703_v59, 4  ;;  %v1691_v15 = vmax.f32 %v1689_v58, %v1690_v3  ;;  %v1711_v14 = vrot.slane %v1710_v16, 4 }
 0x148   : > { %v1508_v21 = vmax.f32 %v1500_v42, 0.0  ;;  %v1507_v20 = vmax.f32 %v1499_v34, 0.0  ;;  %v3154_v4 = vmax.f32 %v1861_v40, %v1862_v8  ;;  %v1883_v27 = vrot.slane %v1882_v2, 1 }
 0x149   : > { %v1698_v43 = vmax.f32 %v1696_v13, %v1697_v17  ;;  %v1705_v24 = vmax.f32 %v1703_v59, %v1704_v19  ;;  %v1692_v31 = vrot.slane %v1691_v15, 2  ;;  %v1712_v36 = vmax.f32 %v1710_v16, %v1711_v14 }
 0x14a   : > { %v1588_v5 = vcombine.high %v1508_v21, %v1508_v21  ;;  %v1595_v6 = vrot.slane %v1508_v21, %v3116_v29  ;;  %v3157_v39 = vmax.f32 %v1875_v53, %v1876_v63  ;;  %v1571_v60 = vcombine.high %v1507_v20, %v1507_v20 }
 0x14b   : > { %v1699_v28 = vrot.slane %v1698_v43, 2  ;;  %v1706_v61 = vrot.slane %v1705_v24, 2  ;;  %v3159_v38 = vmax.f32 %v1868_v49, %v1869_v7  ;;  %v1693_v32 = vmax.f32 %v1691_v15, %v1692_v31 }
 0x14c   : > { %v1602_v25 = vrot.slane %v1588_v5, %v3116_v29  ;;  %v1603_v11 = vcombine.high %v1595_v6, %v1595_v6  ;;  %v3162_v30 = vmax.f32 %v1882_v2, %v1883_v27  ;;  %v1713_v35 = vrot.slane %v1712_v36, 2 }
 0x14d   : > { %v1700_v47 = vmax.f32 %v1698_v43, %v1699_v28  ;;  %v1801_v41 = vsel %vm1688_vm7, %v1595_v6, -inf  ;;  %v1707_v23 = vmax.f32 %v1705_v24, %v1706_v61  ;;  %v1503_v46 = vadd.f32 %v3112_v22, %v1488_v45 }
 0x14e   : > { %v1604_v37 = vcombine.high %v1602_v25, %v1602_v25  ;;  %v1802_v44 = vrot.slane %v1801_v41, 4  ;;  %v1808_v54 = vsel %vm1688_vm7, %v1603_v11, -inf  ;;  %v1815_v55 = vsel %vm1688_vm7, %v1602_v25, -inf }
 0x14f   : > { %v1578_v57 = vrot.slane %v1507_v20, %v3116_v29  ;;  %v1585_v26 = vrot.slane %v1571_v60, %v3116_v29  ;;  %v1694_v48 = vrot.slane %v1693_v32, 1  ;;  %v1809_v33 = vrot.slane %v1808_v54, 4 }
 0x150   : > { %v1803_v40 = vmax.f32 %v1801_v41, %v1802_v44  ;;  %v1497_v53 = vadd.f32 %v3112_v22, %v1482_v50  ;;  %v1701_v9 = vrot.slane %v1700_v47, 1  ;;  %v1714_v18 = vmax.f32 %v1712_v36, %v1713_v35 }
 0x151   : > { %v1816_v42 = vrot.slane %v1815_v55, 4  ;;  %v1822_v34 = vsel %vm1688_vm7, %v1604_v37, -inf  ;;  %v1708_v0 = vrot.slane %v1707_v23, 1  ;;  %v1810_v49 = vmax.f32 %v1808_v54, %v1809_v33 }
 0x152   : > { %v1804_v45 = vrot.slane %v1803_v40, 2  ;;  %v1823_v51 = vrot.slane %v1822_v34, 4  ;;  %v1586_v58 = vcombine.high %v1578_v57, %v1578_v57  ;;  %v1587_v8 = vcombine.high %v1585_v26, %v1585_v26 }
 0x153   : > { %v1817_v12 = vmax.f32 %v1815_v55, %v1816_v42  ;;  %v1773_v63 = vsel %vm1688_vm7, %v1578_v57, -inf  ;;  %v1811_v3 = vrot.slane %v1810_v49, 2  ;;  %v1715_v16 = vrot.slane %v1714_v18, 1 }
 0x154   : > { %v1805_v2 = vmax.f32 %v1803_v40, %v1804_v45  ;;  %v1824_v13 = vmax.f32 %v1822_v34, %v1823_v51  ;;  %v1774_v59 = vrot.slane %v1773_v63, 4  ;;  %v1780_v50 = vsel %vm1688_vm7, %v1586_v58, -inf }
 0x155   : > { %v1787_v7 = vsel %vm1688_vm7, %v1585_v26, -inf  ;;  %v1794_v17 = vsel %vm1688_vm7, %v1587_v8, -inf  ;;  %v3176_v19 = vmax.f32 %v1693_v32, %v1694_v48  ;;  %v1818_v14 = vrot.slane %v1817_v12, 2 }
 0x156   : > { %v1806_v15 = vrot.slane %v1805_v2, 1  ;;  %v1775_v21 = vmax.f32 %v1773_v63, %v1774_v59  ;;  %v3178_v20 = vmax.f32 %v1810_v49, %v1811_v3  ;;  %v1781_v27 = vrot.slane %v1780_v50, 4 }
 0x157   : > { %v1788_v43 = vrot.slane %v1787_v7, 4  ;;  %v1795_v24 = vrot.slane %v1794_v17, 4  ;;  %v3180_v31 = vmax.f32 %v1700_v47, %v1701_v9  ;;  %v3182_v36 = vmax.f32 %v1707_v23, %v1708_v0 }
 0x158   : > { %v1825_v5 = vrot.slane %v1824_v13, 2  ;;  %v1776_v6 = vrot.slane %v1775_v21, 2  ;;  %v3184_v28 = vmax.f32 %v1714_v18, %v1715_v16  ;;  %v1782_v61 = vmax.f32 %v1780_v50, %v1781_v27 }
 0x159   : > { %v1789_v60 = vmax.f32 %v1787_v7, %v1788_v43  ;;  %v1796_v32 = vmax.f32 %v1794_v17, %v1795_v24  ;;  %v3186_v25 = vmax.f32 %v1805_v2, %v1806_v15  ;;  %v3188_v11 = vmax.f32 %v1817_v12, %v1818_v14 }
 0x15a   : > { %v1777_v35 = vmax.f32 %v1775_v21, %v1776_v6  ;;  %v1511_v41 = vmax.f32 %v1503_v46, 0.0  ;;  %v1813_v37 = vrot.slane %v3178_v20, 1  ;;  %v1783_v44 = vrot.slane %v1782_v61, 2 }
 0x15b   : > { %v1790_v47 = vrot.slane %v1789_v60, 2  ;;  %v1797_v54 = vrot.slane %v1796_v32, 2  ;;  %v3191_v23 = vmax.f32 %v1824_v13, %v1825_v5  ;;  %v3194_v9 = vmax.f32 %v1497_v53, 0.0 }
 0x15c   : > { %v1778_v55 = vrot.slane %v1777_v35, 1  ;;  %v1639_v57 = vcombine.high %v1511_v41, %v1511_v41  ;;  %v1646_v26 = vrot.slane %v1511_v41, %v3116_v29  ;;  %v1784_v48 = vmax.f32 %v1782_v61, %v1783_v44 }
 0x15d   : > { %v1791_v40 = vmax.f32 %v1789_v60, %v1790_v47  ;;  %v1798_v33 = vmax.f32 %v1796_v32, %v1797_v54 }
 0x15e   : > { %v1779_v18 = vmax.f32 %v1777_v35, %v1778_v55  ;;  %v1653_v42 = vrot.slane %v1639_v57, %v3116_v29  ;;  %v1654_v46 = vcombine.high %v1646_v26, %v1646_v26  ;;  %v1885_v34 = vsel %vm1688_vm7, %v1646_v26, -inf }
 0x15f   : > { %v1785_v0 = vrot.slane %v1784_v48, 1  ;;  %v1792_v45 = vrot.slane %v1791_v40, 1  ;;  %v1799_v49 = vrot.slane %v1798_v33, 1  ;;  %v1886_v51 = vrot.slane %v1885_v34, 4 }
 0x160   : > { %v1917_v12 = vmax.f32 %v3141_v1, %v1779_v18  ;;  %v1655_v58 = vcombine.high %v1653_v42, %v1653_v42  ;;  %v1892_v8 = vsel %vm1688_vm7, %v1654_v46, -inf  ;;  %v1899_v63 = vsel %vm1688_vm7, %v1653_v42, -inf }
 0x161   : > { %v1786_v2 = vmax.f32 %v1784_v48, %v1785_v0  ;;  %v1793_v53 = vmax.f32 %v1791_v40, %v1792_v45  ;;  %v1800_v3 = vmax.f32 %v1798_v33, %v1799_v49  ;;  %v1887_v13 = vmax.f32 %v1885_v34, %v1886_v51 }
 0x162   : > { %v1933_v59 = vpack.c.bf16 %v1917_v12, %v1917_v12  ;;  %v1893_v16 = vrot.slane %v1892_v8, 4  ;;  %v1900_v50 = vrot.slane %v1899_v63, 4  ;;  %v1906_v7 = vsel %vm1688_vm7, %v1655_v58, -inf }
 0x163   : > { %v1918_v17 = vmax.f32 %v3144_v10, %v1786_v2  ;;  %v1919_v15 = vmax.f32 %v3147_v56, %v1793_v53  ;;  %v1920_v1 = vmax.f32 %v3152_v62, %v1800_v3  ;;  %v1888_v14 = vrot.slane %v1887_v13, 2 }
 0x164   : > { %v1995_v21 = vrot.slane %v1933_v59, %v3116_v29  ;;  %v1894_v27 = vmax.f32 %v1892_v8, %v1893_v16  ;;  %v1901_v43 = vmax.f32 %v1899_v63, %v1900_v50  ;;  %v1907_v24 = vrot.slane %v1906_v7, 4 }
 0x165   : > { %v1934_v5 = vpack.c.bf16 %v1918_v17, %v1918_v17  ;;  %v1935_v6 = vpack.c.bf16 %v1919_v15, %v1919_v15  ;;  %v1936_v61 = vpack.c.bf16 %v1920_v1, %v1920_v1  ;;  %v1889_v60 = vmax.f32 %v1887_v13, %v1888_v14 }
 0x166   : > { %v2107_v32 = vrot.slane %v1995_v21, %v3116_v29  ;;  %v1895_v10 = vrot.slane %v1894_v27, 2  ;;  %v1902_v35 = vrot.slane %v1901_v43, 2  ;;  %v1908_v56 = vmax.f32 %v1906_v7, %v1907_v24 }
 0x167   : > { %v2002_v62 = vrot.slane %v1934_v5, %v3116_v29  ;;  %v2009_v41 = vrot.slane %v1935_v6, %v3116_v29  ;;  %v2016_v44 = vrot.slane %v1936_v61, %v3116_v29  ;;  %v1890_v47 = vrot.slane %v1889_v60, 1 }
 0x168   : > { %v2189_v54 = vunpack.c.l.b16 %v2107_v32  ;;  %v1896_v55 = vmax.f32 %v1894_v27, %v1895_v10  ;;  %v1903_v57 = vmax.f32 %v1901_v43, %v1902_v35  ;;  %v1909_v26 = vrot.slane %v1908_v56, 2  ;;  %v1469_v32 = vpop.f32.mrf.mxu1 }
 0x169   : > { %v2114_v48 = vrot.slane %v2002_v62, %v3116_v29  ;;  %v2121_v40 = vrot.slane %v2009_v41, %v3116_v29  ;;  %v2128_v33 = vrot.slane %v2016_v44, %v3116_v29  ;;  %v1891_v18 = vmax.f32 %v1889_v60, %v1890_v47 }
 0x16a   : > { %v1897_v42 = vrot.slane %v1896_v55, 1  ;;  %v1904_v46 = vrot.slane %v1903_v57, 1  ;;  %v1910_v34 = vmax.f32 %v1908_v56, %v1909_v26  ;;  %v1537_v0 = vcombine.high %v3194_v9, %v3194_v9 }
 0x16b   : > { %v2190_v45 = vunpack.c.l.b16 %v2114_v48  ;;  %v2191_v49 = vunpack.c.l.b16 %v2121_v40  ;;  %v2192_v51 = vunpack.c.l.b16 %v2128_v33  ;;  %v1925_v12 = vmax.f32 %v3154_v4, %v1891_v18 }
 0x16c   : > { %v1898_v58 = vmax.f32 %v1896_v55, %v1897_v42  ;;  %v1905_v8 = vmax.f32 %v1903_v57, %v1904_v46  ;;  %v1911_v63 = vrot.slane %v1910_v34, 1  ;;  %v1544_v2 = vrot.slane %v3194_v9, %v3116_v29 }
 0x16d   : > { %v2210_v53 = vrot.slane %v2190_v45, 7  ;;  %v2212_v3 = vrot.slane %v2191_v49, 6  ;;  %v2214_v13 = vrot.slane %v2192_v51, 5  ;;  %v1941_v59 = vpack.c.bf16 %v1925_v12, %v1925_v12 }
 0x16e   : > { %v1912_v16 = vmax.f32 %v1910_v34, %v1911_v63  ;;  %v1926_v50 = vmax.f32 %v3159_v38, %v1898_v58  ;;  %v1927_v7 = vmax.f32 %v3157_v39, %v1905_v8  ;;  %v1551_v17 = vrot.slane %v1537_v0, %v3116_v29 }
 0x16f   : > { %v2211_v4 = vsel %vm2202_vm8, %v2210_v53, %v2189_v54  ;;  %v2051_v15 = vrot.slane %v1941_v59, %v3116_v29  ;;  %v1552_v1 = vcombine.high %v1544_v2, %v1544_v2  ;;  %v1717_v14 = vsel %vm1688_vm7, %v1544_v2, -inf }
 0x170   : > { %v2213_v9 = vsel %vm2205_vm9, %v2212_v3, %v2211_v4  ;;  %v1928_v21 = vmax.f32 %v3162_v30, %v1912_v16  ;;  %v1942_v27 = vpack.c.bf16 %v1926_v50, %v1926_v50  ;;  %v1943_v43 = vpack.c.bf16 %v1927_v7, %v1927_v7 }
 0x171   : > { %v2215_v39 = vsel %vm2208_vm10, %v2214_v13, %v2213_v9  ;;  %v2163_v38 = vrot.slane %v2051_v15, %v3116_v29  ;;  %v1553_v24 = vcombine.high %v1551_v17, %v1551_v17  ;;  %v1718_v5 = vrot.slane %v1717_v14, 4 }
 0x172   : > { %v2229_v6 = vpack.c.b16 %v2215_v39, %v2215_v39  ;;  %v1944_v61 = vpack.c.bf16 %v1928_v21, %v1928_v21  ;;  %v2058_v60 = vrot.slane %v1942_v27, %v3116_v29  ;;  %v2065_v30 = vrot.slane %v1943_v43, %v3116_v29 }
 0x173   : > { %v2197_v10 = vunpack.c.l.b16 %v2163_v38  ;;  %v1719_v35 = vmax.f32 %v1717_v14, %v1718_v5  ;;  %v1724_v56 = vsel %vm1688_vm7, %v1552_v1, -inf  ;;  %v1731_v62 = vsel %vm1688_vm7, %v1551_v17, -inf }
 0x174   : > { %2456 = vst.sshfl [vmem:[%s3230_s4 + $0x2] sm:$0x3 pattern:$0x76325410] %v2229_v6  ;;  %v2072_v41 = vrot.slane %v1944_v61, %v3116_v29  ;;  %v2170_v44 = vrot.slane %v2058_v60, %v3116_v29  ;;  %v2177_v47 = vrot.slane %v2065_v30, %v3116_v29  ;;  %v1725_v54 = vrot.slane %v1724_v56, 4 }
 0x175   : > { %v1720_v55 = vrot.slane %v1719_v35, 2  ;;  %v1732_v57 = vrot.slane %v1731_v62, 4  ;;  %v1738_v26 = vsel %vm1688_vm7, %v1553_v24, -inf  ;;  %v1486_v48 = vadd.f32 %v1469_v32, %v3124_v52 }
 0x176   : > { %v2184_v40 = vrot.slane %v2072_v41, %v3116_v29  ;;  %v2198_v33 = vunpack.c.l.b16 %v2170_v44  ;;  %v2199_v18 = vunpack.c.l.b16 %v2177_v47  ;;  %v1726_v42 = vmax.f32 %v1724_v56, %v1725_v54 }
 0x177   : > { %v1721_v46 = vmax.f32 %v1719_v35, %v1720_v55  ;;  %v1733_v34 = vmax.f32 %v1731_v62, %v1732_v57  ;;  %v1739_v0 = vrot.slane %v1738_v26, 4  ;;  %v1501_v45 = vadd.f32 %v3112_v22, %v1486_v48 }
 0x178   : > { %v2200_v49 = vunpack.c.l.b16 %v2184_v40  ;;  %v2222_v51 = vrot.slane %v2198_v33, 7  ;;  %v2224_v12 = vrot.slane %v2199_v18, 6  ;;  %v1727_v58 = vrot.slane %v1726_v42, 2 }
 0x179   : > { %v1722_v8 = vrot.slane %v1721_v46, 1  ;;  %v1734_v63 = vrot.slane %v1733_v34, 2  ;;  %v1740_v2 = vmax.f32 %v1738_v26, %v1739_v0  ;;  %v1509_v53 = vmax.f32 %v1501_v45, 0.0 }
 0x17a   : > { %v1820_v52 = vrot.slane %v3188_v11, 1  ;;  %v2223_v3 = vsel %vm2202_vm8, %v2222_v51, %v2197_v10  ;;  %v2226_v13 = vrot.slane %v2200_v49, 5  ;;  %v1728_v59 = vmax.f32 %v1726_v42, %v1727_v58 }
 0x17b   : > { %v2225_v16 = vsel %vm2205_vm9, %v2224_v12, %v2223_v3  ;;  %v1723_v50 = vmax.f32 %v1721_v46, %v1722_v8  ;;  %v1735_v7 = vmax.f32 %v1733_v34, %v1734_v63  ;;  %v1741_v22 = vrot.slane %v1740_v2, 2 }
 0x17c   : > { %v2227_v17 = vsel %vm2208_vm10, %v2226_v13, %v2225_v16  ;;  %v1729_v4 = vrot.slane %v1728_v59, 1  ;;  %v1605_v15 = vcombine.high %v1509_v53, %v1509_v53  ;;  %v1612_v1 = vrot.slane %v1509_v53, %v3116_v29 }
 0x17d   : > { %v2231_v14 = vpack.c.b16 %v2227_v17, %v2227_v17  ;;  %v1736_v9 = vrot.slane %v1735_v7, 1  ;;  %v1742_v21 = vmax.f32 %v1740_v2, %v1741_v22  ;;  %v1913_v27 = vmax.f32 %v3176_v19, %v1723_v50 }
 0x17e   : > { %v1730_v43 = vmax.f32 %v1728_v59, %v1729_v4  ;;  %v1619_v39 = vrot.slane %v1605_v15, %v3116_v29  ;;  %v1620_v38 = vcombine.high %v1612_v1, %v1612_v1  ;;  %v1829_v24 = vsel %vm1688_vm7, %v1612_v1, -inf }
 0x17f   : > { %2458 = vst.sshfl [vmem:[%s3230_s4 + $0x6] sm:$0x3 pattern:$0x76325410] %v2231_v14  ;;  %v1737_v5 = vmax.f32 %v1735_v7, %v1736_v9  ;;  %v1743_v6 = vrot.slane %v1742_v21, 1  ;;  %v1929_v61 = vpack.c.bf16 %v1913_v27, %v1913_v27  ;;  %v1830_v60 = vrot.slane %v1829_v24, 4 }
 0x180   : > { %v1914_v30 = vmax.f32 %v3180_v31, %v1730_v43  ;;  %v1621_v32 = vcombine.high %v1619_v39, %v1619_v39  ;;  %v1836_v10 = vsel %vm1688_vm7, %v1620_v38, -inf  ;;  %v1843_v35 = vsel %vm1688_vm7, %v1619_v39, -inf }
 0x181   : > { %v1744_v56 = vmax.f32 %v1742_v21, %v1743_v6  ;;  %v1915_v19 = vmax.f32 %v3182_v36, %v1737_v5  ;;  %v1967_v62 = vrot.slane %v1929_v61, %v3116_v29  ;;  %v1831_v41 = vmax.f32 %v1829_v24, %v1830_v60 }
 0x182   : > { %v1930_v44 = vpack.c.bf16 %v1914_v30, %v1914_v30  ;;  %v1837_v47 = vrot.slane %v1836_v10, 4  ;;  %v1844_v54 = vrot.slane %v1843_v35, 4  ;;  %v1850_v55 = vsel %vm1688_vm7, %v1621_v32, -inf }
 0x183   : > { %v1814_v31 = vmax.f32 %v3178_v20, %v1813_v37  ;;  %v1916_v57 = vmax.f32 %v3184_v28, %v1744_v56  ;;  %v1931_v26 = vpack.c.bf16 %v1915_v19, %v1915_v19  ;;  %v1832_v48 = vrot.slane %v1831_v41, 2 }
 0x184   : > { %v1974_v40 = vrot.slane %v1930_v44, %v3116_v29  ;;  %v1838_v33 = vmax.f32 %v1836_v10, %v1837_v47  ;;  %v1845_v36 = vmax.f32 %v1843_v35, %v1844_v54  ;;  %v1851_v18 = vrot.slane %v1850_v55, 4 }
 0x185   : > { %v1932_v42 = vpack.c.bf16 %v1916_v57, %v1916_v57  ;;  %v1981_v46 = vrot.slane %v1931_v26, %v3116_v29  ;;  %v2079_v34 = vrot.slane %v1967_v62, %v3116_v29  ;;  %v1833_v0 = vmax.f32 %v1831_v41, %v1832_v48 }
 0x186   : > { %v2086_v45 = vrot.slane %v1974_v40, %v3116_v29  ;;  %v1839_v49 = vrot.slane %v1838_v33, 2  ;;  %v1846_v51 = vrot.slane %v1845_v36, 2  ;;  %v1852_v20 = vmax.f32 %v1850_v55, %v1851_v18 }
 0x187   : > { %v1827_v28 = vrot.slane %v3191_v23, 1  ;;  %v1988_v37 = vrot.slane %v1932_v42, %v3116_v29  ;;  %v2093_v12 = vrot.slane %v1981_v46, %v3116_v29  ;;  %v1834_v58 = vrot.slane %v1833_v0, 1 }
 0x188   : > { %v2186_v8 = vunpack.c.l.b16 %v2086_v45  ;;  %v1840_v63 = vmax.f32 %v1838_v33, %v1839_v49  ;;  %v1847_v2 = vmax.f32 %v1845_v36, %v1846_v51  ;;  %v1853_v53 = vrot.slane %v1852_v20, 2 }
 0x189   : > { %v2100_v3 = vrot.slane %v1988_v37, %v3116_v29  ;;  %v2185_v13 = vunpack.c.l.b16 %v2079_v34  ;;  %v2187_v59 = vunpack.c.l.b16 %v2093_v12  ;;  %v1835_v16 = vmax.f32 %v1833_v0, %v1834_v58 }
 0x18a   : > { %v2201_v50 = vrot.slane %v2186_v8, 7  ;;  %v1841_v7 = vrot.slane %v1840_v63, 1  ;;  %v1848_v22 = vrot.slane %v1847_v2, 1  ;;  %v1854_v17 = vmax.f32 %v1852_v20, %v1853_v53 }
 0x18b   : > { %v1821_v4 = vmax.f32 %v3188_v11, %v1820_v52  ;;  %v2188_v15 = vunpack.c.l.b16 %v2100_v3  ;;  %v2204_v1 = vrot.slane %v2187_v59, 6  ;;  %v1921_v14 = vmax.f32 %v3186_v25, %v1835_v16 }
 0x18c   : > { %v2203_v9 = vsel %vm2202_vm8, %v2201_v50, %v2185_v13  ;;  %v1842_v21 = vmax.f32 %v1840_v63, %v1841_v7  ;;  %v1849_v27 = vmax.f32 %v1847_v2, %v1848_v22  ;;  %v1855_v43 = vrot.slane %v1854_v17, 1 }
 0x18d   : > { %v2206_v39 = vsel %vm2205_vm9, %v2204_v1, %v2203_v9  ;;  %v2207_v38 = vrot.slane %v2188_v15, 5  ;;  %v1937_v24 = vpack.c.bf16 %v1921_v14, %v1921_v14  ;;  %v1828_v5 = vmax.f32 %v3191_v23, %v1827_v28 }
 0x18e   : > { %v1856_v6 = vmax.f32 %v1854_v17, %v1855_v43  ;;  %v1922_v61 = vmax.f32 %v1814_v31, %v1842_v21  ;;  %v1923_v60 = vmax.f32 %v1821_v4, %v1849_v27 }
 0x18f   : > { %v2209_v11 = vsel %vm2208_vm10, %v2207_v38, %v2206_v39  ;;  %v2023_v52 = vrot.slane %v1937_v24, %v3116_v29 }
 0x190   : > { %v2228_v25 = vpack.c.b16 %v2209_v11, %v2209_v11  ;;  %v1924_v30 = vmax.f32 %v1828_v5, %v1856_v6  ;;  %v1938_v32 = vpack.c.bf16 %v1922_v61, %v1922_v61  ;;  %v1939_v10 = vpack.c.bf16 %v1923_v60, %v1923_v60 }
 0x191   : > { %v2135_v23 = vrot.slane %v2023_v52, %v3116_v29 }
 0x192   : > { %2455 = vst.sshfl [vmem:[%s3230_s4] sm:$0x3 pattern:$0x76325410] %v2228_v25  ;;  %v1940_v35 = vpack.c.bf16 %v1924_v30, %v1924_v30  ;;  %v2030_v56 = vrot.slane %v1938_v32, %v3116_v29  ;;  %v2037_v19 = vrot.slane %v1939_v10, %v3116_v29 }
 0x193   : > { %v2193_v31 = vunpack.c.l.b16 %v2135_v23 }
 0x194   : > { %v2044_v62 = vrot.slane %v1940_v35, %v3116_v29  ;;  %v2142_v41 = vrot.slane %v2030_v56, %v3116_v29  ;;  %v2149_v44 = vrot.slane %v2037_v19, %v3116_v29 }
 0x196   : > { %v2156_v47 = vrot.slane %v2044_v62, %v3116_v29  ;;  %v2194_v54 = vunpack.c.l.b16 %v2142_v41  ;;  %v2195_v55 = vunpack.c.l.b16 %v2149_v44 }
 0x198   : > { %v2196_v57 = vunpack.c.l.b16 %v2156_v47  ;;  %v2216_v26 = vrot.slane %v2194_v54, 7  ;;  %v2218_v48 = vrot.slane %v2195_v55, 6 }
 0x19a   : > { %v2217_v40 = vsel %vm2202_vm8, %v2216_v26, %v2193_v31  ;;  %v2220_v33 = vrot.slane %v2196_v57, 5 }
 0x19b   : > { %v2219_v36 = vsel %vm2205_vm9, %v2218_v48, %v2217_v40 }
 0x19c   : > { %v2221_v18 = vsel %vm2208_vm10, %v2220_v33, %v2219_v36 }
 0x19d   : > { %v2230_v42 = vpack.c.b16 %v2221_v18, %v2221_v18 }
 0x19f   : > { %2457 = vst.sshfl [vmem:[%s3230_s4 + $0x4] sm:$0x3 pattern:$0x76325410] %v2230_v42 }
 0x1a0 PF: > { %s14_s12 = sadd.s32 1, %s2790_s12  }
 0x1a1   : > { %p11_p1 = scmp.ge.s32.totalorder %s14_s12, 4  }
 0x1a3   :  { %13 = sbr.rel (!%p11_p1) target bundleno = 1 (0x1), region = 75 }
 0x1a8   :  { %2289 = vsyncpa [#allocation3], 1 }
 0x1a9   :  { %2291 = vsyncpa [#allocation3 + $0x1], 1 }

// kernel: multi_label_cnn_forward.10
= control target key start
LH: loop header
LB: loop body
LE: loop exit
PB: predicated region body
PF: predicated region fallthrough
CT: control target
= control target key end

     0   :  { %8 = vsyncpa [#allocation3], 0  ;;  %s2440_s12 = smov 0   ;;  %s2709_s0 = inlined_call_operand.vmem [shape: bf16[2,6,6,128], index: 0, kind: input, shape index: {}]   ;;  %s2710_s1 = inlined_call_operand.hbm [shape: bf16[9,128,256], index: 1, kind: input, shape index: {}]   ;;  %s2711_s2 = inlined_call_operand.vmem [shape: f32[1,256], index: 2, kind: input, shape index: {}]   ;;  %s2712_s3 = inlined_call_operand.vmem [shape: bf16[2,4,4,256], index: 3, kind: output, shape index: {}]  }
   0x1 LB: > { %s2446_s13 = sadd.s32 4294967295, %s2413_s12   ;;  %p1959_p0 = scmp.ge.s32.totalorder %s2413_s12, 1  ;;  %s2413_s12 = sphi %s2440_s12, %s14_s12  }
   0x2   : > { %p113_p1 = scmp.lt.s32.totalorder %s2413_s12, 3  ;;  %s2415_s14 = smov [#allocation2]  }
   0x3   : > { %s125_s15 = sshll.u32 %s2415_s14, 4  ;;  %p2141_p3 = scmp.eq.s32.totalorder %s2446_s13, 0  ;;  %s126_s15 = int_to_ptr.vmem [resolvable:$true] %s125_s15 }
   0x4   : > { %p2450_p2 = pnand %p1959_p0, %p113_p1  ;;  %s2388_s17 = scalar_lea.vmem %s126_s15, 18432 }
   0x5   : > { %p2389_p7 = scmp.ne.s32.totalorder %s126_s15, %s2388_s17  ;;  %p2396_p10 = scmp.lt.s32.totalorder %s126_s15, %s126_s15 }
   0x6   : > { %p2137_p4 = pneg %p2450_p2  ;;  %p2397_p11 = scmp.lt.s32.totalorder %s2388_s17, %s2388_s17 }
   0x8   : > { %p2138_p5 = pnand %p2141_p3, %p2137_p4  ;;  %p2398_p12 = por %p2397_p11, %p2396_p10 }
   0xa   : > { %p2379_p6 = pneg %p2138_p5 }
   0xc   : > { %p2391_p8 = pnand %p2389_p7, %p2379_p6 }
   0xe   : > { %p2392_p9 = pneg %p2391_p8 }
  0x10   : > { %p2399_p13 = pnand %p2398_p12, %p2392_p9 }
  0x12   : > { %2402 = shalt.err (!%p2399_p13)
}
  0x13   : > { %s2416_s18 = smov 128   ;;  %s2417_s19 = smov 8  }
  0x14   : > { %2140 = dma.hbm_to_vmem [thread:$0]  (!%p2138_p5), %s2710_s1, 18432, %s126_s15, [#allocation3], %s2416_s18, %s2416_s18, %s2417_s19  }
  0x15   : > { %152 = sbr.rel (%p2450_p2) target bundleno = 401 (0x191), region = 32 }
  0x1a   : > { %2408 = dma.done.wait (%p2141_p3), [#allocation3], 18432  }
  0x1b   : > { %2410 = vsyncadd (%p2141_p3), [#allocation3], 4294948864  ;;  %v2418_v0 = vmov 0   ;;  %v2156_v1 = vld [vmem:[#allocation2 + $0x1f4] ss:$8 sps:$4 sm:$0xff]   ;;  %p176_p0 = scmp.lt.s32.totalorder %s2446_s13, 1  ;;  %v235_v23 = vlaneseq }
  0x1c   : > { %360 = vmatprep.mubr.bf16.mxu0 %v2418_v0  ;;  %502 = vmatprep.mubr.bf16.mxu1 %v2418_v0  ;;  %v2158_v2 = vld [vmem:[#allocation2 + $0x74] ss:$8 sps:$4 sm:$0xff]   ;;  %v2160_v3 = vld [vmem:[#allocation2 + $0x1f0] ss:$8 sps:$4 sm:$0xff]   ;;  %v2162_v5 = vld [vmem:[#allocation2 + $0x1e4] ss:$8 sps:$4 sm:$0xff]  }
  0x1d   : > { %328 = vmatprep.subr.bf16.mxu0 %v2156_v1  ;;  %v2161_v4 = vld [vmem:[#allocation2 + $0x70] ss:$8 sps:$4 sm:$0xff]   ;;  %470 = vmatprep.subr.bf16.mxu1 %v2158_v2  ;;  %v2164_v6 = vld [vmem:[#allocation2 + $0x64] ss:$8 sps:$4 sm:$0xff]   ;;  %v2166_v7 = vld [vmem:[#allocation2 + $0x1e0] ss:$8 sps:$4 sm:$0xff]  }
  0x1e   : > { %329 = vmatpush1.bf16.msra.mxu0 %v2160_v3  ;;  %471 = vmatpush1.bf16.msra.mxu1 %v2161_v4  ;;  %v2167_v8 = vld [vmem:[#allocation2 + $0x60] ss:$8 sps:$4 sm:$0xff]   ;;  %v2168_v9 = vld [vmem:[#allocation2 + $0x1d4] ss:$8 sps:$4 sm:$0xff]   ;;  %v2172_v11 = vld [vmem:[#allocation2 + $0x1d0] ss:$8 sps:$4 sm:$0xff]  }
  0x1f   : > { %330 = vmatprep.subr.bf16.mxu0 %v2162_v5  ;;  %472 = vmatprep.subr.bf16.mxu1 %v2164_v6  ;;  %v2170_v10 = vld [vmem:[#allocation2 + $0x54] ss:$8 sps:$4 sm:$0xff]   ;;  %v2173_v12 = vld [vmem:[#allocation2 + $0x50] ss:$8 sps:$4 sm:$0xff]   ;;  %v2174_v13 = vld [vmem:[#allocation2 + $0x1c4] ss:$8 sps:$4 sm:$0xff]  }
  0x20   : > { %v2176_v14 = vld [vmem:[#allocation2 + $0x44] ss:$8 sps:$4 sm:$0xff]   ;;  %s2727_s13 = smov (!%p176_p0, %s2446_s13), 1  ;;  %v2178_v15 = vld [vmem:[#allocation2 + $0x1c0] ss:$8 sps:$4 sm:$0xff]   ;;  %v2480_v28 = vshrl.u32 %v235_v23, 7 }
  0x21   : > { %v2179_v16 = vld [vmem:[#allocation2 + $0x40] ss:$8 sps:$4 sm:$0xff]   ;;  %v2180_v17 = vld [vmem:[#allocation2 + $0x1b4] ss:$8 sps:$4 sm:$0xff]   ;;  %s2132_s22 = smul.u32 24, %s2727_s13  ;;  %vm1285_vm7 = vcmask 1040384  }
  0x22   : > { %331 = vmatpush1.bf16.msra.mxu0 %v2166_v7  ;;  %473 = vmatpush1.bf16.msra.mxu1 %v2167_v8  ;;  %v2182_v18 = vld [vmem:[#allocation2 + $0x34] ss:$8 sps:$4 sm:$0xff]   ;;  %v2184_v19 = vld [vmem:[#allocation2 + $0x1b0] ss:$8 sps:$4 sm:$0xff]   ;;  %v2419_v21 = vmov 1983009808  }
  0x23   : > { %332 = vmatprep.subr.bf16.mxu0 %v2168_v9  ;;  %474 = vmatprep.subr.bf16.mxu1 %v2170_v10  ;;  %v2185_v20 = vld [vmem:[#allocation2 + $0x30] ss:$8 sps:$4 sm:$0xff]   ;;  %v233_v22 = vunpack.c.l.s4 %v2419_v21  ;;  %v2186_v24 = vld [vmem:[#allocation2 + $0x1a4] ss:$8 sps:$4 sm:$0xff]   ;;  %s2478_s25 = scalar_lea.vmem %s2709_s0, %s2132_s22  ;;  %v2190_v26 = vld [vmem:[#allocation2 + $0x1a0] ss:$8 sps:$4 sm:$0xff]  }
  0x24   : > { %v2188_v25 = vld [vmem:[#allocation2 + $0x24] ss:$8 sps:$4 sm:$0xff]   ;;  %v2191_v29 = vld [vmem:[#allocation2 + $0x20] ss:$8 sps:$4 sm:$0xff]   ;;  %v2192_v30 = vld [vmem:[#allocation2 + $0x194] ss:$8 sps:$4 sm:$0xff]  }
  0x25   : > { %v234_v27 = vunpack.c.0.s8 %v233_v22  ;;  %v2194_v31 = vld [vmem:[#allocation2 + $0x14] ss:$8 sps:$4 sm:$0xff]   ;;  %v188_v32 = vld [vmem:[%s2478_s25 + $0x4] sm:$0x7]  ;;  %v189_v33 = vld [vmem:[%s2478_s25 + $0x8] sm:$0x7] }
  0x26   : > { %333 = vmatpush1.bf16.msra.mxu0 %v2172_v11  ;;  %475 = vmatpush1.bf16.msra.mxu1 %v2173_v12  ;;  %v190_v34 = vld [vmem:[%s2478_s25 + $0xc] sm:$0x7]  ;;  %v2486_v35 = vld [vmem:[%s2478_s25 + $0x10] sm:$0x7]  ;;  %v187_v36 = vld [vmem:[%s2478_s25] sm:$0x7]  ;;  %v230_v38 = vcombine.low %v188_v32, %v189_v33 }
  0x27   : > { %334 = vmatprep.subr.bf16.mxu0 %v2174_v13  ;;  %476 = vmatprep.subr.bf16.mxu1 %v2176_v14  ;;  %v2196_v37 = vld [vmem:[#allocation2 + $0x190] ss:$8 sps:$4 sm:$0xff]   ;;  %v231_v39 = vcombine.low %v190_v34, %v2486_v35  ;;  %v2491_v40 = vsub.s32 %v234_v27, %v2480_v28  ;;  %v372_v41 = vcombine.low %v187_v36, %v188_v32  ;;  %v2198_v44 = vld [vmem:[#allocation2 + $0x184] ss:$8 sps:$4 sm:$0xff]   ;;  %v2202_v46 = vld [vmem:[#allocation2 + $0x180] ss:$8 sps:$4 sm:$0xff]  }
  0x28   : > { %v2197_v42 = vld [vmem:[#allocation2 + $0x10] ss:$8 sps:$4 sm:$0xff]   ;;  %v373_v43 = vcombine.low %v189_v33, %v190_v34  ;;  %v2200_v45 = vld [vmem:[#allocation2 + $0x4] ss:$8 sps:$4 sm:$0xff]   ;;  %v2203_v51 = vld [vmem:[#allocation2] ss:$8 sps:$4 sm:$0xff]  }
  0x29   : > { %v238_v47 = vrot.slane %v230_v38, %v2491_v40  ;;  %v245_v48 = vrot.slane %v231_v39, %v2491_v40  ;;  %v380_v49 = vrot.slane %v372_v41, %v2491_v40  ;;  %v2210_v52 = vld [vmem:[#allocation2 + $0x374] ss:$8 sps:$4 sm:$0xff]   ;;  %v2500_v54 = vrot.slane %v188_v32, %v2491_v40  ;;  %v2208_v58 = vld [vmem:[#allocation2 + $0x370] ss:$8 sps:$4 sm:$0xff]   ;;  %v2216_v62 = vld [vmem:[#allocation2 + $0x364] ss:$8 sps:$4 sm:$0xff]  }
  0x2a   : > { %335 = vmatpush1.bf16.msra.mxu0 %v2178_v15  ;;  %477 = vmatpush1.bf16.msra.mxu1 %v2179_v16  ;;  %v2497_v50 = vrot.slane %v373_v43, %v2491_v40  ;;  %v2213_v53 = vld [vmem:[#allocation2 + $0xf4] ss:$8 sps:$4 sm:$0xff]   ;;  %v2503_v55 = vrot.slane %v187_v36, %v2491_v40  ;;  %vm700_vm0 = vsmask.f32 1280  ;;  %v2507_v59 = vrot.slane %v189_v33, %v2491_v40  ;;  %v2211_v61 = vld [vmem:[#allocation2 + $0xf0] ss:$8 sps:$4 sm:$0xff]  }
  0x2b   : > { %336 = vmatprep.subr.bf16.mxu0 %v2180_v17  ;;  %478 = vmatprep.subr.bf16.mxu1 %v2182_v18  ;;  %v246_v56 = vcombine.low %v238_v47, %v245_v48  ;;  %v2510_v60 = vrot.slane %v190_v34, %v2491_v40  ;;  %vm701_vm1 = vsmask.f32 3336  ;;  %v2219_v63 = vld [vmem:[#allocation2 + $0xe4] ss:$8 sps:$4 sm:$0xff]   ;;  %vm703_vm2 = vsmask.f32 5392 }
  0x2c   : > { %v388_v57 = vcombine.low %v380_v49, %v2497_v50  ;;  %v708_v1 = vshrl.u32 %v2503_v55, 16  ;;  %v711_v2 = vshll.u32 %v2503_v55, 16  ;;  %v2214_v3 = vld [vmem:[#allocation2 + $0x360] ss:$8 sps:$4 sm:$0xff]   ;;  %v722_v4 = vshrl.u32 %v2500_v54, 16  ;;  %vm2540_vm3 = vmor %vm700_vm0, %vm701_vm1  ;;  %s2131_s28 = sshll.u32 %s2727_s13, 4 }
  0x2d   : > { %v2217_v5 = vld [vmem:[#allocation2 + $0xe0] ss:$8 sps:$4 sm:$0xff]   ;;  %v725_v6 = vshll.u32 %v2500_v54, 16  ;;  %v736_v7 = vshrl.u32 %v2507_v59, 16  ;;  %v739_v8 = vshll.u32 %v2507_v59, 16  ;;  %v750_v9 = vshrl.u32 %v2510_v60, 16  ;;  %vm2549_vm5 = vmor %vm2540_vm3, %vm703_vm2  ;;  %s185_s4 = scalar_lea.vmem %s2712_s3, %s2131_s28 }
  0x2e   : > { %337 = vmatpush1.bf16.msra.mxu0 %v2184_v19  ;;  %479 = vmatpush1.bf16.msra.mxu1 %v2185_v20  ;;  %v2222_v10 = vld [vmem:[#allocation2 + $0x354] ss:$8 sps:$4 sm:$0xff]   ;;  %v2521_v12 = vcombine.high %v2503_v55, %v2503_v55  ;;  %v710_v13 = vrot.slane %v708_v1, 6  ;;  %v713_v14 = vrot.slane %v711_v2, 7  ;;  %v2220_v15 = vld [vmem:[#allocation2 + $0x350] ss:$8 sps:$4 sm:$0xff]   ;;  %v2527_v18 = vcombine.high %v2500_v54, %v2500_v54 }
  0x2f   : > { %338 = vmatprep.subr.bf16.mxu0 %v2186_v24  ;;  %480 = vmatprep.subr.bf16.mxu1 %v2188_v25  ;;  %v2225_v11 = vld [vmem:[#allocation2 + $0xd4] ss:$8 sps:$4 sm:$0xff]   ;;  %v724_v16 = vrot.slane %v722_v4, 6  ;;  %v2223_v17 = vld [vmem:[#allocation2 + $0xd0] ss:$8 sps:$4 sm:$0xff]   ;;  %v2531_v19 = vcombine.high %v2507_v59, %v2507_v59  ;;  %v727_v20 = vrot.slane %v725_v6, 7  ;;  %v2536_v22 = vcombine.high %v2510_v60, %v2510_v60 }
  0x30   : > { %v753_v21 = vshll.u32 %v2510_v60, 16  ;;  %v738_v24 = vrot.slane %v736_v7, 6  ;;  %v741_v25 = vrot.slane %v739_v8, 7  ;;  %v2228_v27 = vld [vmem:[#allocation2 + $0x344] ss:$8 sps:$4 sm:$0xff]   ;;  %v731_v36 = vshll.u32 %v2527_v18, 16 }
  0x31   : > { %vm705_vm4 = vsmask.f32 7448  ;;  %v2226_v33 = vld [vmem:[#allocation2 + $0x340] ss:$8 sps:$4 sm:$0xff]   ;;  %v728_v34 = vor.u32 %v727_v20, %v724_v16  ;;  %v745_v41 = vshll.u32 %v2531_v19, 16  ;;  %v759_v43 = vshll.u32 %v2536_v22, 16 }
  0x32   : > { %339 = vmatpush1.bf16.msra.mxu0 %v2190_v26  ;;  %481 = vmatpush1.bf16.msra.mxu1 %v2191_v29  ;;  %v752_v26 = vrot.slane %v750_v9, 6  ;;  %v2231_v29 = vld [vmem:[#allocation2 + $0xc4] ss:$8 sps:$4 sm:$0xff]   ;;  %v755_v32 = vrot.slane %v753_v21, 7  ;;  %v742_v39 = vor.u32 %v741_v25, %v738_v24  ;;  %v2235_v49 = vld [vmem:[#allocation2 + $0xb0] ss:$8 sps:$4 sm:$0xff]   ;;  %vm2558_vm6 = vmor %vm2549_vm5, %vm705_vm4 }
  0x33   : > { %340 = vmatprep.subr.bf16.mxu0 %v2192_v30  ;;  %482 = vmatprep.subr.bf16.mxu1 %v2194_v31  ;;  %v714_v30 = vor.u32 %v713_v14, %v710_v13  ;;  %v717_v31 = vshll.u32 %v2521_v12, 16  ;;  %v2238_v1 = vld [vmem:[#allocation2 + $0x320] ss:$8 sps:$4 sm:$0xff]   ;;  %v192_v4 = vld [vmem:[%s2478_s25 + $0x14] sm:$0x7]  ;;  %vm1286_vm8 = vcmask 1042434  }
  0x34   : > { %v2246_v8 = vld [vmem:[#allocation2 + $0x314] ss:$8 sps:$4 sm:$0xff]   ;;  %v2244_v14 = vld [vmem:[#allocation2 + $0x310] ss:$8 sps:$4 sm:$0xff]   ;;  %v2252_v16 = vld [vmem:[#allocation2 + $0x304] ss:$8 sps:$4 sm:$0xff]  }
  0x35   : > { %v715_v47 = vrot.slane %v714_v30, 2  ;;  %v719_v48 = vrot.slane %v717_v31, 7  ;;  %v2249_v9 = vld [vmem:[#allocation2 + $0x94] ss:$8 sps:$4 sm:$0xff]   ;;  %v2250_v24 = vld [vmem:[#allocation2 + $0x300] ss:$8 sps:$4 sm:$0xff]   ;;  %v2592_v31 = vrot.slane %v192_v4, %v2491_v40  ;;  %vm2611_vm9 = vmor %vm1285_vm7, %vm1286_vm8 }
  0x36   : > { %341 = vmatpush1.bf16.msra.mxu0 %v2196_v37  ;;  %483 = vmatpush1.bf16.msra.mxu1 %v2197_v42  ;;  %v2229_v37 = vld [vmem:[#allocation2 + $0xc0] ss:$8 sps:$4 sm:$0xff]   ;;  %v756_v42 = vor.u32 %v755_v32, %v752_v26  ;;  %v2259_v26 = vld [vmem:[#allocation2 + $0x274] ss:$8 sps:$4 sm:$0xff]   ;;  %vm1288_vm10 = vcmask 1044484   ;;  %vm1290_vm11 = vcmask 1046534  }
  0x37   : > { %342 = vmatprep.subr.bf16.mxu0 %v2198_v44  ;;  %484 = vmatprep.subr.bf16.mxu1 %v2200_v45  ;;  %v2234_v44 = vld [vmem:[#allocation2 + $0x334] ss:$8 sps:$4 sm:$0xff]   ;;  %v720_v2 = vsel %vm2558_vm6, %v715_v47, %v719_v48  ;;  %v2253_v25 = vld [vmem:[#allocation2 + $0x80] ss:$8 sps:$4 sm:$0xff]   ;;  %v2607_v48 = vcombine.high %v2592_v31, %v2592_v31  ;;  %vm2630_vm12 = vmor %vm2611_vm9, %vm1288_vm10 }
  0x38   : > { %v2237_v45 = vld [vmem:[#allocation2 + $0xb4] ss:$8 sps:$4 sm:$0xff]   ;;  %vm2645_vm13 = vmor %vm2630_vm12, %vm1290_vm11 }
  0x3a   : > { %343 = vmatpush1.bf16.msra.mxu0 %v2202_v46  ;;  %485 = vmatpush1.bf16.msra.mxu1 %v2203_v51  ;;  %v2232_v46 = vld [vmem:[#allocation2 + $0x330] ss:$8 sps:$4 sm:$0xff]   ;;  %v729_v51 = vrot.slane %v728_v34, 2 }
  0x3b   : > { %621 = vmatprep.subr.bf16.mxu0 %v2210_v52  ;;  %878 = vmatprep.subr.bf16.mxu1 %v2213_v53  ;;  %v733_v52 = vrot.slane %v731_v36, 7  ;;  %v2260_v34 = vld [vmem:[#allocation2 + $0x3f0] ss:$8 sps:$4 sm:$0xff]   ;;  %v2265_v36 = vld [vmem:[#allocation2 + $0x264] ss:$8 sps:$4 sm:$0xff]  }
  0x3d   : > { %361 = vmatmul.mubr.bf16.vlgmr.msra.gmra.mxu0 %v246_v56  ;;  %503 = vmatmul.mubr.bf16.vlgmr.msra.gmra.mxu1 %v388_v57  ;;  %v743_v56 = vrot.slane %v742_v39, 2  ;;  %v747_v57 = vrot.slane %v745_v41, 7  ;;  %v2263_v39 = vld [vmem:[#allocation2 + $0x260] ss:$8 sps:$4 sm:$0xff]  }
  0x3e   : > { %622 = vmatpush1.bf16.msra.mxu0 %v2208_v58  ;;  %879 = vmatpush1.bf16.msra.mxu1 %v2211_v61  ;;  %v757_v58 = vrot.slane %v756_v42, 2  ;;  %v761_v61 = vrot.slane %v759_v43, 7  ;;  %v2266_v41 = vld [vmem:[#allocation2 + $0x3e0] ss:$8 sps:$4 sm:$0xff]   ;;  %v1121_v42 = vshll.u32 %v2592_v31, 16 }
  0x3f   : > { %623 = vmatprep.subr.bf16.mxu0 %v2216_v62  ;;  %880 = vmatprep.subr.bf16.mxu1 %v2219_v63  ;;  %v2240_v62 = vld [vmem:[#allocation2 + $0x324] ss:$8 sps:$4 sm:$0xff]   ;;  %v2571_v6 = vsel %vm2558_vm6, %v743_v56, %v747_v57  ;;  %v2271_v43 = vld [vmem:[#allocation2 + $0x254] ss:$8 sps:$4 sm:$0xff]  }
  0x40   : > { %653 = vmatprep.mubr.bf16.mxu0 %v2418_v0  ;;  %910 = vmatprep.mubr.bf16.mxu1 %v2418_v0  ;;  %v2243_v63 = vld [vmem:[#allocation2 + $0xa4] ss:$8 sps:$4 sm:$0xff]   ;;  %v2575_v7 = vsel %vm2558_vm6, %v757_v58, %v761_v61  ;;  %v1123_v56 = vrot.slane %v1121_v42, 7 }
  0x41   : > { %v781_v13 = vcombine.low %v2571_v6, %v2575_v7  ;;  %v2277_v57 = vld [vmem:[#allocation2 + $0x244] ss:$8 sps:$4 sm:$0xff]  }
  0x42   : > { %624 = vmatpush1.bf16.msra.mxu0 %v2214_v3  ;;  %881 = vmatpush1.bf16.msra.mxu1 %v2217_v5  ;;  %v2241_v3 = vld [vmem:[#allocation2 + $0xa0] ss:$8 sps:$4 sm:$0xff]   ;;  %v2567_v5 = vsel %vm2558_vm6, %v729_v51, %v733_v52  ;;  %v2269_v51 = vld [vmem:[#allocation2 + $0x250] ss:$8 sps:$4 sm:$0xff]   ;;  %v2280_v58 = vld [vmem:[#allocation2 + $0x3c4] ss:$8 sps:$4 sm:$0xff]  }
  0x43   : > { %625 = vmatprep.subr.bf16.mxu0 %v2222_v10  ;;  %882 = vmatprep.subr.bf16.mxu1 %v2225_v11  ;;  %v531_v10 = vcombine.low %v2486_v35, %v192_v4  ;;  %v780_v11 = vcombine.low %v720_v2, %v2567_v5  ;;  %v2584_v23 = vrot.slane %v781_v13, %v2491_v40  ;;  %v2272_v52 = vld [vmem:[#allocation2 + $0x3d0] ss:$8 sps:$4 sm:$0xff]   ;;  %v2278_v2 = vld [vmem:[#allocation2 + $0x3c0] ss:$8 sps:$4 sm:$0xff]   ;;  %v2283_v4 = vld [vmem:[#allocation2 + $0x234] ss:$8 sps:$4 sm:$0xff]  }
  0x44   : > { %v2304_v42 = vld [vmem:[#allocation2 + $0x384] ss:$8 sps:$4 sm:$0xff]  }
  0x45   : > { %v538_v20 = vrot.slane %v531_v10, %v2491_v40  ;;  %v788_v21 = vrot.slane %v780_v11, %v2491_v40 }
  0x46   : > { %626 = vmatpush1.bf16.msra.mxu0 %v2220_v15  ;;  %883 = vmatpush1.bf16.msra.mxu1 %v2223_v17  ;;  %v2247_v15 = vld [vmem:[#allocation2 + $0x90] ss:$8 sps:$4 sm:$0xff]   ;;  %v2255_v17 = vld [vmem:[#allocation2 + $0x84] ss:$8 sps:$4 sm:$0xff]  }
  0x47   : > { %627 = vmatprep.subr.bf16.mxu0 %v2228_v27  ;;  %884 = vmatprep.subr.bf16.mxu1 %v2231_v29  ;;  %v2262_v27 = vld [vmem:[#allocation2 + $0x3f4] ss:$8 sps:$4 sm:$0xff]   ;;  %v2588_v29 = vrot.slane %v2486_v35, %v2491_v40  ;;  %v539_v30 = vcombine.low %v2497_v50, %v538_v20  ;;  %v796_v32 = vcombine.low %v788_v21, %v2584_v23  ;;  %v1118_v50 = vshrl.u32 %v2592_v31, 16  ;;  %v2292_v20 = vld [vmem:[#allocation2 + $0x3a4] ss:$8 sps:$4 sm:$0xff]  }
  0x48   : > { %v2063_v21 = vrot.slane %v2503_v55, 9  ;;  %v2290_v55 = vld [vmem:[#allocation2 + $0x3a0] ss:$8 sps:$4 sm:$0xff]  }
  0x49   : > { %v934_v35 = vshrl.u32 %v2588_v29, 16  ;;  %v937_v38 = vshll.u32 %v2588_v29, 16 }
  0x4a   : > { %628 = vmatpush1.bf16.msra.mxu0 %v2226_v33  ;;  %885 = vmatpush1.bf16.msra.mxu1 %v2229_v37  ;;  %v2257_v33 = vld [vmem:[#allocation2 + $0x270] ss:$8 sps:$4 sm:$0xff]   ;;  %v2268_v37 = vld [vmem:[#allocation2 + $0x3e4] ss:$8 sps:$4 sm:$0xff]  }
  0x4b   : > { %629 = vmatprep.subr.bf16.mxu0 %v2234_v44  ;;  %886 = vmatprep.subr.bf16.mxu1 %v2237_v45  ;;  %v2274_v44 = vld [vmem:[#allocation2 + $0x3d4] ss:$8 sps:$4 sm:$0xff]   ;;  %v2602_v45 = vcombine.high %v2588_v29, %v2588_v29  ;;  %v939_v47 = vrot.slane %v937_v38, 7 }
  0x4d   : > { %v1472_v53 = vrot.slane %v2602_v45, 7 }
  0x4e   : > { %630 = vmatpush1.bf16.msra.mxu0 %v2232_v46  ;;  %887 = vmatpush1.bf16.msra.mxu1 %v2235_v49  ;;  %v936_v46 = vrot.slane %v934_v35, 6  ;;  %v1120_v49 = vrot.slane %v1118_v50, 6  ;;  %v2293_v35 = vld [vmem:[#allocation2 + $0x210] ss:$8 sps:$4 sm:$0xff]  }
  0x4f   : > { %631 = vmatprep.subr.bf16.mxu0 %v2240_v62  ;;  %888 = vmatprep.subr.bf16.mxu1 %v2243_v63  ;;  %v943_v62 = vshll.u32 %v2602_v45, 16  ;;  %v1127_v63 = vshll.u32 %v2607_v48, 16 }
  0x50   : > { %v940_v61 = vor.u32 %v939_v47, %v936_v46 }
  0x51   : > { %v945_v10 = vrot.slane %v943_v62, 7  ;;  %v1129_v11 = vrot.slane %v1127_v63, 7  ;;  %v2307_v62 = vld [vmem:[#allocation2 + $0x174] ss:$8 sps:$4 sm:$0xff]  }
  0x52   : > { %632 = vmatpush1.bf16.msra.mxu0 %v2238_v1  ;;  %889 = vmatpush1.bf16.msra.mxu1 %v2241_v3  ;;  %v2275_v1 = vld [vmem:[#allocation2 + $0x240] ss:$8 sps:$4 sm:$0xff]   ;;  %v1124_v3 = vor.u32 %v1123_v56, %v1120_v49 }
  0x53   : > { %633 = vmatprep.subr.bf16.mxu0 %v2246_v8  ;;  %890 = vmatprep.subr.bf16.mxu1 %v2249_v9  ;;  %v2286_v8 = vld [vmem:[#allocation2 + $0x3b4] ss:$8 sps:$4 sm:$0xff]   ;;  %v941_v9 = vrot.slane %v940_v61, 2  ;;  %v2302_v61 = vld [vmem:[#allocation2 + $0x380] ss:$8 sps:$4 sm:$0xff]  }
  0x56   : > { %634 = vmatpush1.bf16.msra.mxu0 %v2244_v14  ;;  %891 = vmatpush1.bf16.msra.mxu1 %v2247_v15  ;;  %v2281_v14 = vld [vmem:[#allocation2 + $0x230] ss:$8 sps:$4 sm:$0xff]  }
  0x57   : > { %635 = vmatprep.subr.bf16.mxu0 %v2252_v16  ;;  %892 = vmatprep.subr.bf16.mxu1 %v2255_v17  ;;  %v2284_v15 = vld [vmem:[#allocation2 + $0x3b0] ss:$8 sps:$4 sm:$0xff]   ;;  %v1125_v16 = vrot.slane %v1124_v3, 2  ;;  %v2289_v17 = vld [vmem:[#allocation2 + $0x224] ss:$8 sps:$4 sm:$0xff]  }
  0x58   : > { %v2310_v3 = vld [vmem:[#allocation2 + $0x2f4] ss:$8 sps:$4 sm:$0xff]  }
  0x5a   : > { %636 = vmatpush1.bf16.msra.mxu0 %v2250_v24  ;;  %893 = vmatpush1.bf16.msra.mxu1 %v2253_v25  ;;  %v1294_v24 = vrot.slane %v2521_v12, 7  ;;  %v2064_v25 = vrot.slane %v2500_v54, 9  ;;  %v1130_v12 = vsel %vm2558_vm6, %v1125_v16, %v1129_v11  ;;  %v2305_v11 = vld [vmem:[#allocation2 + $0x170] ss:$8 sps:$4 sm:$0xff]   ;;  %v2313_v16 = vld [vmem:[#allocation2 + $0x164] ss:$8 sps:$4 sm:$0xff]  }
  0x5b   : > { %1062 = vmatprep.subr.bf16.mxu0 %v2259_v26  ;;  %1238 = vmatprep.subr.bf16.mxu1 %v2262_v27  ;;  %v1298_v26 = vrot.slane %v2527_v18, 7  ;;  %v2287_v27 = vld [vmem:[#allocation2 + $0x220] ss:$8 sps:$4 sm:$0xff]   ;;  %v2066_v18 = vrot.slane %v2510_v60, 9  ;;  %v2337_v54 = vld [vmem:[#allocation2 + $0x124] ss:$8 sps:$4 sm:$0xff]  }
  0x5d   : > { %654 = vmatmul.mubr.bf16.vlgmr.msra.gmra.mxu0 %v539_v30  ;;  %911 = vmatmul.mubr.bf16.vlgmr.msra.gmra.mxu1 %v796_v32  ;;  %v946_v30 = vsel %vm2558_vm6, %v941_v9, %v945_v10  ;;  %v964_v32 = vcombine.low %v2567_v5, %v2571_v6  ;;  %v1306_v5 = vrot.slane %v2536_v22, 7  ;;  %v2298_v6 = vld [vmem:[#allocation2 + $0x394] ss:$8 sps:$4 sm:$0xff]   ;;  %v2353_v22 = vld [vmem:[#allocation2 + $0x470] ss:$8 sps:$4 sm:$0xff]  }
  0x5e   : > { %1063 = vmatpush1.bf16.msra.mxu0 %v2257_v33  ;;  %1239 = vmatpush1.bf16.msra.mxu1 %v2260_v34  ;;  %v2065_v33 = vrot.slane %v2507_v59, 9  ;;  %v1302_v34 = vrot.slane %v2531_v19, 7  ;;  %v2083_v59 = vrot.slane %v2588_v29, 9  ;;  %v2295_v19 = vld [vmem:[#allocation2 + $0x214] ss:$8 sps:$4 sm:$0xff]   ;;  %v965_v38 = vcombine.low %v2575_v7, %v946_v30 }
  0x5f   : > { %1064 = vmatprep.subr.bf16.mxu0 %v2265_v36  ;;  %1240 = vmatprep.subr.bf16.mxu1 %v2268_v37  ;;  %v2100_v36 = vrot.slane %v2592_v31, 9  ;;  %v1638_v37 = vrot.slane %v2607_v48, 7  ;;  %v972_v50 = vrot.slane %v964_v32, %v2491_v40  ;;  %v1148_v60 = vcombine.low %v946_v30, %v1130_v12  ;;  %v2296_v29 = vld [vmem:[#allocation2 + $0x390] ss:$8 sps:$4 sm:$0xff]   ;;  %v2323_v30 = vld [vmem:[#allocation2 + $0x140] ss:$8 sps:$4 sm:$0xff]  }
  0x60   : > { %1094 = vmatprep.mubr.bf16.mxu0 %v2418_v0  ;;  %1270 = vmatprep.mubr.bf16.mxu1 %v2418_v0  ;;  %v1295_v31 = vsel %vm2645_vm13, %v2063_v21, %v1294_v24  ;;  %v1299_v7 = vsel %vm2645_vm13, %v2064_v25, %v1298_v26  ;;  %v1473_v45 = vsel %vm2645_vm13, %v2083_v59, %v1472_v53  ;;  %v2319_v21 = vld [vmem:[#allocation2 + $0x154] ss:$8 sps:$4 sm:$0xff]   ;;  %v2317_v24 = vld [vmem:[#allocation2 + $0x150] ss:$8 sps:$4 sm:$0xff]   ;;  %v2325_v26 = vld [vmem:[#allocation2 + $0x144] ss:$8 sps:$4 sm:$0xff]  }
  0x61   : > { %v1639_v49 = vsel %vm2645_vm13, %v2100_v36, %v1638_v37  ;;  %v1155_v56 = vrot.slane %v1148_v60, %v2491_v40  ;;  %v2320_v25 = vld [vmem:[#allocation2 + $0x2d0] ss:$8 sps:$4 sm:$0xff]   ;;  %v2326_v32 = vld [vmem:[#allocation2 + $0x2c0] ss:$8 sps:$4 sm:$0xff]   ;;  %v2349_v37 = vld [vmem:[#allocation2 + $0x104] ss:$8 sps:$4 sm:$0xff]  }
  0x62   : > { %1065 = vmatpush1.bf16.msra.mxu0 %v2263_v39  ;;  %1241 = vmatpush1.bf16.msra.mxu1 %v2266_v41  ;;  %v2301_v39 = vld [vmem:[#allocation2 + $0x204] ss:$8 sps:$4 sm:$0xff]   ;;  %v1303_v41 = vsel %vm2645_vm13, %v2065_v33, %v1302_v34  ;;  %v2331_v33 = vld [vmem:[#allocation2 + $0x134] ss:$8 sps:$4 sm:$0xff]   ;;  %v2332_v12 = vld [vmem:[#allocation2 + $0x2b0] ss:$8 sps:$4 sm:$0xff]  }
  0x63   : > { %1066 = vmatprep.subr.bf16.mxu0 %v2271_v43  ;;  %1242 = vmatprep.subr.bf16.mxu1 %v2274_v44  ;;  %v1307_v43 = vsel %vm2645_vm13, %v2066_v18, %v1306_v5  ;;  %v1325_v44 = vcombine.low %v1295_v31, %v1299_v7  ;;  %v1491_v47 = vcombine.low %v1299_v7, %v1303_v41  ;;  %v2334_v34 = vld [vmem:[#allocation2 + $0x2b4] ss:$8 sps:$4 sm:$0xff]   ;;  %v2340_v18 = vld [vmem:[#allocation2 + $0x2a4] ss:$8 sps:$4 sm:$0xff]   ;;  %v2335_v5 = vld [vmem:[#allocation2 + $0x120] ss:$8 sps:$4 sm:$0xff]  }
  0x64   : > { %v1326_v46 = vcombine.low %v1303_v41, %v1307_v43  ;;  %v1492_v48 = vcombine.low %v1307_v43, %v1473_v45  ;;  %v1156_v13 = vcombine.low %v2584_v23, %v1155_v56  ;;  %v2322_v23 = vld [vmem:[#allocation2 + $0x2d4] ss:$8 sps:$4 sm:$0xff]   ;;  %v2338_v59 = vld [vmem:[#allocation2 + $0x2a0] ss:$8 sps:$4 sm:$0xff]   ;;  %v2341_v53 = vld [vmem:[#allocation2 + $0x110] ss:$8 sps:$4 sm:$0xff]  }
  0x65   : > { %v2344_v36 = vld [vmem:[#allocation2 + $0x290] ss:$8 sps:$4 sm:$0xff]   ;;  %v2355_v60 = vld [vmem:[#allocation2 + $0x474] ss:$8 sps:$4 sm:$0xff]   ;;  %v2364_v41 = vld [vmem:[#allocation2 + $0x444] ss:$8 sps:$4 sm:$0xff]  }
  0x66   : > { %1067 = vmatpush1.bf16.msra.mxu0 %v2269_v51  ;;  %1243 = vmatpush1.bf16.msra.mxu1 %v2272_v52  ;;  %v2299_v51 = vld [vmem:[#allocation2 + $0x200] ss:$8 sps:$4 sm:$0xff]   ;;  %v979_v52 = vrot.slane %v965_v38, %v2491_v40  ;;  %v2667_v63 = vrot.slane %v1326_v46, %v2491_v40  ;;  %v2361_v31 = vld [vmem:[#allocation2 + $0x454] ss:$8 sps:$4 sm:$0xff]   ;;  %v2359_v7 = vld [vmem:[#allocation2 + $0x450] ss:$8 sps:$4 sm:$0xff]  }
  0x67   : > { %1068 = vmatprep.subr.bf16.mxu0 %v2277_v57  ;;  %1244 = vmatprep.subr.bf16.mxu1 %v2280_v58  ;;  %v2664_v57 = vrot.slane %v1325_v44, %v2491_v40  ;;  %v1657_v58 = vcombine.low %v1473_v45, %v1639_v49  ;;  %v2347_v38 = vld [vmem:[#allocation2 + $0x100] ss:$8 sps:$4 sm:$0xff]   ;;  %v2367_v43 = vld [vmem:[#allocation2 + $0x434] ss:$8 sps:$4 sm:$0xff]   ;;  %v2365_v44 = vld [vmem:[#allocation2 + $0x430] ss:$8 sps:$4 sm:$0xff]  }
  0x68   : > { %v980_v10 = vcombine.low %v972_v50, %v979_v52  ;;  %v2350_v50 = vld [vmem:[#allocation2 + $0x280] ss:$8 sps:$4 sm:$0xff]   ;;  %v2370_v45 = vld [vmem:[#allocation2 + $0x424] ss:$8 sps:$4 sm:$0xff]  }
  0x69   : > { %v2368_v46 = vld [vmem:[#allocation2 + $0x420] ss:$8 sps:$4 sm:$0xff]  }
  0x6a   : > { %1069 = vmatpush1.bf16.msra.mxu0 %v2275_v1  ;;  %1245 = vmatpush1.bf16.msra.mxu1 %v2278_v2  ;;  %v2670_v1 = vrot.slane %v1491_v47, %v2491_v40  ;;  %v2673_v2 = vrot.slane %v1492_v48, %v2491_v40  ;;  %v2373_v47 = vld [vmem:[#allocation2 + $0x414] ss:$8 sps:$4 sm:$0xff]   ;;  %v2376_v48 = vld [vmem:[#allocation2 + $0x404] ss:$8 sps:$4 sm:$0xff]   ;;  %v2374_v49 = vld [vmem:[#allocation2 + $0x400] ss:$8 sps:$4 sm:$0xff]  }
  0x6b   : > { %1070 = vmatprep.subr.bf16.mxu0 %v2283_v4  ;;  %1246 = vmatprep.subr.bf16.mxu1 %v2286_v8  ;;  %v2676_v4 = vrot.slane %v1657_v58, %v2491_v40  ;;  %v1341_v8 = vcombine.low %v2664_v57, %v2667_v63  ;;  %v2316_v40 = vld [vmem:[#allocation2 + $0x2e4] ss:$8 sps:$4 sm:$0xff]  }
  0x6c   : > { %v1507_v9 = vcombine.low %v2670_v1, %v2673_v2 }
  0x6e   : > { %1071 = vmatpush1.bf16.msra.mxu0 %v2281_v14  ;;  %1247 = vmatpush1.bf16.msra.mxu1 %v2284_v15  ;;  %v1665_v14 = vcombine.low %v2667_v63, %v2676_v4  ;;  %v2308_v15 = vld [vmem:[#allocation2 + $0x2f0] ss:$8 sps:$4 sm:$0xff]  }
  0x6f   : > { %1072 = vmatprep.subr.bf16.mxu0 %v2289_v17  ;;  %1248 = vmatprep.subr.bf16.mxu1 %v2292_v20  ;;  %v2311_v17 = vld [vmem:[#allocation2 + $0x160] ss:$8 sps:$4 sm:$0xff]  }
  0x70   : > { %v2314_v20 = vld [vmem:[#allocation2 + $0x2e0] ss:$8 sps:$4 sm:$0xff]  }
  0x72   : > { %1073 = vmatpush1.bf16.msra.mxu0 %v2287_v27  ;;  %1249 = vmatpush1.bf16.msra.mxu1 %v2290_v55  ;;  %v2328_v27 = vld [vmem:[#allocation2 + $0x2c4] ss:$8 sps:$4 sm:$0xff]   ;;  %v2329_v55 = vld [vmem:[#allocation2 + $0x130] ss:$8 sps:$4 sm:$0xff]  }
  0x73   : > { %1074 = vmatprep.subr.bf16.mxu0 %v2295_v19  ;;  %1250 = vmatprep.subr.bf16.mxu1 %v2298_v6  ;;  %v2343_v19 = vld [vmem:[#allocation2 + $0x114] ss:$8 sps:$4 sm:$0xff]  }
  0x74   : > { %v2346_v6 = vld [vmem:[#allocation2 + $0x294] ss:$8 sps:$4 sm:$0xff]  }
  0x76   : > { %1075 = vmatpush1.bf16.msra.mxu0 %v2293_v35  ;;  %1251 = vmatpush1.bf16.msra.mxu1 %v2296_v29  ;;  %v2352_v35 = vld [vmem:[#allocation2 + $0x284] ss:$8 sps:$4 sm:$0xff]  }
  0x77   : > { %1076 = vmatprep.subr.bf16.mxu0 %v2301_v39  ;;  %1252 = vmatprep.subr.bf16.mxu1 %v2304_v42  ;;  %v2358_v29 = vld [vmem:[#allocation2 + $0x464] ss:$8 sps:$4 sm:$0xff]   ;;  %v2356_v39 = vld [vmem:[#allocation2 + $0x460] ss:$8 sps:$4 sm:$0xff]  }
  0x78   : > { %v2362_v42 = vld [vmem:[#allocation2 + $0x440] ss:$8 sps:$4 sm:$0xff]  }
  0x7a   : > { %1077 = vmatpush1.bf16.msra.mxu0 %v2299_v51  ;;  %1253 = vmatpush1.bf16.msra.mxu1 %v2302_v61 }
  0x7b   : > { %1423 = vmatprep.subr.bf16.mxu0 %v2307_v62  ;;  %1589 = vmatprep.subr.bf16.mxu1 %v2310_v3 }
  0x7d   : > { %1095 = vmatmul.mubr.bf16.vlgmr.msra.gmra.mxu0 %v980_v10  ;;  %1271 = vmatmul.mubr.bf16.vlgmr.msra.gmra.mxu1 %v1156_v13 }
  0x7e   : > { %1424 = vmatpush1.bf16.msra.mxu0 %v2305_v11  ;;  %1590 = vmatpush1.bf16.msra.mxu1 %v2308_v15 }
  0x7f   : > { %1425 = vmatprep.subr.bf16.mxu0 %v2313_v16  ;;  %1591 = vmatprep.subr.bf16.mxu1 %v2316_v40 }
  0x80   : > { %1455 = vmatprep.mubr.bf16.mxu0 %v2418_v0  ;;  %1621 = vmatprep.mubr.bf16.mxu1 %v2418_v0 }
  0x82   : > { %1426 = vmatpush1.bf16.msra.mxu0 %v2311_v17  ;;  %1592 = vmatpush1.bf16.msra.mxu1 %v2314_v20 }
  0x83   : > { %1427 = vmatprep.subr.bf16.mxu0 %v2319_v21  ;;  %1593 = vmatprep.subr.bf16.mxu1 %v2322_v23 }
  0x86   : > { %1428 = vmatpush1.bf16.msra.mxu0 %v2317_v24  ;;  %1594 = vmatpush1.bf16.msra.mxu1 %v2320_v25 }
  0x87   : > { %1429 = vmatprep.subr.bf16.mxu0 %v2325_v26  ;;  %1595 = vmatprep.subr.bf16.mxu1 %v2328_v27 }
  0x8a   : > { %1430 = vmatpush1.bf16.msra.mxu0 %v2323_v30  ;;  %1596 = vmatpush1.bf16.msra.mxu1 %v2326_v32 }
  0x8b   : > { %1431 = vmatprep.subr.bf16.mxu0 %v2331_v33  ;;  %1597 = vmatprep.subr.bf16.mxu1 %v2334_v34 }
  0x8e   : > { %1432 = vmatpush1.bf16.msra.mxu0 %v2329_v55  ;;  %1598 = vmatpush1.bf16.msra.mxu1 %v2332_v12 }
  0x8f   : > { %1433 = vmatprep.subr.bf16.mxu0 %v2337_v54  ;;  %1599 = vmatprep.subr.bf16.mxu1 %v2340_v18 }
  0x92   : > { %1434 = vmatpush1.bf16.msra.mxu0 %v2335_v5  ;;  %1600 = vmatpush1.bf16.msra.mxu1 %v2338_v59 }
  0x93   : > { %1435 = vmatprep.subr.bf16.mxu0 %v2343_v19  ;;  %1601 = vmatprep.subr.bf16.mxu1 %v2346_v6 }
  0x96   : > { %1436 = vmatpush1.bf16.msra.mxu0 %v2341_v53  ;;  %1602 = vmatpush1.bf16.msra.mxu1 %v2344_v36 }
  0x97   : > { %1437 = vmatprep.subr.bf16.mxu0 %v2349_v37  ;;  %1603 = vmatprep.subr.bf16.mxu1 %v2352_v35 }
  0x9a   : > { %1438 = vmatpush1.bf16.msra.mxu0 %v2347_v38  ;;  %1604 = vmatpush1.bf16.msra.mxu1 %v2350_v50 }
  0x9b   : > { %1747 = vmatprep.subr.bf16.mxu0 %v2355_v60 }
  0x9d   : > { %1456 = vmatmul.mubr.bf16.vlgmr.msra.gmra.mxu0 %v1341_v8  ;;  %1622 = vmatmul.mubr.bf16.vlgmr.msra.gmra.mxu1 %v1507_v9 }
  0x9e   : > { %1748 = vmatpush1.bf16.msra.mxu0 %v2353_v22  ;;  %1779 = vmatprep.mubr.bf16.mxu0 %v2418_v0  ;;  %v2371_v0 = vld [vmem:[#allocation2 + $0x410] ss:$8 sps:$4 sm:$0xff]   ;;  %v1798_v22 = vsub.s32 0, %v2480_v28 }
  0x9f   : > { %1749 = vmatprep.subr.bf16.mxu0 %v2358_v29  ;;  %v1794_v29 = vld [vmem:[%s2711_s2] sm:$0x3] }
  0xa2   : > { %1750 = vmatpush1.bf16.msra.mxu0 %v2356_v39 }
  0xa3   : > { %1751 = vmatprep.subr.bf16.mxu0 %v2361_v31 }
  0xa6   : > { %1752 = vmatpush1.bf16.msra.mxu0 %v2359_v7  ;;  %v1802_v7 = vsub.s32 1, %v2480_v28 }
  0xa7   : > { %1753 = vmatprep.subr.bf16.mxu0 %v2364_v41 }
  0xaa   : > { %1754 = vmatpush1.bf16.msra.mxu0 %v2362_v42 }
  0xab   : > { %1755 = vmatprep.subr.bf16.mxu0 %v2367_v43 }
  0xae   : > { %1756 = vmatpush1.bf16.msra.mxu0 %v2365_v44 }
  0xaf   : > { %1757 = vmatprep.subr.bf16.mxu0 %v2370_v45 }
  0xb2   : > { %1758 = vmatpush1.bf16.msra.mxu0 %v2368_v46  ;;  %v1799_v46 = vrot.slane %v1794_v29, %v1798_v22 }
  0xb3   : > { %1759 = vmatprep.subr.bf16.mxu0 %v2373_v47 }
  0xb6   : > { %1760 = vmatpush1.bf16.msra.mxu0 %v2371_v0 }
  0xb7   : > { %1761 = vmatprep.subr.bf16.mxu0 %v2376_v48 }
  0xba   : > { %1762 = vmatpush1.bf16.msra.mxu0 %v2374_v49 }
  0xbd   : > { %1780 = vmatmul.mubr.bf16.vlgmr.msra.gmra.mxu0 %v1665_v14 }
  0xfd   : > { %v362_v51 = vpop.f32.mrf.mxu0  ;;  %v504_v52 = vpop.f32.mrf.mxu1 }
  0xfe   : > { %v505_v17 = vadd.f32 %v504_v52, %v362_v51  ;;  %v1803_v51 = vrot.slane %v1794_v29, %v1802_v7 }
  0xff   : > { %v364_v56 = vpop.f32.mrf.mxu0  ;;  %v506_v57 = vpop.f32.mrf.mxu1 }
 0x100   : > { %v507_v20 = vadd.f32 %v506_v57, %v364_v56 }
 0x101   : > { %v366_v58 = vpop.f32.mrf.mxu0  ;;  %v508_v61 = vpop.f32.mrf.mxu1 }
 0x102   : > { %v509_v25 = vadd.f32 %v508_v61, %v366_v58 }
 0x103   : > { %v368_v62 = vpop.f32.mrf.mxu0  ;;  %v510_v2 = vpop.f32.mrf.mxu1 }
 0x104   : > { %v511_v30 = vadd.f32 %v510_v2, %v368_v62 }
 0x11d   : > { %v655_v1 = vpop.f32.mrf.mxu0  ;;  %v912_v8 = vpop.f32.mrf.mxu1 }
 0x11e   : > { %v664_v21 = vadd.f32 %v655_v1, %v505_v17 }
 0x11f   : > { %v657_v3 = vpop.f32.mrf.mxu0  ;;  %v914_v10 = vpop.f32.mrf.mxu1 }
 0x120   : > { %v665_v26 = vadd.f32 %v657_v3, %v507_v20  ;;  %v921_v32 = vadd.f32 %v912_v8, %v664_v21 }
 0x121   : > { %v659_v9 = vpop.f32.mrf.mxu0  ;;  %v916_v13 = vpop.f32.mrf.mxu1 }
 0x122   : > { %v666_v33 = vadd.f32 %v659_v9, %v509_v25  ;;  %v922_v55 = vadd.f32 %v914_v10, %v665_v26 }
 0x123   : > { %v661_v11 = vpop.f32.mrf.mxu0  ;;  %v918_v16 = vpop.f32.mrf.mxu1 }
 0x124   : > { %v667_v12 = vadd.f32 %v661_v11, %v511_v30  ;;  %v923_v59 = vadd.f32 %v916_v13, %v666_v33 }
 0x126   : > { %v924_v6 = vadd.f32 %v918_v16, %v667_v12 }
 0x13d   : > { %v1096_v15 = vpop.f32.mrf.mxu0  ;;  %v1272_v63 = vpop.f32.mrf.mxu1 }
 0x13e   : > { %v1105_v54 = vadd.f32 %v1096_v15, %v921_v32 }
 0x13f   : > { %v1098_v40 = vpop.f32.mrf.mxu0  ;;  %v1274_v14 = vpop.f32.mrf.mxu1 }
 0x140   : > { %v1106_v19 = vadd.f32 %v1098_v40, %v922_v55  ;;  %v1281_v53 = vadd.f32 %v1272_v63, %v1105_v54 }
 0x141   : > { %v1100_v4 = vpop.f32.mrf.mxu0  ;;  %v1276_v24 = vpop.f32.mrf.mxu1 }
 0x142   : > { %v1107_v36 = vadd.f32 %v1100_v4, %v923_v59  ;;  %v1282_v38 = vadd.f32 %v1274_v14, %v1106_v19 }
 0x143   : > { %v1102_v23 = vpop.f32.mrf.mxu0  ;;  %v1278_v34 = vpop.f32.mrf.mxu1 }
 0x144   : > { %v1108_v50 = vadd.f32 %v1102_v23, %v924_v6  ;;  %v1283_v39 = vadd.f32 %v1276_v24, %v1107_v36 }
 0x146   : > { %v1284_v43 = vadd.f32 %v1278_v34, %v1108_v50 }
 0x15d   : > { %v1457_v27 = vpop.f32.mrf.mxu0  ;;  %v1623_v5 = vpop.f32.mrf.mxu1 }
 0x15e   : > { %v1466_v60 = vadd.f32 %v1457_v27, %v1281_v53 }
 0x15f   : > { %v1459_v18 = vpop.f32.mrf.mxu0  ;;  %v1625_v35 = vpop.f32.mrf.mxu1 }
 0x160   : > { %v1467_v31 = vadd.f32 %v1459_v18, %v1282_v38  ;;  %v1632_v44 = vadd.f32 %v1623_v5, %v1466_v60 }
 0x161   : > { %v1461_v37 = vpop.f32.mrf.mxu0  ;;  %v1627_v42 = vpop.f32.mrf.mxu1 }
 0x162   : > { %v1468_v45 = vadd.f32 %v1461_v37, %v1283_v39  ;;  %v1633_v0 = vadd.f32 %v1625_v35, %v1467_v31 }
 0x163   : > { %v1463_v41 = vpop.f32.mrf.mxu0  ;;  %v1629_v52 = vpop.f32.mrf.mxu1 }
 0x164   : > { %v1469_v48 = vadd.f32 %v1463_v41, %v1284_v43  ;;  %v1634_v57 = vadd.f32 %v1627_v42, %v1468_v45 }
 0x166   : > { %v1635_v1 = vadd.f32 %v1629_v52, %v1469_v48 }
 0x17d   : > { %v1781_v47 = vpop.f32.mrf.mxu0 }
 0x17e   : > { %v1790_v49 = vadd.f32 %v1781_v47, %v1632_v44 }
 0x17f   : > { %v1783_v56 = vpop.f32.mrf.mxu0 }
 0x180   : > { %v1806_v58 = vadd.f32 %v1799_v46, %v1790_v49  ;;  %v1791_v61 = vadd.f32 %v1783_v56, %v1633_v0 }
 0x181   : > { %v1785_v62 = vpop.f32.mrf.mxu0 }
 0x182   : > { %v1807_v28 = vadd.f32 %v1803_v51, %v1791_v61  ;;  %v1792_v2 = vadd.f32 %v1785_v62, %v1634_v57  ;;  %v1810_v8 = vmax.f32 %v1806_v58, 0.0 }
 0x183   : > { %v1787_v3 = vpop.f32.mrf.mxu0 }
 0x184   : > { %v1811_v9 = vmax.f32 %v1807_v28, 0.0  ;;  %v1793_v10 = vadd.f32 %v1787_v3, %v1635_v1  ;;  %v1808_v11 = vadd.f32 %v1799_v46, %v1792_v2 }
 0x186   : > { %v1818_v13 = vcombine.low %v1810_v8, %v1811_v9  ;;  %v1819_v15 = vcombine.high %v1810_v8, %v1811_v9  ;;  %v2117_v16 = vcombine.low %v1811_v9, %v1811_v9  ;;  %v2118_v40 = vcombine.high %v1811_v9, %v1811_v9 }
 0x187   : > { %v1809_v63 = vadd.f32 %v1803_v51, %v1793_v10  ;;  %v1812_v17 = vmax.f32 %v1808_v11, 0.0 }
 0x188   : > { %v2121_v4 = vpack.c.bf16 %v2117_v16, %v1818_v13  ;;  %v2122_v14 = vpack.c.bf16 %v2118_v40, %v1819_v15 }
 0x189   : > { %v1813_v20 = vmax.f32 %v1809_v63, 0.0 }
 0x18a   : > { %2125 = vst.sshfl [vmem:[%s185_s4] sm:$0x33 pattern:$0x76325410] %v2121_v4 }
 0x18b   : > { %2126 = vst.sshfl [vmem:[%s185_s4 + $0x4] sm:$0x33 pattern:$0x76325410] %v2122_v14  ;;  %v1820_v21 = vcombine.low %v1812_v17, %v1813_v20  ;;  %v1821_v23 = vcombine.high %v1812_v17, %v1813_v20  ;;  %v2119_v24 = vcombine.low %v1813_v20, %v1813_v20  ;;  %v2120_v25 = vcombine.high %v1813_v20, %v1813_v20 }
 0x18d   : > { %v2123_v26 = vpack.c.bf16 %v2119_v24, %v1820_v21  ;;  %v2124_v27 = vpack.c.bf16 %v2120_v25, %v1821_v23 }
 0x18f   : > { %2127 = vst.sshfl [vmem:[%s185_s4 + $0x8] sm:$0x33 pattern:$0x76325410] %v2123_v26 }
 0x190   : > { %2128 = vst.sshfl [vmem:[%s185_s4 + $0xc] sm:$0x33 pattern:$0x76325410] %v2124_v27 }
 0x191 PF: > { %s14_s12 = sadd.s32 1, %s2413_s12  }
 0x192   : > { %p11_p1 = scmp.ge.s32.totalorder %s14_s12, 4  }
 0x194   :  { %13 = sbr.rel (!%p11_p1) target bundleno = 1 (0x1), region = 75 }
 0x199   :  { %1911 = vsyncpa [#allocation3], 1 }
 0x19a   :  { %1913 = vsyncpa [#allocation3 + $0x1], 1 }

// kernel: multi_label_cnn_forward.13
= control target key start
LH: loop header
LB: loop body
LE: loop exit
PB: predicated region body
PF: predicated region fallthrough
CT: control target
= control target key end

     0   :  { %v294_v6 = vmov 1966171168   ;;  %v66_v8 = vlaneseq  ;;  %v295_v26 = vmov 0.0   ;;  %s373_s1 = inlined_call_operand.vmem [shape: bf16[256,128], index: 1, kind: input, shape index: {}]   ;;  %s374_s0 = inlined_call_operand.vmem [shape: bf16[2,256], index: 0, kind: input, shape index: {}]   ;;  %s375_s2 = inlined_call_operand.vmem [shape: f32[1,128], index: 2, kind: input, shape index: {}]   ;;  %s376_s3 = inlined_call_operand.vmem [shape: bf16[2,128], index: 3, kind: output, shape index: {}]  }
   0x1   :  { %v278_v0 = vld [vmem:[%s373_s1 + $0x78] sm:$0xff]   ;;  %v280_v2 = vld [vmem:[%s373_s1 + $0x70] sm:$0xff]   ;;  %v282_v4 = vld [vmem:[%s373_s1 + $0x68] sm:$0xff]   ;;  %v64_v7 = vunpack.c.l.s4 %v294_v6  ;;  %19 = vst [vmem:[#allocation2] sm:$0x3] %v295_v26 }
   0x2   :  { %v279_v1 = vld [vmem:[%s373_s1 + $0x38] sm:$0xff]   ;;  %254 = vmatprep.subr.bf16.mxu0 %v278_v0  ;;  %v281_v3 = vld [vmem:[%s373_s1 + $0x30] sm:$0xff]   ;;  %v283_v5 = vld [vmem:[%s373_s1 + $0x28] sm:$0xff]   ;;  %v67_v12 = vshrl.u32 %v66_v8, 7 }
   0x3   :  { %255 = vmatpush3.bf16.msra.mxu0 %v279_v1  ;;  %v284_v9 = vld [vmem:[%s373_s1 + $0x60] sm:$0xff]   ;;  %v65_v11 = vunpack.c.0.s8 %v64_v7  ;;  %v286_v13 = vld [vmem:[%s373_s1 + $0x58] sm:$0xff]   ;;  %v288_v16 = vld [vmem:[%s373_s1 + $0x50] sm:$0xff]  }
   0x4   :  { %256 = vmatprep.subr.bf16.mxu0 %v280_v2  ;;  %v285_v10 = vld [vmem:[%s373_s1 + $0x20] sm:$0xff]   ;;  %v287_v14 = vld [vmem:[%s373_s1 + $0x18] sm:$0xff]   ;;  %v289_v19 = vld [vmem:[%s373_s1 + $0x10] sm:$0xff]  }
   0x5   :  { %v68_v15 = vsub.s32 %v65_v11, %v67_v12  ;;  %v236_v17 = vld.sshfl [vmem:[%s374_s0] sm:$0x11 pattern:$0x75316420]  ;;  %v290_v21 = vld [vmem:[%s373_s1 + $0x48] sm:$0xff]  }
   0x6   :  { %v62_v18 = vcombine.high %v236_v17, %v236_v17  ;;  %v291_v22 = vld [vmem:[%s373_s1 + $0x8] sm:$0xff]   ;;  %v292_v23 = vld [vmem:[%s373_s1 + $0x40] sm:$0xff]  }
   0x7   :  { %257 = vmatpush3.bf16.msra.mxu0 %v281_v3  ;;  %v293_v24 = vld [vmem:[%s373_s1] sm:$0xff]   ;;  %v69_v25 = vrot.slane %v236_v17, %v68_v15 }
   0x8   :  { %258 = vmatprep.subr.bf16.mxu0 %v282_v4  ;;  %v76_v20 = vrot.slane %v62_v18, %v68_v15  ;;  %v20_v28 = vld [vmem:[#allocation2] sm:$0x3] }
   0x9   :  { %v253_v34 = vld [vmem:[%s375_s2] ss:$0 sm:$0xff] }
   0xa   :  { %207 = vmatprep.mubr.bf16.mxu0 %v76_v20 }
   0xb   :  { %259 = vmatpush3.bf16.msra.mxu0 %v283_v5 }
   0xc   :  { %260 = vmatprep.subr.bf16.mxu0 %v284_v9 }
   0xf   :  { %261 = vmatpush3.bf16.msra.mxu0 %v285_v10 }
  0x10   :  { %262 = vmatprep.subr.bf16.mxu0 %v286_v13 }
  0x13   :  { %263 = vmatpush3.bf16.msra.mxu0 %v287_v14 }
  0x14   :  { %264 = vmatprep.subr.bf16.mxu0 %v288_v16 }
  0x17   :  { %265 = vmatpush3.bf16.msra.mxu0 %v289_v19 }
  0x18   :  { %266 = vmatprep.subr.bf16.mxu0 %v290_v21 }
  0x1b   :  { %267 = vmatpush3.bf16.msra.mxu0 %v291_v22 }
  0x1c   :  { %268 = vmatprep.subr.bf16.mxu0 %v292_v23 }
  0x1f   :  { %269 = vmatpush3.bf16.msra.mxu0 %v293_v24 }
  0x22   :  { %208 = vmatmul.mubr.bf16.vlgmr.msra.gmra.mxu0 %v69_v25 }
  0xe2   :  { %v270_v27 = vpop.f32.mrf.mxu0 }
  0xe4   :  { %v271_v29 = vpop.f32.mrf.mxu0 }
  0xe5   :  { %v272_v30 = vadd.f32 %v271_v29, %v270_v27 }
  0xe6   :  { %v273_v31 = vpop.f32.mrf.mxu0 }
  0xe7   :  { %v215_v32 = vadd.f32 %v272_v30, %v20_v28 }
  0xe8   :  { %v274_v33 = vpop.f32.mrf.mxu0 }
  0xe9   :  { %216 = vst [vmem:[#allocation2] sm:$0x3] %v215_v32 }
  0xf0   :  { %v220_v35 = vld [vmem:[#allocation2] sm:$0x3] }
  0xf1   :  { %v228_v36 = vadd.f32 %v253_v34, %v220_v35 }
  0xf3   :  { %v229_v37 = vmax.f32 %v228_v36, 0.0 }
  0xf5   :  { %v230_v38 = vpack.c.bf16 %v229_v37, %v229_v37 }
  0xf7   :  { %231 = vst [vmem:[%s376_s3] sm:$0x1] %v230_v38 }

// kernel: multi_label_cnn_forward.14
= control target key start
LH: loop header
LB: loop body
LE: loop exit
PB: predicated region body
PF: predicated region fallthrough
CT: control target
= control target key end

     0   :  { %v195_v0 = vmov 0.0   ;;  %vm196_vm0 = vmmov 0   ;;  %s250_s1 = inlined_call_operand.vmem [shape: bf16[128,128], index: 1, kind: input, shape index: {}]   ;;  %s251_s0 = inlined_call_operand.vmem [shape: bf16[2,128], index: 0, kind: input, shape index: {}]   ;;  %s252_s2 = inlined_call_operand.vmem [shape: f32[1,128], index: 2, kind: input, shape index: {}]   ;;  %s253_s3 = inlined_call_operand.vmem [shape: bf16[2,128], index: 3, kind: output, shape index: {}]  }
   0x1   :  { %165 = vmatprep.subr.bf16.mxu0 %v195_v0  ;;  %19 = vst [vmem:[#allocation2] sm:$0x3] %v195_v0  ;;  %v187_v1 = vld [vmem:[%s250_s1 + $0x38] sm:$0xff]   ;;  %181 = vmatprep.mubr.msk.bf16.mxu0 %vm196_vm0, %v195_v0  ;;  %v188_v2 = vld [vmem:[%s250_s1 + $0x30] sm:$0xff]   ;;  %v189_v3 = vld [vmem:[%s250_s1 + $0x28] sm:$0xff]  }
   0x2   :  { %166 = vmatpush3.bf16.msra.mxu0 %v187_v1  ;;  %v190_v4 = vld [vmem:[%s250_s1 + $0x20] sm:$0xff]   ;;  %v191_v5 = vld [vmem:[%s250_s1 + $0x18] sm:$0xff]   ;;  %v192_v6 = vld [vmem:[%s250_s1 + $0x10] sm:$0xff]  }
   0x3   :  { %167 = vmatprep.subr.bf16.mxu0 %v195_v0  ;;  %v193_v7 = vld [vmem:[%s250_s1 + $0x8] sm:$0xff]   ;;  %v194_v8 = vld [vmem:[%s250_s1] sm:$0xff]  }
   0x4   :  { %v21_v9 = vld [vmem:[%s251_s0] sm:$0x1] }
   0x5   :  { %v155_v16 = vld [vmem:[%s252_s2] ss:$0 sm:$0xff] }
   0x6   :  { %168 = vmatpush3.bf16.msra.mxu0 %v188_v2 }
   0x7   :  { %169 = vmatprep.subr.bf16.mxu0 %v195_v0 }
   0x8   :  { %v20_v10 = vld [vmem:[#allocation2] sm:$0x3] }
   0xa   :  { %170 = vmatpush3.bf16.msra.mxu0 %v189_v3 }
   0xb   :  { %171 = vmatprep.subr.bf16.mxu0 %v195_v0 }
   0xe   :  { %172 = vmatpush3.bf16.msra.mxu0 %v190_v4 }
   0xf   :  { %173 = vmatprep.subr.bf16.mxu0 %v195_v0 }
  0x12   :  { %174 = vmatpush3.bf16.msra.mxu0 %v191_v5 }
  0x13   :  { %175 = vmatprep.subr.bf16.mxu0 %v195_v0 }
  0x16   :  { %176 = vmatpush3.bf16.msra.mxu0 %v192_v6 }
  0x17   :  { %177 = vmatprep.subr.bf16.mxu0 %v195_v0 }
  0x1a   :  { %178 = vmatpush3.bf16.msra.mxu0 %v193_v7 }
  0x1b   :  { %179 = vmatprep.subr.bf16.mxu0 %v195_v0 }
  0x1e   :  { %180 = vmatpush3.bf16.msra.mxu0 %v194_v8 }
  0x21   :  { %182 = vmatmul.mubr.bf16.vlgmr.msra.gmra.mxu0 %v21_v9 }
  0xe1   :  { %v120_v11 = vpop.f32.mrf.mxu0 }
  0xe2   :  { %v126_v12 = vadd.f32 %v120_v11, %v20_v10 }
  0xe3   :  { %v183_v13 = vpop.f32.mrf.mxu0 }
  0xe4   :  { %127 = vst [vmem:[#allocation2] sm:$0x3] %v126_v12 }
  0xe5   :  { %v123_v14 = vpop.f32.mrf.mxu0 }
  0xe7   :  { %v184_v15 = vpop.f32.mrf.mxu0 }
  0xeb   :  { %v131_v17 = vld [vmem:[#allocation2] sm:$0x3] }
  0xec   :  { %v139_v18 = vadd.f32 %v155_v16, %v131_v17 }
  0xee   :  { %v140_v19 = vmax.f32 %v139_v18, 0.0 }
  0xf0   :  { %v141_v20 = vpack.c.bf16 %v140_v19, %v140_v19 }
  0xf2   :  { %142 = vst [vmem:[%s253_s3] sm:$0x1] %v141_v20 }

// kernel: multi_label_cnn_forward.15
= control target key start
LH: loop header
LB: loop body
LE: loop exit
PB: predicated region body
PF: predicated region fallthrough
CT: control target
= control target key end

     0   :  { %v236_v1 = vmov 0.0   ;;  %vm237_vm0 = vmmov 0   ;;  %s292_s0 = inlined_call_operand.vmem [shape: bf16[2,128], index: 0, kind: input, shape index: {}]   ;;  %s293_s1 = inlined_call_operand.vmem [shape: bf16[128,128], index: 1, kind: input, shape index: {}]   ;;  %s294_s2 = inlined_call_operand.vmem [shape: f32[1,128], index: 2, kind: input, shape index: {}]   ;;  %s295_s3 = inlined_call_operand.hbm [shape: f32[2,128], index: 3, kind: output, shape index: {}]  }
   0x1   :  { %v202_v0 = vld [vmem:[%s293_s1 + $0x38] sm:$0xff]   ;;  %179 = vmatprep.subr.bf16.mxu0 %v236_v1  ;;  %20 = vst [vmem:[#allocation2] sm:$0x3] %v236_v1  ;;  %v203_v2 = vld [vmem:[%s293_s1 + $0x30] sm:$0xff]   ;;  %195 = vmatprep.mubr.msk.bf16.mxu0 %vm237_vm0, %v236_v1  ;;  %v204_v3 = vld [vmem:[%s293_s1 + $0x28] sm:$0xff]  }
   0x2   :  { %180 = vmatpush3.bf16.msra.mxu0 %v202_v0 }
   0x3   :  { %181 = vmatprep.subr.bf16.mxu0 %v236_v1 }
   0x6   :  { %182 = vmatpush3.bf16.msra.mxu0 %v203_v2 }
   0x7   :  { %183 = vmatprep.subr.bf16.mxu0 %v236_v1 }
   0x8   :  { %8 = vsyncpa [#allocation4], 0  ;;  %v205_v4 = vld [vmem:[%s293_s1 + $0x20] sm:$0xff]   ;;  %v206_v5 = vld [vmem:[%s293_s1 + $0x18] sm:$0xff]  }
   0x9   :  { %v207_v6 = vld [vmem:[%s293_s1 + $0x10] sm:$0xff]   ;;  %v208_v7 = vld [vmem:[%s293_s1 + $0x8] sm:$0xff]   ;;  %v209_v8 = vld [vmem:[%s293_s1] sm:$0xff]  }
   0xa   :  { %184 = vmatpush3.bf16.msra.mxu0 %v204_v3  ;;  %v22_v9 = vld [vmem:[%s292_s0] sm:$0x1]  ;;  %s238_s0 = smov [#allocation3]  }
   0xb   :  { %185 = vmatprep.subr.bf16.mxu0 %v236_v1  ;;  %v21_v10 = vld [vmem:[#allocation2] sm:$0x3]  ;;  %s153_s1 = sshll.u32 %s238_s0, 4  ;;  %s154_s1 = int_to_ptr.vmem [resolvable:$true] %s153_s1 }
   0xc   :  { %v169_v16 = vld [vmem:[%s294_s2] ss:$0 sm:$0xff]  ;;  %s214_s5 = scalar_lea.vmem %s154_s1, 32  ;;  %p219_p1 = scmp.lt.s32.totalorder %s154_s1, %s154_s1 }
   0xd   :  { %p215_p0 = scmp.ne.s32.totalorder %s154_s1, %s214_s5  ;;  %p220_p2 = scmp.lt.s32.totalorder %s214_s5, %s214_s5 }
   0xe   :  { %186 = vmatpush3.bf16.msra.mxu0 %v205_v4 }
   0xf   :  { %187 = vmatprep.subr.bf16.mxu0 %v236_v1  ;;  %p221_p3 = por %p220_p2, %p219_p1 }
  0x11   :  { %p222_p4 = pnand %p221_p3, %p215_p0 }
  0x12   :  { %188 = vmatpush3.bf16.msra.mxu0 %v206_v5 }
  0x13   :  { %189 = vmatprep.subr.bf16.mxu0 %v236_v1 }
  0x16   :  { %190 = vmatpush3.bf16.msra.mxu0 %v207_v6 }
  0x17   :  { %191 = vmatprep.subr.bf16.mxu0 %v236_v1 }
  0x1a   :  { %192 = vmatpush3.bf16.msra.mxu0 %v208_v7 }
  0x1b   :  { %193 = vmatprep.subr.bf16.mxu0 %v236_v1 }
  0x1e   :  { %194 = vmatpush3.bf16.msra.mxu0 %v209_v8 }
  0x21   :  { %196 = vmatmul.mubr.bf16.vlgmr.msra.gmra.mxu0 %v22_v9 }
  0xe1   :  { %v121_v11 = vpop.f32.mrf.mxu0 }
  0xe2   :  { %v127_v12 = vadd.f32 %v121_v11, %v21_v10 }
  0xe3   :  { %v197_v13 = vpop.f32.mrf.mxu0 }
  0xe4   :  { %128 = vst [vmem:[#allocation2] sm:$0x3] %v127_v12 }
  0xe5   :  { %v124_v14 = vpop.f32.mrf.mxu0 }
  0xe7   :  { %v198_v15 = vpop.f32.mrf.mxu0 }
  0xeb   :  { %v132_v17 = vld [vmem:[#allocation2] sm:$0x3] }
  0xec   :  { %v140_v18 = vadd.f32 %v169_v16, %v132_v17 }
  0xee   :  { %v141_v19 = vsub.f32 0.0, %v140_v18 }
  0xf0   :  { %v142_v20 = vmul.f32 1.442695, %v141_v19 }
  0xf2   :  { %210 = vpow2.f32 %v142_v20 }
  0xff   :  { %v211_v21 = vpop.eup %210 }
 0x100   :  { %v144_v22 = vadd.f32 1.0, %v211_v21 }
 0x102   :  { %212 = vrcp.f32 %v144_v22 }
 0x10f   :  { %v213_v23 = vpop.eup %212 }
 0x110   :  { %146 = vst [vmem:[#allocation3] sm:$0x3] %v213_v23 }
 0x111   :  { %225 = shalt.err (!%p222_p4)
}
 0x112   :  { %156 = dma.vmem_to_hbm [thread:$0]  %s154_s1, 32, %s295_s3, [#allocation4]  }
 0x113   :  { %234 = dma.done.wait [#allocation4], 32  }
 0x114   :  { %235 = vsyncadd [#allocation4], 4294967264 }
 0x115   :  { %160 = vsyncpa [#allocation4], 1 }

// kernel: multi_label_cnn_forward.12
= control target key start
LH: loop header
LB: loop body
LE: loop exit
PB: predicated region body
PF: predicated region fallthrough
CT: control target
= control target key end

     0   :  { %s3191_s12 = smov 0   ;;  %s3897_s0 = inlined_call_operand.vmem [shape: bf16[2,6,6,256], index: 0, kind: input, shape index: {}]   ;;  %s3898_s1 = inlined_call_operand.vmem [shape: bf16[9,256,64], index: 1, kind: input, shape index: {}]   ;;  %s3899_s2 = inlined_call_operand.vmem [shape: f32[1,64], index: 2, kind: input, shape index: {}]   ;;  %s3900_s3 = inlined_call_operand.vmem [shape: bf16[2,2,2,64], index: 3, kind: output, shape index: {}]  }
   0x1 LB: > { %s2384_s13 = sadd.s32 4294967295, %s3166_s12   ;;  %p2388_p0 = scmp.ge.s32.totalorder %s3166_s12, 1  ;;  %s3166_s12 = sphi %s3191_s12, %s13_s12  }
   0x2   : > { %p137_p1 = scmp.lt.s32.totalorder %s3166_s12, 3 }
   0x4   : > { %p138_p2 = pnand %p2388_p0, %p137_p1 }
   0x5   : > { %p160_p3 = scmp.lt.s32.totalorder (!%p138_p2), %s2384_s13, 1 }
   0x6   : > { %141 = sbr.rel (%p138_p2) target bundleno = 424 (0x1a8), region = 32 }
   0xb   : > { %v3016_v0 = vld [vmem:[%s3898_s1 + $0x1f8] sm:$0xff]   ;;  %v3020_v4 = vld [vmem:[%s3898_s1 + $0x1f0] sm:$0xff]   ;;  %v3024_v8 = vld [vmem:[%s3898_s1 + $0x1e8] sm:$0xff]   ;;  %s3908_s13 = smov (!%p160_p3, %s2384_s13), 1  ;;  %v286_v28 = vlaneseq  ;;  %v3168_v36 = vmov 1983009808  }
   0xc   : > { %v3017_v1 = vld [vmem:[%s3898_s1 + $0x78] sm:$0xff]   ;;  %2806 = vmatprep.subr.bf16.mxu0 %v3016_v0  ;;  %v3021_v5 = vld [vmem:[%s3898_s1 + $0x70] sm:$0xff]   ;;  %v3025_v9 = vld [vmem:[%s3898_s1 + $0x68] sm:$0xff]   ;;  %s3004_s16 = smul.u32 48, %s3908_s13  ;;  %v284_v37 = vunpack.c.l.s4 %v3168_v36  ;;  %vm1452_vm0 = vcmask 1040384   ;;  %vm1453_vm1 = vcmask 1042434  }
   0xd   : > { %v3018_v2 = vld [vmem:[%s3898_s1 + $0x1b8] sm:$0xff]   ;;  %2828 = vmatprep.subr.bf16.mxu1 %v3017_v1  ;;  %v3022_v6 = vld [vmem:[%s3898_s1 + $0x1b0] sm:$0xff]   ;;  %v3026_v10 = vld [vmem:[%s3898_s1 + $0x1a8] sm:$0xff]   ;;  %v3307_v33 = vshrl.u32 %v286_v28, 7  ;;  %vm1455_vm2 = vcmask 1044484   ;;  %vm1457_vm3 = vcmask 1046534  }
   0xe   : > { %v3019_v3 = vld [vmem:[%s3898_s1 + $0x38] sm:$0xff]   ;;  %2807 = vmatpush3.bf16.msra.mxu0 %v3018_v2  ;;  %v3023_v7 = vld [vmem:[%s3898_s1 + $0x30] sm:$0xff]   ;;  %v3027_v11 = vld [vmem:[%s3898_s1 + $0x28] sm:$0xff]   ;;  %s3299_s27 = scalar_lea.vmem %s3897_s0, %s3004_s16  ;;  %v285_v41 = vunpack.c.0.s8 %v284_v37  ;;  %vm791_vm5 = vsmask.f32 1280  ;;  %vm2106_vm14 = vcmask 517120  }
   0xf   : > { %2829 = vmatpush3.bf16.msra.mxu1 %v3019_v3  ;;  %2808 = vmatprep.subr.bf16.mxu0 %v3020_v4  ;;  %v3028_v12 = vld [vmem:[%s3898_s1 + $0x1e0] sm:$0xff]   ;;  %v3032_v16 = vld [vmem:[%s3898_s1 + $0x1d8] sm:$0xff]   ;;  %v3036_v20 = vld [vmem:[%s3898_s1 + $0x1d0] sm:$0xff]   ;;  %vm792_vm6 = vsmask.f32 3336  ;;  %vm2292_vm15 = vcmask 1041409  }
  0x10   : > { %2830 = vmatprep.subr.bf16.mxu1 %v3021_v5  ;;  %v3029_v13 = vld [vmem:[%s3898_s1 + $0x60] sm:$0xff]   ;;  %v3033_v17 = vld [vmem:[%s3898_s1 + $0x58] sm:$0xff]   ;;  %v3037_v21 = vld [vmem:[%s3898_s1 + $0x50] sm:$0xff]   ;;  %v3331_v45 = vsub.s32 %v285_v41, %v3307_v33  ;;  %vm794_vm7 = vsmask.f32 5392  ;;  %s2390_s8 = sshll.u32 %s3908_s13, 1 }
  0x11   : > { %v3030_v14 = vld [vmem:[%s3898_s1 + $0x1a0] sm:$0xff]   ;;  %v3034_v18 = vld [vmem:[%s3898_s1 + $0x198] sm:$0xff]   ;;  %v3038_v22 = vld [vmem:[%s3898_s1 + $0x190] sm:$0xff]   ;;  %vm796_vm8 = vsmask.f32 7448  ;;  %s168_s11 = scalar_lea.vmem %s3900_s3, %s2390_s8 }
  0x12   : > { %2809 = vmatpush3.bf16.msra.mxu0 %v3022_v6  ;;  %v3031_v15 = vld [vmem:[%s3898_s1 + $0x20] sm:$0xff]   ;;  %v3035_v19 = vld [vmem:[%s3898_s1 + $0x18] sm:$0xff]   ;;  %v3039_v23 = vld [vmem:[%s3898_s1 + $0x10] sm:$0xff]  }
  0x13   : > { %2831 = vmatpush3.bf16.msra.mxu1 %v3023_v7  ;;  %2810 = vmatprep.subr.bf16.mxu0 %v3024_v8  ;;  %v3040_v24 = vld [vmem:[%s3898_s1 + $0x1c8] sm:$0xff]   ;;  %v3044_v29 = vld [vmem:[%s3898_s1 + $0x1c0] sm:$0xff]   ;;  %v3313_v35 = vld.sshfl [vmem:[%s3299_s27 + $0x10] sm:$0x5f pattern:$0x76325410] }
  0x14   : > { %2832 = vmatprep.subr.bf16.mxu1 %v3025_v9  ;;  %v3041_v25 = vld [vmem:[%s3898_s1 + $0x48] sm:$0xff]   ;;  %v3045_v30 = vld [vmem:[%s3898_s1 + $0x40] sm:$0xff]   ;;  %v3316_v38 = vld.sshfl [vmem:[%s3299_s27 + $0x18] sm:$0x5f pattern:$0x76325410] }
  0x15   : > { %v3042_v26 = vld [vmem:[%s3898_s1 + $0x188] sm:$0xff]   ;;  %v3046_v31 = vld [vmem:[%s3898_s1 + $0x180] sm:$0xff]   ;;  %v439_v42 = vcombine.low %v3313_v35, %v3316_v38  ;;  %v3048_v47 = vld [vmem:[%s3898_s1 + $0x378] sm:$0xff]   ;;  %v827_v48 = vshrl.u32 %v3313_v35, 16  ;;  %v830_v63 = vshll.u32 %v3313_v35, 16  ;;  %v841_v8 = vshrl.u32 %v3316_v38, 16 }
  0x16   : > { %2811 = vmatpush3.bf16.msra.mxu0 %v3026_v10  ;;  %v3043_v27 = vld [vmem:[%s3898_s1 + $0x8] sm:$0xff]   ;;  %v3047_v32 = vld [vmem:[%s3898_s1] sm:$0xff]   ;;  %v3050_v54 = vld [vmem:[%s3898_s1 + $0xf8] sm:$0xff]   ;;  %v844_v10 = vshll.u32 %v3316_v38, 16  ;;  %v3430_v37 = vcombine.high %v3316_v38, %v3316_v38 }
  0x17   : > { %2833 = vmatpush3.bf16.msra.mxu1 %v3027_v11  ;;  %2812 = vmatprep.subr.bf16.mxu0 %v3028_v12  ;;  %v3310_v34 = vld.sshfl [vmem:[%s3299_s27 + $0x8] sm:$0x5f pattern:$0x76325410]  ;;  %v3344_v53 = vrot.slane %v439_v42, %v3331_v45  ;;  %v3049_v55 = vld [vmem:[%s3898_s1 + $0x338] sm:$0xff]   ;;  %v3052_v0 = vld [vmem:[%s3898_s1 + $0x370] sm:$0xff]  }
  0x18   : > { %2834 = vmatprep.subr.bf16.mxu1 %v3029_v13  ;;  %v3319_v39 = vld.sshfl [vmem:[%s3299_s27 + $0x20] sm:$0x5f pattern:$0x76325410]  ;;  %v281_v40 = vcombine.low %v3310_v34, %v3313_v35  ;;  %v3051_v62 = vld [vmem:[%s3898_s1 + $0xb8] sm:$0xff]   ;;  %v3053_v1 = vld [vmem:[%s3898_s1 + $0x330] sm:$0xff]   ;;  %v3390_v13 = vcombine.high %v3310_v34, %v3310_v34 }
  0x19   : > { %v282_v43 = vcombine.low %v3316_v38, %v3319_v39  ;;  %v3328_v44 = vld.sshfl [vmem:[%s3299_s27] sm:$0x5f pattern:$0x76325410]  ;;  %v3054_v2 = vld [vmem:[%s3898_s1 + $0xf0] sm:$0xff]   ;;  %v813_v5 = vshrl.u32 %v3310_v34, 16  ;;  %vm1454_vm4 = vmor %vm1452_vm0, %vm1453_vm1 }
  0x1a   : > { %2813 = vmatpush3.bf16.msra.mxu0 %v3030_v14  ;;  %v438_v46 = vcombine.low %v3328_v44, %v3310_v34  ;;  %v799_v49 = vshrl.u32 %v3328_v44, 16  ;;  %v289_v50 = vrot.slane %v281_v40, %v3331_v45  ;;  %v3354_v56 = vcombine.high %v3328_v44, %v3328_v44  ;;  %v3055_v6 = vld [vmem:[%s3898_s1 + $0xb0] sm:$0xff]   ;;  %v3056_v9 = vld [vmem:[%s3898_s1 + $0x368] sm:$0xff]   ;;  %v3064_v28 = vld [vmem:[%s3898_s1 + $0x358] sm:$0xff]  }
  0x1b   : > { %2835 = vmatpush3.bf16.msra.mxu1 %v3031_v15  ;;  %2814 = vmatprep.subr.bf16.mxu0 %v3032_v16  ;;  %v296_v51 = vrot.slane %v282_v43, %v3331_v45  ;;  %v802_v57 = vshll.u32 %v3328_v44, 16  ;;  %v3057_v11 = vld [vmem:[%s3898_s1 + $0x328] sm:$0xff]   ;;  %v815_v15 = vrot.slane %v813_v5, 6  ;;  %v816_v16 = vshll.u32 %v3310_v34, 16  ;;  %v3065_v36 = vld [vmem:[%s3898_s1 + $0x318] sm:$0xff]   ;;  %v3068_v43 = vld [vmem:[%s3898_s1 + $0x350] sm:$0xff]  }
  0x1c   : > { %2836 = vmatprep.subr.bf16.mxu1 %v3033_v17  ;;  %v446_v52 = vrot.slane %v438_v46, %v3331_v45  ;;  %v801_v3 = vrot.slane %v799_v49, 6  ;;  %v808_v7 = vshll.u32 %v3354_v56, 16  ;;  %v3058_v12 = vld [vmem:[%s3898_s1 + $0xe8] sm:$0xff]   ;;  %v3067_v41 = vld [vmem:[%s3898_s1 + $0x98] sm:$0xff]   ;;  %v843_v42 = vrot.slane %v841_v8, 6  ;;  %v3077_v5 = vld [vmem:[%s3898_s1 + $0x300] sm:$0xff]  }
  0x1d   : > { %v298_v58 = vcombine.high %v289_v50, %v296_v51  ;;  %v297_v60 = vcombine.low %v289_v50, %v296_v51  ;;  %v804_v4 = vrot.slane %v802_v57, 7  ;;  %v3059_v17 = vld [vmem:[%s3898_s1 + $0xa8] sm:$0xff]   ;;  %v846_v49 = vrot.slane %v844_v10, 7  ;;  %v3069_v50 = vld [vmem:[%s3898_s1 + $0x310] sm:$0xff]   ;;  %v3079_v10 = vld [vmem:[%s3898_s1 + $0x80] sm:$0xff]  }
  0x1e   : > { %2815 = vmatpush3.bf16.msra.mxu0 %v3034_v18  ;;  %v455_v59 = vcombine.high %v446_v52, %v3344_v53  ;;  %v454_v61 = vcombine.low %v446_v52, %v3344_v53  ;;  %v3396_v18 = vrot.slane %v808_v7, 7  ;;  %v850_v51 = vshll.u32 %v3430_v37, 16  ;;  %v3071_v52 = vld [vmem:[%s3898_s1 + $0x90] sm:$0xff]   ;;  %v3072_v57 = vld [vmem:[%s3898_s1 + $0x348] sm:$0xff]   ;;  %vm3498_vm9 = vmor %vm1454_vm4, %vm1455_vm2 }
  0x1f   : > { %2837 = vmatpush3.bf16.msra.mxu1 %v3035_v19  ;;  %2816 = vmatprep.subr.bf16.mxu0 %v3036_v20  ;;  %v805_v14 = vor.u32 %v804_v4, %v801_v3  ;;  %v3060_v19 = vld [vmem:[%s3898_s1 + $0x360] sm:$0xff]   ;;  %v818_v20 = vrot.slane %v816_v16, 7  ;;  %v1051_v4 = vshll.u32 %v3319_v39, 16  ;;  %vm793_vm10 = vmor %vm791_vm5, %vm792_vm6  ;;  %v3081_v16 = vld [vmem:[%s3898_s1 + $0x238] sm:$0xff]   ;;  %vm2328_vm0 = vcmask 516096  }
  0x20   : > { %2838 = vmatprep.subr.bf16.mxu1 %v3037_v21  ;;  %429 = vmatprep.mubr.bf16.mxu0 %v298_v58  ;;  %v3062_v21 = vld [vmem:[%s3898_s1 + $0xe0] sm:$0xff]   ;;  %v3479_v7 = vld.sshfl [vmem:[%s3299_s27 + $0x28] sm:$0x5f pattern:$0x76325410]  ;;  %vm795_vm11 = vmor %vm793_vm10, %vm794_vm7 }
  0x21   : > { %586 = vmatprep.mubr.bf16.mxu1 %v455_v59  ;;  %v3073_v59 = vld [vmem:[%s3898_s1 + $0x308] sm:$0xff]   ;;  %v3076_v3 = vld [vmem:[%s3898_s1 + $0x340] sm:$0xff]   ;;  %vm3509_vm12 = vmor %vm795_vm11, %vm796_vm8 }
  0x22   : > { %2817 = vmatpush3.bf16.msra.mxu0 %v3038_v22  ;;  %v822_v22 = vshll.u32 %v3390_v13, 16  ;;  %vm3537_vm13 = vmor %vm3498_vm9, %vm1457_vm3 }
  0x23   : > { %2839 = vmatpush3.bf16.msra.mxu1 %v3039_v23  ;;  %2818 = vmatprep.subr.bf16.mxu0 %v3040_v24  ;;  %v3061_v23 = vld [vmem:[%s3898_s1 + $0x320] sm:$0xff]   ;;  %v3408_v24 = vrot.slane %v805_v14, 2 }
  0x24   : > { %2840 = vmatprep.subr.bf16.mxu1 %v3041_v25  ;;  %v819_v25 = vor.u32 %v818_v20, %v815_v15  ;;  %v3090_v15 = vld [vmem:[%s3898_s1 + $0x3e8] sm:$0xff]  }
  0x26   : > { %2819 = vmatpush3.bf16.msra.mxu0 %v3042_v26  ;;  %v3063_v26 = vld [vmem:[%s3898_s1 + $0xa0] sm:$0xff]   ;;  %v3432_v40 = vrot.slane %v819_v25, 2 }
  0x27   : > { %2841 = vmatpush3.bf16.msra.mxu1 %v3043_v27  ;;  %2820 = vmatprep.subr.bf16.mxu0 %v3044_v29  ;;  %v829_v27 = vrot.slane %v827_v48, 6  ;;  %v3418_v29 = vcombine.high %v3313_v35, %v3313_v35  ;;  %v3070_v48 = vld [vmem:[%s3898_s1 + $0xd0] sm:$0xff]  }
  0x28   : > { %2842 = vmatprep.subr.bf16.mxu1 %v3045_v30  ;;  %v832_v30 = vrot.slane %v830_v63, 7 }
  0x2a   : > { %2821 = vmatpush3.bf16.msra.mxu0 %v3046_v31  ;;  %v3066_v31 = vld [vmem:[%s3898_s1 + $0xd8] sm:$0xff]   ;;  %v833_v46 = vor.u32 %v832_v30, %v829_v27  ;;  %v1461_v30 = vrot.slane %v3354_v56, 7 }
  0x2b   : > { %2843 = vmatpush3.bf16.msra.mxu1 %v3047_v32  ;;  %2850 = vmatprep.subr.bf16.mxu0 %v3048_v47  ;;  %v3423_v32 = vrot.slane %v822_v22, 7  ;;  %v836_v47 = vshll.u32 %v3418_v29, 16  ;;  %v1255_v22 = vshrl.u32 %v3479_v7, 16 }
  0x2c   : > { %2872 = vmatprep.subr.bf16.mxu1 %v3050_v54  ;;  %v847_v54 = vor.u32 %v846_v49, %v843_v42  ;;  %v834_v58 = vrot.slane %v833_v46, 2 }
  0x2d   : > { %430 = vmatmul.mubr.bf16.vlgmr.msra.gmra.mxu0 %v297_v60  ;;  %v3074_v60 = vld [vmem:[%s3898_s1 + $0xc8] sm:$0xff]   ;;  %v1257_v42 = vrot.slane %v1255_v22, 6 }
  0x2e   : > { %587 = vmatmul.mubr.bf16.vlgmr.msra.gmra.mxu1 %v454_v61  ;;  %2851 = vmatpush3.bf16.msra.mxu0 %v3049_v55  ;;  %v1048_v55 = vshrl.u32 %v3319_v39, 16  ;;  %v838_v61 = vrot.slane %v836_v47, 7  ;;  %v848_v63 = vrot.slane %v847_v54, 2  ;;  %v3083_v54 = vld [vmem:[%s3898_s1 + $0x3b8] sm:$0xff]  }
  0x2f   : > { %2873 = vmatpush3.bf16.msra.mxu1 %v3051_v62  ;;  %2852 = vmatprep.subr.bf16.mxu0 %v3052_v0  ;;  %v3463_v62 = vcombine.high %v3319_v39, %v3319_v39  ;;  %v852_v0 = vrot.slane %v850_v51, 7 }
  0x30   : > { %2874 = vmatprep.subr.bf16.mxu1 %v3054_v2  ;;  %v1050_v2 = vrot.slane %v1048_v55, 6 }
  0x31   : > { %v1057_v8 = vshll.u32 %v3463_v62, 16  ;;  %v1669_v22 = vrot.slane %v3463_v62, 7  ;;  %v2754_v62 = vrot.slane %v3479_v7, 9 }
  0x32   : > { %2853 = vmatpush3.bf16.msra.mxu0 %v3053_v1  ;;  %v3075_v1 = vld [vmem:[%s3898_s1 + $0x88] sm:$0xff]  }
  0x33   : > { %2875 = vmatpush3.bf16.msra.mxu1 %v3055_v6  ;;  %2854 = vmatprep.subr.bf16.mxu0 %v3056_v9  ;;  %v3078_v6 = vld [vmem:[%s3898_s1 + $0xc0] sm:$0xff]   ;;  %v636_v9 = vcombine.low %v3319_v39, %v3479_v7 }
  0x34   : > { %2876 = vmatprep.subr.bf16.mxu1 %v3058_v12  ;;  %v3494_v12 = vcombine.high %v3479_v7, %v3479_v7 }
  0x35   : > { %v643_v14 = vrot.slane %v636_v9, %v3331_v45  ;;  %v1469_v9 = vrot.slane %v3418_v29, 7  ;;  %v1473_v29 = vrot.slane %v3430_v37, 7 }
  0x36   : > { %2855 = vmatpush3.bf16.msra.mxu0 %v3057_v11  ;;  %v3080_v11 = vld [vmem:[%s3898_s1 + $0x278] sm:$0xff]  }
  0x37   : > { %2877 = vmatpush3.bf16.msra.mxu1 %v3059_v17  ;;  %2856 = vmatprep.subr.bf16.mxu0 %v3060_v19  ;;  %v1053_v17 = vrot.slane %v1051_v4, 7  ;;  %v1059_v19 = vrot.slane %v1057_v8, 7  ;;  %v645_v20 = vcombine.high %v3344_v53, %v643_v14  ;;  %v2655_v4 = vrot.slane %v3313_v35, 9 }
  0x38   : > { %2878 = vmatprep.subr.bf16.mxu1 %v3062_v21  ;;  %v644_v21 = vcombine.low %v3344_v53, %v643_v14  ;;  %v2653_v53 = vrot.slane %v3328_v44, 9  ;;  %v853_v44 = vsel %vm3509_vm12, %v848_v63, %v852_v0 }
  0x39   : > { %v1054_v27 = vor.u32 %v1053_v17, %v1050_v2  ;;  %776 = vmatprep.mubr.bf16.mxu0 %v645_v20  ;;  %v3093_v17 = vld [vmem:[%s3898_s1 + $0x220] sm:$0xff]  }
  0x3a   : > { %2857 = vmatpush3.bf16.msra.mxu0 %v3061_v23  ;;  %v1258_v23 = vshll.u32 %v3479_v7, 16  ;;  %v3100_v7 = vld [vmem:[%s3898_s1 + $0x250] sm:$0xff]  }
  0x3b   : > { %2879 = vmatpush3.bf16.msra.mxu1 %v3063_v26  ;;  %2858 = vmatprep.subr.bf16.mxu0 %v3064_v28  ;;  %v3082_v26 = vld [vmem:[%s3898_s1 + $0x3f8] sm:$0xff]   ;;  %v1264_v28 = vshll.u32 %v3494_v12, 16  ;;  %v1055_v46 = vrot.slane %v1054_v27, 2  ;;  %v3094_v27 = vld [vmem:[%s3898_s1 + $0x3e0] sm:$0xff]  }
  0x3c   : > { %2880 = vmatprep.subr.bf16.mxu1 %v3066_v31  ;;  %v811_v31 = vsel %vm3509_vm12, %v3408_v24, %v3396_v18  ;;  %v1260_v47 = vrot.slane %v1258_v23, 7  ;;  %v3096_v23 = vld [vmem:[%s3898_s1 + $0x258] sm:$0xff]  }
  0x3d   : > { %v1060_v49 = vsel %vm3509_vm12, %v1055_v46, %v1059_v19  ;;  %v1266_v51 = vrot.slane %v1264_v28, 7  ;;  %v2705_v19 = vrot.slane %v3319_v39, 9  ;;  %v3098_v46 = vld [vmem:[%s3898_s1 + $0x3d8] sm:$0xff]  }
  0x3e   : > { %2859 = vmatpush3.bf16.msra.mxu0 %v3065_v36  ;;  %v825_v36 = vsel %vm3509_vm12, %v3432_v40, %v3423_v32  ;;  %v1095_v55 = vcombine.low %v853_v44, %v1060_v49  ;;  %v3099_v32 = vld [vmem:[%s3898_s1 + $0x398] sm:$0xff]  }
  0x3f   : > { %2881 = vmatpush3.bf16.msra.mxu1 %v3067_v41  ;;  %2860 = vmatprep.subr.bf16.mxu0 %v3068_v43  ;;  %v839_v41 = vsel %vm3509_vm12, %v834_v58, %v838_v61  ;;  %v887_v56 = vcombine.low %v811_v31, %v825_v36  ;;  %v3084_v43 = vld [vmem:[%s3898_s1 + $0x270] sm:$0xff]   ;;  %v2654_v58 = vrot.slane %v3310_v34, 9  ;;  %v1465_v61 = vrot.slane %v3390_v13, 7 }
  0x40   : > { %2882 = vmatprep.subr.bf16.mxu1 %v3070_v48  ;;  %v1094_v18 = vcombine.low %v825_v36, %v839_v41  ;;  %v888_v24 = vcombine.low %v839_v41, %v853_v44  ;;  %v3085_v48 = vld [vmem:[%s3898_s1 + $0x230] sm:$0xff]   ;;  %v3569_v2 = vrot.slane %v1095_v55, %v3331_v45  ;;  %v1670_v28 = vsel %vm3537_vm13, %v2705_v19, %v1669_v22  ;;  %v3136_v22 = vld [vmem:[%s3898_s1 + $0x148] sm:$0xff]  }
  0x41   : > { %v895_v40 = vrot.slane %v887_v56, %v3331_v45  ;;  %v1466_v13 = vsel %vm3537_vm13, %v2654_v58, %v1465_v61  ;;  %v1865_v41 = vrot.slane %v3494_v12, 7  ;;  %v3103_v58 = vld [vmem:[%s3898_s1 + $0x390] sm:$0xff]   ;;  %v3109_v61 = vld [vmem:[%s3898_s1 + $0x200] sm:$0xff]  }
  0x42   : > { %2861 = vmatpush3.bf16.msra.mxu0 %v3069_v50  ;;  %v3548_v50 = vrot.slane %v1094_v18, %v3331_v45  ;;  %v3132_v19 = vld [vmem:[%s3898_s1 + $0x150] sm:$0xff]  }
  0x43   : > { %2883 = vmatpush3.bf16.msra.mxu1 %v3071_v52  ;;  %2862 = vmatprep.subr.bf16.mxu0 %v3072_v57  ;;  %v3551_v52 = vrot.slane %v888_v24, %v3331_v45  ;;  %v1261_v57 = vor.u32 %v1260_v47, %v1257_v42  ;;  %v3095_v42 = vld [vmem:[%s3898_s1 + $0x3a0] sm:$0xff]   ;;  %v1866_v12 = vsel %vm3537_vm13, %v2754_v62, %v1865_v41  ;;  %v3101_v24 = vld [vmem:[%s3898_s1 + $0x210] sm:$0xff]  }
  0x44   : > { %2884 = vmatprep.subr.bf16.mxu1 %v3074_v60  ;;  %v1462_v60 = vsel %vm3537_vm13, %v2653_v53, %v1461_v30  ;;  %v3097_v53 = vld [vmem:[%s3898_s1 + $0x218] sm:$0xff]   ;;  %v1900_v18 = vcombine.low %v1670_v28, %v1866_v12  ;;  %v3141_v62 = vld [vmem:[%s3898_s1 + $0x100] sm:$0xff]   ;;  %v3147_v12 = vld [vmem:[%s3898_s1 + $0x430] sm:$0xff]  }
  0x45   : > { %v904_v63 = vcombine.high %v895_v40, %v3551_v52  ;;  %v903_v0 = vcombine.low %v895_v40, %v3551_v52  ;;  %v1262_v34 = vrot.slane %v1261_v57, 2  ;;  %v1508_v14 = vcombine.low %v1462_v60, %v1466_v13  ;;  %v3105_v57 = vld [vmem:[%s3898_s1 + $0x208] sm:$0xff]   ;;  %v3142_v41 = vld [vmem:[%s3898_s1 + $0x2c0] sm:$0xff]  }
  0x46   : > { %2863 = vmatpush3.bf16.msra.mxu0 %v3073_v59  ;;  %v3088_v59 = vld [vmem:[%s3898_s1 + $0x268] sm:$0xff]  }
  0x47   : > { %2885 = vmatpush3.bf16.msra.mxu1 %v3075_v1  ;;  %2864 = vmatprep.subr.bf16.mxu0 %v3076_v3  ;;  %v3086_v1 = vld [vmem:[%s3898_s1 + $0x3f0] sm:$0xff]   ;;  %v3089_v3 = vld [vmem:[%s3898_s1 + $0x228] sm:$0xff]   ;;  %v1267_v8 = vsel %vm3509_vm12, %v1262_v34, %v1266_v51  ;;  %v3614_v39 = vrot.slane %v1508_v14, %v3331_v45  ;;  %v1110_v34 = vcombine.low %v3548_v50, %v3569_v2  ;;  %v3125_v14 = vld [vmem:[%s3898_s1 + $0x120] sm:$0xff]  }
  0x48   : > { %2886 = vmatprep.subr.bf16.mxu1 %v3078_v6  ;;  %1035 = vmatprep.mubr.bf16.mxu1 %v904_v63  ;;  %v1111_v6 = vcombine.high %v3548_v50, %v3569_v2  ;;  %v1301_v35 = vcombine.low %v1060_v49, %v1267_v8  ;;  %v3104_v49 = vld [vmem:[%s3898_s1 + $0x248] sm:$0xff]   ;;  %v3102_v51 = vld [vmem:[%s3898_s1 + $0x3d0] sm:$0xff]   ;;  %v3114_v50 = vld [vmem:[%s3898_s1 + $0x2f8] sm:$0xff]  }
  0x49   : > { %v3106_v60 = vld [vmem:[%s3898_s1 + $0x3c8] sm:$0xff]   ;;  %v3117_v2 = vld [vmem:[%s3898_s1 + $0x130] sm:$0xff]  }
  0x4a   : > { %2865 = vmatpush3.bf16.msra.mxu0 %v3077_v5  ;;  %v3087_v5 = vld [vmem:[%s3898_s1 + $0x3b0] sm:$0xff]   ;;  %v3107_v63 = vld [vmem:[%s3898_s1 + $0x388] sm:$0xff]  }
  0x4b   : > { %2887 = vmatpush3.bf16.msra.mxu1 %v3079_v10  ;;  %2894 = vmatprep.subr.bf16.mxu0 %v3080_v11  ;;  %v3092_v10 = vld [vmem:[%s3898_s1 + $0x260] sm:$0xff]   ;;  %v2656_v11 = vrot.slane %v3316_v38, 9  ;;  %v3599_v38 = vrot.slane %v1301_v35, %v3331_v45  ;;  %v3120_v8 = vld [vmem:[%s3898_s1 + $0x168] sm:$0xff]   ;;  %v3119_v35 = vld [vmem:[%s3898_s1 + $0x2b0] sm:$0xff]  }
  0x4c   : > { %2916 = vmatprep.subr.bf16.mxu1 %v3082_v26 }
  0x4d   : > { %777 = vmatmul.mubr.bf16.vlgmr.msra.gmra.mxu0 %v644_v21  ;;  %v3091_v21 = vld [vmem:[%s3898_s1 + $0x3a8] sm:$0xff]   ;;  %v1474_v37 = vsel %vm3537_vm13, %v2656_v11, %v1473_v29  ;;  %v1310_v25 = vcombine.high %v3551_v52, %v3599_v38  ;;  %v3126_v29 = vld [vmem:[%s3898_s1 + $0x2e0] sm:$0xff]  }
  0x4e   : > { %2895 = vmatpush3.bf16.msra.mxu0 %v3081_v16  ;;  %1036 = vmatmul.mubr.bf16.vlgmr.msra.gmra.mxu1 %v903_v0  ;;  %v1470_v16 = vsel %vm3537_vm13, %v2655_v4, %v1469_v9  ;;  %v1705_v31 = vcombine.low %v1474_v37, %v1670_v28  ;;  %v3112_v0 = vld [vmem:[%s3898_s1 + $0x178] sm:$0xff]   ;;  %v3116_v4 = vld [vmem:[%s3898_s1 + $0x170] sm:$0xff]   ;;  %v3122_v11 = vld [vmem:[%s3898_s1 + $0x2e8] sm:$0xff]  }
  0x4f   : > { %2896 = vmatprep.subr.bf16.mxu0 %v3084_v43  ;;  %2917 = vmatpush3.bf16.msra.mxu1 %v3083_v54  ;;  %v1704_v20 = vcombine.low %v1466_v13, %v1470_v16  ;;  %v1509_v26 = vcombine.low %v1470_v16, %v1474_v37  ;;  %v3111_v13 = vld [vmem:[%s3898_s1 + $0x380] sm:$0xff]   ;;  %v3118_v9 = vld [vmem:[%s3898_s1 + $0x2f0] sm:$0xff]   ;;  %v3128_v16 = vld [vmem:[%s3898_s1 + $0x158] sm:$0xff]  }
  0x50   : > { %1242 = vmatprep.mubr.bf16.mxu0 %v1111_v6  ;;  %2918 = vmatprep.subr.bf16.mxu1 %v3086_v1  ;;  %v3643_v43 = vrot.slane %v1705_v31, %v3331_v45  ;;  %v3110_v1 = vld [vmem:[%s3898_s1 + $0x3c0] sm:$0xff]   ;;  %v1309_v6 = vcombine.low %v3551_v52, %v3599_v38  ;;  %v3131_v37 = vld [vmem:[%s3898_s1 + $0x298] sm:$0xff]   ;;  %v3138_v28 = vld [vmem:[%s3898_s1 + $0x2c8] sm:$0xff]  }
  0x51   : > { %v3626_v30 = vrot.slane %v1509_v26, %v3331_v45  ;;  %v3629_v36 = vrot.slane %v1704_v20, %v3331_v45  ;;  %1441 = vmatprep.mubr.bf16.mxu1 %v1310_v25  ;;  %v3124_v52 = vld [vmem:[%s3898_s1 + $0x160] sm:$0xff]   ;;  %v3130_v20 = vld [vmem:[%s3898_s1 + $0x2d8] sm:$0xff]   ;;  %v3137_v25 = vld [vmem:[%s3898_s1 + $0x108] sm:$0xff]  }
  0x52   : > { %2897 = vmatpush3.bf16.msra.mxu0 %v3085_v48  ;;  %v3661_v48 = vrot.slane %v1900_v18, %v3331_v45  ;;  %v3127_v38 = vld [vmem:[%s3898_s1 + $0x2a0] sm:$0xff]   ;;  %v3135_v26 = vld [vmem:[%s3898_s1 + $0x290] sm:$0xff]   ;;  %v3144_v31 = vld [vmem:[%s3898_s1 + $0x478] sm:$0xff]  }
  0x53   : > { %2898 = vmatprep.subr.bf16.mxu0 %v3088_v59  ;;  %2919 = vmatpush3.bf16.msra.mxu1 %v3087_v5  ;;  %v1525_v44 = vcombine.high %v3614_v39, %v3626_v30  ;;  %v1524_v56 = vcombine.low %v3614_v39, %v3626_v30  ;;  %v1721_v47 = vcombine.high %v3629_v36, %v3643_v43  ;;  %v3108_v59 = vld [vmem:[%s3898_s1 + $0x240] sm:$0xff]   ;;  %v3115_v5 = vld [vmem:[%s3898_s1 + $0x2b8] sm:$0xff]   ;;  %v3149_v39 = vld [vmem:[%s3898_s1 + $0x428] sm:$0xff]  }
  0x54   : > { %2920 = vmatprep.subr.bf16.mxu1 %v3090_v15  ;;  %v1720_v40 = vcombine.low %v3629_v36, %v3643_v43  ;;  %v1909_v54 = vcombine.high %v3626_v30, %v3661_v48  ;;  %v1908_v55 = vcombine.low %v3626_v30, %v3661_v48  ;;  %v3123_v15 = vld [vmem:[%s3898_s1 + $0x2a8] sm:$0xff]   ;;  %v3151_v18 = vld [vmem:[%s3898_s1 + $0x420] sm:$0xff]   ;;  %v3154_v36 = vld [vmem:[%s3898_s1 + $0x450] sm:$0xff]  }
  0x55   : > { %v3155_v43 = vld [vmem:[%s3898_s1 + $0x410] sm:$0xff]  }
  0x56   : > { %2899 = vmatpush3.bf16.msra.mxu0 %v3089_v3  ;;  %v3113_v3 = vld [vmem:[%s3898_s1 + $0x138] sm:$0xff]  }
  0x57   : > { %2900 = vmatprep.subr.bf16.mxu0 %v3092_v10  ;;  %2921 = vmatpush3.bf16.msra.mxu1 %v3091_v21  ;;  %v3121_v10 = vld [vmem:[%s3898_s1 + $0x128] sm:$0xff]   ;;  %v3133_v21 = vld [vmem:[%s3898_s1 + $0x110] sm:$0xff]  }
  0x58   : > { %2922 = vmatprep.subr.bf16.mxu1 %v3094_v27  ;;  %v3140_v27 = vld [vmem:[%s3898_s1 + $0x140] sm:$0xff]  }
  0x5a   : > { %2901 = vmatpush3.bf16.msra.mxu0 %v3093_v17  ;;  %v3129_v17 = vld [vmem:[%s3898_s1 + $0x118] sm:$0xff]  }
  0x5b   : > { %2902 = vmatprep.subr.bf16.mxu0 %v3096_v23  ;;  %2923 = vmatpush3.bf16.msra.mxu1 %v3095_v42  ;;  %v3134_v23 = vld [vmem:[%s3898_s1 + $0x2d0] sm:$0xff]   ;;  %v3145_v42 = vld [vmem:[%s3898_s1 + $0x438] sm:$0xff]  }
  0x5c   : > { %2924 = vmatprep.subr.bf16.mxu1 %v3098_v46  ;;  %v3148_v46 = vld [vmem:[%s3898_s1 + $0x468] sm:$0xff]  }
  0x5e   : > { %2903 = vmatpush3.bf16.msra.mxu0 %v3097_v53  ;;  %v3139_v53 = vld [vmem:[%s3898_s1 + $0x288] sm:$0xff]  }
  0x5f   : > { %2904 = vmatprep.subr.bf16.mxu0 %v3100_v7  ;;  %2925 = vmatpush3.bf16.msra.mxu1 %v3099_v32  ;;  %v3146_v7 = vld [vmem:[%s3898_s1 + $0x470] sm:$0xff]   ;;  %v3157_v32 = vld [vmem:[%s3898_s1 + $0x408] sm:$0xff]  }
  0x60   : > { %2926 = vmatprep.subr.bf16.mxu1 %v3102_v51  ;;  %v3159_v51 = vld [vmem:[%s3898_s1 + $0x400] sm:$0xff]  }
  0x62   : > { %2905 = vmatpush3.bf16.msra.mxu0 %v3101_v24  ;;  %v3152_v24 = vld [vmem:[%s3898_s1 + $0x458] sm:$0xff]  }
  0x63   : > { %2906 = vmatprep.subr.bf16.mxu0 %v3104_v49  ;;  %2927 = vmatpush3.bf16.msra.mxu1 %v3103_v58  ;;  %v3158_v49 = vld [vmem:[%s3898_s1 + $0x440] sm:$0xff]  }
  0x64   : > { %2928 = vmatprep.subr.bf16.mxu1 %v3106_v60 }
  0x66   : > { %2907 = vmatpush3.bf16.msra.mxu0 %v3105_v57 }
  0x67   : > { %2908 = vmatprep.subr.bf16.mxu0 %v3108_v59  ;;  %2929 = vmatpush3.bf16.msra.mxu1 %v3107_v63 }
  0x68   : > { %2930 = vmatprep.subr.bf16.mxu1 %v3110_v1 }
  0x6a   : > { %2909 = vmatpush3.bf16.msra.mxu0 %v3109_v61 }
  0x6b   : > { %2938 = vmatprep.subr.bf16.mxu0 %v3112_v0  ;;  %2931 = vmatpush3.bf16.msra.mxu1 %v3111_v13 }
  0x6c   : > { %2960 = vmatprep.subr.bf16.mxu1 %v3114_v50 }
  0x6d   : > { %1243 = vmatmul.mubr.bf16.vlgmr.msra.gmra.mxu0 %v1110_v34 }
  0x6e   : > { %2939 = vmatpush3.bf16.msra.mxu0 %v3113_v3  ;;  %1656 = vmatprep.mubr.bf16.mxu0 %v1525_v44  ;;  %v3143_v44 = vld [vmem:[%s3898_s1 + $0x280] sm:$0xff]  }
  0x6f   : > { %2940 = vmatprep.subr.bf16.mxu0 %v3116_v4  ;;  %1442 = vmatmul.mubr.bf16.vlgmr.msra.gmra.mxu1 %v1309_v6 }
  0x70   : > { %2961 = vmatpush3.bf16.msra.mxu1 %v3115_v5  ;;  %1852 = vmatprep.mubr.bf16.mxu1 %v1721_v47  ;;  %v3153_v47 = vld [vmem:[%s3898_s1 + $0x418] sm:$0xff]  }
  0x71   : > { %2962 = vmatprep.subr.bf16.mxu1 %v3118_v9 }
  0x72   : > { %2941 = vmatpush3.bf16.msra.mxu0 %v3117_v2 }
  0x73   : > { %2942 = vmatprep.subr.bf16.mxu0 %v3120_v8 }
  0x74   : > { %2963 = vmatpush3.bf16.msra.mxu1 %v3119_v35 }
  0x75   : > { %2964 = vmatprep.subr.bf16.mxu1 %v3122_v11 }
  0x76   : > { %2943 = vmatpush3.bf16.msra.mxu0 %v3121_v10 }
  0x77   : > { %2944 = vmatprep.subr.bf16.mxu0 %v3124_v52 }
  0x78   : > { %2965 = vmatpush3.bf16.msra.mxu1 %v3123_v15 }
  0x79   : > { %2966 = vmatprep.subr.bf16.mxu1 %v3126_v29 }
  0x7a   : > { %2945 = vmatpush3.bf16.msra.mxu0 %v3125_v14 }
  0x7b   : > { %2946 = vmatprep.subr.bf16.mxu0 %v3128_v16 }
  0x7c   : > { %2967 = vmatpush3.bf16.msra.mxu1 %v3127_v38 }
  0x7d   : > { %2968 = vmatprep.subr.bf16.mxu1 %v3130_v20 }
  0x7e   : > { %2947 = vmatpush3.bf16.msra.mxu0 %v3129_v17 }
  0x7f   : > { %2948 = vmatprep.subr.bf16.mxu0 %v3132_v19 }
  0x80   : > { %2969 = vmatpush3.bf16.msra.mxu1 %v3131_v37 }
  0x81   : > { %2970 = vmatprep.subr.bf16.mxu1 %v3134_v23 }
  0x82   : > { %2949 = vmatpush3.bf16.msra.mxu0 %v3133_v21 }
  0x83   : > { %2950 = vmatprep.subr.bf16.mxu0 %v3136_v22 }
  0x84   : > { %2971 = vmatpush3.bf16.msra.mxu1 %v3135_v26 }
  0x85   : > { %2972 = vmatprep.subr.bf16.mxu1 %v3138_v28 }
  0x86   : > { %2951 = vmatpush3.bf16.msra.mxu0 %v3137_v25 }
  0x87   : > { %2952 = vmatprep.subr.bf16.mxu0 %v3140_v27 }
  0x88   : > { %2973 = vmatpush3.bf16.msra.mxu1 %v3139_v53 }
  0x89   : > { %2974 = vmatprep.subr.bf16.mxu1 %v3142_v41 }
  0x8a   : > { %2953 = vmatpush3.bf16.msra.mxu0 %v3141_v62 }
  0x8b   : > { %2982 = vmatprep.subr.bf16.mxu0 %v3144_v31 }
  0x8c   : > { %2975 = vmatpush3.bf16.msra.mxu1 %v3143_v44 }
  0x8d   : > { %1657 = vmatmul.mubr.bf16.vlgmr.msra.gmra.mxu0 %v1524_v56  ;;  %v3150_v56 = vld [vmem:[%s3898_s1 + $0x460] sm:$0xff]  }
  0x8e   : > { %2983 = vmatpush3.bf16.msra.mxu0 %v3145_v42  ;;  %2040 = vmatprep.mubr.bf16.mxu0 %v1909_v54 }
  0x8f   : > { %2984 = vmatprep.subr.bf16.mxu0 %v3146_v7  ;;  %1853 = vmatmul.mubr.bf16.vlgmr.msra.gmra.mxu1 %v1720_v40  ;;  %v3156_v40 = vld [vmem:[%s3898_s1 + $0x448] sm:$0xff]  }
  0x92   : > { %2985 = vmatpush3.bf16.msra.mxu0 %v3147_v12 }
  0x93   : > { %2986 = vmatprep.subr.bf16.mxu0 %v3148_v46 }
  0x96   : > { %2987 = vmatpush3.bf16.msra.mxu0 %v3149_v39 }
  0x97   : > { %2988 = vmatprep.subr.bf16.mxu0 %v3150_v56 }
  0x9a   : > { %2989 = vmatpush3.bf16.msra.mxu0 %v3151_v18 }
  0x9b   : > { %2990 = vmatprep.subr.bf16.mxu0 %v3152_v24 }
  0x9e   : > { %2991 = vmatpush3.bf16.msra.mxu0 %v3153_v47 }
  0x9f   : > { %2992 = vmatprep.subr.bf16.mxu0 %v3154_v36 }
  0xa2   : > { %2993 = vmatpush3.bf16.msra.mxu0 %v3155_v43 }
  0xa3   : > { %2994 = vmatprep.subr.bf16.mxu0 %v3156_v40 }
  0xa6   : > { %2995 = vmatpush3.bf16.msra.mxu0 %v3157_v32 }
  0xa7   : > { %2996 = vmatprep.subr.bf16.mxu0 %v3158_v49 }
  0xaa   : > { %2997 = vmatpush3.bf16.msra.mxu0 %v3159_v51 }
  0xad   : > { %2041 = vmatmul.mubr.bf16.vlgmr.msra.gmra.mxu0 %v1908_v55 }
  0xed   : > { %v2822_v54 = vpop.f32.mrf.mxu0 }
  0xee   : > { %v2844_v57 = vpop.f32.mrf.mxu1 }
  0xef   : > { %v2823_v58 = vpop.f32.mrf.mxu0 }
  0xf0   : > { %v2845_v59 = vpop.f32.mrf.mxu1  ;;  %v2824_v9 = vadd.f32 %v2823_v58, %v2822_v54  ;;  %v2803_v58 = vld [vmem:[%s3899_s2] ss:$0 sm:$0xff] }
  0xf1   : > { %v2825_v60 = vpop.f32.mrf.mxu0  ;;  %v2846_v10 = vadd.f32 %v2845_v59, %v2844_v57 }
  0xf2   : > { %v2847_v61 = vpop.f32.mrf.mxu1 }
  0xf3   : > { %v2826_v63 = vpop.f32.mrf.mxu0  ;;  %v589_v15 = vadd.f32 %v2846_v10, %v2824_v9 }
  0xf4   : > { %v2848_v1 = vpop.f32.mrf.mxu1  ;;  %v2827_v16 = vadd.f32 %v2826_v63, %v2825_v60 }
  0xf5   : > { %v2849_v29 = vadd.f32 %v2848_v1, %v2847_v61 }
  0xf7   : > { %v592_v22 = vadd.f32 %v2849_v29, %v2827_v16 }
 0x10d   : > { %v2866_v0 = vpop.f32.mrf.mxu0 }
 0x10e   : > { %v2888_v3 = vpop.f32.mrf.mxu1 }
 0x10f   : > { %v2867_v34 = vpop.f32.mrf.mxu0 }
 0x110   : > { %v2889_v4 = vpop.f32.mrf.mxu1  ;;  %v2868_v11 = vadd.f32 %v2867_v34, %v2866_v0 }
 0x111   : > { %v2869_v13 = vpop.f32.mrf.mxu0  ;;  %v2890_v19 = vadd.f32 %v2889_v4, %v2888_v3 }
 0x112   : > { %v2891_v2 = vpop.f32.mrf.mxu1  ;;  %v785_v38 = vadd.f32 %v2868_v11, %v589_v15 }
 0x113   : > { %v2870_v50 = vpop.f32.mrf.mxu0 }
 0x114   : > { %v2892_v6 = vpop.f32.mrf.mxu1  ;;  %v2871_v20 = vadd.f32 %v2870_v50, %v2869_v13  ;;  %v1044_v25 = vadd.f32 %v2890_v19, %v785_v38 }
 0x115   : > { %v2893_v27 = vadd.f32 %v2892_v6, %v2891_v2  ;;  %v3169_v2 = vmov 1966171168  }
 0x116   : > { %v786_v26 = vadd.f32 %v2871_v20, %v592_v22 }
 0x118   : > { %v1045_v42 = vadd.f32 %v2893_v27, %v786_v26 }
 0x12d   : > { %v2910_v5 = vpop.f32.mrf.mxu0 }
 0x12f   : > { %v2911_v8 = vpop.f32.mrf.mxu0  ;;  %v2932_v30 = vpop.f32.mrf.mxu1 }
 0x130   : > { %v2912_v23 = vadd.f32 %v2911_v8, %v2910_v5  ;;  %v2176_v5 = vunpack.c.l.s4 %v3169_v2 }
 0x131   : > { %v2913_v48 = vpop.f32.mrf.mxu0  ;;  %v2933_v55 = vpop.f32.mrf.mxu1 }
 0x132   : > { %v1251_v53 = vadd.f32 %v2912_v23, %v1044_v25  ;;  %v2934_v31 = vadd.f32 %v2933_v55, %v2932_v30 }
 0x133   : > { %v2914_v35 = vpop.f32.mrf.mxu0  ;;  %v2935_v52 = vpop.f32.mrf.mxu1 }
 0x134   : > { %v2915_v41 = vadd.f32 %v2914_v35, %v2913_v48  ;;  %v1450_v46 = vadd.f32 %v2934_v31, %v1251_v53 }
 0x135   : > { %v2936_v17 = vpop.f32.mrf.mxu1 }
 0x136   : > { %v1252_v39 = vadd.f32 %v2915_v41, %v1045_v42  ;;  %v2937_v56 = vadd.f32 %v2936_v17, %v2935_v52  ;;  %v2177_v17 = vunpack.c.0.s8 %v2176_v5 }
 0x138   : > { %v1451_v40 = vadd.f32 %v2937_v56, %v1252_v39 }
 0x14d   : > { %v2954_v14 = vpop.f32.mrf.mxu0 }
 0x14f   : > { %v2955_v21 = vpop.f32.mrf.mxu0  ;;  %v2976_v37 = vpop.f32.mrf.mxu1 }
 0x150   : > { %v2956_v7 = vadd.f32 %v2955_v21, %v2954_v14 }
 0x151   : > { %v2957_v28 = vpop.f32.mrf.mxu0  ;;  %v2977_v62 = vpop.f32.mrf.mxu1 }
 0x152   : > { %v1665_v18 = vadd.f32 %v2956_v7, %v1450_v46  ;;  %v2978_v24 = vadd.f32 %v2977_v62, %v2976_v37 }
 0x153   : > { %v2958_v44 = vpop.f32.mrf.mxu0  ;;  %v2979_v12 = vpop.f32.mrf.mxu1 }
 0x154   : > { %v2959_v47 = vadd.f32 %v2958_v44, %v2957_v28  ;;  %v1861_v49 = vadd.f32 %v2978_v24, %v1665_v18 }
 0x155   : > { %v2980_v36 = vpop.f32.mrf.mxu1 }
 0x156   : > { %v1666_v51 = vadd.f32 %v2959_v47, %v1451_v40  ;;  %v2981_v54 = vadd.f32 %v2980_v36, %v2979_v12  ;;  %v3170_v40 = vmov 1935823168  }
 0x158   : > { %v1862_v63 = vadd.f32 %v2981_v54, %v1666_v51 }
 0x16d   : > { %v2998_v43 = vpop.f32.mrf.mxu0 }
 0x16f   : > { %v2999_v32 = vpop.f32.mrf.mxu0 }
 0x170   : > { %v3000_v57 = vadd.f32 %v2999_v32, %v2998_v43  ;;  %v2232_v32 = vunpack.c.l.s4 %v3170_v40 }
 0x171   : > { %v3001_v59 = vpop.f32.mrf.mxu0 }
 0x172   : > { %v2049_v60 = vadd.f32 %v3000_v57, %v1861_v49 }
 0x173   : > { %v3002_v61 = vpop.f32.mrf.mxu0 }
 0x174   : > { %v2058_v0 = vadd.f32 %v2803_v58, %v2049_v60  ;;  %v3003_v1 = vadd.f32 %v3002_v61, %v3001_v59  ;;  %v3873_v61 = vsub.s32 %v2177_v17, %v3307_v33 }
 0x176   : > { %v2060_v34 = vmax.f32 %v2058_v0, 0.0  ;;  %v2050_v3 = vadd.f32 %v3003_v1, %v1862_v63 }
 0x178   : > { %v2064_v13 = vcombine.high %v2060_v34, %v2060_v34  ;;  %v2071_v4 = vrot.slane %v2060_v34, %v3331_v45  ;;  %v2059_v50 = vadd.f32 %v2803_v58, %v2050_v3 }
 0x17a   : > { %v2078_v6 = vrot.slane %v2064_v13, %v3331_v45  ;;  %v2079_v8 = vcombine.high %v2071_v4, %v2071_v4  ;;  %v2107_v30 = vsel %vm2106_vm14, %v2071_v4, -inf  ;;  %v2061_v48 = vmax.f32 %v2059_v50, 0.0 }
 0x17b   : > { %v2108_v55 = vrot.slane %v2107_v30, 4  ;;  %v2233_v50 = vunpack.c.0.s8 %v2232_v32 }
 0x17c   : > { %v2080_v9 = vcombine.high %v2078_v6, %v2078_v6  ;;  %v2114_v10 = vsel %vm2106_vm14, %v2079_v8, -inf  ;;  %v2121_v35 = vsel %vm2106_vm14, %v2078_v6, -inf  ;;  %v2081_v52 = vcombine.high %v2061_v48, %v2061_v48 }
 0x17d   : > { %v2109_v11 = vmax.f32 %v2107_v30, %v2108_v55  ;;  %v2115_v14 = vrot.slane %v2114_v10, 4  ;;  %v2122_v15 = vrot.slane %v2121_v35, 4  ;;  %v2088_v16 = vrot.slane %v2061_v48, %v3331_v45 }
 0x17e   : > { %v2128_v29 = vsel %vm2106_vm14, %v2080_v9, -inf  ;;  %v2095_v38 = vrot.slane %v2081_v52, %v3331_v45 }
 0x17f   : > { %v2110_v19 = vrot.slane %v2109_v11, 2  ;;  %v2116_v20 = vmax.f32 %v2114_v10, %v2115_v14  ;;  %v2123_v21 = vmax.f32 %v2121_v35, %v2122_v15  ;;  %v2129_v37 = vrot.slane %v2128_v29, 4 }
 0x180   : > { %v2096_v22 = vcombine.high %v2088_v16, %v2088_v16  ;;  %v2097_v23 = vcombine.high %v2095_v38, %v2095_v38  ;;  %v2135_v25 = vsel %vm2106_vm14, %v2088_v16, -inf  ;;  %v2149_v26 = vsel %vm2106_vm14, %v2095_v38, -inf }
 0x181   : > { %v2111_v27 = vmax.f32 %v2109_v11, %v2110_v19  ;;  %v2117_v28 = vrot.slane %v2116_v20, 2  ;;  %v2124_v62 = vrot.slane %v2123_v21, 2  ;;  %v2130_v53 = vmax.f32 %v2128_v29, %v2129_v37 }
 0x182   : > { %v2136_v31 = vrot.slane %v2135_v25, 4  ;;  %v2142_v41 = vsel %vm2106_vm14, %v2096_v22, -inf  ;;  %v2150_v42 = vrot.slane %v2149_v26, 4  ;;  %v2156_v45 = vsel %vm2106_vm14, %v2097_v23, -inf }
 0x183   : > { %v2112_v7 = vrot.slane %v2111_v27, 1  ;;  %v2118_v44 = vmax.f32 %v2116_v20, %v2117_v28  ;;  %v2125_v12 = vmax.f32 %v2123_v21, %v2124_v62  ;;  %v2131_v46 = vrot.slane %v2130_v53, 2 }
 0x184   : > { %v2137_v39 = vmax.f32 %v2135_v25, %v2136_v31  ;;  %v2143_v56 = vrot.slane %v2142_v41, 4  ;;  %v2151_v18 = vmax.f32 %v2149_v26, %v2150_v42  ;;  %v2157_v24 = vrot.slane %v2156_v45, 4 }
 0x185   : > { %v2119_v47 = vrot.slane %v2118_v44, 1  ;;  %v2126_v36 = vrot.slane %v2125_v12, 1  ;;  %v2132_v43 = vmax.f32 %v2130_v53, %v2131_v46  ;;  %v2113_v58 = vmax.f32 %v2111_v27, %v2112_v7 }
 0x186   : > { %v2138_v49 = vrot.slane %v2137_v39, 2  ;;  %v2144_v51 = vmax.f32 %v2142_v41, %v2143_v56  ;;  %v2152_v54 = vrot.slane %v2151_v18, 2  ;;  %v2158_v57 = vmax.f32 %v2156_v45, %v2157_v24 }
 0x187   : > { %v2127_v59 = vmax.f32 %v2125_v12, %v2126_v36  ;;  %v2133_v60 = vrot.slane %v2132_v43, 1  ;;  %v2120_v3 = vmax.f32 %v2118_v44, %v2119_v47  ;;  %v2236_v14 = vsub.s32 %v2233_v50, %v3307_v33 }
 0x188   : > { %v2139_v63 = vmax.f32 %v2137_v39, %v2138_v49  ;;  %v2145_v0 = vrot.slane %v2144_v51, 2  ;;  %v2153_v1 = vmax.f32 %v2151_v18, %v2152_v54  ;;  %v2159_v34 = vrot.slane %v2158_v57, 2 }
 0x189   : > { %v2134_v13 = vmax.f32 %v2132_v43, %v2133_v60  ;;  %v2163_v4 = vmax.f32 %v2113_v58, %v2127_v59 }
 0x18a   : > { %v2140_v2 = vrot.slane %v2139_v63, 1  ;;  %v2146_v5 = vmax.f32 %v2144_v51, %v2145_v0  ;;  %v2154_v6 = vrot.slane %v2153_v1, 1  ;;  %v2160_v8 = vmax.f32 %v2158_v57, %v2159_v34 }
 0x18b   : > { %v2164_v30 = vmax.f32 %v2120_v3, %v2134_v13  ;;  %v2167_v48 = vpack.c.bf16 %v2163_v4, %v2163_v4 }
 0x18c   : > { %v2141_v55 = vmax.f32 %v2139_v63, %v2140_v2  ;;  %v2147_v9 = vrot.slane %v2146_v5, 1  ;;  %v2155_v10 = vmax.f32 %v2153_v1, %v2154_v6  ;;  %v2161_v35 = vrot.slane %v2160_v8, 1 }
 0x18d   : > { %v2168_v52 = vpack.c.bf16 %v2164_v30, %v2164_v30  ;;  %v2181_v11 = vrot.slane %v2167_v48, %v3873_v61 }
 0x18e   : > { %v2148_v15 = vmax.f32 %v2146_v5, %v2147_v9  ;;  %v2162_v16 = vmax.f32 %v2160_v8, %v2161_v35  ;;  %v2165_v29 = vmax.f32 %v2141_v55, %v2155_v10 }
 0x18f   : > { %v2188_v17 = vrot.slane %v2181_v11, %v3873_v61  ;;  %v2195_v38 = vrot.slane %v2168_v52, %v3873_v61 }
 0x190   : > { %v2166_v19 = vmax.f32 %v2148_v15, %v2162_v16  ;;  %v2169_v20 = vpack.c.bf16 %v2165_v29, %v2165_v29 }
 0x191   : > { %v2202_v21 = vrot.slane %v2195_v38, %v3873_v61  ;;  %v2237_v37 = vrot.slane %v2188_v17, %v2236_v14 }
 0x192   : > { %v2170_v22 = vpack.c.bf16 %v2166_v19, %v2166_v19  ;;  %v2209_v23 = vrot.slane %v2169_v20, %v3873_v61 }
 0x193   : > { %v2251_v25 = vrot.slane %v2202_v21, %v2236_v14  ;;  %v2244_v27 = vrot.slane %v2237_v37, %v2236_v14 }
 0x194   : > { %v2216_v26 = vrot.slane %v2209_v23, %v3873_v61  ;;  %v2223_v33 = vrot.slane %v2170_v22, %v3873_v61 }
 0x195   : > { %v2258_v28 = vrot.slane %v2251_v25, %v2236_v14  ;;  %v2287_v42 = vunpack.c.l.b16 %v2244_v27 }
 0x196   : > { %v2230_v62 = vrot.slane %v2223_v33, %v3873_v61  ;;  %v2265_v53 = vrot.slane %v2216_v26, %v2236_v14 }
 0x197   : > { %v2288_v31 = vunpack.c.l.b16 %v2258_v28 }
 0x198   : > { %v2279_v41 = vrot.slane %v2230_v62, %v2236_v14  ;;  %v2272_v7 = vrot.slane %v2265_v53, %v2236_v14 }
 0x199   : > { %v2291_v45 = vrot.slane %v2288_v31, 7 }
 0x19a   : > { %v2286_v44 = vrot.slane %v2279_v41, %v2236_v14  ;;  %v2289_v18 = vunpack.c.l.b16 %v2272_v7 }
 0x19b   : > { %v2293_v12 = vsel %vm2292_vm15, %v2291_v45, %v2287_v42 }
 0x19c   : > { %v2296_v46 = vpack.c.b16 %v2293_v12, %v2293_v12  ;;  %v2290_v39 = vunpack.c.l.b16 %v2286_v44 }
 0x19e   : > { %v2304_v56 = vrot.slane %v2296_v46, %v3873_v61  ;;  %v2294_v24 = vrot.slane %v2290_v39, 7 }
 0x1a0   : > { %v2311_v47 = vrot.slane %v2304_v56, %v3873_v61  ;;  %v2295_v36 = vsel %vm2292_vm15, %v2294_v24, %v2289_v18 }
 0x1a1   : > { %v2297_v43 = vpack.c.b16 %v2295_v36, %v2295_v36 }
 0x1a2   : > { %2329 = vst.msk [vmem:[%s168_s11] sm:$0x1] %vm2328_vm0, %v2311_v47 }
 0x1a3   : > { %v2318_v40 = vrot.slane %v2297_v43, %v3873_v61 }
 0x1a5   : > { %v2325_v32 = vrot.slane %v2318_v40, %v3873_v61 }
 0x1a7   : > { %2330 = vst.msk [vmem:[%s168_s11 + $0x1] sm:$0x1] %vm2328_vm0, %v2325_v32 }
 0x1a8 PF: > { %s13_s12 = sadd.s32 1, %s3166_s12  }
 0x1a9   : > { %p10_p4 = scmp.ge.s32.totalorder %s13_s12, 4  }
 0x1ab   :  { %12 = sbr.rel (!%p10_p4) target bundleno = 1 (0x1), region = 70 }

// kernel: multi_label_cnn_forward.11
= control target key start
LH: loop header
LB: loop body
LE: loop exit
PB: predicated region body
PF: predicated region fallthrough
CT: control target
= control target key end

     0   :  { %s3866_s12 = smov 0   ;;  %s4989_s0 = inlined_call_operand.vmem [shape: bf16[2,6,6,256], index: 0, kind: input, shape index: {}]   ;;  %s4990_s1 = inlined_call_operand.vmem [shape: bf16[9,256,256], index: 1, kind: input, shape index: {}]   ;;  %s4991_s2 = inlined_call_operand.vmem [shape: f32[1,256], index: 2, kind: input, shape index: {}]   ;;  %s4992_s3 = inlined_call_operand.vmem [shape: bf16[2,4,4,256], index: 3, kind: output, shape index: {}]  }
   0x1 LB: > { %s2811_s13 = sadd.s32 4294967295, %s3843_s12   ;;  %p2815_p0 = scmp.ge.s32.totalorder %s3843_s12, 1  ;;  %s3843_s12 = sphi %s3866_s12, %s13_s12  }
   0x2   : > { %p137_p1 = scmp.lt.s32.totalorder %s3843_s12, 3 }
   0x4   : > { %p138_p2 = pnand %p2815_p0, %p137_p1 }
   0x5   : > { %p161_p3 = scmp.lt.s32.totalorder (!%p138_p2), %s2811_s13, 1 }
   0x6   : > { %141 = sbr.rel (%p138_p2) target bundleno = 544 (0x220), region = 32 }
   0xb   : > { %v3400_v0 = vld [vmem:[%s4990_s1 + $0x374] ss:$8 sps:$4 sm:$0xff]   ;;  %v3404_v2 = vld [vmem:[%s4990_s1 + $0x370] ss:$8 sps:$4 sm:$0xff]   ;;  %v3406_v4 = vld [vmem:[%s4990_s1 + $0x364] ss:$8 sps:$4 sm:$0xff]   ;;  %v287_v41 = vlaneseq }
   0xc   : > { %v3402_v1 = vld [vmem:[%s4990_s1 + $0x74] ss:$8 sps:$4 sm:$0xff]   ;;  %462 = vmatprep.subr.bf16.mxu0 %v3400_v0  ;;  %v3405_v3 = vld [vmem:[%s4990_s1 + $0x70] ss:$8 sps:$4 sm:$0xff]   ;;  %v3408_v5 = vld [vmem:[%s4990_s1 + $0x64] ss:$8 sps:$4 sm:$0xff]  }
   0xd   : > { %685 = vmatprep.subr.bf16.mxu1 %v3402_v1  ;;  %463 = vmatpush1.bf16.msra.mxu0 %v3404_v2  ;;  %v3410_v6 = vld [vmem:[%s4990_s1 + $0x360] ss:$8 sps:$4 sm:$0xff]   ;;  %v3412_v8 = vld [vmem:[%s4990_s1 + $0x354] ss:$8 sps:$4 sm:$0xff]   ;;  %v3416_v10 = vld [vmem:[%s4990_s1 + $0x350] ss:$8 sps:$4 sm:$0xff]  }
   0xe   : > { %686 = vmatpush1.bf16.msra.mxu1 %v3405_v3  ;;  %464 = vmatprep.subr.bf16.mxu0 %v3406_v4  ;;  %v3411_v7 = vld [vmem:[%s4990_s1 + $0x60] ss:$8 sps:$4 sm:$0xff]   ;;  %v3414_v9 = vld [vmem:[%s4990_s1 + $0x54] ss:$8 sps:$4 sm:$0xff]   ;;  %v3417_v11 = vld [vmem:[%s4990_s1 + $0x50] ss:$8 sps:$4 sm:$0xff]  }
   0xf   : > { %687 = vmatprep.subr.bf16.mxu1 %v3408_v5  ;;  %v3418_v12 = vld [vmem:[%s4990_s1 + $0x344] ss:$8 sps:$4 sm:$0xff]   ;;  %v3422_v14 = vld [vmem:[%s4990_s1 + $0x340] ss:$8 sps:$4 sm:$0xff]   ;;  %v3424_v16 = vld [vmem:[%s4990_s1 + $0x334] ss:$8 sps:$4 sm:$0xff]  }
  0x10   : > { %v3420_v13 = vld [vmem:[%s4990_s1 + $0x44] ss:$8 sps:$4 sm:$0xff]   ;;  %v3423_v15 = vld [vmem:[%s4990_s1 + $0x40] ss:$8 sps:$4 sm:$0xff]   ;;  %v3426_v17 = vld [vmem:[%s4990_s1 + $0x34] ss:$8 sps:$4 sm:$0xff]  }
  0x11   : > { %465 = vmatpush1.bf16.msra.mxu0 %v3410_v6  ;;  %v3428_v18 = vld [vmem:[%s4990_s1 + $0x330] ss:$8 sps:$4 sm:$0xff]   ;;  %v3430_v20 = vld [vmem:[%s4990_s1 + $0x324] ss:$8 sps:$4 sm:$0xff]   ;;  %v3434_v22 = vld [vmem:[%s4990_s1 + $0x320] ss:$8 sps:$4 sm:$0xff]  }
  0x12   : > { %688 = vmatpush1.bf16.msra.mxu1 %v3411_v7  ;;  %466 = vmatprep.subr.bf16.mxu0 %v3412_v8  ;;  %v3429_v19 = vld [vmem:[%s4990_s1 + $0x30] ss:$8 sps:$4 sm:$0xff]   ;;  %v3432_v21 = vld [vmem:[%s4990_s1 + $0x24] ss:$8 sps:$4 sm:$0xff]   ;;  %v3435_v23 = vld [vmem:[%s4990_s1 + $0x20] ss:$8 sps:$4 sm:$0xff]  }
  0x13   : > { %689 = vmatprep.subr.bf16.mxu1 %v3414_v9  ;;  %v3436_v24 = vld [vmem:[%s4990_s1 + $0x314] ss:$8 sps:$4 sm:$0xff]   ;;  %v3440_v26 = vld [vmem:[%s4990_s1 + $0x310] ss:$8 sps:$4 sm:$0xff]   ;;  %v3442_v28 = vld [vmem:[%s4990_s1 + $0x304] ss:$8 sps:$4 sm:$0xff]  }
  0x14   : > { %v3438_v25 = vld [vmem:[%s4990_s1 + $0x14] ss:$8 sps:$4 sm:$0xff]   ;;  %v3441_v27 = vld [vmem:[%s4990_s1 + $0x10] ss:$8 sps:$4 sm:$0xff]   ;;  %v3444_v29 = vld [vmem:[%s4990_s1 + $0x4] ss:$8 sps:$4 sm:$0xff]  }
  0x15   : > { %467 = vmatpush1.bf16.msra.mxu0 %v3416_v10  ;;  %v3446_v30 = vld [vmem:[%s4990_s1 + $0x300] ss:$8 sps:$4 sm:$0xff]   ;;  %v3448_v32 = vld [vmem:[%s4990_s1 + $0x3f4] ss:$8 sps:$4 sm:$0xff]   ;;  %v3452_v34 = vld [vmem:[%s4990_s1 + $0x3f0] ss:$8 sps:$4 sm:$0xff]  }
  0x16   : > { %690 = vmatpush1.bf16.msra.mxu1 %v3417_v11  ;;  %468 = vmatprep.subr.bf16.mxu0 %v3418_v12  ;;  %v3447_v31 = vld [vmem:[%s4990_s1] ss:$8 sps:$4 sm:$0xff]   ;;  %v3450_v33 = vld [vmem:[%s4990_s1 + $0xf4] ss:$8 sps:$4 sm:$0xff]   ;;  %v3453_v35 = vld [vmem:[%s4990_s1 + $0xf0] ss:$8 sps:$4 sm:$0xff]  }
  0x17   : > { %691 = vmatprep.subr.bf16.mxu1 %v3420_v13  ;;  %v3454_v36 = vld [vmem:[%s4990_s1 + $0x3e4] ss:$8 sps:$4 sm:$0xff]   ;;  %s5002_s13 = smov (!%p161_p3, %s2811_s13), 1  ;;  %v3458_v38 = vld [vmem:[%s4990_s1 + $0x3e0] ss:$8 sps:$4 sm:$0xff]   ;;  %v4013_v48 = vshrl.u32 %v287_v41, 7 }
  0x18   : > { %v3456_v37 = vld [vmem:[%s4990_s1 + $0xe4] ss:$8 sps:$4 sm:$0xff]   ;;  %v3845_v39 = vmov 1983009808   ;;  %v3459_v42 = vld [vmem:[%s4990_s1 + $0xe0] ss:$8 sps:$4 sm:$0xff]  }
  0x19   : > { %469 = vmatpush1.bf16.msra.mxu0 %v3422_v14  ;;  %v285_v40 = vunpack.c.l.s4 %v3845_v39  ;;  %v3460_v43 = vld [vmem:[%s4990_s1 + $0x3d4] ss:$8 sps:$4 sm:$0xff]   ;;  %s3390_s21 = smul.u32 48, %s5002_s13  ;;  %v3464_v45 = vld [vmem:[%s4990_s1 + $0x3d0] ss:$8 sps:$4 sm:$0xff]   ;;  %vm1857_vm7 = vcmask 1040384  }
  0x1a   : > { %692 = vmatpush1.bf16.msra.mxu1 %v3423_v15  ;;  %470 = vmatprep.subr.bf16.mxu0 %v3424_v16  ;;  %v3462_v44 = vld [vmem:[%s4990_s1 + $0xd4] ss:$8 sps:$4 sm:$0xff]   ;;  %v3465_v46 = vld [vmem:[%s4990_s1 + $0xd0] ss:$8 sps:$4 sm:$0xff]   ;;  %v3466_v49 = vld [vmem:[%s4990_s1 + $0x3c4] ss:$8 sps:$4 sm:$0xff]  }
  0x1b   : > { %693 = vmatprep.subr.bf16.mxu1 %v3426_v17  ;;  %v286_v47 = vunpack.c.0.s8 %v285_v40  ;;  %s4021_s5 = scalar_lea.vmem %s4989_s0, %s3390_s21  ;;  %vm992_vm0 = vsmask.f32 1280  ;;  %v3468_v50 = vld [vmem:[%s4990_s1 + $0xc4] ss:$8 sps:$4 sm:$0xff]   ;;  %vm993_vm1 = vsmask.f32 3336 }
  0x1c   : > { %v3470_v51 = vld [vmem:[%s4990_s1 + $0x3c0] ss:$8 sps:$4 sm:$0xff]   ;;  %vm995_vm2 = vsmask.f32 5392  ;;  %v3472_v55 = vld [vmem:[%s4990_s1 + $0x3b4] ss:$8 sps:$4 sm:$0xff]   ;;  %vm4100_vm4 = vmor %vm992_vm0, %vm993_vm1 }
  0x1d   : > { %471 = vmatpush1.bf16.msra.mxu0 %v3428_v18  ;;  %v3471_v52 = vld [vmem:[%s4990_s1 + $0xc0] ss:$8 sps:$4 sm:$0xff]   ;;  %v4036_v54 = vsub.s32 %v286_v47, %v4013_v48  ;;  %v4042_v56 = vld.sshfl [vmem:[%s4021_s5 + $0x10] sm:$0x5f pattern:$0x76325410]  ;;  %vm4132_vm5 = vmor %vm4100_vm4, %vm995_vm2 }
  0x1e   : > { %694 = vmatpush1.bf16.msra.mxu1 %v3429_v19  ;;  %472 = vmatprep.subr.bf16.mxu0 %v3430_v20  ;;  %v4033_v53 = vld.sshfl [vmem:[%s4021_s5 + $0x8] sm:$0x5f pattern:$0x76325410]  ;;  %v3474_v57 = vld [vmem:[%s4990_s1 + $0xb4] ss:$8 sps:$4 sm:$0xff]  }
  0x1f   : > { %695 = vmatprep.subr.bf16.mxu1 %v3432_v21  ;;  %v4048_v58 = vld.sshfl [vmem:[%s4021_s5 + $0x18] sm:$0x5f pattern:$0x76325410]  ;;  %v282_v59 = vcombine.low %v4033_v53, %v4042_v56  ;;  %vm997_vm3 = vsmask.f32 7448  ;;  %v4089_v12 = vcombine.high %v4033_v53, %v4033_v53 }
  0x20   : > { %v4053_v60 = vld.sshfl [vmem:[%s4021_s5 + $0x20] sm:$0x5f pattern:$0x76325410]  ;;  %v506_v61 = vcombine.low %v4042_v56, %v4048_v58  ;;  %v3476_v62 = vld [vmem:[%s4990_s1 + $0x3b0] ss:$8 sps:$4 sm:$0xff]   ;;  %vm4151_vm6 = vmor %vm4132_vm5, %vm997_vm3 }
  0x21   : > { %473 = vmatpush1.bf16.msra.mxu0 %v3434_v22  ;;  %v283_v63 = vcombine.low %v4048_v58, %v4053_v60  ;;  %v4063_v0 = vrot.slane %v282_v59, %v4036_v54  ;;  %v2819_v1 = vld.sshfl [vmem:[%s4021_s5] sm:$0x5f pattern:$0x76325410]  ;;  %v3477_v2 = vld [vmem:[%s4990_s1 + $0xb0] ss:$8 sps:$4 sm:$0xff]  }
  0x22   : > { %696 = vmatpush1.bf16.msra.mxu1 %v3435_v23  ;;  %474 = vmatprep.subr.bf16.mxu0 %v3436_v24  ;;  %v3478_v3 = vld [vmem:[%s4990_s1 + $0x3a4] ss:$8 sps:$4 sm:$0xff]   ;;  %v505_v4 = vcombine.low %v2819_v1, %v4033_v53  ;;  %v4074_v5 = vrot.slane %v506_v61, %v4036_v54  ;;  %v4076_v6 = vcombine.high %v2819_v1, %v2819_v1  ;;  %v1000_v7 = vshrl.u32 %v2819_v1, 16  ;;  %v3482_v15 = vld [vmem:[%s4990_s1 + $0x3a0] ss:$8 sps:$4 sm:$0xff]   ;;  %s3389_s4 = sshll.u32 %s5002_s13, 4 }
  0x23   : > { %697 = vmatprep.subr.bf16.mxu1 %v3438_v25  ;;  %v3480_v8 = vld [vmem:[%s4990_s1 + $0xa4] ss:$8 sps:$4 sm:$0xff]   ;;  %v4082_v9 = vrot.slane %v283_v63, %v4036_v54  ;;  %v1003_v10 = vshll.u32 %v2819_v1, 16  ;;  %v1014_v14 = vshrl.u32 %v4033_v53, 16  ;;  %v1028_v17 = vshrl.u32 %v4042_v56, 16  ;;  %s170_s8 = scalar_lea.vmem %s4992_s3, %s3389_s4 }
  0x24   : > { %v4085_v11 = vrot.slane %v505_v4, %v4036_v54  ;;  %v1002_v13 = vrot.slane %v1000_v7, 6  ;;  %v3483_v20 = vld [vmem:[%s4990_s1 + $0xa0] ss:$8 sps:$4 sm:$0xff]   ;;  %v3484_v21 = vld [vmem:[%s4990_s1 + $0x394] ss:$8 sps:$4 sm:$0xff]   ;;  %v1009_v23 = vshll.u32 %v4076_v6, 16 }
  0x25   : > { %475 = vmatpush1.bf16.msra.mxu0 %v3440_v26  ;;  %v299_v16 = vcombine.high %v4063_v0, %v4082_v9  ;;  %v1005_v19 = vrot.slane %v1003_v10, 7  ;;  %v3486_v24 = vld [vmem:[%s4990_s1 + $0x94] ss:$8 sps:$4 sm:$0xff]   ;;  %v1031_v25 = vshll.u32 %v4042_v56, 16  ;;  %v3496_v4 = vld [vmem:[%s4990_s1 + $0x670] ss:$8 sps:$4 sm:$0xff]  }
  0x26   : > { %698 = vmatpush1.bf16.msra.mxu1 %v3441_v27  ;;  %476 = vmatprep.subr.bf16.mxu0 %v3442_v28  ;;  %v522_v22 = vcombine.high %v4085_v11, %v4074_v5  ;;  %v1017_v27 = vshll.u32 %v4033_v53, 16  ;;  %v3488_v28 = vld [vmem:[%s4990_s1 + $0x390] ss:$8 sps:$4 sm:$0xff]   ;;  %v1011_v40 = vrot.slane %v1009_v23, 7  ;;  %v3495_v53 = vld [vmem:[%s4990_s1 + $0x80] ss:$8 sps:$4 sm:$0xff]  }
  0x27   : > { %699 = vmatprep.subr.bf16.mxu1 %v3444_v29  ;;  %v1006_v26 = vor.u32 %v1005_v19, %v1002_v13  ;;  %v3489_v29 = vld [vmem:[%s4990_s1 + $0x90] ss:$8 sps:$4 sm:$0xff]   ;;  %494 = vmatprep.mubr.bf16.mxu0 %v299_v16  ;;  %v3507_v13 = vld [vmem:[%s4990_s1 + $0x164] ss:$8 sps:$4 sm:$0xff]   ;;  %v3505_v18 = vld [vmem:[%s4990_s1 + $0x160] ss:$8 sps:$4 sm:$0xff]  }
  0x28   : > { %717 = vmatprep.mubr.bf16.mxu1 %v522_v22  ;;  %v1019_v41 = vrot.slane %v1017_v27, 7  ;;  %v3499_v10 = vld [vmem:[%s4990_s1 + $0x170] ss:$8 sps:$4 sm:$0xff]   ;;  %v3510_v19 = vld [vmem:[%s4990_s1 + $0x654] ss:$8 sps:$4 sm:$0xff]   ;;  %vm1858_vm8 = vcmask 1042434  }
  0x29   : > { %477 = vmatpush1.bf16.msra.mxu0 %v3446_v30  ;;  %v1042_v30 = vshrl.u32 %v4048_v58, 16  ;;  %v1007_v39 = vrot.slane %v1006_v26, 2  ;;  %v3508_v22 = vld [vmem:[%s4990_s1 + $0x650] ss:$8 sps:$4 sm:$0xff]   ;;  %v3519_v26 = vld [vmem:[%s4990_s1 + $0x144] ss:$8 sps:$4 sm:$0xff]   ;;  %vm1859_vm11 = vmor %vm1857_vm7, %vm1858_vm8 }
  0x2a   : > { %700 = vmatpush1.bf16.msra.mxu1 %v3447_v31  ;;  %478 = vmatprep.subr.bf16.mxu0 %v3448_v32  ;;  %v4127_v31 = vcombine.high %v4042_v56, %v4042_v56  ;;  %v3514_v27 = vld [vmem:[%s4990_s1 + $0x640] ss:$8 sps:$4 sm:$0xff]   ;;  %v3520_v32 = vld [vmem:[%s4990_s1 + $0x630] ss:$8 sps:$4 sm:$0xff]   ;;  %vm1860_vm9 = vcmask 1044484   ;;  %vm1862_vm10 = vcmask 1046534  }
  0x2b   : > { %701 = vmatprep.subr.bf16.mxu1 %v3450_v33  ;;  %v1016_v33 = vrot.slane %v1014_v14, 6  ;;  %v1012_v56 = vsel %vm4151_vm6, %v1007_v39, %v1011_v40  ;;  %v3537_v39 = vld [vmem:[%s4990_s1 + $0x114] ss:$8 sps:$4 sm:$0xff]   ;;  %v3532_v40 = vld [vmem:[%s4990_s1 + $0x610] ss:$8 sps:$4 sm:$0xff]   ;;  %vm1861_vm12 = vmor %vm1859_vm11, %vm1860_vm9 }
  0x2c   : > { %v1037_v47 = vshll.u32 %v4127_v31, 16  ;;  %vm4595_vm13 = vmor %vm1861_vm12, %vm1862_vm10 }
  0x2d   : > { %479 = vmatpush2.bf16.msra.mxu0 %v3452_v34  ;;  %v1023_v34 = vshll.u32 %v4089_v12, 16 }
  0x2e   : > { %702 = vmatpush2.bf16.msra.mxu1 %v3453_v35  ;;  %480 = vmatprep.subr.bf16.mxu0 %v3454_v36  ;;  %v3490_v35 = vld [vmem:[%s4990_s1 + $0x384] ss:$8 sps:$4 sm:$0xff]   ;;  %v1045_v36 = vshll.u32 %v4048_v58, 16  ;;  %v1039_v61 = vrot.slane %v1037_v47, 7 }
  0x2f   : > { %703 = vmatprep.subr.bf16.mxu1 %v3456_v37  ;;  %v1030_v37 = vrot.slane %v1028_v17, 6 }
  0x31   : > { %481 = vmatpush2.bf16.msra.mxu0 %v3458_v38  ;;  %v3492_v38 = vld [vmem:[%s4990_s1 + $0x84] ss:$8 sps:$4 sm:$0xff]  }
  0x32   : > { %704 = vmatpush2.bf16.msra.mxu1 %v3459_v42  ;;  %482 = vmatprep.subr.bf16.mxu0 %v3460_v43  ;;  %v4146_v42 = vcombine.high %v4048_v58, %v4048_v58  ;;  %v3501_v58 = vld [vmem:[%s4990_s1 + $0x174] ss:$8 sps:$4 sm:$0xff]   ;;  %v3586_v43 = vld [vmem:[%s4990_s1 + $0x680] ss:$8 sps:$4 sm:$0xff]  }
  0x33   : > { %705 = vmatprep.subr.bf16.mxu1 %v3462_v44  ;;  %v1033_v44 = vrot.slane %v1031_v25, 7  ;;  %v3516_v25 = vld [vmem:[%s4990_s1 + $0x644] ss:$8 sps:$4 sm:$0xff]  }
  0x34   : > { %v1051_v1 = vshll.u32 %v4146_v42, 16 }
  0x35   : > { %483 = vmatpush2.bf16.msra.mxu0 %v3464_v45  ;;  %v1020_v45 = vor.u32 %v1019_v41, %v1016_v33  ;;  %v3523_v33 = vld [vmem:[%s4990_s1 + $0x130] ss:$8 sps:$4 sm:$0xff]  }
  0x36   : > { %706 = vmatpush2.bf16.msra.mxu1 %v3465_v46  ;;  %484 = vmatprep.subr.bf16.mxu0 %v3466_v49  ;;  %v1025_v46 = vrot.slane %v1023_v34, 7  ;;  %v1044_v49 = vrot.slane %v1042_v30, 6  ;;  %v3525_v30 = vld [vmem:[%s4990_s1 + $0x134] ss:$8 sps:$4 sm:$0xff]   ;;  %v3528_v34 = vld [vmem:[%s4990_s1 + $0x624] ss:$8 sps:$4 sm:$0xff]  }
  0x37   : > { %707 = vmatprep.subr.bf16.mxu1 %v3468_v50  ;;  %v3494_v50 = vld [vmem:[%s4990_s1 + $0x380] ss:$8 sps:$4 sm:$0xff]   ;;  %v3535_v41 = vld [vmem:[%s4990_s1 + $0x110] ss:$8 sps:$4 sm:$0xff]  }
  0x39   : > { %485 = vmatpush2.bf16.msra.mxu0 %v3470_v51  ;;  %v1034_v51 = vor.u32 %v1033_v44, %v1030_v37  ;;  %v3529_v37 = vld [vmem:[%s4990_s1 + $0x120] ss:$8 sps:$4 sm:$0xff]   ;;  %v3540_v44 = vld [vmem:[%s4990_s1 + $0x604] ss:$8 sps:$4 sm:$0xff]  }
  0x3a   : > { %708 = vmatpush2.bf16.msra.mxu1 %v3471_v52  ;;  %486 = vmatprep.subr.bf16.mxu0 %v3472_v55  ;;  %v1047_v52 = vrot.slane %v1045_v36, 7  ;;  %v3498_v55 = vld [vmem:[%s4990_s1 + $0x674] ss:$8 sps:$4 sm:$0xff]   ;;  %v3526_v36 = vld [vmem:[%s4990_s1 + $0x620] ss:$8 sps:$4 sm:$0xff]  }
  0x3b   : > { %709 = vmatprep.subr.bf16.mxu1 %v3474_v57  ;;  %v1021_v57 = vrot.slane %v1020_v45, 2  ;;  %v1035_v59 = vrot.slane %v1034_v51, 2  ;;  %v3543_v45 = vld [vmem:[%s4990_s1 + $0x104] ss:$8 sps:$4 sm:$0xff]   ;;  %v3546_v51 = vld [vmem:[%s4990_s1 + $0x6f4] ss:$8 sps:$4 sm:$0xff]  }
  0x3d   : > { %487 = vmatpush2.bf16.msra.mxu0 %v3476_v62  ;;  %v1048_v62 = vor.u32 %v1047_v52, %v1044_v49  ;;  %v4172_v63 = vsel %vm4151_vm6, %v1021_v57, %v1025_v46  ;;  %v4283_v46 = vld.sshfl [vmem:[%s4021_s5 + $0x28] sm:$0x5f pattern:$0x76325410]  ;;  %v3547_v57 = vld [vmem:[%s4990_s1 + $0x1f0] ss:$8 sps:$4 sm:$0xff]  }
  0x3e   : > { %710 = vmatpush2.bf16.msra.mxu1 %v3477_v2  ;;  %488 = vmatprep.subr.bf16.mxu0 %v3478_v3  ;;  %v298_v2 = vcombine.low %v4063_v0, %v4082_v9  ;;  %v521_v3 = vcombine.low %v4085_v11, %v4074_v5  ;;  %v3504_v0 = vld [vmem:[%s4990_s1 + $0x664] ss:$8 sps:$4 sm:$0xff]   ;;  %v4191_v9 = vsel %vm4151_vm6, %v1035_v59, %v1039_v61  ;;  %v1053_v11 = vrot.slane %v1051_v1, 7  ;;  %v3538_v49 = vld [vmem:[%s4990_s1 + $0x600] ss:$8 sps:$4 sm:$0xff]  }
  0x3f   : > { %711 = vmatprep.subr.bf16.mxu1 %v3480_v8  ;;  %v1049_v7 = vrot.slane %v1048_v62, 2  ;;  %v1088_v8 = vcombine.low %v1012_v56, %v4172_v63  ;;  %v769_v47 = vcombine.low %v4053_v60, %v4283_v46  ;;  %v3544_v56 = vld [vmem:[%s4990_s1 + $0x6f0] ss:$8 sps:$4 sm:$0xff]   ;;  %v3555_v59 = vld [vmem:[%s4990_s1 + $0x1e4] ss:$8 sps:$4 sm:$0xff]  }
  0x40   : > { %v3550_v61 = vld [vmem:[%s4990_s1 + $0x6e0] ss:$8 sps:$4 sm:$0xff]   ;;  %v3558_v1 = vld [vmem:[%s4990_s1 + $0x6d4] ss:$8 sps:$4 sm:$0xff]  }
  0x41   : > { %489 = vmatpush2.bf16.msra.mxu0 %v3482_v15  ;;  %v4198_v14 = vsel %vm4151_vm6, %v1049_v7, %v1053_v11  ;;  %v3502_v15 = vld [vmem:[%s4990_s1 + $0x660] ss:$8 sps:$4 sm:$0xff]   ;;  %v4206_v17 = vrot.slane %v1088_v8, %v4036_v54  ;;  %v4297_v52 = vrot.slane %v769_v47, %v4036_v54  ;;  %v3559_v7 = vld [vmem:[%s4990_s1 + $0x1d0] ss:$8 sps:$4 sm:$0xff]   ;;  %v1320_v8 = vshll.u32 %v4053_v60, 16 }
  0x42   : > { %712 = vmatpush2.bf16.msra.mxu1 %v3483_v20  ;;  %490 = vmatprep.subr.bf16.mxu0 %v3484_v21  ;;  %v1089_v16 = vcombine.low %v4191_v9, %v4198_v14  ;;  %v3513_v20 = vld [vmem:[%s4990_s1 + $0x154] ss:$8 sps:$4 sm:$0xff]   ;;  %v3553_v62 = vld [vmem:[%s4990_s1 + $0x1e0] ss:$8 sps:$4 sm:$0xff]   ;;  %v3564_v11 = vld [vmem:[%s4990_s1 + $0x6c4] ss:$8 sps:$4 sm:$0xff]  }
  0x43   : > { %713 = vmatprep.subr.bf16.mxu1 %v3486_v24  ;;  %v3511_v24 = vld [vmem:[%s4990_s1 + $0x150] ss:$8 sps:$4 sm:$0xff]  }
  0x44   : > { %v4218_v21 = vrot.slane %v1089_v16, %v4036_v54  ;;  %v4349_v16 = vcombine.high %v4053_v60, %v4053_v60  ;;  %v3583_v47 = vld [vmem:[%s4990_s1 + $0x190] ss:$8 sps:$4 sm:$0xff]  }
  0x45   : > { %491 = vmatpush2.bf16.msra.mxu0 %v3488_v28  ;;  %v3517_v28 = vld [vmem:[%s4990_s1 + $0x140] ss:$8 sps:$4 sm:$0xff]  }
  0x46   : > { %714 = vmatpush2.bf16.msra.mxu1 %v3489_v29  ;;  %492 = vmatprep.subr.bf16.mxu0 %v3490_v35  ;;  %v1105_v23 = vcombine.high %v4206_v17, %v4218_v21  ;;  %v3522_v29 = vld [vmem:[%s4990_s1 + $0x634] ss:$8 sps:$4 sm:$0xff]   ;;  %v3531_v35 = vld [vmem:[%s4990_s1 + $0x124] ss:$8 sps:$4 sm:$0xff]  }
  0x47   : > { %715 = vmatprep.subr.bf16.mxu1 %v3492_v38  ;;  %v3534_v38 = vld [vmem:[%s4990_s1 + $0x614] ss:$8 sps:$4 sm:$0xff]  }
  0x49   : > { %493 = vmatpush2.bf16.msra.mxu0 %v3494_v50  ;;  %v3541_v50 = vld [vmem:[%s4990_s1 + $0x100] ss:$8 sps:$4 sm:$0xff]  }
  0x4a   : > { %716 = vmatpush2.bf16.msra.mxu1 %v3495_v53  ;;  %941 = vmatprep.subr.bf16.mxu0 %v3498_v55  ;;  %v3549_v53 = vld [vmem:[%s4990_s1 + $0x1f4] ss:$8 sps:$4 sm:$0xff]   ;;  %v778_v55 = vcombine.high %v4074_v5, %v4297_v52 }
  0x4b   : > { %1268 = vmatprep.subr.bf16.mxu1 %v3501_v58  ;;  %v3552_v58 = vld [vmem:[%s4990_s1 + $0x6e4] ss:$8 sps:$4 sm:$0xff]  }
  0x4c   : > { %495 = vmatmul.mubr.bf16.vlgmr.msra.gmra.mxu0 %v298_v2  ;;  %v3561_v2 = vld [vmem:[%s4990_s1 + $0x1d4] ss:$8 sps:$4 sm:$0xff]  }
  0x4d   : > { %718 = vmatmul.mubr.bf16.vlgmr.msra.gmra.mxu1 %v521_v3  ;;  %942 = vmatpush1.bf16.msra.mxu0 %v3496_v4  ;;  %v3556_v3 = vld [vmem:[%s4990_s1 + $0x6d0] ss:$8 sps:$4 sm:$0xff]   ;;  %v1317_v4 = vshrl.u32 %v4053_v60, 16  ;;  %v3573_v60 = vld [vmem:[%s4990_s1 + $0x1b4] ss:$8 sps:$4 sm:$0xff]  }
  0x4e   : > { %1269 = vmatpush1.bf16.msra.mxu1 %v3499_v10  ;;  %943 = vmatprep.subr.bf16.mxu0 %v3504_v0  ;;  %v1592_v10 = vshrl.u32 %v4283_v46, 16  ;;  %v1595_v0 = vshll.u32 %v4283_v46, 16 }
  0x4f   : > { %1270 = vmatprep.subr.bf16.mxu1 %v3507_v13  ;;  %1300 = vmatprep.mubr.bf16.mxu1 %v1105_v23  ;;  %v3567_v13 = vld [vmem:[%s4990_s1 + $0x1c4] ss:$8 sps:$4 sm:$0xff]  }
  0x50   : > { %973 = vmatprep.mubr.bf16.mxu0 %v778_v55  ;;  %v1594_v23 = vrot.slane %v1592_v10, 6  ;;  %v1363_v55 = vcombine.low %v4172_v63, %v4191_v9  ;;  %v3597_v63 = vld [vmem:[%s4990_s1 + $0x774] ss:$8 sps:$4 sm:$0xff]  }
  0x51   : > { %944 = vmatpush1.bf16.msra.mxu0 %v3502_v15  ;;  %v3562_v15 = vld [vmem:[%s4990_s1 + $0x6c0] ss:$8 sps:$4 sm:$0xff]   ;;  %v3606_v10 = vld [vmem:[%s4990_s1 + $0x454] ss:$8 sps:$4 sm:$0xff]  }
  0x52   : > { %1271 = vmatpush1.bf16.msra.mxu1 %v3505_v18  ;;  %945 = vmatprep.subr.bf16.mxu0 %v3510_v19  ;;  %v1319_v18 = vrot.slane %v1317_v4, 6  ;;  %v3565_v19 = vld [vmem:[%s4990_s1 + $0x1c0] ss:$8 sps:$4 sm:$0xff]   ;;  %v4422_v9 = vrot.slane %v1363_v55, %v4036_v54  ;;  %v3600_v4 = vld [vmem:[%s4990_s1 + $0x464] ss:$8 sps:$4 sm:$0xff]  }
  0x53   : > { %1272 = vmatprep.subr.bf16.mxu1 %v3513_v20  ;;  %v1322_v20 = vrot.slane %v1320_v8, 7  ;;  %v3601_v8 = vld [vmem:[%s4990_s1 + $0x760] ss:$8 sps:$4 sm:$0xff]   ;;  %v3652_v55 = vld [vmem:[%s4990_s1 + $0x4d0] ss:$8 sps:$4 sm:$0xff]  }
  0x55   : > { %946 = vmatpush1.bf16.msra.mxu0 %v3508_v22  ;;  %v4356_v22 = vcombine.high %v4283_v46, %v4283_v46 }
  0x56   : > { %1273 = vmatpush1.bf16.msra.mxu1 %v3511_v24  ;;  %947 = vmatprep.subr.bf16.mxu0 %v3516_v25  ;;  %v1597_v24 = vrot.slane %v1595_v0, 7  ;;  %v3570_v25 = vld [vmem:[%s4990_s1 + $0x6b4] ss:$8 sps:$4 sm:$0xff]  }
  0x57   : > { %1274 = vmatprep.subr.bf16.mxu1 %v3519_v26  ;;  %v1326_v26 = vshll.u32 %v4349_v16, 16  ;;  %v3609_v0 = vld [vmem:[%s4990_s1 + $0x754] ss:$8 sps:$4 sm:$0xff]  }
  0x59   : > { %948 = vmatpush1.bf16.msra.mxu0 %v3514_v27  ;;  %v3568_v27 = vld [vmem:[%s4990_s1 + $0x6b0] ss:$8 sps:$4 sm:$0xff]  }
  0x5a   : > { %1275 = vmatpush1.bf16.msra.mxu1 %v3517_v28  ;;  %949 = vmatprep.subr.bf16.mxu0 %v3522_v29  ;;  %v3571_v28 = vld [vmem:[%s4990_s1 + $0x1b0] ss:$8 sps:$4 sm:$0xff]   ;;  %v1323_v29 = vor.u32 %v1322_v20, %v1319_v18  ;;  %v3615_v18 = vld [vmem:[%s4990_s1 + $0x744] ss:$8 sps:$4 sm:$0xff]   ;;  %v3613_v20 = vld [vmem:[%s4990_s1 + $0x740] ss:$8 sps:$4 sm:$0xff]  }
  0x5b   : > { %1276 = vmatprep.subr.bf16.mxu1 %v3525_v30  ;;  %v1598_v30 = vor.u32 %v1597_v24, %v1594_v23  ;;  %v3618_v23 = vld [vmem:[%s4990_s1 + $0x434] ss:$8 sps:$4 sm:$0xff]  }
  0x5c   : > { %v3621_v24 = vld [vmem:[%s4990_s1 + $0x734] ss:$8 sps:$4 sm:$0xff]  }
  0x5d   : > { %950 = vmatpush1.bf16.msra.mxu0 %v3520_v32  ;;  %v1601_v32 = vshll.u32 %v4356_v22, 16 }
  0x5e   : > { %1277 = vmatpush1.bf16.msra.mxu1 %v3523_v33  ;;  %951 = vmatprep.subr.bf16.mxu0 %v3528_v34  ;;  %v3576_v33 = vld [vmem:[%s4990_s1 + $0x6a4] ss:$8 sps:$4 sm:$0xff]  }
  0x5f   : > { %1278 = vmatprep.subr.bf16.mxu1 %v3531_v35  ;;  %v3579_v34 = vld [vmem:[%s4990_s1 + $0x1a4] ss:$8 sps:$4 sm:$0xff]   ;;  %v3574_v35 = vld [vmem:[%s4990_s1 + $0x6a0] ss:$8 sps:$4 sm:$0xff]  }
  0x61   : > { %952 = vmatpush1.bf16.msra.mxu0 %v3526_v36  ;;  %v1328_v36 = vrot.slane %v1326_v26, 7  ;;  %v3624_v26 = vld [vmem:[%s4990_s1 + $0x424] ss:$8 sps:$4 sm:$0xff]  }
  0x62   : > { %1279 = vmatpush1.bf16.msra.mxu1 %v3529_v37  ;;  %953 = vmatprep.subr.bf16.mxu0 %v3534_v38  ;;  %v3577_v37 = vld [vmem:[%s4990_s1 + $0x1a0] ss:$8 sps:$4 sm:$0xff]   ;;  %v1324_v38 = vrot.slane %v1323_v29, 2 }
  0x63   : > { %1280 = vmatprep.subr.bf16.mxu1 %v3537_v39  ;;  %v1599_v39 = vrot.slane %v1598_v30, 2  ;;  %v3625_v29 = vld [vmem:[%s4990_s1 + $0x720] ss:$8 sps:$4 sm:$0xff]   ;;  %v3630_v30 = vld [vmem:[%s4990_s1 + $0x414] ss:$8 sps:$4 sm:$0xff]  }
  0x65   : > { %954 = vmatpush1.bf16.msra.mxu0 %v3532_v40  ;;  %v1603_v40 = vrot.slane %v1601_v32, 7  ;;  %v3633_v32 = vld [vmem:[%s4990_s1 + $0x714] ss:$8 sps:$4 sm:$0xff]  }
  0x66   : > { %1281 = vmatpush1.bf16.msra.mxu1 %v3535_v41  ;;  %955 = vmatprep.subr.bf16.mxu0 %v3540_v44  ;;  %v3582_v41 = vld [vmem:[%s4990_s1 + $0x694] ss:$8 sps:$4 sm:$0xff]  }
  0x67   : > { %1282 = vmatprep.subr.bf16.mxu1 %v3543_v45  ;;  %v3585_v44 = vld [vmem:[%s4990_s1 + $0x194] ss:$8 sps:$4 sm:$0xff]   ;;  %v3580_v45 = vld [vmem:[%s4990_s1 + $0x690] ss:$8 sps:$4 sm:$0xff]  }
  0x69   : > { %956 = vmatpush1.bf16.msra.mxu0 %v3538_v49  ;;  %v1329_v49 = vsel %vm4151_vm6, %v1324_v38, %v1328_v36  ;;  %v3639_v36 = vld [vmem:[%s4990_s1 + $0x704] ss:$8 sps:$4 sm:$0xff]   ;;  %v3637_v38 = vld [vmem:[%s4990_s1 + $0x700] ss:$8 sps:$4 sm:$0xff]  }
  0x6a   : > { %1283 = vmatpush1.bf16.msra.mxu1 %v3541_v50  ;;  %957 = vmatprep.subr.bf16.mxu0 %v3546_v51  ;;  %v1604_v50 = vsel %vm4151_vm6, %v1599_v39, %v1603_v40  ;;  %v3588_v51 = vld [vmem:[%s4990_s1 + $0x684] ss:$8 sps:$4 sm:$0xff]   ;;  %v3642_v39 = vld [vmem:[%s4990_s1 + $0x4f4] ss:$8 sps:$4 sm:$0xff]  }
  0x6b   : > { %1284 = vmatprep.subr.bf16.mxu1 %v3549_v53  ;;  %v3591_v53 = vld [vmem:[%s4990_s1 + $0x184] ss:$8 sps:$4 sm:$0xff]   ;;  %v3645_v40 = vld [vmem:[%s4990_s1 + $0x7f4] ss:$8 sps:$4 sm:$0xff]  }
  0x6d   : > { %958 = vmatpush2.bf16.msra.mxu0 %v3544_v56  ;;  %v1364_v56 = vcombine.low %v4198_v14, %v1329_v49 }
  0x6e   : > { %1285 = vmatpush2.bf16.msra.mxu1 %v3547_v57  ;;  %959 = vmatprep.subr.bf16.mxu0 %v3552_v58  ;;  %v1638_v57 = vcombine.low %v1329_v49, %v1604_v50  ;;  %v3589_v58 = vld [vmem:[%s4990_s1 + $0x180] ss:$8 sps:$4 sm:$0xff]  }
  0x6f   : > { %1286 = vmatprep.subr.bf16.mxu1 %v3555_v59  ;;  %v3594_v59 = vld [vmem:[%s4990_s1 + $0x474] ss:$8 sps:$4 sm:$0xff]   ;;  %v4425_v14 = vrot.slane %v1364_v56, %v4036_v54  ;;  %v3646_v49 = vld [vmem:[%s4990_s1 + $0x4e0] ss:$8 sps:$4 sm:$0xff]   ;;  %v3655_v56 = vld [vmem:[%s4990_s1 + $0x7d0] ss:$8 sps:$4 sm:$0xff]  }
  0x70   : > { %v3649_v50 = vld [vmem:[%s4990_s1 + $0x7e0] ss:$8 sps:$4 sm:$0xff]  }
  0x71   : > { %960 = vmatpush2.bf16.msra.mxu0 %v3550_v61  ;;  %v4428_v61 = vrot.slane %v1638_v57, %v4036_v54  ;;  %v3660_v57 = vld [vmem:[%s4990_s1 + $0x4c4] ss:$8 sps:$4 sm:$0xff]  }
  0x72   : > { %1287 = vmatpush2.bf16.msra.mxu1 %v3553_v62  ;;  %961 = vmatprep.subr.bf16.mxu0 %v3558_v1  ;;  %v777_v62 = vcombine.low %v4074_v5, %v4297_v52  ;;  %v3592_v1 = vld [vmem:[%s4990_s1 + $0x470] ss:$8 sps:$4 sm:$0xff]   ;;  %v3603_v5 = vld [vmem:[%s4990_s1 + $0x764] ss:$8 sps:$4 sm:$0xff]   ;;  %v1380_v52 = vcombine.high %v4422_v9, %v4425_v14 }
  0x73   : > { %1288 = vmatprep.subr.bf16.mxu1 %v3561_v2  ;;  %v1104_v2 = vcombine.low %v4206_v17, %v4218_v21  ;;  %v1647_v17 = vcombine.high %v4218_v21, %v4428_v61 }
  0x75   : > { %962 = vmatpush2.bf16.msra.mxu0 %v3556_v3  ;;  %v3595_v3 = vld [vmem:[%s4990_s1 + $0x770] ss:$8 sps:$4 sm:$0xff]  }
  0x76   : > { %1289 = vmatpush2.bf16.msra.mxu1 %v3559_v7  ;;  %963 = vmatprep.subr.bf16.mxu0 %v3564_v11  ;;  %v3598_v7 = vld [vmem:[%s4990_s1 + $0x460] ss:$8 sps:$4 sm:$0xff]   ;;  %v3604_v11 = vld [vmem:[%s4990_s1 + $0x450] ss:$8 sps:$4 sm:$0xff]  }
  0x77   : > { %1290 = vmatprep.subr.bf16.mxu1 %v3567_v13  ;;  %v3607_v13 = vld [vmem:[%s4990_s1 + $0x750] ss:$8 sps:$4 sm:$0xff]  }
  0x79   : > { %964 = vmatpush2.bf16.msra.mxu0 %v3562_v15  ;;  %v3612_v15 = vld [vmem:[%s4990_s1 + $0x444] ss:$8 sps:$4 sm:$0xff]  }
  0x7a   : > { %1291 = vmatpush2.bf16.msra.mxu1 %v3565_v19  ;;  %965 = vmatprep.subr.bf16.mxu0 %v3570_v25  ;;  %v3610_v19 = vld [vmem:[%s4990_s1 + $0x440] ss:$8 sps:$4 sm:$0xff]   ;;  %v3616_v25 = vld [vmem:[%s4990_s1 + $0x430] ss:$8 sps:$4 sm:$0xff]  }
  0x7b   : > { %1292 = vmatprep.subr.bf16.mxu1 %v3573_v60  ;;  %v3619_v60 = vld [vmem:[%s4990_s1 + $0x730] ss:$8 sps:$4 sm:$0xff]  }
  0x7d   : > { %966 = vmatpush2.bf16.msra.mxu0 %v3568_v27  ;;  %v3627_v27 = vld [vmem:[%s4990_s1 + $0x724] ss:$8 sps:$4 sm:$0xff]  }
  0x7e   : > { %1293 = vmatpush2.bf16.msra.mxu1 %v3571_v28  ;;  %967 = vmatprep.subr.bf16.mxu0 %v3576_v33  ;;  %v3622_v28 = vld [vmem:[%s4990_s1 + $0x420] ss:$8 sps:$4 sm:$0xff]   ;;  %v3628_v33 = vld [vmem:[%s4990_s1 + $0x410] ss:$8 sps:$4 sm:$0xff]  }
  0x7f   : > { %1294 = vmatprep.subr.bf16.mxu1 %v3579_v34  ;;  %v3631_v34 = vld [vmem:[%s4990_s1 + $0x710] ss:$8 sps:$4 sm:$0xff]  }
  0x81   : > { %968 = vmatpush2.bf16.msra.mxu0 %v3574_v35  ;;  %v3636_v35 = vld [vmem:[%s4990_s1 + $0x404] ss:$8 sps:$4 sm:$0xff]  }
  0x82   : > { %1295 = vmatpush2.bf16.msra.mxu1 %v3577_v37  ;;  %969 = vmatprep.subr.bf16.mxu0 %v3582_v41  ;;  %v3634_v37 = vld [vmem:[%s4990_s1 + $0x400] ss:$8 sps:$4 sm:$0xff]   ;;  %v3640_v41 = vld [vmem:[%s4990_s1 + $0x4f0] ss:$8 sps:$4 sm:$0xff]  }
  0x83   : > { %1296 = vmatprep.subr.bf16.mxu1 %v3585_v44  ;;  %v3643_v44 = vld [vmem:[%s4990_s1 + $0x7f0] ss:$8 sps:$4 sm:$0xff]  }
  0x85   : > { %970 = vmatpush2.bf16.msra.mxu0 %v3580_v45  ;;  %v3648_v45 = vld [vmem:[%s4990_s1 + $0x4e4] ss:$8 sps:$4 sm:$0xff]  }
  0x86   : > { %1297 = vmatpush2.bf16.msra.mxu1 %v3583_v47  ;;  %971 = vmatprep.subr.bf16.mxu0 %v3588_v51  ;;  %v3651_v47 = vld [vmem:[%s4990_s1 + $0x7e4] ss:$8 sps:$4 sm:$0xff]   ;;  %v3654_v51 = vld [vmem:[%s4990_s1 + $0x4d4] ss:$8 sps:$4 sm:$0xff]  }
  0x87   : > { %1298 = vmatprep.subr.bf16.mxu1 %v3591_v53  ;;  %v3657_v53 = vld [vmem:[%s4990_s1 + $0x7d4] ss:$8 sps:$4 sm:$0xff]  }
  0x89   : > { %972 = vmatpush2.bf16.msra.mxu0 %v3586_v43  ;;  %v3663_v43 = vld [vmem:[%s4990_s1 + $0x7c4] ss:$8 sps:$4 sm:$0xff]  }
  0x8a   : > { %1299 = vmatpush2.bf16.msra.mxu1 %v3589_v58  ;;  %1543 = vmatprep.subr.bf16.mxu0 %v3594_v59  ;;  %v3658_v58 = vld [vmem:[%s4990_s1 + $0x4c0] ss:$8 sps:$4 sm:$0xff]  }
  0x8b   : > { %1810 = vmatprep.subr.bf16.mxu1 %v3597_v63  ;;  %v3661_v59 = vld [vmem:[%s4990_s1 + $0x7c0] ss:$8 sps:$4 sm:$0xff]   ;;  %v3666_v63 = vld [vmem:[%s4990_s1 + $0x4b4] ss:$8 sps:$4 sm:$0xff]  }
  0x8c   : > { %974 = vmatmul.mubr.bf16.vlgmr.msra.gmra.mxu0 %v777_v62  ;;  %v3669_v62 = vld [vmem:[%s4990_s1 + $0x7b4] ss:$8 sps:$4 sm:$0xff]  }
  0x8d   : > { %1301 = vmatmul.mubr.bf16.vlgmr.msra.gmra.mxu1 %v1104_v2  ;;  %1544 = vmatpush1.bf16.msra.mxu0 %v3592_v1  ;;  %v3664_v1 = vld [vmem:[%s4990_s1 + $0x4b0] ss:$8 sps:$4 sm:$0xff]  }
  0x8e   : > { %1811 = vmatpush1.bf16.msra.mxu1 %v3595_v3  ;;  %1545 = vmatprep.subr.bf16.mxu0 %v3600_v4  ;;  %v3832_v2 = vld.sshfl [vmem:[%s4021_s5 + $0x18] sm:$0x5f pattern:$0x76325410]  ;;  %v1878_v4 = vrot.slane %v4146_v42, 7 }
  0x8f   : > { %1812 = vmatprep.subr.bf16.mxu1 %v3603_v5  ;;  %1575 = vmatprep.mubr.bf16.mxu0 %v1380_v52  ;;  %v3180_v3 = vrot.slane %v3832_v2, 9  ;;  %v3833_v5 = vld.sshfl [vmem:[%s4021_s5 + $0x20] sm:$0x5f pattern:$0x76325410] }
  0x90   : > { %1842 = vmatprep.mubr.bf16.mxu1 %v1647_v17  ;;  %v3245_v52 = vrot.slane %v3833_v5, 9  ;;  %v2142_v17 = vrot.slane %v4349_v16, 7  ;;  %v3675_v42 = vld [vmem:[%s4990_s1 + $0x7a4] ss:$8 sps:$4 sm:$0xff]   ;;  %v3700_v2 = vld [vmem:[%s4990_s1 + $0x250] ss:$8 sps:$4 sm:$0xff]  }
  0x91   : > { %1546 = vmatpush1.bf16.msra.mxu0 %v3598_v7  ;;  %v3667_v7 = vld [vmem:[%s4990_s1 + $0x7b0] ss:$8 sps:$4 sm:$0xff]   ;;  %v3834_v16 = vld.sshfl [vmem:[%s4021_s5] sm:$0x5f pattern:$0x76325410] }
  0x92   : > { %1813 = vmatpush1.bf16.msra.mxu1 %v3601_v8  ;;  %1547 = vmatprep.subr.bf16.mxu0 %v3606_v10  ;;  %v3672_v8 = vld [vmem:[%s4990_s1 + $0x4a4] ss:$8 sps:$4 sm:$0xff]   ;;  %v3712_v10 = vld [vmem:[%s4990_s1 + $0x230] ss:$8 sps:$4 sm:$0xff]  }
  0x93   : > { %1814 = vmatprep.subr.bf16.mxu1 %v3609_v0  ;;  %v3177_v0 = vrot.slane %v3834_v16, 9  ;;  %v3711_v5 = vld [vmem:[%s4990_s1 + $0x544] ss:$8 sps:$4 sm:$0xff]  }
  0x94   : > { %v3720_v16 = vld [vmem:[%s4990_s1 + $0x224] ss:$8 sps:$4 sm:$0xff]  }
  0x95   : > { %1548 = vmatpush1.bf16.msra.mxu0 %v3604_v11  ;;  %v1866_v11 = vrot.slane %v4076_v6, 7  ;;  %v3673_v6 = vld [vmem:[%s4990_s1 + $0x7a0] ss:$8 sps:$4 sm:$0xff]  }
  0x96   : > { %1815 = vmatpush1.bf16.msra.mxu1 %v3607_v13  ;;  %1549 = vmatprep.subr.bf16.mxu0 %v3612_v15  ;;  %v3835_v13 = vld.sshfl [vmem:[%s4021_s5 + $0x8] sm:$0x5f pattern:$0x76325410] }
  0x97   : > { %1816 = vmatprep.subr.bf16.mxu1 %v3615_v18  ;;  %v3178_v15 = vrot.slane %v3835_v13, 9  ;;  %v1870_v18 = vrot.slane %v4089_v12, 7  ;;  %v3678_v12 = vld [vmem:[%s4990_s1 + $0x494] ss:$8 sps:$4 sm:$0xff]   ;;  %v3721_v13 = vld [vmem:[%s4990_s1 + $0x520] ss:$8 sps:$4 sm:$0xff]  }
  0x99   : > { %1550 = vmatpush1.bf16.msra.mxu0 %v3610_v19  ;;  %v1879_v19 = vsel %vm4595_vm13, %v3180_v3, %v1878_v4  ;;  %v3703_v3 = vld [vmem:[%s4990_s1 + $0x550] ss:$8 sps:$4 sm:$0xff]   ;;  %v3708_v4 = vld [vmem:[%s4990_s1 + $0x244] ss:$8 sps:$4 sm:$0xff]  }
  0x9a   : > { %1817 = vmatpush1.bf16.msra.mxu1 %v3613_v20  ;;  %1551 = vmatprep.subr.bf16.mxu0 %v3618_v23  ;;  %v2143_v20 = vsel %vm4595_vm13, %v3245_v52, %v2142_v17  ;;  %v3670_v23 = vld [vmem:[%s4990_s1 + $0x4a0] ss:$8 sps:$4 sm:$0xff]  }
  0x9b   : > { %1818 = vmatprep.subr.bf16.mxu1 %v3621_v24  ;;  %v3836_v24 = vld.sshfl [vmem:[%s4021_s5 + $0x10] sm:$0x5f pattern:$0x76325410]  ;;  %v3706_v52 = vld [vmem:[%s4990_s1 + $0x240] ss:$8 sps:$4 sm:$0xff]  }
  0x9c   : > { %v3709_v17 = vld [vmem:[%s4990_s1 + $0x540] ss:$8 sps:$4 sm:$0xff]  }
  0x9d   : > { %1552 = vmatpush1.bf16.msra.mxu0 %v3616_v25  ;;  %v3179_v25 = vrot.slane %v3836_v24, 9  ;;  %v3735_v24 = vld [vmem:[%s4990_s1 + $0x504] ss:$8 sps:$4 sm:$0xff]  }
  0x9e   : > { %1819 = vmatpush1.bf16.msra.mxu1 %v3619_v60  ;;  %1553 = vmatprep.subr.bf16.mxu0 %v3624_v26  ;;  %v1874_v60 = vrot.slane %v4127_v31, 7  ;;  %v2178_v26 = vcombine.low %v1879_v19, %v2143_v20  ;;  %v1867_v31 = vsel %vm4595_vm13, %v3177_v0, %v1866_v11  ;;  %v3723_v0 = vld [vmem:[%s4990_s1 + $0x524] ss:$8 sps:$4 sm:$0xff]   ;;  %v3718_v11 = vld [vmem:[%s4990_s1 + $0x220] ss:$8 sps:$4 sm:$0xff]  }
  0x9f   : > { %1820 = vmatprep.subr.bf16.mxu1 %v3627_v27  ;;  %v3681_v27 = vld [vmem:[%s4990_s1 + $0x794] ss:$8 sps:$4 sm:$0xff]  }
  0xa1   : > { %1554 = vmatpush1.bf16.msra.mxu0 %v3622_v28  ;;  %v1871_v28 = vsel %vm4595_vm13, %v3178_v15, %v1870_v18  ;;  %v3726_v15 = vld [vmem:[%s4990_s1 + $0x214] ss:$8 sps:$4 sm:$0xff]  }
  0xa2   : > { %1821 = vmatpush1.bf16.msra.mxu1 %v3625_v29  ;;  %1555 = vmatprep.subr.bf16.mxu0 %v3630_v30  ;;  %v3676_v29 = vld [vmem:[%s4990_s1 + $0x490] ss:$8 sps:$4 sm:$0xff]   ;;  %v1875_v30 = vsel %vm4595_vm13, %v3179_v25, %v1874_v60  ;;  %v3729_v18 = vld [vmem:[%s4990_s1 + $0x514] ss:$8 sps:$4 sm:$0xff]   ;;  %v3730_v25 = vld [vmem:[%s4990_s1 + $0x200] ss:$8 sps:$4 sm:$0xff]  }
  0xa3   : > { %1822 = vmatprep.subr.bf16.mxu1 %v3633_v32  ;;  %v3679_v32 = vld [vmem:[%s4990_s1 + $0x790] ss:$8 sps:$4 sm:$0xff]   ;;  %v3733_v60 = vld [vmem:[%s4990_s1 + $0x500] ss:$8 sps:$4 sm:$0xff]  }
  0xa5   : > { %1556 = vmatpush1.bf16.msra.mxu0 %v3628_v33  ;;  %v3684_v33 = vld [vmem:[%s4990_s1 + $0x484] ss:$8 sps:$4 sm:$0xff]  }
  0xa6   : > { %1823 = vmatpush1.bf16.msra.mxu1 %v3631_v34  ;;  %1557 = vmatprep.subr.bf16.mxu0 %v3636_v35  ;;  %v3687_v34 = vld [vmem:[%s4990_s1 + $0x784] ss:$8 sps:$4 sm:$0xff]   ;;  %v1913_v35 = vcombine.low %v1867_v31, %v1871_v28 }
  0xa7   : > { %1824 = vmatprep.subr.bf16.mxu1 %v3639_v36  ;;  %v3310_v36 = vrot.slane %v4283_v46, 9  ;;  %v3690_v46 = vld [vmem:[%s4990_s1 + $0x274] ss:$8 sps:$4 sm:$0xff]   ;;  %v3744_v31 = vld [vmem:[%s4990_s1 + $0x2e4] ss:$8 sps:$4 sm:$0xff]  }
  0xa9   : > { %1558 = vmatpush1.bf16.msra.mxu0 %v3634_v37  ;;  %v2406_v37 = vrot.slane %v4356_v22, 7 }
  0xaa   : > { %1825 = vmatpush1.bf16.msra.mxu1 %v3637_v38  ;;  %1559 = vmatprep.subr.bf16.mxu0 %v3642_v39  ;;  %v1914_v38 = vcombine.low %v1875_v30, %v1879_v19  ;;  %v2177_v39 = vcombine.low %v1871_v28, %v1875_v30  ;;  %v3724_v19 = vld [vmem:[%s4990_s1 + $0x210] ss:$8 sps:$4 sm:$0xff]   ;;  %v3747_v28 = vld [vmem:[%s4990_s1 + $0x5e4] ss:$8 sps:$4 sm:$0xff]   ;;  %v3745_v30 = vld [vmem:[%s4990_s1 + $0x5e0] ss:$8 sps:$4 sm:$0xff]  }
  0xab   : > { %1826 = vmatprep.subr.bf16.mxu1 %v3645_v40  ;;  %v3682_v40 = vld [vmem:[%s4990_s1 + $0x480] ss:$8 sps:$4 sm:$0xff]  }
  0xad   : > { %1560 = vmatpush2.bf16.msra.mxu0 %v3640_v41  ;;  %v2407_v41 = vsel %vm4595_vm13, %v3310_v36, %v2406_v37  ;;  %v3756_v36 = vld [vmem:[%s4990_s1 + $0x2c4] ss:$8 sps:$4 sm:$0xff]  }
  0xae   : > { %1827 = vmatpush2.bf16.msra.mxu1 %v3643_v44  ;;  %1561 = vmatprep.subr.bf16.mxu0 %v3648_v45  ;;  %v3685_v44 = vld [vmem:[%s4990_s1 + $0x780] ss:$8 sps:$4 sm:$0xff]   ;;  %v2441_v22 = vcombine.low %v2143_v20, %v2407_v41  ;;  %v3693_v45 = vld [vmem:[%s4990_s1 + $0x574] ss:$8 sps:$4 sm:$0xff]   ;;  %v3727_v20 = vld [vmem:[%s4990_s1 + $0x510] ss:$8 sps:$4 sm:$0xff]  }
  0xaf   : > { %1828 = vmatprep.subr.bf16.mxu1 %v3651_v47  ;;  %v4659_v47 = vrot.slane %v1913_v35, %v4036_v54  ;;  %v3751_v35 = vld [vmem:[%s4990_s1 + $0x5d0] ss:$8 sps:$4 sm:$0xff]   ;;  %v3759_v37 = vld [vmem:[%s4990_s1 + $0x5c4] ss:$8 sps:$4 sm:$0xff]   ;;  %v3765_v41 = vld [vmem:[%s4990_s1 + $0x5b4] ss:$8 sps:$4 sm:$0xff]  }
  0xb1   : > { %1562 = vmatpush2.bf16.msra.mxu0 %v3646_v49  ;;  %v4662_v49 = vrot.slane %v1914_v38, %v4036_v54  ;;  %v3754_v38 = vld [vmem:[%s4990_s1 + $0x2c0] ss:$8 sps:$4 sm:$0xff]  }
  0xb2   : > { %1829 = vmatpush2.bf16.msra.mxu1 %v3649_v50  ;;  %1563 = vmatprep.subr.bf16.mxu0 %v3654_v51  ;;  %v4665_v50 = vrot.slane %v2177_v39, %v4036_v54  ;;  %v4668_v51 = vrot.slane %v2178_v26, %v4036_v54  ;;  %v3738_v26 = vld [vmem:[%s4990_s1 + $0x2f4] ss:$8 sps:$4 sm:$0xff]   ;;  %v3757_v39 = vld [vmem:[%s4990_s1 + $0x5c0] ss:$8 sps:$4 sm:$0xff]  }
  0xb3   : > { %1830 = vmatprep.subr.bf16.mxu1 %v3657_v53  ;;  %v4671_v53 = vrot.slane %v2441_v22, %v4036_v54  ;;  %v3696_v54 = vld [vmem:[%s4990_s1 + $0x264] ss:$8 sps:$4 sm:$0xff]  }
  0xb4   : > { %v3768_v22 = vld [vmem:[%s4990_s1 + $0x2a4] ss:$8 sps:$4 sm:$0xff]  }
  0xb5   : > { %1564 = vmatpush2.bf16.msra.mxu0 %v3652_v55  ;;  %v1379_v55 = vcombine.low %v4422_v9, %v4425_v14  ;;  %v2450_v9 = vcombine.high %v4662_v49, %v4671_v53  ;;  %v3699_v14 = vld [vmem:[%s4990_s1 + $0x564] ss:$8 sps:$4 sm:$0xff]  }
  0xb6   : > { %1831 = vmatpush2.bf16.msra.mxu1 %v3655_v56  ;;  %1565 = vmatprep.subr.bf16.mxu0 %v3660_v57  ;;  %v3688_v56 = vld [vmem:[%s4990_s1 + $0x270] ss:$8 sps:$4 sm:$0xff]   ;;  %v1646_v57 = vcombine.low %v4218_v21, %v4428_v61  ;;  %v2449_v21 = vcombine.low %v4662_v49, %v4671_v53  ;;  %v1930_v61 = vcombine.high %v4659_v47, %v4662_v49 }
  0xb7   : > { %1832 = vmatprep.subr.bf16.mxu1 %v3663_v43  ;;  %v3691_v43 = vld [vmem:[%s4990_s1 + $0x570] ss:$8 sps:$4 sm:$0xff]  }
  0xb9   : > { %1566 = vmatpush2.bf16.msra.mxu0 %v3658_v58  ;;  %v2194_v58 = vcombine.high %v4665_v50, %v4668_v51 }
  0xba   : > { %1833 = vmatpush2.bf16.msra.mxu1 %v3661_v59  ;;  %1567 = vmatprep.subr.bf16.mxu0 %v3666_v63  ;;  %v3694_v59 = vld [vmem:[%s4990_s1 + $0x260] ss:$8 sps:$4 sm:$0xff]  }
  0xbb   : > { %1834 = vmatprep.subr.bf16.mxu1 %v3669_v62  ;;  %v3697_v63 = vld [vmem:[%s4990_s1 + $0x560] ss:$8 sps:$4 sm:$0xff]   ;;  %v3702_v62 = vld [vmem:[%s4990_s1 + $0x254] ss:$8 sps:$4 sm:$0xff]  }
  0xbd   : > { %1568 = vmatpush2.bf16.msra.mxu0 %v3664_v1  ;;  %v3705_v1 = vld [vmem:[%s4990_s1 + $0x554] ss:$8 sps:$4 sm:$0xff]  }
  0xbe   : > { %1835 = vmatpush2.bf16.msra.mxu1 %v3667_v7  ;;  %1569 = vmatprep.subr.bf16.mxu0 %v3672_v8  ;;  %v3714_v7 = vld [vmem:[%s4990_s1 + $0x234] ss:$8 sps:$4 sm:$0xff]  }
  0xbf   : > { %1836 = vmatprep.subr.bf16.mxu1 %v3675_v42  ;;  %v3717_v8 = vld [vmem:[%s4990_s1 + $0x534] ss:$8 sps:$4 sm:$0xff]   ;;  %v3715_v42 = vld [vmem:[%s4990_s1 + $0x530] ss:$8 sps:$4 sm:$0xff]  }
  0xc1   : > { %1570 = vmatpush2.bf16.msra.mxu0 %v3670_v23  ;;  %v3732_v23 = vld [vmem:[%s4990_s1 + $0x204] ss:$8 sps:$4 sm:$0xff]  }
  0xc2   : > { %1837 = vmatpush2.bf16.msra.mxu1 %v3673_v6  ;;  %1571 = vmatprep.subr.bf16.mxu0 %v3678_v12  ;;  %v3741_v6 = vld [vmem:[%s4990_s1 + $0x5f4] ss:$8 sps:$4 sm:$0xff]   ;;  %v3736_v12 = vld [vmem:[%s4990_s1 + $0x2f0] ss:$8 sps:$4 sm:$0xff]  }
  0xc3   : > { %1838 = vmatprep.subr.bf16.mxu1 %v3681_v27  ;;  %v3739_v27 = vld [vmem:[%s4990_s1 + $0x5f0] ss:$8 sps:$4 sm:$0xff]  }
  0xc5   : > { %1572 = vmatpush2.bf16.msra.mxu0 %v3676_v29  ;;  %v3742_v29 = vld [vmem:[%s4990_s1 + $0x2e0] ss:$8 sps:$4 sm:$0xff]  }
  0xc6   : > { %1839 = vmatpush2.bf16.msra.mxu1 %v3679_v32  ;;  %1573 = vmatprep.subr.bf16.mxu0 %v3684_v33  ;;  %v3750_v32 = vld [vmem:[%s4990_s1 + $0x2d4] ss:$8 sps:$4 sm:$0xff]  }
  0xc7   : > { %1840 = vmatprep.subr.bf16.mxu1 %v3687_v34  ;;  %v3753_v33 = vld [vmem:[%s4990_s1 + $0x5d4] ss:$8 sps:$4 sm:$0xff]   ;;  %v3748_v34 = vld [vmem:[%s4990_s1 + $0x2d0] ss:$8 sps:$4 sm:$0xff]  }
  0xc9   : > { %1574 = vmatpush2.bf16.msra.mxu0 %v3682_v40  ;;  %v3762_v40 = vld [vmem:[%s4990_s1 + $0x2b4] ss:$8 sps:$4 sm:$0xff]  }
  0xca   : > { %1841 = vmatpush2.bf16.msra.mxu1 %v3685_v44  ;;  %2093 = vmatprep.subr.bf16.mxu0 %v3690_v46  ;;  %v3760_v44 = vld [vmem:[%s4990_s1 + $0x2b0] ss:$8 sps:$4 sm:$0xff]  }
  0xcb   : > { %2357 = vmatprep.subr.bf16.mxu1 %v3693_v45  ;;  %v3763_v46 = vld [vmem:[%s4990_s1 + $0x5b0] ss:$8 sps:$4 sm:$0xff]   ;;  %v3771_v45 = vld [vmem:[%s4990_s1 + $0x5a4] ss:$8 sps:$4 sm:$0xff]  }
  0xcc   : > { %1576 = vmatmul.mubr.bf16.vlgmr.msra.gmra.mxu0 %v1379_v55  ;;  %v3766_v55 = vld [vmem:[%s4990_s1 + $0x2a0] ss:$8 sps:$4 sm:$0xff]  }
  0xcd   : > { %1843 = vmatmul.mubr.bf16.vlgmr.msra.gmra.mxu1 %v1646_v57  ;;  %2094 = vmatpush1.bf16.msra.mxu0 %v3688_v56  ;;  %v3769_v56 = vld [vmem:[%s4990_s1 + $0x5a0] ss:$8 sps:$4 sm:$0xff]   ;;  %v3774_v57 = vld [vmem:[%s4990_s1 + $0x294] ss:$8 sps:$4 sm:$0xff]  }
  0xce   : > { %2358 = vmatpush1.bf16.msra.mxu1 %v3691_v43  ;;  %2095 = vmatprep.subr.bf16.mxu0 %v3696_v54  ;;  %v3777_v43 = vld [vmem:[%s4990_s1 + $0x594] ss:$8 sps:$4 sm:$0xff]   ;;  %v3772_v54 = vld [vmem:[%s4990_s1 + $0x290] ss:$8 sps:$4 sm:$0xff]  }
  0xcf   : > { %2359 = vmatprep.subr.bf16.mxu1 %v3699_v14  ;;  %2125 = vmatprep.mubr.bf16.mxu0 %v1930_v61  ;;  %v3775_v14 = vld [vmem:[%s4990_s1 + $0x590] ss:$8 sps:$4 sm:$0xff]   ;;  %v3780_v61 = vld [vmem:[%s4990_s1 + $0x284] ss:$8 sps:$4 sm:$0xff]  }
  0xd0   : > { %2389 = vmatprep.mubr.bf16.mxu1 %v2194_v58  ;;  %v3783_v58 = vld [vmem:[%s4990_s1 + $0x584] ss:$8 sps:$4 sm:$0xff]  }
  0xd1   : > { %2096 = vmatpush1.bf16.msra.mxu0 %v3694_v59  ;;  %v3778_v59 = vld [vmem:[%s4990_s1 + $0x280] ss:$8 sps:$4 sm:$0xff]  }
  0xd2   : > { %2360 = vmatpush1.bf16.msra.mxu1 %v3697_v63  ;;  %2097 = vmatprep.subr.bf16.mxu0 %v3702_v62  ;;  %v3781_v63 = vld [vmem:[%s4990_s1 + $0x580] ss:$8 sps:$4 sm:$0xff]   ;;  %v3786_v62 = vld [vmem:[%s4990_s1 + $0x874] ss:$8 sps:$4 sm:$0xff]  }
  0xd3   : > { %2361 = vmatprep.subr.bf16.mxu1 %v3705_v1  ;;  %v1929_v1 = vcombine.low %v4659_v47, %v4662_v49  ;;  %v3787_v47 = vld [vmem:[%s4990_s1 + $0x860] ss:$8 sps:$4 sm:$0xff]  }
  0xd5   : > { %2098 = vmatpush1.bf16.msra.mxu0 %v3700_v2  ;;  %v2193_v2 = vcombine.low %v4665_v50, %v4668_v51  ;;  %v3792_v50 = vld [vmem:[%s4990_s1 + $0x854] ss:$8 sps:$4 sm:$0xff]   ;;  %v3790_v51 = vld [vmem:[%s4990_s1 + $0x850] ss:$8 sps:$4 sm:$0xff]  }
  0xd6   : > { %2362 = vmatpush1.bf16.msra.mxu1 %v3703_v3  ;;  %2099 = vmatprep.subr.bf16.mxu0 %v3708_v4  ;;  %v3784_v3 = vld [vmem:[%s4990_s1 + $0x870] ss:$8 sps:$4 sm:$0xff]   ;;  %v3789_v4 = vld [vmem:[%s4990_s1 + $0x864] ss:$8 sps:$4 sm:$0xff]  }
  0xd7   : > { %2363 = vmatprep.subr.bf16.mxu1 %v3711_v5  ;;  %v3795_v5 = vld [vmem:[%s4990_s1 + $0x844] ss:$8 sps:$4 sm:$0xff]  }
  0xd9   : > { %2100 = vmatpush1.bf16.msra.mxu0 %v3706_v52  ;;  %v3798_v52 = vld [vmem:[%s4990_s1 + $0x834] ss:$8 sps:$4 sm:$0xff]  }
  0xda   : > { %2364 = vmatpush1.bf16.msra.mxu1 %v3709_v17  ;;  %2101 = vmatprep.subr.bf16.mxu0 %v3714_v7  ;;  %v3796_v17 = vld [vmem:[%s4990_s1 + $0x830] ss:$8 sps:$4 sm:$0xff]   ;;  %v3801_v7 = vld [vmem:[%s4990_s1 + $0x824] ss:$8 sps:$4 sm:$0xff]  }
  0xdb   : > { %2365 = vmatprep.subr.bf16.mxu1 %v3717_v8  ;;  %v3799_v8 = vld [vmem:[%s4990_s1 + $0x820] ss:$8 sps:$4 sm:$0xff]  }
  0xdd   : > { %2102 = vmatpush1.bf16.msra.mxu0 %v3712_v10  ;;  %v3804_v10 = vld [vmem:[%s4990_s1 + $0x814] ss:$8 sps:$4 sm:$0xff]  }
  0xde   : > { %2366 = vmatpush1.bf16.msra.mxu1 %v3715_v42  ;;  %2103 = vmatprep.subr.bf16.mxu0 %v3720_v16  ;;  %v3802_v42 = vld [vmem:[%s4990_s1 + $0x810] ss:$8 sps:$4 sm:$0xff]   ;;  %v3807_v16 = vld [vmem:[%s4990_s1 + $0x804] ss:$8 sps:$4 sm:$0xff]  }
  0xdf   : > { %2367 = vmatprep.subr.bf16.mxu1 %v3723_v0  ;;  %v3805_v0 = vld [vmem:[%s4990_s1 + $0x800] ss:$8 sps:$4 sm:$0xff]  }
  0xe1   : > { %2104 = vmatpush1.bf16.msra.mxu0 %v3718_v11  ;;  %v3810_v11 = vld [vmem:[%s4990_s1 + $0x8f4] ss:$8 sps:$4 sm:$0xff]  }
  0xe2   : > { %2368 = vmatpush1.bf16.msra.mxu1 %v3721_v13  ;;  %2105 = vmatprep.subr.bf16.mxu0 %v3726_v15  ;;  %v3808_v13 = vld [vmem:[%s4990_s1 + $0x8f0] ss:$8 sps:$4 sm:$0xff]   ;;  %v3813_v15 = vld [vmem:[%s4990_s1 + $0x8e4] ss:$8 sps:$4 sm:$0xff]  }
  0xe3   : > { %2369 = vmatprep.subr.bf16.mxu1 %v3729_v18  ;;  %v3811_v18 = vld [vmem:[%s4990_s1 + $0x8e0] ss:$8 sps:$4 sm:$0xff]  }
  0xe5   : > { %2106 = vmatpush1.bf16.msra.mxu0 %v3724_v19  ;;  %v3816_v19 = vld [vmem:[%s4990_s1 + $0x8d4] ss:$8 sps:$4 sm:$0xff]  }
  0xe6   : > { %2370 = vmatpush1.bf16.msra.mxu1 %v3727_v20  ;;  %2107 = vmatprep.subr.bf16.mxu0 %v3732_v23  ;;  %v3814_v20 = vld [vmem:[%s4990_s1 + $0x8d0] ss:$8 sps:$4 sm:$0xff]   ;;  %v3819_v23 = vld [vmem:[%s4990_s1 + $0x8c4] ss:$8 sps:$4 sm:$0xff]  }
  0xe7   : > { %2371 = vmatprep.subr.bf16.mxu1 %v3735_v24  ;;  %v3817_v24 = vld [vmem:[%s4990_s1 + $0x8c0] ss:$8 sps:$4 sm:$0xff]  }
  0xe9   : > { %2108 = vmatpush1.bf16.msra.mxu0 %v3730_v25  ;;  %v3822_v25 = vld [vmem:[%s4990_s1 + $0x8b4] ss:$8 sps:$4 sm:$0xff]  }
  0xea   : > { %2372 = vmatpush1.bf16.msra.mxu1 %v3733_v60  ;;  %2109 = vmatprep.subr.bf16.mxu0 %v3738_v26  ;;  %v3820_v60 = vld [vmem:[%s4990_s1 + $0x8b0] ss:$8 sps:$4 sm:$0xff]   ;;  %v3825_v26 = vld [vmem:[%s4990_s1 + $0x8a4] ss:$8 sps:$4 sm:$0xff]  }
  0xeb   : > { %2373 = vmatprep.subr.bf16.mxu1 %v3741_v6  ;;  %v3823_v6 = vld [vmem:[%s4990_s1 + $0x8a0] ss:$8 sps:$4 sm:$0xff]  }
  0xed   : > { %2110 = vmatpush2.bf16.msra.mxu0 %v3736_v12  ;;  %v3828_v12 = vld [vmem:[%s4990_s1 + $0x894] ss:$8 sps:$4 sm:$0xff]  }
  0xee   : > { %2374 = vmatpush2.bf16.msra.mxu1 %v3739_v27  ;;  %2111 = vmatprep.subr.bf16.mxu0 %v3744_v31  ;;  %v3826_v27 = vld [vmem:[%s4990_s1 + $0x890] ss:$8 sps:$4 sm:$0xff]   ;;  %v3831_v31 = vld [vmem:[%s4990_s1 + $0x884] ss:$8 sps:$4 sm:$0xff]  }
  0xef   : > { %2375 = vmatprep.subr.bf16.mxu1 %v3747_v28  ;;  %v3829_v28 = vld [vmem:[%s4990_s1 + $0x880] ss:$8 sps:$4 sm:$0xff]  }
  0xf1   : > { %2112 = vmatpush2.bf16.msra.mxu0 %v3742_v29 }
  0xf2   : > { %2376 = vmatpush2.bf16.msra.mxu1 %v3745_v30  ;;  %2113 = vmatprep.subr.bf16.mxu0 %v3750_v32 }
  0xf3   : > { %2377 = vmatprep.subr.bf16.mxu1 %v3753_v33 }
  0xf5   : > { %2114 = vmatpush2.bf16.msra.mxu0 %v3748_v34 }
  0xf6   : > { %2378 = vmatpush2.bf16.msra.mxu1 %v3751_v35  ;;  %2115 = vmatprep.subr.bf16.mxu0 %v3756_v36 }
  0xf7   : > { %2379 = vmatprep.subr.bf16.mxu1 %v3759_v37 }
  0xf9   : > { %2116 = vmatpush2.bf16.msra.mxu0 %v3754_v38 }
  0xfa   : > { %2380 = vmatpush2.bf16.msra.mxu1 %v3757_v39  ;;  %2117 = vmatprep.subr.bf16.mxu0 %v3762_v40 }
  0xfb   : > { %2381 = vmatprep.subr.bf16.mxu1 %v3765_v41 }
  0xfd   : > { %2118 = vmatpush2.bf16.msra.mxu0 %v3760_v44 }
  0xfe   : > { %2382 = vmatpush2.bf16.msra.mxu1 %v3763_v46  ;;  %2119 = vmatprep.subr.bf16.mxu0 %v3768_v22 }
  0xff   : > { %2383 = vmatprep.subr.bf16.mxu1 %v3771_v45 }
 0x101   : > { %2120 = vmatpush2.bf16.msra.mxu0 %v3766_v55 }
 0x102   : > { %2384 = vmatpush2.bf16.msra.mxu1 %v3769_v56  ;;  %2121 = vmatprep.subr.bf16.mxu0 %v3774_v57 }
 0x103   : > { %2385 = vmatprep.subr.bf16.mxu1 %v3777_v43 }
 0x105   : > { %2122 = vmatpush2.bf16.msra.mxu0 %v3772_v54 }
 0x106   : > { %2386 = vmatpush2.bf16.msra.mxu1 %v3775_v14  ;;  %2123 = vmatprep.subr.bf16.mxu0 %v3780_v61 }
 0x107   : > { %2387 = vmatprep.subr.bf16.mxu1 %v3783_v58 }
 0x109   : > { %2124 = vmatpush2.bf16.msra.mxu0 %v3778_v59 }
 0x10a   : > { %2388 = vmatpush2.bf16.msra.mxu1 %v3781_v63  ;;  %2613 = vmatprep.subr.bf16.mxu0 %v3786_v62 }
 0x10c   : > { %2126 = vmatmul.mubr.bf16.vlgmr.msra.gmra.mxu0 %v1929_v1  ;;  %v496_v29 = vpop.f32.mrf.mxu0 }
 0x10d   : > { %2390 = vmatmul.mubr.bf16.vlgmr.msra.gmra.mxu1 %v2193_v2  ;;  %2614 = vmatpush1.bf16.msra.mxu0 %v3784_v3  ;;  %v719_v30 = vpop.f32.mrf.mxu1 }
 0x10e   : > { %2645 = vmatprep.mubr.bf16.mxu0 %v2450_v9  ;;  %2615 = vmatprep.subr.bf16.mxu0 %v3789_v4  ;;  %v3793_v9 = vld [vmem:[%s4990_s1 + $0x840] ss:$8 sps:$4 sm:$0xff]   ;;  %v498_v32 = vpop.f32.mrf.mxu0  ;;  %v720_v57 = vadd.f32 %v719_v30, %v496_v29 }
 0x10f   : > { %v721_v33 = vpop.f32.mrf.mxu1 }
 0x110   : > { %v500_v34 = vpop.f32.mrf.mxu0  ;;  %v722_v43 = vadd.f32 %v721_v33, %v498_v32 }
 0x111   : > { %2616 = vmatpush1.bf16.msra.mxu0 %v3787_v47  ;;  %v723_v35 = vpop.f32.mrf.mxu1 }
 0x112   : > { %2617 = vmatprep.subr.bf16.mxu0 %v3792_v50  ;;  %v502_v36 = vpop.f32.mrf.mxu0  ;;  %v724_v58 = vadd.f32 %v723_v35, %v500_v34 }
 0x113   : > { %v725_v38 = vpop.f32.mrf.mxu1 }
 0x114   : > { %v726_v62 = vadd.f32 %v725_v38, %v502_v36 }
 0x115   : > { %2618 = vmatpush1.bf16.msra.mxu0 %v3790_v51 }
 0x116   : > { %2619 = vmatprep.subr.bf16.mxu0 %v3795_v5 }
 0x119   : > { %2620 = vmatpush1.bf16.msra.mxu0 %v3793_v9 }
 0x11a   : > { %2621 = vmatprep.subr.bf16.mxu0 %v3798_v52 }
 0x11d   : > { %2622 = vmatpush1.bf16.msra.mxu0 %v3796_v17 }
 0x11e   : > { %2623 = vmatprep.subr.bf16.mxu0 %v3801_v7 }
 0x121   : > { %2624 = vmatpush1.bf16.msra.mxu0 %v3799_v8 }
 0x122   : > { %2625 = vmatprep.subr.bf16.mxu0 %v3804_v10 }
 0x125   : > { %2626 = vmatpush1.bf16.msra.mxu0 %v3802_v42 }
 0x126   : > { %2627 = vmatprep.subr.bf16.mxu0 %v3807_v16 }
 0x129   : > { %2628 = vmatpush1.bf16.msra.mxu0 %v3805_v0 }
 0x12a   : > { %2629 = vmatprep.subr.bf16.mxu0 %v3810_v11 }
 0x12d   : > { %2630 = vmatpush2.bf16.msra.mxu0 %v3808_v13  ;;  %v2664_v13 = vsub.s32 0, %v4013_v48 }
 0x12e   : > { %2631 = vmatprep.subr.bf16.mxu0 %v3813_v15  ;;  %v2660_v15 = vld [vmem:[%s4991_s2] sm:$0x3] }
 0x131   : > { %2632 = vmatpush2.bf16.msra.mxu0 %v3811_v18 }
 0x132   : > { %2633 = vmatprep.subr.bf16.mxu0 %v3816_v19 }
 0x135   : > { %2634 = vmatpush2.bf16.msra.mxu0 %v3814_v20  ;;  %v2668_v20 = vsub.s32 1, %v4013_v48 }
 0x136   : > { %2635 = vmatprep.subr.bf16.mxu0 %v3819_v23 }
 0x137   : > { %v2669_v29 = vrot.slane %v2660_v15, %v2668_v20 }
 0x139   : > { %2636 = vmatpush2.bf16.msra.mxu0 %v3817_v24 }
 0x13a   : > { %2637 = vmatprep.subr.bf16.mxu0 %v3822_v25 }
 0x13d   : > { %2638 = vmatpush2.bf16.msra.mxu0 %v3820_v60 }
 0x13e   : > { %2639 = vmatprep.subr.bf16.mxu0 %v3825_v26 }
 0x141   : > { %2640 = vmatpush2.bf16.msra.mxu0 %v3823_v6  ;;  %v2665_v6 = vrot.slane %v2660_v15, %v2664_v13 }
 0x142   : > { %2641 = vmatprep.subr.bf16.mxu0 %v3828_v12 }
 0x145   : > { %2642 = vmatpush2.bf16.msra.mxu0 %v3826_v27 }
 0x146   : > { %2643 = vmatprep.subr.bf16.mxu0 %v3831_v31 }
 0x149   : > { %2644 = vmatpush2.bf16.msra.mxu0 %v3829_v28 }
 0x14c   : > { %2646 = vmatmul.mubr.bf16.vlgmr.msra.gmra.mxu0 %v2449_v21  ;;  %v975_v37 = vpop.f32.mrf.mxu0 }
 0x14d   : > { %v1302_v40 = vpop.f32.mrf.mxu1  ;;  %v984_v54 = vadd.f32 %v975_v37, %v720_v57 }
 0x14e   : > { %v977_v39 = vpop.f32.mrf.mxu0 }
 0x14f   : > { %v1304_v44 = vpop.f32.mrf.mxu1  ;;  %v985_v59 = vadd.f32 %v977_v39, %v722_v43  ;;  %v1311_v1 = vadd.f32 %v1302_v40, %v984_v54 }
 0x150   : > { %v979_v41 = vpop.f32.mrf.mxu0 }
 0x151   : > { %v1306_v22 = vpop.f32.mrf.mxu1  ;;  %v986_v2 = vadd.f32 %v979_v41, %v724_v58  ;;  %v1312_v4 = vadd.f32 %v1304_v44, %v985_v59 }
 0x152   : > { %v981_v46 = vpop.f32.mrf.mxu0 }
 0x153   : > { %v1308_v55 = vpop.f32.mrf.mxu1  ;;  %v987_v47 = vadd.f32 %v981_v46, %v726_v62  ;;  %v1313_v9 = vadd.f32 %v1306_v22, %v986_v2 }
 0x155   : > { %v1314_v17 = vadd.f32 %v1308_v55, %v987_v47 }
 0x18c   : > { %v1577_v45 = vpop.f32.mrf.mxu0 }
 0x18d   : > { %v1844_v49 = vpop.f32.mrf.mxu1  ;;  %v1586_v50 = vadd.f32 %v1577_v45, %v1311_v1 }
 0x18e   : > { %v1579_v56 = vpop.f32.mrf.mxu0 }
 0x18f   : > { %v1846_v21 = vpop.f32.mrf.mxu1  ;;  %v1587_v52 = vadd.f32 %v1579_v56, %v1312_v4  ;;  %v1853_v7 = vadd.f32 %v1844_v49, %v1586_v50 }
 0x190   : > { %v1581_v53 = vpop.f32.mrf.mxu0 }
 0x191   : > { %v1848_v61 = vpop.f32.mrf.mxu1  ;;  %v1588_v8 = vadd.f32 %v1581_v53, %v1313_v9  ;;  %v1854_v16 = vadd.f32 %v1846_v21, %v1587_v52 }
 0x192   : > { %v1583_v14 = vpop.f32.mrf.mxu0 }
 0x193   : > { %v1850_v3 = vpop.f32.mrf.mxu1  ;;  %v1589_v0 = vadd.f32 %v1583_v14, %v1314_v17  ;;  %v1855_v18 = vadd.f32 %v1848_v61, %v1588_v8 }
 0x195   : > { %v1856_v25 = vadd.f32 %v1850_v3, %v1589_v0 }
 0x1cc   : > { %v2127_v63 = vpop.f32.mrf.mxu0 }
 0x1cd   : > { %v2391_v5 = vpop.f32.mrf.mxu1  ;;  %v2136_v11 = vadd.f32 %v2127_v63, %v1853_v7 }
 0x1ce   : > { %v2129_v51 = vpop.f32.mrf.mxu0 }
 0x1cf   : > { %v2393_v42 = vpop.f32.mrf.mxu1  ;;  %v2137_v19 = vadd.f32 %v2129_v51, %v1854_v16  ;;  %v2400_v60 = vadd.f32 %v2391_v5, %v2136_v11 }
 0x1d0   : > { %v2131_v10 = vpop.f32.mrf.mxu0 }
 0x1d1   : > { %v2395_v24 = vpop.f32.mrf.mxu1  ;;  %v2138_v26 = vadd.f32 %v2131_v10, %v1855_v18  ;;  %v2401_v27 = vadd.f32 %v2393_v42, %v2137_v19 }
 0x1d2   : > { %v2133_v23 = vpop.f32.mrf.mxu0 }
 0x1d3   : > { %v2139_v31 = vadd.f32 %v2133_v23, %v1856_v25  ;;  %v2397_v30 = vpop.f32.mrf.mxu1  ;;  %v2402_v33 = vadd.f32 %v2395_v24, %v2138_v26 }
 0x1d5   : > { %v2403_v37 = vadd.f32 %v2397_v30, %v2139_v31 }
 0x20c   : > { %v2647_v12 = vpop.f32.mrf.mxu0 }
 0x20d   : > { %v2656_v28 = vadd.f32 %v2647_v12, %v2400_v60 }
 0x20e   : > { %v2649_v32 = vpop.f32.mrf.mxu0 }
 0x20f   : > { %v2672_v34 = vadd.f32 %v2665_v6, %v2656_v28  ;;  %v2657_v35 = vadd.f32 %v2649_v32, %v2401_v27 }
 0x210   : > { %v2651_v36 = vpop.f32.mrf.mxu0 }
 0x211   : > { %v2673_v48 = vadd.f32 %v2669_v29, %v2657_v35  ;;  %v2658_v38 = vadd.f32 %v2651_v36, %v2402_v33  ;;  %v2676_v40 = vmax.f32 %v2672_v34, 0.0 }
 0x212   : > { %v2653_v39 = vpop.f32.mrf.mxu0 }
 0x213   : > { %v2677_v41 = vmax.f32 %v2673_v48, 0.0  ;;  %v2659_v44 = vadd.f32 %v2653_v39, %v2403_v37  ;;  %v2674_v46 = vadd.f32 %v2665_v6, %v2658_v38 }
 0x215   : > { %v2684_v22 = vcombine.low %v2676_v40, %v2677_v41  ;;  %v2685_v45 = vcombine.high %v2676_v40, %v2677_v41  ;;  %v3375_v55 = vcombine.low %v2677_v41, %v2677_v41  ;;  %v3376_v56 = vcombine.high %v2677_v41, %v2677_v41 }
 0x216   : > { %v2675_v49 = vadd.f32 %v2669_v29, %v2659_v44  ;;  %v2678_v57 = vmax.f32 %v2674_v46, 0.0 }
 0x217   : > { %v3379_v53 = vpack.c.bf16 %v3375_v55, %v2684_v22  ;;  %v3380_v21 = vpack.c.bf16 %v3376_v56, %v2685_v45 }
 0x218   : > { %v2679_v43 = vmax.f32 %v2675_v49, 0.0 }
 0x219   : > { %3383 = vst.sshfl [vmem:[%s170_s8] sm:$0x33 pattern:$0x76325410] %v3379_v53 }
 0x21a   : > { %3384 = vst.sshfl [vmem:[%s170_s8 + $0x4] sm:$0x33 pattern:$0x76325410] %v3380_v21  ;;  %v2686_v54 = vcombine.low %v2678_v57, %v2679_v43  ;;  %v2687_v14 = vcombine.high %v2678_v57, %v2679_v43  ;;  %v3377_v61 = vcombine.low %v2679_v43, %v2679_v43  ;;  %v3378_v58 = vcombine.high %v2679_v43, %v2679_v43 }
 0x21c   : > { %v3381_v59 = vpack.c.bf16 %v3377_v61, %v2686_v54  ;;  %v3382_v63 = vpack.c.bf16 %v3378_v58, %v2687_v14 }
 0x21e   : > { %3385 = vst.sshfl [vmem:[%s170_s8 + $0x8] sm:$0x33 pattern:$0x76325410] %v3381_v59 }
 0x21f   : > { %3386 = vst.sshfl [vmem:[%s170_s8 + $0xc] sm:$0x33 pattern:$0x76325410] %v3382_v63 }
 0x220 PF: > { %s13_s12 = sadd.s32 1, %s3843_s12  }
 0x221   : > { %p10_p4 = scmp.ge.s32.totalorder %s13_s12, 4  }
 0x223   :  { %12 = sbr.rel (!%p10_p4) target bundleno = 1 (0x1), region = 70 }

</bundles_post_ra>
